<compile_context>
chip_gen: v5e
topology: v5e:2x2
jax: 0.10.0
libtpu: 0.0.40
codegen_flags: <defaults>
</compile_context>

<pallas_src>
import jax
import jax.numpy as jnp
from jax.experimental import pallas as pl
from jax.experimental.pallas import tpu as pltpu

K = 5              # kernel_size
PAD = K // 2       # 'same' padding, dilation=1
CP = 8             # channel count padded to a full sublane group
LANE = 128
MAX_LANES_PER_STEP = 2048   # lane budget per grid step (B*L <= this)


def _round_up(x, m):
    return ((x + m - 1) // m) * m


def _make_cnn_kernel(n_blocks, cp, wp, BL):
    """Fused CNN kernel: all blocks inside one pallas_call.

    Per-grid-step layout (B images packed on the lane axis):
      state s : (cp, BL) f32.  Lane g = j*L + (h+PAD)*Wp + (w+PAD) holds
                channel row `c` of pixel (h, w) of image j; halo/tail lanes
                are don't-care (re-masked each block, cropped in the wrapper).
      xs      : (K*K*cp, BL) f32 VMEM scratch im2col matrix, built from 25
                lane-rotated copies of the masked activation (pltpu.roll →
                XLU; all scratch stores are 8-sublane-aligned full-lane
                writes).  Cast to bf16 at the matmul input.
    """
    def kernel(x_ref, w_ref, b_ref, m_ref, o_ref, xs_ref):
        # Hoisted once per grid step: 0/1 validity mask broadcast to (cp, BL).
        maskf = jnp.broadcast_to(m_ref[...], (cp, BL))

        s = x_ref[0]                                    # (cp, BL) f32
        for blk in range(n_blocks):
            # Block activation (Norm is Identity, then ReLU); zero halo/tail.
            a = jnp.maximum(s, 0.0) * maskf             # f32 elementwise (VPU)

            # im2col: one lane-rotated copy per conv tap.  For interior lanes
            # the needed tap index i + d always stays inside the image's own
            # L-lane segment, so the circular wrap never corrupts real pixels.
            for kh in range(K):
                for kw in range(K):
                    d = (kh - PAD) * wp + (kw - PAD)
                    t = kh * K + kw
                    sh = (-d) % BL                       # static, non-negative
                    tap = a if sh == 0 else pltpu.roll(a, shift=sh, axis=1)
                    xs_ref[pl.ds(t * cp, cp), :] = tap   # aligned 8-row store

            # Whole conv block = ONE bf16 MXU matmul (K = K*K*cp contraction),
            # f32 accumulation, + bias.
            s = jnp.dot(w_ref[blk],
                        xs_ref[...].astype(jnp.bfloat16),
                        preferred_element_type=jnp.float32) + b_ref[blk]

        o_ref[0] = s                                     # lane-dense store
    return kernel


@jax.jit
def cnn_pallas_forward(x_nchw, w_all, b_all):
    """CNN.forward with is_chan_last=False: input/output are NCHW (f32)."""
    N, C, H, W = x_nchw.shape
    n_blocks, cp, kkcp = w_all.shape
    Hp, Wp = H + 2 * PAD, W + 2 * PAD
    L = _round_up(Hp * Wp, LANE)

    # Images per grid step (packed along lanes).  Keeps the matmul lane dim
    # wide while bounding per-step VMEM; grid = ceil(N / B).
    B = max(1, min(N, MAX_LANES_PER_STEP // L))
    G = -(-N // B)
    NP = G * B
    BL = B * L

    # One-time layout prep (plain-JAX glue): NCHW -> zero halo pad, channel
    # pad 4->8, flatten spatial to the lane axis, pad lanes to L, pad batch to
    # G*B, and concatenate B images per grid step along the lane axis.
    xp = jnp.pad(x_nchw, ((0, NP - N), (0, cp - C), (PAD, PAD), (PAD, PAD)))
    xp = xp.reshape(NP, cp, Hp * Wp)
    xp = jnp.pad(xp, ((0, 0), (0, 0), (0, L - Hp * Wp)))
    xp = xp.reshape(G, B, cp, L).transpose(0, 2, 1, 3).reshape(G, cp, BL)

    # 0/1 validity mask (1 = interior pixel, 0 = halo/tail), tiled over the B
    # image segments.  Passed as f32 so the kernel does no compare at all.
    m2d = jnp.zeros((Hp, Wp), jnp.float32).at[PAD:PAD + H, PAD:PAD + W].set(1.0)
    mL = jnp.pad(m2d.reshape(1, Hp * Wp), ((0, 0), (0, L - Hp * Wp)))
    mask = jnp.tile(mL, (1, B))                           # (1, BL)

    kernel = _make_cnn_kernel(n_blocks, cp, Wp, BL)
    out = pl.pallas_call(
        kernel,
        out_shape=jax.ShapeDtypeStruct((G, cp, BL), jnp.float32),
        grid_spec=pltpu.PrefetchScalarGridSpec(
            num_scalar_prefetch=0,
            grid=(G,),
            in_specs=[
                pl.BlockSpec((1, cp, BL), lambda g: (g, 0, 0)),
                pl.BlockSpec((n_blocks, cp, kkcp), lambda g: (0, 0, 0)),
                pl.BlockSpec((n_blocks, cp, 1), lambda g: (0, 0, 0)),
                pl.BlockSpec((1, BL), lambda g: (0, 0)),
            ],
            out_specs=pl.BlockSpec((1, cp, BL), lambda g: (g, 0, 0)),
            scratch_shapes=[
                pltpu.VMEM((K * K * cp, BL), jnp.float32),   # xs (im2col)
            ],
        ),
        compiler_params=pltpu.CompilerParams(
            dimension_semantics=("parallel",)),   # batch steps across v7x TCs
    )(xp, w_all, b_all, mask)

    # Undo the packing / padding (wrapper-side glue).
    out = out.reshape(G, cp, B, L).transpose(0, 2, 1, 3).reshape(NP, cp, L)
    out = out[:N, :C, :Hp * Wp].reshape(N, C, Hp, Wp)
    return out[:, :, PAD:PAD + H, PAD:PAD + W]


def init_cnn_params(key, n_channels, n_blocks):
    """Deterministic synthetic Conv2d params, PyTorch layout (Cout,Cin,K,K)."""
    params = []
    for i in range(n_blocks):
        kw_key, kb_key = jax.random.split(jax.random.fold_in(key, i))
        scale = 1.0 / jnp.sqrt(jnp.float32(n_channels * K * K))
        w = jax.random.normal(kw_key, (n_channels, n_channels, K, K),
                              jnp.float32) * scale
        b = jax.random.normal(kb_key, (n_channels,), jnp.float32) * scale
        params.append((w, b))
    return params


def pack_params(params, cp=CP):
    """Pack params into MXU-feed orientation, stationary across blocks/steps:
       w_all: (n_blocks, cp, K*K*cp) bfloat16, contraction = (kh*K+kw)*cp + cin
       b_all: (n_blocks, cp, 1) float32."""
    w_list, b_list = [], []
    for w, b in params:
        cout, cin = w.shape[0], w.shape[1]
        wt = jnp.transpose(w, (0, 2, 3, 1))                    # (Cout,K,K,Cin)
        wt = jnp.pad(wt, ((0, cp - cout), (0, 0), (0, 0), (0, cp - cin)))
        w_list.append(wt.reshape(cp, K * K * cp).astype(jnp.bfloat16))
        b_list.append(jnp.pad(b, (0, cp - cout))[:, None].astype(jnp.float32))
    return jnp.stack(w_list), jnp.stack(b_list)


def cnn_reference(x, params):
    """Pure-JAX f32 reference: X = conv2d(relu(X)) per block (NCHW / OIHW)."""
    out = x
    for w, b in params:
        a = jnp.maximum(out, 0.0)
        out = jax.lax.conv_general_dilated(
            a, w, window_strides=(1, 1),
            padding=((PAD, PAD), (PAD, PAD)),
            dimension_numbers=("NCHW", "OIHW", "NCHW"),
            precision=jax.lax.Precision.HIGHEST,
        ) + b[None, :, None, None]
    return out


if __name__ == "__main__":
    key = jax.random.PRNGKey(0)
    xkey, pkey = jax.random.split(key)

    N, C, H, W = 2, 4, 16, 16          # batch=2, channels=4, spatial=16
    n_blocks = 3

    x = jax.random.normal(xkey, (N, C, H, W), jnp.float32)
    params = init_cnn_params(pkey, n_channels=C, n_blocks=n_blocks)
    w_all, b_all = pack_params(params)

    out = cnn_pallas_forward(x, w_all, b_all)
    jax.block_until_ready(out)
    assert out.shape == (N, C, H, W), out.shape

    # Reference is full f32; the kernel uses bf16 weights + bf16 im2col with
    # f32 accumulation, so expect ~1e-2-level deviation (an all-f32 kernel
    # would pass at ~1e-5).  5e-2 comfortably bounds the bf16 path.
    ref = cnn_reference(x, params)
    max_err = float(jnp.max(jnp.abs(out - ref)))
    assert max_err < 5e-2, f"max abs error vs f32 reference: {max_err}"

    print("KERNEL_OK")
</pallas_src>

<mosaic_0001>
module attributes {stable_mosaic.version = 11 : i64} {
  func.func @kernel(%arg0: i32, %arg1: memref<1x8x1024xf32, #tpu.memory_space<vmem>>, %arg2: memref<3x8x200xbf16, #tpu.memory_space<vmem>>, %arg3: memref<3x8x1xf32, #tpu.memory_space<vmem>>, %arg4: memref<1x1024xf32, #tpu.memory_space<vmem>>, %arg5: memref<1x8x1024xf32, #tpu.memory_space<vmem>>, %arg6: memref<200x1024xf32, #tpu.memory_space<vmem>>) attributes {dimension_semantics = [#tpu.dimension_semantics<parallel>], iteration_bounds = array<i64: 1>, scalar_prefetch = 0 : i64, scratch_operands = 1 : i64, tpu.core_type = #tpu.core_type<tc>, window_params = [{transform_indices = @transform_0, window_bounds = array<i64: 1, 8, 1024>}, {pipeline_mode = #tpu.pipeline_mode<synchronous>, transform_indices = @transform_1, window_bounds = array<i64: 3, 8, 200>}, {pipeline_mode = #tpu.pipeline_mode<synchronous>, transform_indices = @transform_2, window_bounds = array<i64: 3, 8, 1>}, {pipeline_mode = #tpu.pipeline_mode<synchronous>, transform_indices = @transform_3, window_bounds = array<i64: 1, 1024>}, {transform_indices = @transform_4, window_bounds = array<i64: 1, 8, 1024>}]} {
    %c0 = arith.constant 0 : index
    %c0_0 = arith.constant 0 : index
    %0 = vector.load %arg4[%c0, %c0_0] : memref<1x1024xf32, #tpu.memory_space<vmem>>, vector<1x1024xf32>
    %1 = vector.shape_cast %0 : vector<1x1024xf32> to vector<1x1024xf32>
    %2 = vector.broadcast %1 : vector<1x1024xf32> to vector<8x1024xf32>
    %c0_1 = arith.constant 0 : index
    %c0_2 = arith.constant 0 : index
    %c0_3 = arith.constant 0 : index
    %3 = vector.load %arg1[%c0_1, %c0_2, %c0_3] : memref<1x8x1024xf32, #tpu.memory_space<vmem>>, vector<1x8x1024xf32>
    %4 = vector.shape_cast %3 : vector<1x8x1024xf32> to vector<8x1024xf32>
    %cst = arith.constant 0.000000e+00 : f32
    %5 = vector.broadcast %cst : f32 to vector<8x1024xf32>
    %6 = arith.maximumf %4, %5 : vector<8x1024xf32>
    %7 = arith.mulf %6, %2 : vector<8x1024xf32>
    %c42_i32 = arith.constant 42 : i32
    %8 = tpu.dynamic_rotate %7 by %c42_i32 dim 1 : vector<8x1024xf32>, i32 -> vector<8x1024xf32>
    %c0_4 = arith.constant 0 : index
    %c0_5 = arith.constant 0 : index
    %9 = vector.load %arg6[%c0_4, %c0_5] : memref<200x1024xf32, #tpu.memory_space<vmem>>, vector<8x1024xf32>
    tpu.vector_store %arg6[%c0_4, %c0_5], %8 {strides = array<i32>} : memref<200x1024xf32, #tpu.memory_space<vmem>>, vector<8x1024xf32>,
    %c41_i32 = arith.constant 41 : i32
    %10 = tpu.dynamic_rotate %7 by %c41_i32 dim 1 : vector<8x1024xf32>, i32 -> vector<8x1024xf32>
    %c8 = arith.constant 8 : index
    %c0_6 = arith.constant 0 : index
    %11 = vector.load %arg6[%c8, %c0_6] : memref<200x1024xf32, #tpu.memory_space<vmem>>, vector<8x1024xf32>
    tpu.vector_store %arg6[%c8, %c0_6], %10 {strides = array<i32>} : memref<200x1024xf32, #tpu.memory_space<vmem>>, vector<8x1024xf32>,
    %c40_i32 = arith.constant 40 : i32
    %12 = tpu.dynamic_rotate %7 by %c40_i32 dim 1 : vector<8x1024xf32>, i32 -> vector<8x1024xf32>
    %c16 = arith.constant 16 : index
    %c0_7 = arith.constant 0 : index
    %13 = vector.load %arg6[%c16, %c0_7] : memref<200x1024xf32, #tpu.memory_space<vmem>>, vector<8x1024xf32>
    tpu.vector_store %arg6[%c16, %c0_7], %12 {strides = array<i32>} : memref<200x1024xf32, #tpu.memory_space<vmem>>, vector<8x1024xf32>,
    %c39_i32 = arith.constant 39 : i32
    %14 = tpu.dynamic_rotate %7 by %c39_i32 dim 1 : vector<8x1024xf32>, i32 -> vector<8x1024xf32>
    %c24 = arith.constant 24 : index
    %c0_8 = arith.constant 0 : index
    %15 = vector.load %arg6[%c24, %c0_8] : memref<200x1024xf32, #tpu.memory_space<vmem>>, vector<8x1024xf32>
    tpu.vector_store %arg6[%c24, %c0_8], %14 {strides = array<i32>} : memref<200x1024xf32, #tpu.memory_space<vmem>>, vector<8x1024xf32>,
    %c38_i32 = arith.constant 38 : i32
    %16 = tpu.dynamic_rotate %7 by %c38_i32 dim 1 : vector<8x1024xf32>, i32 -> vector<8x1024xf32>
    %c32 = arith.constant 32 : index
    %c0_9 = arith.constant 0 : index
    %17 = vector.load %arg6[%c32, %c0_9] : memref<200x1024xf32, #tpu.memory_space<vmem>>, vector<8x1024xf32>
    tpu.vector_store %arg6[%c32, %c0_9], %16 {strides = array<i32>} : memref<200x1024xf32, #tpu.memory_space<vmem>>, vector<8x1024xf32>,
    %c22_i32 = arith.constant 22 : i32
    %18 = tpu.dynamic_rotate %7 by %c22_i32 dim 1 : vector<8x1024xf32>, i32 -> vector<8x1024xf32>
    %c40 = arith.constant 40 : index
    %c0_10 = arith.constant 0 : index
    %19 = vector.load %arg6[%c40, %c0_10] : memref<200x1024xf32, #tpu.memory_space<vmem>>, vector<8x1024xf32>
    tpu.vector_store %arg6[%c40, %c0_10], %18 {strides = array<i32>} : memref<200x1024xf32, #tpu.memory_space<vmem>>, vector<8x1024xf32>,
    %c21_i32 = arith.constant 21 : i32
    %20 = tpu.dynamic_rotate %7 by %c21_i32 dim 1 : vector<8x1024xf32>, i32 -> vector<8x1024xf32>
    %c48 = arith.constant 48 : index
    %c0_11 = arith.constant 0 : index
    %21 = vector.load %arg6[%c48, %c0_11] : memref<200x1024xf32, #tpu.memory_space<vmem>>, vector<8x1024xf32>
    tpu.vector_store %arg6[%c48, %c0_11], %20 {strides = array<i32>} : memref<200x1024xf32, #tpu.memory_space<vmem>>, vector<8x1024xf32>,
    %c20_i32 = arith.constant 20 : i32
    %22 = tpu.dynamic_rotate %7 by %c20_i32 dim 1 : vector<8x1024xf32>, i32 -> vector<8x1024xf32>
    %c56 = arith.constant 56 : index
    %c0_12 = arith.constant 0 : index
    %23 = vector.load %arg6[%c56, %c0_12] : memref<200x1024xf32, #tpu.memory_space<vmem>>, vector<8x1024xf32>
    tpu.vector_store %arg6[%c56, %c0_12], %22 {strides = array<i32>} : memref<200x1024xf32, #tpu.memory_space<vmem>>, vector<8x1024xf32>,
    %c19_i32 = arith.constant 19 : i32
    %24 = tpu.dynamic_rotate %7 by %c19_i32 dim 1 : vector<8x1024xf32>, i32 -> vector<8x1024xf32>
    %c64 = arith.constant 64 : index
    %c0_13 = arith.constant 0 : index
    %25 = vector.load %arg6[%c64, %c0_13] : memref<200x1024xf32, #tpu.memory_space<vmem>>, vector<8x1024xf32>
    tpu.vector_store %arg6[%c64, %c0_13], %24 {strides = array<i32>} : memref<200x1024xf32, #tpu.memory_space<vmem>>, vector<8x1024xf32>,
    %c18_i32 = arith.constant 18 : i32
    %26 = tpu.dynamic_rotate %7 by %c18_i32 dim 1 : vector<8x1024xf32>, i32 -> vector<8x1024xf32>
    %c72 = arith.constant 72 : index
    %c0_14 = arith.constant 0 : index
    %27 = vector.load %arg6[%c72, %c0_14] : memref<200x1024xf32, #tpu.memory_space<vmem>>, vector<8x1024xf32>
    tpu.vector_store %arg6[%c72, %c0_14], %26 {strides = array<i32>} : memref<200x1024xf32, #tpu.memory_space<vmem>>, vector<8x1024xf32>,
    %c2_i32 = arith.constant 2 : i32
    %28 = tpu.dynamic_rotate %7 by %c2_i32 dim 1 : vector<8x1024xf32>, i32 -> vector<8x1024xf32>
    %c80 = arith.constant 80 : index
    %c0_15 = arith.constant 0 : index
    %29 = vector.load %arg6[%c80, %c0_15] : memref<200x1024xf32, #tpu.memory_space<vmem>>, vector<8x1024xf32>
    tpu.vector_store %arg6[%c80, %c0_15], %28 {strides = array<i32>} : memref<200x1024xf32, #tpu.memory_space<vmem>>, vector<8x1024xf32>,
    %c1_i32 = arith.constant 1 : i32
    %30 = tpu.dynamic_rotate %7 by %c1_i32 dim 1 : vector<8x1024xf32>, i32 -> vector<8x1024xf32>
    %c88 = arith.constant 88 : index
    %c0_16 = arith.constant 0 : index
    %31 = vector.load %arg6[%c88, %c0_16] : memref<200x1024xf32, #tpu.memory_space<vmem>>, vector<8x1024xf32>
    tpu.vector_store %arg6[%c88, %c0_16], %30 {strides = array<i32>} : memref<200x1024xf32, #tpu.memory_space<vmem>>, vector<8x1024xf32>,
    %c96 = arith.constant 96 : index
    %c0_17 = arith.constant 0 : index
    %32 = vector.load %arg6[%c96, %c0_17] : memref<200x1024xf32, #tpu.memory_space<vmem>>, vector<8x1024xf32>
    tpu.vector_store %arg6[%c96, %c0_17], %7 {strides = array<i32>} : memref<200x1024xf32, #tpu.memory_space<vmem>>, vector<8x1024xf32>,
    %c1023_i32 = arith.constant 1023 : i32
    %33 = tpu.dynamic_rotate %7 by %c1023_i32 dim 1 : vector<8x1024xf32>, i32 -> vector<8x1024xf32>
    %c104 = arith.constant 104 : index
    %c0_18 = arith.constant 0 : index
    %34 = vector.load %arg6[%c104, %c0_18] : memref<200x1024xf32, #tpu.memory_space<vmem>>, vector<8x1024xf32>
    tpu.vector_store %arg6[%c104, %c0_18], %33 {strides = array<i32>} : memref<200x1024xf32, #tpu.memory_space<vmem>>, vector<8x1024xf32>,
    %c1022_i32 = arith.constant 1022 : i32
    %35 = tpu.dynamic_rotate %7 by %c1022_i32 dim 1 : vector<8x1024xf32>, i32 -> vector<8x1024xf32>
    %c112 = arith.constant 112 : index
    %c0_19 = arith.constant 0 : index
    %36 = vector.load %arg6[%c112, %c0_19] : memref<200x1024xf32, #tpu.memory_space<vmem>>, vector<8x1024xf32>
    tpu.vector_store %arg6[%c112, %c0_19], %35 {strides = array<i32>} : memref<200x1024xf32, #tpu.memory_space<vmem>>, vector<8x1024xf32>,
    %c1006_i32 = arith.constant 1006 : i32
    %37 = tpu.dynamic_rotate %7 by %c1006_i32 dim 1 : vector<8x1024xf32>, i32 -> vector<8x1024xf32>
    %c120 = arith.constant 120 : index
    %c0_20 = arith.constant 0 : index
    %38 = vector.load %arg6[%c120, %c0_20] : memref<200x1024xf32, #tpu.memory_space<vmem>>, vector<8x1024xf32>
    tpu.vector_store %arg6[%c120, %c0_20], %37 {strides = array<i32>} : memref<200x1024xf32, #tpu.memory_space<vmem>>, vector<8x1024xf32>,
    %c1005_i32 = arith.constant 1005 : i32
    %39 = tpu.dynamic_rotate %7 by %c1005_i32 dim 1 : vector<8x1024xf32>, i32 -> vector<8x1024xf32>
    %c128 = arith.constant 128 : index
    %c0_21 = arith.constant 0 : index
    %40 = vector.load %arg6[%c128, %c0_21] : memref<200x1024xf32, #tpu.memory_space<vmem>>, vector<8x1024xf32>
    tpu.vector_store %arg6[%c128, %c0_21], %39 {strides = array<i32>} : memref<200x1024xf32, #tpu.memory_space<vmem>>, vector<8x1024xf32>,
    %c1004_i32 = arith.constant 1004 : i32
    %41 = tpu.dynamic_rotate %7 by %c1004_i32 dim 1 : vector<8x1024xf32>, i32 -> vector<8x1024xf32>
    %c136 = arith.constant 136 : index
    %c0_22 = arith.constant 0 : index
    %42 = vector.load %arg6[%c136, %c0_22] : memref<200x1024xf32, #tpu.memory_space<vmem>>, vector<8x1024xf32>
    tpu.vector_store %arg6[%c136, %c0_22], %41 {strides = array<i32>} : memref<200x1024xf32, #tpu.memory_space<vmem>>, vector<8x1024xf32>,
    %c1003_i32 = arith.constant 1003 : i32
    %43 = tpu.dynamic_rotate %7 by %c1003_i32 dim 1 : vector<8x1024xf32>, i32 -> vector<8x1024xf32>
    %c144 = arith.constant 144 : index
    %c0_23 = arith.constant 0 : index
    %44 = vector.load %arg6[%c144, %c0_23] : memref<200x1024xf32, #tpu.memory_space<vmem>>, vector<8x1024xf32>
    tpu.vector_store %arg6[%c144, %c0_23], %43 {strides = array<i32>} : memref<200x1024xf32, #tpu.memory_space<vmem>>, vector<8x1024xf32>,
    %c1002_i32 = arith.constant 1002 : i32
    %45 = tpu.dynamic_rotate %7 by %c1002_i32 dim 1 : vector<8x1024xf32>, i32 -> vector<8x1024xf32>
    %c152 = arith.constant 152 : index
    %c0_24 = arith.constant 0 : index
    %46 = vector.load %arg6[%c152, %c0_24] : memref<200x1024xf32, #tpu.memory_space<vmem>>, vector<8x1024xf32>
    tpu.vector_store %arg6[%c152, %c0_24], %45 {strides = array<i32>} : memref<200x1024xf32, #tpu.memory_space<vmem>>, vector<8x1024xf32>,
    %c986_i32 = arith.constant 986 : i32
    %47 = tpu.dynamic_rotate %7 by %c986_i32 dim 1 : vector<8x1024xf32>, i32 -> vector<8x1024xf32>
    %c160 = arith.constant 160 : index
    %c0_25 = arith.constant 0 : index
    %48 = vector.load %arg6[%c160, %c0_25] : memref<200x1024xf32, #tpu.memory_space<vmem>>, vector<8x1024xf32>
    tpu.vector_store %arg6[%c160, %c0_25], %47 {strides = array<i32>} : memref<200x1024xf32, #tpu.memory_space<vmem>>, vector<8x1024xf32>,
    %c985_i32 = arith.constant 985 : i32
    %49 = tpu.dynamic_rotate %7 by %c985_i32 dim 1 : vector<8x1024xf32>, i32 -> vector<8x1024xf32>
    %c168 = arith.constant 168 : index
    %c0_26 = arith.constant 0 : index
    %50 = vector.load %arg6[%c168, %c0_26] : memref<200x1024xf32, #tpu.memory_space<vmem>>, vector<8x1024xf32>
    tpu.vector_store %arg6[%c168, %c0_26], %49 {strides = array<i32>} : memref<200x1024xf32, #tpu.memory_space<vmem>>, vector<8x1024xf32>,
    %c984_i32 = arith.constant 984 : i32
    %51 = tpu.dynamic_rotate %7 by %c984_i32 dim 1 : vector<8x1024xf32>, i32 -> vector<8x1024xf32>
    %c176 = arith.constant 176 : index
    %c0_27 = arith.constant 0 : index
    %52 = vector.load %arg6[%c176, %c0_27] : memref<200x1024xf32, #tpu.memory_space<vmem>>, vector<8x1024xf32>
    tpu.vector_store %arg6[%c176, %c0_27], %51 {strides = array<i32>} : memref<200x1024xf32, #tpu.memory_space<vmem>>, vector<8x1024xf32>,
    %c983_i32 = arith.constant 983 : i32
    %53 = tpu.dynamic_rotate %7 by %c983_i32 dim 1 : vector<8x1024xf32>, i32 -> vector<8x1024xf32>
    %c184 = arith.constant 184 : index
    %c0_28 = arith.constant 0 : index
    %54 = vector.load %arg6[%c184, %c0_28] : memref<200x1024xf32, #tpu.memory_space<vmem>>, vector<8x1024xf32>
    tpu.vector_store %arg6[%c184, %c0_28], %53 {strides = array<i32>} : memref<200x1024xf32, #tpu.memory_space<vmem>>, vector<8x1024xf32>,
    %c982_i32 = arith.constant 982 : i32
    %55 = tpu.dynamic_rotate %7 by %c982_i32 dim 1 : vector<8x1024xf32>, i32 -> vector<8x1024xf32>
    %c192 = arith.constant 192 : index
    %c0_29 = arith.constant 0 : index
    %56 = vector.load %arg6[%c192, %c0_29] : memref<200x1024xf32, #tpu.memory_space<vmem>>, vector<8x1024xf32>
    tpu.vector_store %arg6[%c192, %c0_29], %55 {strides = array<i32>} : memref<200x1024xf32, #tpu.memory_space<vmem>>, vector<8x1024xf32>,
    %c0_30 = arith.constant 0 : index
    %c0_31 = arith.constant 0 : index
    %c0_32 = arith.constant 0 : index
    %57 = vector.load %arg2[%c0_30, %c0_31, %c0_32] : memref<3x8x200xbf16, #tpu.memory_space<vmem>>, vector<1x8x200xbf16>
    %58 = vector.shape_cast %57 : vector<1x8x200xbf16> to vector<8x200xbf16>
    %c0_33 = arith.constant 0 : index
    %c0_34 = arith.constant 0 : index
    %59 = vector.load %arg6[%c0_33, %c0_34] : memref<200x1024xf32, #tpu.memory_space<vmem>>, vector<200x1024xf32>
    %60 = arith.truncf %59 : vector<200x1024xf32> to vector<200x1024xbf16>
    %cst_35 = arith.constant dense<0.000000e+00> : vector<8x1024xf32>
    %61 = tpu.matmul %58, %60, %cst_35 {dimension_numbers = #tpu.dot_dimension_numbers<[1], [0], [0], [1], [0, 0, 1, 1], [], []>} : vector<8x200xbf16>, vector<200x1024xbf16>, vector<8x1024xf32> -> vector<8x1024xf32>
    %c0_36 = arith.constant 0 : index
    %c0_37 = arith.constant 0 : index
    %c0_38 = arith.constant 0 : index
    %62 = vector.load %arg3[%c0_36, %c0_37, %c0_38] : memref<3x8x1xf32, #tpu.memory_space<vmem>>, vector<1x8x1xf32>
    %63 = vector.shape_cast %62 : vector<1x8x1xf32> to vector<8x1xf32>
    %64 = vector.broadcast %63 : vector<8x1xf32> to vector<8x1024xf32>
    %65 = arith.addf %61, %64 : vector<8x1024xf32>
    %cst_39 = arith.constant 0.000000e+00 : f32
    %66 = vector.broadcast %cst_39 : f32 to vector<8x1024xf32>
    %67 = arith.maximumf %65, %66 : vector<8x1024xf32>
    %68 = arith.mulf %67, %2 : vector<8x1024xf32>
    %c42_i32_40 = arith.constant 42 : i32
    %69 = tpu.dynamic_rotate %68 by %c42_i32_40 dim 1 : vector<8x1024xf32>, i32 -> vector<8x1024xf32>
    %c0_41 = arith.constant 0 : index
    %c0_42 = arith.constant 0 : index
    %70 = vector.load %arg6[%c0_41, %c0_42] : memref<200x1024xf32, #tpu.memory_space<vmem>>, vector<8x1024xf32>
    tpu.vector_store %arg6[%c0_41, %c0_42], %69 {strides = array<i32>} : memref<200x1024xf32, #tpu.memory_space<vmem>>, vector<8x1024xf32>,
    %c41_i32_43 = arith.constant 41 : i32
    %71 = tpu.dynamic_rotate %68 by %c41_i32_43 dim 1 : vector<8x1024xf32>, i32 -> vector<8x1024xf32>
    %c8_44 = arith.constant 8 : index
    %c0_45 = arith.constant 0 : index
    %72 = vector.load %arg6[%c8_44, %c0_45] : memref<200x1024xf32, #tpu.memory_space<vmem>>, vector<8x1024xf32>
    tpu.vector_store %arg6[%c8_44, %c0_45], %71 {strides = array<i32>} : memref<200x1024xf32, #tpu.memory_space<vmem>>, vector<8x1024xf32>,
    %c40_i32_46 = arith.constant 40 : i32
    %73 = tpu.dynamic_rotate %68 by %c40_i32_46 dim 1 : vector<8x1024xf32>, i32 -> vector<8x1024xf32>
    %c16_47 = arith.constant 16 : index
    %c0_48 = arith.constant 0 : index
    %74 = vector.load %arg6[%c16_47, %c0_48] : memref<200x1024xf32, #tpu.memory_space<vmem>>, vector<8x1024xf32>
    tpu.vector_store %arg6[%c16_47, %c0_48], %73 {strides = array<i32>} : memref<200x1024xf32, #tpu.memory_space<vmem>>, vector<8x1024xf32>,
    %c39_i32_49 = arith.constant 39 : i32
    %75 = tpu.dynamic_rotate %68 by %c39_i32_49 dim 1 : vector<8x1024xf32>, i32 -> vector<8x1024xf32>
    %c24_50 = arith.constant 24 : index
    %c0_51 = arith.constant 0 : index
    %76 = vector.load %arg6[%c24_50, %c0_51] : memref<200x1024xf32, #tpu.memory_space<vmem>>, vector<8x1024xf32>
    tpu.vector_store %arg6[%c24_50, %c0_51], %75 {strides = array<i32>} : memref<200x1024xf32, #tpu.memory_space<vmem>>, vector<8x1024xf32>,
    %c38_i32_52 = arith.constant 38 : i32
    %77 = tpu.dynamic_rotate %68 by %c38_i32_52 dim 1 : vector<8x1024xf32>, i32 -> vector<8x1024xf32>
    %c32_53 = arith.constant 32 : index
    %c0_54 = arith.constant 0 : index
    %78 = vector.load %arg6[%c32_53, %c0_54] : memref<200x1024xf32, #tpu.memory_space<vmem>>, vector<8x1024xf32>
    tpu.vector_store %arg6[%c32_53, %c0_54], %77 {strides = array<i32>} : memref<200x1024xf32, #tpu.memory_space<vmem>>, vector<8x1024xf32>,
    %c22_i32_55 = arith.constant 22 : i32
    %79 = tpu.dynamic_rotate %68 by %c22_i32_55 dim 1 : vector<8x1024xf32>, i32 -> vector<8x1024xf32>
    %c40_56 = arith.constant 40 : index
    %c0_57 = arith.constant 0 : index
    %80 = vector.load %arg6[%c40_56, %c0_57] : memref<200x1024xf32, #tpu.memory_space<vmem>>, vector<8x1024xf32>
    tpu.vector_store %arg6[%c40_56, %c0_57], %79 {strides = array<i32>} : memref<200x1024xf32, #tpu.memory_space<vmem>>, vector<8x1024xf32>,
    %c21_i32_58 = arith.constant 21 : i32
    %81 = tpu.dynamic_rotate %68 by %c21_i32_58 dim 1 : vector<8x1024xf32>, i32 -> vector<8x1024xf32>
    %c48_59 = arith.constant 48 : index
    %c0_60 = arith.constant 0 : index
    %82 = vector.load %arg6[%c48_59, %c0_60] : memref<200x1024xf32, #tpu.memory_space<vmem>>, vector<8x1024xf32>
    tpu.vector_store %arg6[%c48_59, %c0_60], %81 {strides = array<i32>} : memref<200x1024xf32, #tpu.memory_space<vmem>>, vector<8x1024xf32>,
    %c20_i32_61 = arith.constant 20 : i32
    %83 = tpu.dynamic_rotate %68 by %c20_i32_61 dim 1 : vector<8x1024xf32>, i32 -> vector<8x1024xf32>
    %c56_62 = arith.constant 56 : index
    %c0_63 = arith.constant 0 : index
    %84 = vector.load %arg6[%c56_62, %c0_63] : memref<200x1024xf32, #tpu.memory_space<vmem>>, vector<8x1024xf32>
    tpu.vector_store %arg6[%c56_62, %c0_63], %83 {strides = array<i32>} : memref<200x1024xf32, #tpu.memory_space<vmem>>, vector<8x1024xf32>,
    %c19_i32_64 = arith.constant 19 : i32
    %85 = tpu.dynamic_rotate %68 by %c19_i32_64 dim 1 : vector<8x1024xf32>, i32 -> vector<8x1024xf32>
    %c64_65 = arith.constant 64 : index
    %c0_66 = arith.constant 0 : index
    %86 = vector.load %arg6[%c64_65, %c0_66] : memref<200x1024xf32, #tpu.memory_space<vmem>>, vector<8x1024xf32>
    tpu.vector_store %arg6[%c64_65, %c0_66], %85 {strides = array<i32>} : memref<200x1024xf32, #tpu.memory_space<vmem>>, vector<8x1024xf32>,
    %c18_i32_67 = arith.constant 18 : i32
    %87 = tpu.dynamic_rotate %68 by %c18_i32_67 dim 1 : vector<8x1024xf32>, i32 -> vector<8x1024xf32>
    %c72_68 = arith.constant 72 : index
    %c0_69 = arith.constant 0 : index
    %88 = vector.load %arg6[%c72_68, %c0_69] : memref<200x1024xf32, #tpu.memory_space<vmem>>, vector<8x1024xf32>
    tpu.vector_store %arg6[%c72_68, %c0_69], %87 {strides = array<i32>} : memref<200x1024xf32, #tpu.memory_space<vmem>>, vector<8x1024xf32>,
    %c2_i32_70 = arith.constant 2 : i32
    %89 = tpu.dynamic_rotate %68 by %c2_i32_70 dim 1 : vector<8x1024xf32>, i32 -> vector<8x1024xf32>
    %c80_71 = arith.constant 80 : index
    %c0_72 = arith.constant 0 : index
    %90 = vector.load %arg6[%c80_71, %c0_72] : memref<200x1024xf32, #tpu.memory_space<vmem>>, vector<8x1024xf32>
    tpu.vector_store %arg6[%c80_71, %c0_72], %89 {strides = array<i32>} : memref<200x1024xf32, #tpu.memory_space<vmem>>, vector<8x1024xf32>,
    %c1_i32_73 = arith.constant 1 : i32
    %91 = tpu.dynamic_rotate %68 by %c1_i32_73 dim 1 : vector<8x1024xf32>, i32 -> vector<8x1024xf32>
    %c88_74 = arith.constant 88 : index
    %c0_75 = arith.constant 0 : index
    %92 = vector.load %arg6[%c88_74, %c0_75] : memref<200x1024xf32, #tpu.memory_space<vmem>>, vector<8x1024xf32>
    tpu.vector_store %arg6[%c88_74, %c0_75], %91 {strides = array<i32>} : memref<200x1024xf32, #tpu.memory_space<vmem>>, vector<8x1024xf32>,
    %c96_76 = arith.constant 96 : index
    %c0_77 = arith.constant 0 : index
    %93 = vector.load %arg6[%c96_76, %c0_77] : memref<200x1024xf32, #tpu.memory_space<vmem>>, vector<8x1024xf32>
    tpu.vector_store %arg6[%c96_76, %c0_77], %68 {strides = array<i32>} : memref<200x1024xf32, #tpu.memory_space<vmem>>, vector<8x1024xf32>,
    %c1023_i32_78 = arith.constant 1023 : i32
    %94 = tpu.dynamic_rotate %68 by %c1023_i32_78 dim 1 : vector<8x1024xf32>, i32 -> vector<8x1024xf32>
    %c104_79 = arith.constant 104 : index
    %c0_80 = arith.constant 0 : index
    %95 = vector.load %arg6[%c104_79, %c0_80] : memref<200x1024xf32, #tpu.memory_space<vmem>>, vector<8x1024xf32>
    tpu.vector_store %arg6[%c104_79, %c0_80], %94 {strides = array<i32>} : memref<200x1024xf32, #tpu.memory_space<vmem>>, vector<8x1024xf32>,
    %c1022_i32_81 = arith.constant 1022 : i32
    %96 = tpu.dynamic_rotate %68 by %c1022_i32_81 dim 1 : vector<8x1024xf32>, i32 -> vector<8x1024xf32>
    %c112_82 = arith.constant 112 : index
    %c0_83 = arith.constant 0 : index
    %97 = vector.load %arg6[%c112_82, %c0_83] : memref<200x1024xf32, #tpu.memory_space<vmem>>, vector<8x1024xf32>
    tpu.vector_store %arg6[%c112_82, %c0_83], %96 {strides = array<i32>} : memref<200x1024xf32, #tpu.memory_space<vmem>>, vector<8x1024xf32>,
    %c1006_i32_84 = arith.constant 1006 : i32
    %98 = tpu.dynamic_rotate %68 by %c1006_i32_84 dim 1 : vector<8x1024xf32>, i32 -> vector<8x1024xf32>
    %c120_85 = arith.constant 120 : index
    %c0_86 = arith.constant 0 : index
    %99 = vector.load %arg6[%c120_85, %c0_86] : memref<200x1024xf32, #tpu.memory_space<vmem>>, vector<8x1024xf32>
    tpu.vector_store %arg6[%c120_85, %c0_86], %98 {strides = array<i32>} : memref<200x1024xf32, #tpu.memory_space<vmem>>, vector<8x1024xf32>,
    %c1005_i32_87 = arith.constant 1005 : i32
    %100 = tpu.dynamic_rotate %68 by %c1005_i32_87 dim 1 : vector<8x1024xf32>, i32 -> vector<8x1024xf32>
    %c128_88 = arith.constant 128 : index
    %c0_89 = arith.constant 0 : index
    %101 = vector.load %arg6[%c128_88, %c0_89] : memref<200x1024xf32, #tpu.memory_space<vmem>>, vector<8x1024xf32>
    tpu.vector_store %arg6[%c128_88, %c0_89], %100 {strides = array<i32>} : memref<200x1024xf32, #tpu.memory_space<vmem>>, vector<8x1024xf32>,
    %c1004_i32_90 = arith.constant 1004 : i32
    %102 = tpu.dynamic_rotate %68 by %c1004_i32_90 dim 1 : vector<8x1024xf32>, i32 -> vector<8x1024xf32>
    %c136_91 = arith.constant 136 : index
    %c0_92 = arith.constant 0 : index
    %103 = vector.load %arg6[%c136_91, %c0_92] : memref<200x1024xf32, #tpu.memory_space<vmem>>, vector<8x1024xf32>
    tpu.vector_store %arg6[%c136_91, %c0_92], %102 {strides = array<i32>} : memref<200x1024xf32, #tpu.memory_space<vmem>>, vector<8x1024xf32>,
    %c1003_i32_93 = arith.constant 1003 : i32
    %104 = tpu.dynamic_rotate %68 by %c1003_i32_93 dim 1 : vector<8x1024xf32>, i32 -> vector<8x1024xf32>
    %c144_94 = arith.constant 144 : index
    %c0_95 = arith.constant 0 : index
    %105 = vector.load %arg6[%c144_94, %c0_95] : memref<200x1024xf32, #tpu.memory_space<vmem>>, vector<8x1024xf32>
    tpu.vector_store %arg6[%c144_94, %c0_95], %104 {strides = array<i32>} : memref<200x1024xf32, #tpu.memory_space<vmem>>, vector<8x1024xf32>,
    %c1002_i32_96 = arith.constant 1002 : i32
    %106 = tpu.dynamic_rotate %68 by %c1002_i32_96 dim 1 : vector<8x1024xf32>, i32 -> vector<8x1024xf32>
    %c152_97 = arith.constant 152 : index
    %c0_98 = arith.constant 0 : index
    %107 = vector.load %arg6[%c152_97, %c0_98] : memref<200x1024xf32, #tpu.memory_space<vmem>>, vector<8x1024xf32>
    tpu.vector_store %arg6[%c152_97, %c0_98], %106 {strides = array<i32>} : memref<200x1024xf32, #tpu.memory_space<vmem>>, vector<8x1024xf32>,
    %c986_i32_99 = arith.constant 986 : i32
    %108 = tpu.dynamic_rotate %68 by %c986_i32_99 dim 1 : vector<8x1024xf32>, i32 -> vector<8x1024xf32>
    %c160_100 = arith.constant 160 : index
    %c0_101 = arith.constant 0 : index
    %109 = vector.load %arg6[%c160_100, %c0_101] : memref<200x1024xf32, #tpu.memory_space<vmem>>, vector<8x1024xf32>
    tpu.vector_store %arg6[%c160_100, %c0_101], %108 {strides = array<i32>} : memref<200x1024xf32, #tpu.memory_space<vmem>>, vector<8x1024xf32>,
    %c985_i32_102 = arith.constant 985 : i32
    %110 = tpu.dynamic_rotate %68 by %c985_i32_102 dim 1 : vector<8x1024xf32>, i32 -> vector<8x1024xf32>
    %c168_103 = arith.constant 168 : index
    %c0_104 = arith.constant 0 : index
    %111 = vector.load %arg6[%c168_103, %c0_104] : memref<200x1024xf32, #tpu.memory_space<vmem>>, vector<8x1024xf32>
    tpu.vector_store %arg6[%c168_103, %c0_104], %110 {strides = array<i32>} : memref<200x1024xf32, #tpu.memory_space<vmem>>, vector<8x1024xf32>,
    %c984_i32_105 = arith.constant 984 : i32
    %112 = tpu.dynamic_rotate %68 by %c984_i32_105 dim 1 : vector<8x1024xf32>, i32 -> vector<8x1024xf32>
    %c176_106 = arith.constant 176 : index
    %c0_107 = arith.constant 0 : index
    %113 = vector.load %arg6[%c176_106, %c0_107] : memref<200x1024xf32, #tpu.memory_space<vmem>>, vector<8x1024xf32>
    tpu.vector_store %arg6[%c176_106, %c0_107], %112 {strides = array<i32>} : memref<200x1024xf32, #tpu.memory_space<vmem>>, vector<8x1024xf32>,
    %c983_i32_108 = arith.constant 983 : i32
    %114 = tpu.dynamic_rotate %68 by %c983_i32_108 dim 1 : vector<8x1024xf32>, i32 -> vector<8x1024xf32>
    %c184_109 = arith.constant 184 : index
    %c0_110 = arith.constant 0 : index
    %115 = vector.load %arg6[%c184_109, %c0_110] : memref<200x1024xf32, #tpu.memory_space<vmem>>, vector<8x1024xf32>
    tpu.vector_store %arg6[%c184_109, %c0_110], %114 {strides = array<i32>} : memref<200x1024xf32, #tpu.memory_space<vmem>>, vector<8x1024xf32>,
    %c982_i32_111 = arith.constant 982 : i32
    %116 = tpu.dynamic_rotate %68 by %c982_i32_111 dim 1 : vector<8x1024xf32>, i32 -> vector<8x1024xf32>
    %c192_112 = arith.constant 192 : index
    %c0_113 = arith.constant 0 : index
    %117 = vector.load %arg6[%c192_112, %c0_113] : memref<200x1024xf32, #tpu.memory_space<vmem>>, vector<8x1024xf32>
    tpu.vector_store %arg6[%c192_112, %c0_113], %116 {strides = array<i32>} : memref<200x1024xf32, #tpu.memory_space<vmem>>, vector<8x1024xf32>,
    %c1 = arith.constant 1 : index
    %c0_114 = arith.constant 0 : index
    %c0_115 = arith.constant 0 : index
    %118 = vector.load %arg2[%c1, %c0_114, %c0_115] : memref<3x8x200xbf16, #tpu.memory_space<vmem>>, vector<1x8x200xbf16>
    %119 = vector.shape_cast %118 : vector<1x8x200xbf16> to vector<8x200xbf16>
    %c0_116 = arith.constant 0 : index
    %c0_117 = arith.constant 0 : index
    %120 = vector.load %arg6[%c0_116, %c0_117] : memref<200x1024xf32, #tpu.memory_space<vmem>>, vector<200x1024xf32>
    %121 = arith.truncf %120 : vector<200x1024xf32> to vector<200x1024xbf16>
    %cst_118 = arith.constant dense<0.000000e+00> : vector<8x1024xf32>
    %122 = tpu.matmul %119, %121, %cst_118 {dimension_numbers = #tpu.dot_dimension_numbers<[1], [0], [0], [1], [0, 0, 1, 1], [], []>} : vector<8x200xbf16>, vector<200x1024xbf16>, vector<8x1024xf32> -> vector<8x1024xf32>
    %c1_119 = arith.constant 1 : index
    %c0_120 = arith.constant 0 : index
    %c0_121 = arith.constant 0 : index
    %123 = vector.load %arg3[%c1_119, %c0_120, %c0_121] : memref<3x8x1xf32, #tpu.memory_space<vmem>>, vector<1x8x1xf32>
    %124 = vector.shape_cast %123 : vector<1x8x1xf32> to vector<8x1xf32>
    %125 = vector.broadcast %124 : vector<8x1xf32> to vector<8x1024xf32>
    %126 = arith.addf %122, %125 : vector<8x1024xf32>
    %cst_122 = arith.constant 0.000000e+00 : f32
    %127 = vector.broadcast %cst_122 : f32 to vector<8x1024xf32>
    %128 = arith.maximumf %126, %127 : vector<8x1024xf32>
    %129 = arith.mulf %128, %2 : vector<8x1024xf32>
    %c42_i32_123 = arith.constant 42 : i32
    %130 = tpu.dynamic_rotate %129 by %c42_i32_123 dim 1 : vector<8x1024xf32>, i32 -> vector<8x1024xf32>
    %c0_124 = arith.constant 0 : index
    %c0_125 = arith.constant 0 : index
    %131 = vector.load %arg6[%c0_124, %c0_125] : memref<200x1024xf32, #tpu.memory_space<vmem>>, vector<8x1024xf32>
    tpu.vector_store %arg6[%c0_124, %c0_125], %130 {strides = array<i32>} : memref<200x1024xf32, #tpu.memory_space<vmem>>, vector<8x1024xf32>,
    %c41_i32_126 = arith.constant 41 : i32
    %132 = tpu.dynamic_rotate %129 by %c41_i32_126 dim 1 : vector<8x1024xf32>, i32 -> vector<8x1024xf32>
    %c8_127 = arith.constant 8 : index
    %c0_128 = arith.constant 0 : index
    %133 = vector.load %arg6[%c8_127, %c0_128] : memref<200x1024xf32, #tpu.memory_space<vmem>>, vector<8x1024xf32>
    tpu.vector_store %arg6[%c8_127, %c0_128], %132 {strides = array<i32>} : memref<200x1024xf32, #tpu.memory_space<vmem>>, vector<8x1024xf32>,
    %c40_i32_129 = arith.constant 40 : i32
    %134 = tpu.dynamic_rotate %129 by %c40_i32_129 dim 1 : vector<8x1024xf32>, i32 -> vector<8x1024xf32>
    %c16_130 = arith.constant 16 : index
    %c0_131 = arith.constant 0 : index
    %135 = vector.load %arg6[%c16_130, %c0_131] : memref<200x1024xf32, #tpu.memory_space<vmem>>, vector<8x1024xf32>
    tpu.vector_store %arg6[%c16_130, %c0_131], %134 {strides = array<i32>} : memref<200x1024xf32, #tpu.memory_space<vmem>>, vector<8x1024xf32>,
    %c39_i32_132 = arith.constant 39 : i32
    %136 = tpu.dynamic_rotate %129 by %c39_i32_132 dim 1 : vector<8x1024xf32>, i32 -> vector<8x1024xf32>
    %c24_133 = arith.constant 24 : index
    %c0_134 = arith.constant 0 : index
    %137 = vector.load %arg6[%c24_133, %c0_134] : memref<200x1024xf32, #tpu.memory_space<vmem>>, vector<8x1024xf32>
    tpu.vector_store %arg6[%c24_133, %c0_134], %136 {strides = array<i32>} : memref<200x1024xf32, #tpu.memory_space<vmem>>, vector<8x1024xf32>,
    %c38_i32_135 = arith.constant 38 : i32
    %138 = tpu.dynamic_rotate %129 by %c38_i32_135 dim 1 : vector<8x1024xf32>, i32 -> vector<8x1024xf32>
    %c32_136 = arith.constant 32 : index
    %c0_137 = arith.constant 0 : index
    %139 = vector.load %arg6[%c32_136, %c0_137] : memref<200x1024xf32, #tpu.memory_space<vmem>>, vector<8x1024xf32>
    tpu.vector_store %arg6[%c32_136, %c0_137], %138 {strides = array<i32>} : memref<200x1024xf32, #tpu.memory_space<vmem>>, vector<8x1024xf32>,
    %c22_i32_138 = arith.constant 22 : i32
    %140 = tpu.dynamic_rotate %129 by %c22_i32_138 dim 1 : vector<8x1024xf32>, i32 -> vector<8x1024xf32>
    %c40_139 = arith.constant 40 : index
    %c0_140 = arith.constant 0 : index
    %141 = vector.load %arg6[%c40_139, %c0_140] : memref<200x1024xf32, #tpu.memory_space<vmem>>, vector<8x1024xf32>
    tpu.vector_store %arg6[%c40_139, %c0_140], %140 {strides = array<i32>} : memref<200x1024xf32, #tpu.memory_space<vmem>>, vector<8x1024xf32>,
    %c21_i32_141 = arith.constant 21 : i32
    %142 = tpu.dynamic_rotate %129 by %c21_i32_141 dim 1 : vector<8x1024xf32>, i32 -> vector<8x1024xf32>
    %c48_142 = arith.constant 48 : index
    %c0_143 = arith.constant 0 : index
    %143 = vector.load %arg6[%c48_142, %c0_143] : memref<200x1024xf32, #tpu.memory_space<vmem>>, vector<8x1024xf32>
    tpu.vector_store %arg6[%c48_142, %c0_143], %142 {strides = array<i32>} : memref<200x1024xf32, #tpu.memory_space<vmem>>, vector<8x1024xf32>,
    %c20_i32_144 = arith.constant 20 : i32
    %144 = tpu.dynamic_rotate %129 by %c20_i32_144 dim 1 : vector<8x1024xf32>, i32 -> vector<8x1024xf32>
    %c56_145 = arith.constant 56 : index
    %c0_146 = arith.constant 0 : index
    %145 = vector.load %arg6[%c56_145, %c0_146] : memref<200x1024xf32, #tpu.memory_space<vmem>>, vector<8x1024xf32>
    tpu.vector_store %arg6[%c56_145, %c0_146], %144 {strides = array<i32>} : memref<200x1024xf32, #tpu.memory_space<vmem>>, vector<8x1024xf32>,
    %c19_i32_147 = arith.constant 19 : i32
    %146 = tpu.dynamic_rotate %129 by %c19_i32_147 dim 1 : vector<8x1024xf32>, i32 -> vector<8x1024xf32>
    %c64_148 = arith.constant 64 : index
    %c0_149 = arith.constant 0 : index
    %147 = vector.load %arg6[%c64_148, %c0_149] : memref<200x1024xf32, #tpu.memory_space<vmem>>, vector<8x1024xf32>
    tpu.vector_store %arg6[%c64_148, %c0_149], %146 {strides = array<i32>} : memref<200x1024xf32, #tpu.memory_space<vmem>>, vector<8x1024xf32>,
    %c18_i32_150 = arith.constant 18 : i32
    %148 = tpu.dynamic_rotate %129 by %c18_i32_150 dim 1 : vector<8x1024xf32>, i32 -> vector<8x1024xf32>
    %c72_151 = arith.constant 72 : index
    %c0_152 = arith.constant 0 : index
    %149 = vector.load %arg6[%c72_151, %c0_152] : memref<200x1024xf32, #tpu.memory_space<vmem>>, vector<8x1024xf32>
    tpu.vector_store %arg6[%c72_151, %c0_152], %148 {strides = array<i32>} : memref<200x1024xf32, #tpu.memory_space<vmem>>, vector<8x1024xf32>,
    %c2_i32_153 = arith.constant 2 : i32
    %150 = tpu.dynamic_rotate %129 by %c2_i32_153 dim 1 : vector<8x1024xf32>, i32 -> vector<8x1024xf32>
    %c80_154 = arith.constant 80 : index
    %c0_155 = arith.constant 0 : index
    %151 = vector.load %arg6[%c80_154, %c0_155] : memref<200x1024xf32, #tpu.memory_space<vmem>>, vector<8x1024xf32>
    tpu.vector_store %arg6[%c80_154, %c0_155], %150 {strides = array<i32>} : memref<200x1024xf32, #tpu.memory_space<vmem>>, vector<8x1024xf32>,
    %c1_i32_156 = arith.constant 1 : i32
    %152 = tpu.dynamic_rotate %129 by %c1_i32_156 dim 1 : vector<8x1024xf32>, i32 -> vector<8x1024xf32>
    %c88_157 = arith.constant 88 : index
    %c0_158 = arith.constant 0 : index
    %153 = vector.load %arg6[%c88_157, %c0_158] : memref<200x1024xf32, #tpu.memory_space<vmem>>, vector<8x1024xf32>
    tpu.vector_store %arg6[%c88_157, %c0_158], %152 {strides = array<i32>} : memref<200x1024xf32, #tpu.memory_space<vmem>>, vector<8x1024xf32>,
    %c96_159 = arith.constant 96 : index
    %c0_160 = arith.constant 0 : index
    %154 = vector.load %arg6[%c96_159, %c0_160] : memref<200x1024xf32, #tpu.memory_space<vmem>>, vector<8x1024xf32>
    tpu.vector_store %arg6[%c96_159, %c0_160], %129 {strides = array<i32>} : memref<200x1024xf32, #tpu.memory_space<vmem>>, vector<8x1024xf32>,
    %c1023_i32_161 = arith.constant 1023 : i32
    %155 = tpu.dynamic_rotate %129 by %c1023_i32_161 dim 1 : vector<8x1024xf32>, i32 -> vector<8x1024xf32>
    %c104_162 = arith.constant 104 : index
    %c0_163 = arith.constant 0 : index
    %156 = vector.load %arg6[%c104_162, %c0_163] : memref<200x1024xf32, #tpu.memory_space<vmem>>, vector<8x1024xf32>
    tpu.vector_store %arg6[%c104_162, %c0_163], %155 {strides = array<i32>} : memref<200x1024xf32, #tpu.memory_space<vmem>>, vector<8x1024xf32>,
    %c1022_i32_164 = arith.constant 1022 : i32
    %157 = tpu.dynamic_rotate %129 by %c1022_i32_164 dim 1 : vector<8x1024xf32>, i32 -> vector<8x1024xf32>
    %c112_165 = arith.constant 112 : index
    %c0_166 = arith.constant 0 : index
    %158 = vector.load %arg6[%c112_165, %c0_166] : memref<200x1024xf32, #tpu.memory_space<vmem>>, vector<8x1024xf32>
    tpu.vector_store %arg6[%c112_165, %c0_166], %157 {strides = array<i32>} : memref<200x1024xf32, #tpu.memory_space<vmem>>, vector<8x1024xf32>,
    %c1006_i32_167 = arith.constant 1006 : i32
    %159 = tpu.dynamic_rotate %129 by %c1006_i32_167 dim 1 : vector<8x1024xf32>, i32 -> vector<8x1024xf32>
    %c120_168 = arith.constant 120 : index
    %c0_169 = arith.constant 0 : index
    %160 = vector.load %arg6[%c120_168, %c0_169] : memref<200x1024xf32, #tpu.memory_space<vmem>>, vector<8x1024xf32>
    tpu.vector_store %arg6[%c120_168, %c0_169], %159 {strides = array<i32>} : memref<200x1024xf32, #tpu.memory_space<vmem>>, vector<8x1024xf32>,
    %c1005_i32_170 = arith.constant 1005 : i32
    %161 = tpu.dynamic_rotate %129 by %c1005_i32_170 dim 1 : vector<8x1024xf32>, i32 -> vector<8x1024xf32>
    %c128_171 = arith.constant 128 : index
    %c0_172 = arith.constant 0 : index
    %162 = vector.load %arg6[%c128_171, %c0_172] : memref<200x1024xf32, #tpu.memory_space<vmem>>, vector<8x1024xf32>
    tpu.vector_store %arg6[%c128_171, %c0_172], %161 {strides = array<i32>} : memref<200x1024xf32, #tpu.memory_space<vmem>>, vector<8x1024xf32>,
    %c1004_i32_173 = arith.constant 1004 : i32
    %163 = tpu.dynamic_rotate %129 by %c1004_i32_173 dim 1 : vector<8x1024xf32>, i32 -> vector<8x1024xf32>
    %c136_174 = arith.constant 136 : index
    %c0_175 = arith.constant 0 : index
    %164 = vector.load %arg6[%c136_174, %c0_175] : memref<200x1024xf32, #tpu.memory_space<vmem>>, vector<8x1024xf32>
    tpu.vector_store %arg6[%c136_174, %c0_175], %163 {strides = array<i32>} : memref<200x1024xf32, #tpu.memory_space<vmem>>, vector<8x1024xf32>,
    %c1003_i32_176 = arith.constant 1003 : i32
    %165 = tpu.dynamic_rotate %129 by %c1003_i32_176 dim 1 : vector<8x1024xf32>, i32 -> vector<8x1024xf32>
    %c144_177 = arith.constant 144 : index
    %c0_178 = arith.constant 0 : index
    %166 = vector.load %arg6[%c144_177, %c0_178] : memref<200x1024xf32, #tpu.memory_space<vmem>>, vector<8x1024xf32>
    tpu.vector_store %arg6[%c144_177, %c0_178], %165 {strides = array<i32>} : memref<200x1024xf32, #tpu.memory_space<vmem>>, vector<8x1024xf32>,
    %c1002_i32_179 = arith.constant 1002 : i32
    %167 = tpu.dynamic_rotate %129 by %c1002_i32_179 dim 1 : vector<8x1024xf32>, i32 -> vector<8x1024xf32>
    %c152_180 = arith.constant 152 : index
    %c0_181 = arith.constant 0 : index
    %168 = vector.load %arg6[%c152_180, %c0_181] : memref<200x1024xf32, #tpu.memory_space<vmem>>, vector<8x1024xf32>
    tpu.vector_store %arg6[%c152_180, %c0_181], %167 {strides = array<i32>} : memref<200x1024xf32, #tpu.memory_space<vmem>>, vector<8x1024xf32>,
    %c986_i32_182 = arith.constant 986 : i32
    %169 = tpu.dynamic_rotate %129 by %c986_i32_182 dim 1 : vector<8x1024xf32>, i32 -> vector<8x1024xf32>
    %c160_183 = arith.constant 160 : index
    %c0_184 = arith.constant 0 : index
    %170 = vector.load %arg6[%c160_183, %c0_184] : memref<200x1024xf32, #tpu.memory_space<vmem>>, vector<8x1024xf32>
    tpu.vector_store %arg6[%c160_183, %c0_184], %169 {strides = array<i32>} : memref<200x1024xf32, #tpu.memory_space<vmem>>, vector<8x1024xf32>,
    %c985_i32_185 = arith.constant 985 : i32
    %171 = tpu.dynamic_rotate %129 by %c985_i32_185 dim 1 : vector<8x1024xf32>, i32 -> vector<8x1024xf32>
    %c168_186 = arith.constant 168 : index
    %c0_187 = arith.constant 0 : index
    %172 = vector.load %arg6[%c168_186, %c0_187] : memref<200x1024xf32, #tpu.memory_space<vmem>>, vector<8x1024xf32>
    tpu.vector_store %arg6[%c168_186, %c0_187], %171 {strides = array<i32>} : memref<200x1024xf32, #tpu.memory_space<vmem>>, vector<8x1024xf32>,
    %c984_i32_188 = arith.constant 984 : i32
    %173 = tpu.dynamic_rotate %129 by %c984_i32_188 dim 1 : vector<8x1024xf32>, i32 -> vector<8x1024xf32>
    %c176_189 = arith.constant 176 : index
    %c0_190 = arith.constant 0 : index
    %174 = vector.load %arg6[%c176_189, %c0_190] : memref<200x1024xf32, #tpu.memory_space<vmem>>, vector<8x1024xf32>
    tpu.vector_store %arg6[%c176_189, %c0_190], %173 {strides = array<i32>} : memref<200x1024xf32, #tpu.memory_space<vmem>>, vector<8x1024xf32>,
    %c983_i32_191 = arith.constant 983 : i32
    %175 = tpu.dynamic_rotate %129 by %c983_i32_191 dim 1 : vector<8x1024xf32>, i32 -> vector<8x1024xf32>
    %c184_192 = arith.constant 184 : index
    %c0_193 = arith.constant 0 : index
    %176 = vector.load %arg6[%c184_192, %c0_193] : memref<200x1024xf32, #tpu.memory_space<vmem>>, vector<8x1024xf32>
    tpu.vector_store %arg6[%c184_192, %c0_193], %175 {strides = array<i32>} : memref<200x1024xf32, #tpu.memory_space<vmem>>, vector<8x1024xf32>,
    %c982_i32_194 = arith.constant 982 : i32
    %177 = tpu.dynamic_rotate %129 by %c982_i32_194 dim 1 : vector<8x1024xf32>, i32 -> vector<8x1024xf32>
    %c192_195 = arith.constant 192 : index
    %c0_196 = arith.constant 0 : index
    %178 = vector.load %arg6[%c192_195, %c0_196] : memref<200x1024xf32, #tpu.memory_space<vmem>>, vector<8x1024xf32>
    tpu.vector_store %arg6[%c192_195, %c0_196], %177 {strides = array<i32>} : memref<200x1024xf32, #tpu.memory_space<vmem>>, vector<8x1024xf32>,
    %c2 = arith.constant 2 : index
    %c0_197 = arith.constant 0 : index
    %c0_198 = arith.constant 0 : index
    %179 = vector.load %arg2[%c2, %c0_197, %c0_198] : memref<3x8x200xbf16, #tpu.memory_space<vmem>>, vector<1x8x200xbf16>
    %180 = vector.shape_cast %179 : vector<1x8x200xbf16> to vector<8x200xbf16>
    %c0_199 = arith.constant 0 : index
    %c0_200 = arith.constant 0 : index
    %181 = vector.load %arg6[%c0_199, %c0_200] : memref<200x1024xf32, #tpu.memory_space<vmem>>, vector<200x1024xf32>
    %182 = arith.truncf %181 : vector<200x1024xf32> to vector<200x1024xbf16>
    %cst_201 = arith.constant dense<0.000000e+00> : vector<8x1024xf32>
    %183 = tpu.matmul %180, %182, %cst_201 {dimension_numbers = #tpu.dot_dimension_numbers<[1], [0], [0], [1], [0, 0, 1, 1], [], []>} : vector<8x200xbf16>, vector<200x1024xbf16>, vector<8x1024xf32> -> vector<8x1024xf32>
    %c2_202 = arith.constant 2 : index
    %c0_203 = arith.constant 0 : index
    %c0_204 = arith.constant 0 : index
    %184 = vector.load %arg3[%c2_202, %c0_203, %c0_204] : memref<3x8x1xf32, #tpu.memory_space<vmem>>, vector<1x8x1xf32>
    %185 = vector.shape_cast %184 : vector<1x8x1xf32> to vector<8x1xf32>
    %186 = vector.broadcast %185 : vector<8x1xf32> to vector<8x1024xf32>
    %187 = arith.addf %183, %186 : vector<8x1024xf32>
    %c0_205 = arith.constant 0 : index
    %c0_206 = arith.constant 0 : index
    %c0_207 = arith.constant 0 : index
    %188 = vector.load %arg5[%c0_205, %c0_206, %c0_207] : memref<1x8x1024xf32, #tpu.memory_space<vmem>>, vector<1x8x1024xf32>
    %189 = vector.shape_cast %188 : vector<1x8x1024xf32> to vector<8x1024xf32>
    %190 = vector.shape_cast %187 : vector<8x1024xf32> to vector<1x8x1024xf32>
    tpu.vector_store %arg5[%c0_205, %c0_206, %c0_207], %190 {strides = array<i32>} : memref<1x8x1024xf32, #tpu.memory_space<vmem>>, vector<1x8x1024xf32>,
    return
  }
  func.func @transform_0(%arg0: i32) -> (i32, i32, i32) {
    %c0_i32 = arith.constant 0 : i32
    %c0_i32_0 = arith.constant 0 : i32
    %c0_i32_1 = arith.constant 0 : i32
    return %arg0, %c0_i32, %c0_i32_0 : i32, i32, i32
  }
  func.func @transform_1(%arg0: i32) -> (i32, i32, i32) {
    %c0_i32 = arith.constant 0 : i32
    %c0_i32_0 = arith.constant 0 : i32
    %c0_i32_1 = arith.constant 0 : i32
    %c0_i32_2 = arith.constant 0 : i32
    return %c0_i32, %c0_i32_0, %c0_i32_1 : i32, i32, i32
  }
  func.func @transform_2(%arg0: i32) -> (i32, i32, i32) {
    %c0_i32 = arith.constant 0 : i32
    %c0_i32_0 = arith.constant 0 : i32
    %c0_i32_1 = arith.constant 0 : i32
    %c0_i32_2 = arith.constant 0 : i32
    return %c0_i32, %c0_i32_0, %c0_i32_1 : i32, i32, i32
  }
  func.func @transform_3(%arg0: i32) -> (i32, i32) {
    %c0_i32 = arith.constant 0 : i32
    %c0_i32_0 = arith.constant 0 : i32
    %c0_i32_1 = arith.constant 0 : i32
    return %c0_i32, %c0_i32_0 : i32, i32
  }
  func.func @transform_4(%arg0: i32) -> (i32, i32, i32) {
    %c0_i32 = arith.constant 0 : i32
    %c0_i32_0 = arith.constant 0 : i32
    %c0_i32_1 = arith.constant 0 : i32
    return %arg0, %c0_i32, %c0_i32_0 : i32, i32, i32
  }
}

</mosaic_0001>

<bundles_post_ra>
// kernel: cnn_pallas_forward.1
= control target key start
LH: loop header
LB: loop body
LE: loop exit
PB: predicated region body
PF: predicated region fallthrough
CT: control target
= control target key end

     0   :  { %s5586_s6 = smov 41   ;;  %s5587_s7 = smov 40   ;;  %v76_v38 = vlaneseq  ;;  %s11331_s0 = inlined_call_operand.vmem [shape: f32[1,8,1024], index: 0, kind: input, shape index: {}]   ;;  %s11332_s3 = inlined_call_operand.vmem [shape: f32[1,1024], index: 3, kind: input, shape index: {}]   ;;  %s11333_s1 = inlined_call_operand.vmem [shape: bf16[3,8,200], index: 1, kind: input, shape index: {}]   ;;  %s11334_s2 = inlined_call_operand.vmem [shape: f32[3,8,1], index: 2, kind: input, shape index: {}]   ;;  %s11335_s4 = inlined_call_operand.vmem [shape: f32[1,8,1024], index: 4, kind: output, shape index: {}]  }
   0x1   :  { %v18_v0 = vld [vmem:[%s11332_s3] sm:$0xff]  ;;  %v41_v2 = vld [vmem:[%s11331_s0 + $0x28] sm:$0xff]  ;;  %v42_v13 = vld [vmem:[%s11331_s0 + $0x30] sm:$0xff]  ;;  %s5588_s8 = smov 39   ;;  %s5589_s9 = smov 38  }
   0x2   :  { %v40_v1 = vld [vmem:[%s11331_s0 + $0x20] sm:$0xff]  ;;  %v5644_v3 = vperm.slane %v18_v0, 4  ;;  %v5646_v4 = vperm.slane %v18_v0, 5  ;;  %v49_v6 = vmax.f32 %v41_v2, 0.0  ;;  %v37_v8 = vld [vmem:[%s11331_s0 + $0x8] sm:$0xff]  ;;  %v5654_v9 = vperm.slane %v18_v0, 0 }
   0x3   :  { %v48_v5 = vmax.f32 %v40_v1, 0.0  ;;  %v36_v7 = vld [vmem:[%s11331_s0] sm:$0xff]  ;;  %v5656_v10 = vperm.slane %v18_v0, 1  ;;  %v45_v12 = vmax.f32 %v37_v8, 0.0  ;;  %v43_v14 = vld [vmem:[%s11331_s0 + $0x38] sm:$0xff]  ;;  %v5670_v17 = vperm.slane %v18_v0, 6 }
   0x4   :  { %11845 = vst [vmem:[#allocation3_spill] sm:$0xff] %v5644_v3  ;;  %v44_v11 = vmax.f32 %v36_v7, 0.0  ;;  %v5668_v16 = vmul.f32 %v49_v6, %v5646_v4  ;;  %v5672_v18 = vperm.slane %v18_v0, 7  ;;  %v38_v19 = vld [vmem:[%s11331_s0 + $0x10] sm:$0xff]  ;;  %v39_v20 = vld [vmem:[%s11331_s0 + $0x18] sm:$0xff]  ;;  %v50_v23 = vmax.f32 %v42_v13, 0.0 }
   0x5   :  { %11846 = vst [vmem:[#allocation4_spill] sm:$0xff] %v5646_v4  ;;  %v5665_v15 = vmul.f32 %v48_v5, %v5644_v3  ;;  %v5684_v22 = vmul.f32 %v45_v12, %v5656_v10  ;;  %v51_v24 = vmax.f32 %v43_v14, 0.0  ;;  %v5690_v26 = vperm.slane %v18_v0, 2  ;;  %s5585_s0 = smov 42   ;;  %s5590_s10 = smov 22  }
   0x6   :  { %11847 = vst [vmem:[#allocation5_spill] sm:$0xff] %v5654_v9  ;;  %v5681_v21 = vmul.f32 %v44_v11, %v5654_v9  ;;  %v5692_v27 = vperm.slane %v18_v0, 3  ;;  %v46_v28 = vmax.f32 %v38_v19, 0.0  ;;  %v47_v30 = vmax.f32 %v39_v20, 0.0  ;;  %s5591_s11 = smov 21   ;;  %s5592_s12 = smov 20  }
   0x7   :  { %11848 = vst [vmem:[#allocation6_spill] sm:$0xff] %v5656_v10  ;;  %v5688_v25 = vpack.i.bf16 %v5668_v16, %v5665_v15  ;;  %v5701_v31 = vmul.f32 %v50_v23, %v5670_v17  ;;  %v5704_v32 = vmul.f32 %v51_v24, %v5672_v18  ;;  %s5593_s13 = smov 19   ;;  %s5594_s14 = smov 18   ;;  %v5798_v39 = vand.u32 127, %v76_v38 }
   0x8   :  { %11849 = vst [vmem:[#allocation7_spill] sm:$0xff] %v5665_v15  ;;  %v5696_v29 = vpack.i.bf16 %v5684_v22, %v5681_v21  ;;  %v5709_v33 = vmul.f32 %v46_v28, %v5690_v26  ;;  %v5712_v34 = vmul.f32 %v47_v30, %v5692_v27  ;;  %s5595_s15 = smov 2   ;;  %s5596_s16 = smov 1  }
   0x9   :  { %11850 = vst [vmem:[#allocation8_spill] sm:$0xff] %v5668_v16  ;;  %4184 = vrot.lane.b32.xlu1 %v5688_v25, %s5585_s0  ;;  %v5718_v35 = vpack.i.bf16 %v5704_v32, %v5701_v31  ;;  %vm11506_vm0 = vcmp.lt.s32.totalorder %v5798_v39, 41  ;;  %vm11507_vm1 = vcmp.lt.s32.totalorder %v5798_v39, 42  ;;  %s5597_s17 = smov 127   ;;  %s5598_s18 = smov 126   ;;  %vm11515_vm2 = vcmp.lt.s32.totalorder %v5798_v39, 40 }
   0xa   :  { %11851 = vst [vmem:[#allocation9_spill] sm:$0xff] %v5670_v17  ;;  %4174 = vrot.lane.b32.xlu0 %v5696_v29, %s5585_s0  ;;  %4194 = vrot.lane.b32.xlu2 %v5696_v29, %s5586_s6  ;;  %v5722_v36 = vpack.i.bf16 %v5712_v34, %v5709_v33  ;;  %s5599_s19 = smov 110   ;;  %vm11505_vm3 = vcmp.lt.s32.totalorder %v5798_v39, 39  ;;  %vm11530_vm4 = vcmp.lt.s32.totalorder %v5798_v39, 38  ;;  %s5600_s20 = smov 109   ;;  %vm243_vm5 = vcmp.lt.s32.totalorder %v5798_v39, 22 }
   0xb   :  { %11852 = vst [vmem:[#allocation10_spill] sm:$0xff] %v5672_v18  ;;  %s5601_s21 = smov 108   ;;  %s5602_s22 = smov 107   ;;  %vm11504_vm6 = vcmp.lt.s32.totalorder %v5798_v39, 21  ;;  %vm309_vm7 = vcmp.lt.s32.totalorder %v5798_v39, 20  ;;  %vm11534_vm8 = vcmp.lt.s32.totalorder %v5798_v39, 19 }
   0xc   :  { %11853 = vst [vmem:[#allocation11_spill] sm:$0xff] %v5690_v26  ;;  %s5603_s23 = smov 106   ;;  %s5604_s3 = smov 90   ;;  %vm11497_vm9 = vcmp.lt.s32.totalorder %v5798_v39, 18  ;;  %vm11533_vm10 = vcmp.lt.s32.totalorder %v5798_v39, 2  ;;  %vm11494_vm11 = vcmp.lt.s32.totalorder %v5798_v39, 126 }
   0xd   :  { %11854 = vst [vmem:[#allocation12_spill] sm:$0xff] %v5692_v27  ;;  %s5605_s24 = smov 89   ;;  %s5606_s25 = smov 88   ;;  %vm11493_vm12 = vcmp.lt.s32.totalorder %v5798_v39, 1  ;;  %vm11495_vm13 = vcmp.lt.s32.totalorder %v5798_v39, 127  ;;  %vm11496_vm14 = vcmp.lt.s32.totalorder %v5798_v39, 110 }
   0xe   :  { %11855 = vst [vmem:[#allocation13_spill] sm:$0xff] %v5701_v31  ;;  %s5607_s26 = smov 87   ;;  %s5608_s27 = smov 86   ;;  %vm581_vm15 = vcmp.lt.s32.totalorder %v5798_v39, 109 }
   0xf   :  { %11856 = vst [vmem:[#allocation14_spill] sm:$0xff] %v5709_v33 }
  0x11   :  { %4189 = vrot.lane.b32.xlu1 %v5718_v35, %s5585_s0 }
  0x12   :  { %4179 = vrot.lane.b32.xlu0 %v5722_v36, %s5585_s0  ;;  %4199 = vrot.lane.b32.xlu2 %v5722_v36, %s5586_s6 }
  0x19   :  { %4209 = vrot.lane.b32.xlu1 %v5718_v35, %s5586_s6 }
  0x1a   :  { %4204 = vrot.lane.b32.xlu0 %v5688_v25, %s5586_s6  ;;  %4214 = vrot.lane.b32.xlu2 %v5696_v29, %s5587_s7 }
  0x21   :  { %4224 = vrot.lane.b32.xlu1 %v5688_v25, %s5587_s7 }
  0x22   :  { %4219 = vrot.lane.b32.xlu0 %v5722_v36, %s5587_s7  ;;  %4229 = vrot.lane.b32.xlu2 %v5718_v35, %s5587_s7 }
  0x29   :  { %4239 = vrot.lane.b32.xlu1 %v5722_v36, %s5588_s8 }
  0x2a   :  { %4234 = vrot.lane.b32.xlu0 %v5696_v29, %s5588_s8  ;;  %4244 = vrot.lane.b32.xlu2 %v5688_v25, %s5588_s8 }
  0x31   :  { %4254 = vrot.lane.b32.xlu1 %v5696_v29, %s5589_s9 }
  0x32   :  { %4249 = vrot.lane.b32.xlu0 %v5718_v35, %s5588_s8  ;;  %4259 = vrot.lane.b32.xlu2 %v5722_v36, %s5589_s9 }
  0x39   :  { %4269 = vrot.lane.b32.xlu1 %v5718_v35, %s5589_s9 }
  0x3a   :  { %4264 = vrot.lane.b32.xlu0 %v5688_v25, %s5589_s9  ;;  %4274 = vrot.lane.b32.xlu2 %v5696_v29, %s5590_s10 }
  0x41   :  { %4284 = vrot.lane.b32.xlu1 %v5688_v25, %s5590_s10 }
  0x42   :  { %4279 = vrot.lane.b32.xlu0 %v5722_v36, %s5590_s10  ;;  %4289 = vrot.lane.b32.xlu2 %v5718_v35, %s5590_s10 }
  0x49   :  { %4299 = vrot.lane.b32.xlu1 %v5722_v36, %s5591_s11 }
  0x4a   :  { %4294 = vrot.lane.b32.xlu0 %v5696_v29, %s5591_s11  ;;  %4304 = vrot.lane.b32.xlu2 %v5688_v25, %s5591_s11 }
  0x51   :  { %4314 = vrot.lane.b32.xlu1 %v5696_v29, %s5592_s12 }
  0x52   :  { %4309 = vrot.lane.b32.xlu0 %v5718_v35, %s5591_s11  ;;  %4319 = vrot.lane.b32.xlu2 %v5722_v36, %s5592_s12 }
  0x59   :  { %4329 = vrot.lane.b32.xlu1 %v5718_v35, %s5592_s12 }
  0x5a   :  { %4324 = vrot.lane.b32.xlu0 %v5688_v25, %s5592_s12  ;;  %4334 = vrot.lane.b32.xlu2 %v5696_v29, %s5593_s13 }
  0x61   :  { %4344 = vrot.lane.b32.xlu1 %v5688_v25, %s5593_s13 }
  0x62   :  { %4339 = vrot.lane.b32.xlu0 %v5722_v36, %s5593_s13  ;;  %4349 = vrot.lane.b32.xlu2 %v5718_v35, %s5593_s13 }
  0x64   :  { %v5790_v37 = vpop.permute.xlu2 %4194 }
  0x65   :  { %v11353_v41 = vunpack.i.h.bf16 %v5790_v37 }
  0x69   :  { %4359 = vrot.lane.b32.xlu1 %v5722_v36, %s5594_s14 }
  0x6a   :  { %4354 = vrot.lane.b32.xlu0 %v5696_v29, %s5594_s14  ;;  %4364 = vrot.lane.b32.xlu2 %v5688_v25, %s5594_s14 }
  0x6c   :  { %v5800_v40 = vpop.permute.xlu2 %4199 }
  0x6d   :  { %v11342_v42 = vunpack.i.l.bf16 %v5800_v40  ;;  %v11344_v61 = vunpack.i.h.bf16 %v5800_v40 }
  0x6f   :  { %v5811_v43 = vsel %vm11506_vm0, %v11353_v41, %v11342_v42 }
  0x70   :  { %11857 = vst [vmem:[#allocation15_spill] sm:$0xff] %v5811_v43 }
  0x71   :  { %4374 = vrot.lane.b32.xlu1 %v5696_v29, %s5595_s15 }
  0x72   :  { %4369 = vrot.lane.b32.xlu0 %v5718_v35, %s5594_s14  ;;  %4379 = vrot.lane.b32.xlu2 %v5722_v36, %s5595_s15 }
  0x74   :  { %v5819_v44 = vpop.permute.xlu2 %4214 }
  0x75   :  { %v11359_v12 = vunpack.i.h.bf16 %v5819_v44 }
  0x79   :  { %4389 = vrot.lane.b32.xlu1 %v5718_v35, %s5595_s15 }
  0x7a   :  { %4384 = vrot.lane.b32.xlu0 %v5688_v25, %s5595_s15  ;;  %4394 = vrot.lane.b32.xlu2 %v5696_v29, %s5596_s16 }
  0x7b   :  { %v5825_v45 = vpop.permute.xlu1 %4184 }
  0x7c   :  { %11858 = vst [vmem:[#allocation16_spill] sm:$0xff] %v5825_v45  ;;  %v5829_v46 = vpop.permute.xlu0 %4174  ;;  %v5831_v47 = vpop.permute.xlu2 %4229  ;;  %v11339_v55 = vunpack.i.h.bf16 %v5825_v45  ;;  %v11338_v58 = vunpack.i.l.bf16 %v5825_v45 }
  0x7d   :  { %v11354_v50 = vunpack.i.h.bf16 %v5829_v46 }
  0x81   :  { %4404 = vrot.lane.b32.xlu1 %v5688_v25, %s5596_s16 }
  0x82   :  { %4399 = vrot.lane.b32.xlu0 %v5722_v36, %s5596_s16  ;;  %4409 = vrot.lane.b32.xlu2 %v5718_v35, %s5596_s16 }
  0x83   :  { %v5837_v48 = vpop.permute.xlu1 %4189 }
  0x84   :  { %v5841_v49 = vpop.permute.xlu0 %4179  ;;  %v5845_v52 = vpop.permute.xlu2 %4244  ;;  %v11341_v56 = vunpack.i.l.bf16 %v5837_v48 }
  0x85   :  { %v11346_v51 = vunpack.i.l.bf16 %v5841_v49  ;;  %11859 = vst [vmem:[#allocation17_spill] sm:$0xff] %v5845_v52  ;;  %v11347_v59 = vunpack.i.h.bf16 %v5841_v49  ;;  %v11343_v24 = vunpack.i.l.bf16 %v5845_v52  ;;  %v11357_v42 = vunpack.i.h.bf16 %v5845_v52 }
  0x86   :  { %v5892_v5 = vsel %vm11507_vm1, %v11339_v55, %v11341_v56 }
  0x87   :  { %v5854_v53 = vsel %vm11507_vm1, %v11354_v50, %v11346_v51  ;;  %11863 = vst [vmem:[#allocation21_spill] sm:$0xff] %v5892_v5  ;;  %v5900_v6 = vsel %vm11507_vm1, %v11347_v59, %v11338_v58 }
  0x88   :  { %11860 = vst [vmem:[#allocation18_spill] sm:$0xff] %v5854_v53 }
  0x89   :  { %4419 = vrot.lane.b32.xlu1 %v5722_v36, %s5597_s17  ;;  %11864 = vst [vmem:[#allocation22_spill] sm:$0xff] %v5900_v6 }
  0x8a   :  { %4414 = vrot.lane.b32.xlu0 %v5696_v29, %s5597_s17  ;;  %4424 = vrot.lane.b32.xlu2 %v5688_v25, %s5597_s17 }
  0x8b   :  { %v5864_v57 = vpop.permute.xlu1 %4209 }
  0x8c   :  { %v5870_v60 = vpop.permute.xlu0 %4204  ;;  %v11340_v62 = vunpack.i.l.bf16 %v5864_v57  ;;  %v5876_v1 = vpop.permute.xlu2 %4259 }
  0x8d   :  { %11861 = vst [vmem:[#allocation19_spill] sm:$0xff] %v5870_v60  ;;  %v11337_v63 = vunpack.i.h.bf16 %v5870_v60  ;;  %v11336_v0 = vunpack.i.l.bf16 %v5870_v60  ;;  %v11880_v27 = vunpack.i.h.bf16 %v5876_v1 }
  0x8f   :  { %v5884_v2 = vsel %vm11506_vm0, %v11344_v61, %v11336_v0  ;;  %v5912_v8 = vsel %vm11506_vm0, %v11337_v63, %v11340_v62 }
  0x90   :  { %11862 = vst [vmem:[#allocation20_spill] sm:$0xff] %v5884_v2 }
  0x91   :  { %4434 = vrot.lane.b32.xlu1 %v5696_v29, %s5598_s18  ;;  %11865 = vst [vmem:[#allocation23_spill] sm:$0xff] %v5912_v8 }
  0x92   :  { %4429 = vrot.lane.b32.xlu0 %v5718_v35, %s5597_s17  ;;  %4439 = vrot.lane.b32.xlu2 %v5722_v36, %s5598_s18 }
  0x93   :  { %v5919_v13 = vpop.permute.xlu1 %4224 }
  0x94   :  { %11866 = vst [vmem:[#allocation24_spill] sm:$0xff] %v5919_v13  ;;  %v5923_v14 = vpop.permute.xlu0 %4219  ;;  %v5927_v20 = vpop.permute.xlu2 %4274  ;;  %v11345_v30 = vunpack.i.l.bf16 %v5919_v13  ;;  %v11355_v56 = vunpack.i.h.bf16 %v5919_v13 }
  0x95   :  { %v11348_v19 = vunpack.i.l.bf16 %v5923_v14  ;;  %v11349_v38 = vunpack.i.h.bf16 %v5923_v14 }
  0x97   :  { %v5935_v23 = vsel %vm11515_vm2, %v11359_v12, %v11348_v19  ;;  %v5978_v62 = vsel %vm11515_vm2, %v11349_v38, %v11345_v30  ;;  %v11356_v30 = vunpack.i.l.bf16 %v5831_v47  ;;  %v11877_v12 = vunpack.i.h.bf16 %v5927_v20 }
  0x98   :  { %11867 = vst [vmem:[#allocation25_spill] sm:$0xff] %v5935_v23 }
  0x99   :  { %4449 = vrot.lane.b32.xlu1 %v5718_v35, %s5598_s18  ;;  %11870 = vst [vmem:[#allocation28_spill] sm:$0xff] %v5978_v62 }
  0x9a   :  { %4444 = vrot.lane.b32.xlu0 %v5688_v25, %s5598_s18  ;;  %4454 = vrot.lane.b32.xlu2 %v5696_v29, %s5599_s19 }
  0x9b   :  { %v5942_v28 = vpop.permute.xlu1 %4239 }
  0x9c   :  { %v11351_v11 = vunpack.i.h.bf16 %v5942_v28  ;;  %v11350_v7 = vunpack.i.l.bf16 %v5942_v28  ;;  %v5951_v0 = vpop.permute.xlu0 %4234  ;;  %v5954_v58 = vpop.permute.xlu2 %4289 }
  0x9d   :  { %v11360_v63 = vunpack.i.h.bf16 %v5951_v0 }
  0x9e   :  { %v5970_v54 = vsel %vm11505_vm3, %v11351_v11, %v11343_v24  ;;  %v11352_v24 = vunpack.i.l.bf16 %v5876_v1  ;;  %v6019_v11 = vsel %vm11515_vm2, %v11355_v56, %v11356_v30 }
  0x9f   :  { %v5962_v55 = vsel %vm11505_vm3, %v11360_v63, %v11350_v7  ;;  %11869 = vst [vmem:[#allocation27_spill] sm:$0xff] %v5970_v54 }
  0xa0   :  { %11868 = vst [vmem:[#allocation26_spill] sm:$0xff] %v5962_v55 }
  0xa1   :  { %4464 = vrot.lane.b32.xlu1 %v5688_v25, %s5599_s19  ;;  %11873 = vst [vmem:[#allocation31_spill] sm:$0xff] %v6019_v11 }
  0xa2   :  { %4459 = vrot.lane.b32.xlu0 %v5722_v36, %s5599_s19  ;;  %4469 = vrot.lane.b32.xlu2 %v5718_v35, %s5599_s19 }
  0xa3   :  { %v5989_v61 = vpop.permute.xlu1 %4254 }
  0xa4   :  { %v11361_v51 = vunpack.i.h.bf16 %v5989_v61  ;;  %v5995_v59 = vpop.permute.xlu0 %4249  ;;  %v6001_v38 = vpop.permute.xlu2 %4304 }
  0xa5   :  { %v11358_v19 = vunpack.i.l.bf16 %v5995_v59  ;;  %11871 = vst [vmem:[#allocation29_spill] sm:$0xff] %v6001_v38  ;;  %v11897_v6 = vunpack.i.l.bf16 %v6001_v38 }
  0xa6   :  { %v6009_v7 = vsel %vm11530_vm4, %v11361_v51, %v11352_v24 }
  0xa7   :  { %11872 = vst [vmem:[#allocation30_spill] sm:$0xff] %v6009_v7  ;;  %v6027_v24 = vsel %vm11505_vm3, %v11357_v42, %v11358_v19 }
  0xa8   :  { %11874 = vst [vmem:[#allocation32_spill] sm:$0xff] %v6027_v24 }
  0xa9   :  { %4479 = vrot.lane.b32.xlu1 %v5722_v36, %s5600_s20 }
  0xaa   :  { %4474 = vrot.lane.b32.xlu0 %v5696_v29, %s5600_s20  ;;  %4484 = vrot.lane.b32.xlu2 %v5688_v25, %s5600_s20 }
  0xab   :  { %v6033_v50 = vpop.permute.xlu1 %4269 }
  0xac   :  { %v6037_v56 = vpop.permute.xlu0 %4264  ;;  %v6039_v30 = vpop.permute.xlu2 %4319 }
  0xad   :  { %11875 = vst [vmem:[#allocation33_spill] sm:$0xff] %v6037_v56  ;;  %v11381_v51 = vunpack.i.l.bf16 %v6037_v56  ;;  %v11391_v5 = vunpack.i.l.bf16 %v6039_v30 }
  0xaf   :  { %v6088_v10 = vsel %vm11530_vm4, %v11880_v27, %v11381_v51 }
  0xb0   :  { %11881 = vst [vmem:[#allocation37_spill] sm:$0xff] %v6088_v10 }
  0xb1   :  { %4494 = vrot.lane.b32.xlu1 %v5696_v29, %s5601_s21 }
  0xb2   :  { %4489 = vrot.lane.b32.xlu0 %v5718_v35, %s5600_s20  ;;  %4499 = vrot.lane.b32.xlu2 %v5722_v36, %s5601_s21 }
  0xb3   :  { %v6047_v19 = vpop.permute.xlu1 %4284 }
  0xb4   :  { %11876 = vst [vmem:[#allocation34_spill] sm:$0xff] %v6047_v19  ;;  %v11376_v17 = vunpack.i.l.bf16 %v6047_v19  ;;  %v6056_v18 = vpop.permute.xlu0 %4279  ;;  %v6062_v26 = vpop.permute.xlu2 %4334  ;;  %v11886_v9 = vunpack.i.h.bf16 %v6047_v19 }
  0xb5   :  { %v11378_v4 = vunpack.i.h.bf16 %v6056_v18  ;;  %v11377_v3 = vunpack.i.l.bf16 %v6056_v18 }
  0xb7   :  { %v6070_v63 = vsel %vm243_vm5, %v11877_v12, %v11377_v3  ;;  %v6078_v41 = vsel %vm243_vm5, %v11378_v4, %v11376_v17  ;;  %v11882_v17 = vunpack.i.l.bf16 %v6033_v50  ;;  %v11883_v3 = vunpack.i.h.bf16 %v6037_v56 }
  0xb8   :  { %11878 = vst [vmem:[#allocation35_spill] sm:$0xff] %v6070_v63  ;;  %v11885_v4 = vunpack.i.l.bf16 %v5954_v58 }
  0xb9   :  { %11879 = vst [vmem:[#allocation36_spill] sm:$0xff] %v6078_v41  ;;  %4509 = vrot.lane.b32.xlu1 %v5718_v35, %s5601_s21  ;;  %v6100_v42 = vsel %vm11530_vm4, %v11883_v3, %v11882_v17 }
  0xba   :  { %11884 = vst [vmem:[#allocation38_spill] sm:$0xff] %v6100_v42  ;;  %v6108_v27 = vsel %vm243_vm5, %v11886_v9, %v11885_v4  ;;  %4504 = vrot.lane.b32.xlu0 %v5688_v25, %s5601_s21  ;;  %4514 = vrot.lane.b32.xlu2 %v5696_v29, %s5602_s22 }
  0xbb   :  { %11887 = vst [vmem:[#allocation39_spill] sm:$0xff] %v6108_v27  ;;  %v6114_v51 = vpop.permute.xlu1 %4299 }
  0xbc   :  { %v11386_v3 = vunpack.i.l.bf16 %v6114_v51  ;;  %v6119_v17 = vpop.permute.xlu0 %4294  ;;  %v6123_v9 = vpop.permute.xlu2 %4349  ;;  %v11898_v62 = vunpack.i.h.bf16 %v6114_v51 }
  0xbd   :  { %v11387_v4 = vunpack.i.h.bf16 %v6119_v17  ;;  %11888 = vst [vmem:[#allocation40_spill] sm:$0xff] %v6123_v9 }
  0xbe   :  { %v6192_v54 = vsel %vm11504_vm6, %v11898_v62, %v11897_v6 }
  0xbf   :  { %v6131_v12 = vsel %vm11504_vm6, %v11387_v4, %v11386_v3  ;;  %11899 = vst [vmem:[#allocation48_spill] sm:$0xff] %v6192_v54  ;;  %v11407_v54 = vunpack.i.h.bf16 %v6062_v26 }
  0xc0   :  { %11889 = vst [vmem:[#allocation41_spill] sm:$0xff] %v6131_v12 }
  0xc1   :  { %4524 = vrot.lane.b32.xlu1 %v5688_v25, %s5602_s22 }
  0xc2   :  { %4519 = vrot.lane.b32.xlu0 %v5722_v36, %s5602_s22  ;;  %4529 = vrot.lane.b32.xlu2 %v5718_v35, %s5602_s22 }
  0xc3   :  { %v6138_v8 = vpop.permute.xlu1 %4314 }
  0xc4   :  { %v11392_v11 = vunpack.i.h.bf16 %v6138_v8  ;;  %v6144_v24 = vpop.permute.xlu0 %4309  ;;  %v6146_v3 = vpop.permute.xlu2 %4364 }
  0xc5   :  { %11890 = vst [vmem:[#allocation42_spill] sm:$0xff] %v6144_v24  ;;  %v11900_v31 = vunpack.i.l.bf16 %v6144_v24  ;;  %v11921_v43 = vunpack.i.h.bf16 %v6146_v3 }
  0xc6   :  { %11891 = vst [vmem:[#allocation43_spill] sm:$0xff] %v6146_v3  ;;  %v6154_v4 = vsel %vm309_vm7, %v11392_v11, %v11391_v5  ;;  %v11895_v5 = vunpack.i.h.bf16 %v6039_v30 }
  0xc7   :  { %11892 = vst [vmem:[#allocation44_spill] sm:$0xff] %v6154_v4 }
  0xc9   :  { %4539 = vrot.lane.b32.xlu1 %v5722_v36, %s5603_s23 }
  0xca   :  { %4534 = vrot.lane.b32.xlu0 %v5696_v29, %s5603_s23  ;;  %4544 = vrot.lane.b32.xlu2 %v5688_v25, %s5603_s23 }
  0xcb   :  { %v6163_v42 = vpop.permute.xlu1 %4329 }
  0xcc   :  { %11893 = vst [vmem:[#allocation45_spill] sm:$0xff] %v6163_v42  ;;  %v6170_v27 = vpop.permute.xlu0 %4324  ;;  %v6176_v41 = vpop.permute.xlu2 %4379  ;;  %v11903_v60 = vunpack.i.l.bf16 %v6163_v42 }
  0xcd   :  { %11894 = vst [vmem:[#allocation46_spill] sm:$0xff] %v6170_v27  ;;  %v11399_v2 = vunpack.i.l.bf16 %v6170_v27  ;;  %v11904_v62 = vunpack.i.h.bf16 %v6170_v27 }
  0xcf   :  { %v6184_v11 = vsel %vm309_vm7, %v11895_v5, %v11399_v2  ;;  %v11901_v5 = vunpack.i.h.bf16 %v6001_v38  ;;  %v6212_v6 = vsel %vm309_vm7, %v11904_v62, %v11903_v60 }
  0xd0   :  { %11896 = vst [vmem:[#allocation47_spill] sm:$0xff] %v6184_v11 }
  0xd1   :  { %4554 = vrot.lane.b32.xlu1 %v5696_v29, %s5604_s3  ;;  %v6204_v2 = vsel %vm11504_vm6, %v11901_v5, %v11900_v31  ;;  %11905 = vst [vmem:[#allocation50_spill] sm:$0xff] %v6212_v6 }
  0xd2   :  { %11902 = vst [vmem:[#allocation49_spill] sm:$0xff] %v6204_v2  ;;  %4549 = vrot.lane.b32.xlu0 %v5718_v35, %s5603_s23  ;;  %4559 = vrot.lane.b32.xlu2 %v5722_v36, %s5604_s3 }
  0xd3   :  { %v6219_v11 = vpop.permute.xlu1 %4344 }
  0xd4   :  { %11906 = vst [vmem:[#allocation51_spill] sm:$0xff] %v6219_v11  ;;  %v6223_v31 = vpop.permute.xlu0 %4339  ;;  %v6227_v5 = vpop.permute.xlu2 %4394  ;;  %v11912_v56 = vunpack.i.l.bf16 %v6219_v11 }
  0xd5   :  { %v11406_v60 = vunpack.i.l.bf16 %v6223_v31  ;;  %v11913_v19 = vunpack.i.h.bf16 %v6223_v31 }
  0xd7   :  { %v6235_v62 = vsel %vm11534_vm8, %v11407_v54, %v11406_v60  ;;  %v11910_v60 = vunpack.i.l.bf16 %v6146_v3  ;;  %v6278_v38 = vsel %vm11534_vm8, %v11913_v19, %v11912_v56  ;;  %v11918_v56 = vunpack.i.l.bf16 %v6123_v9 }
  0xd8   :  { %11907 = vst [vmem:[#allocation52_spill] sm:$0xff] %v6235_v62 }
  0xd9   :  { %4569 = vrot.lane.b32.xlu1 %v5718_v35, %s5604_s3  ;;  %11914 = vst [vmem:[#allocation56_spill] sm:$0xff] %v6278_v38 }
  0xda   :  { %4564 = vrot.lane.b32.xlu0 %v5688_v25, %s5604_s3  ;;  %4574 = vrot.lane.b32.xlu2 %v5696_v29, %s5605_s24 }
  0xdb   :  { %v6242_v2 = vpop.permute.xlu1 %4359 }
  0xdc   :  { %v11423_v54 = vunpack.i.h.bf16 %v6242_v2  ;;  %v11421_v45 = vunpack.i.l.bf16 %v6242_v2  ;;  %v6251_v52 = vpop.permute.xlu0 %4354  ;;  %v6254_v13 = vpop.permute.xlu2 %4409 }
  0xdd   :  { %v11422_v10 = vunpack.i.h.bf16 %v6251_v52  ;;  %11908 = vst [vmem:[#allocation53_spill] sm:$0xff] %v6254_v13 }
  0xde   :  { %v6270_v6 = vsel %vm11497_vm9, %v11423_v54, %v11910_v60  ;;  %v11916_v54 = vunpack.i.l.bf16 %v6176_v41 }
  0xdf   :  { %v6262_v15 = vsel %vm11497_vm9, %v11422_v10, %v11421_v45  ;;  %11911 = vst [vmem:[#allocation55_spill] sm:$0xff] %v6270_v6  ;;  %v11919_v6 = vunpack.i.h.bf16 %v6219_v11 }
  0xe0   :  { %11909 = vst [vmem:[#allocation54_spill] sm:$0xff] %v6262_v15 }
  0xe1   :  { %4584 = vrot.lane.b32.xlu1 %v5688_v25, %s5605_s24  ;;  %v6317_v53 = vsel %vm11534_vm8, %v11919_v6, %v11918_v56 }
  0xe2   :  { %4579 = vrot.lane.b32.xlu0 %v5722_v36, %s5605_s24  ;;  %4589 = vrot.lane.b32.xlu2 %v5718_v35, %s5605_s24  ;;  %11920 = vst [vmem:[#allocation59_spill] sm:$0xff] %v6317_v53  ;;  %v11930_v53 = vunpack.i.h.bf16 %v6176_v41 }
  0xe3   :  { %v6292_v19 = vpop.permute.xlu1 %4374 }
  0xe4   :  { %v11431_v10 = vunpack.i.h.bf16 %v6292_v19  ;;  %v6298_v45 = vpop.permute.xlu0 %4369  ;;  %v6301_v38 = vpop.permute.xlu2 %4424 }
  0xe5   :  { %11915 = vst [vmem:[#allocation57_spill] sm:$0xff] %v6298_v45  ;;  %v11432_v60 = vunpack.i.l.bf16 %v6298_v45 }
  0xe6   :  { %v6309_v27 = vsel %vm11533_vm10, %v11431_v10, %v11916_v54 }
  0xe7   :  { %11917 = vst [vmem:[#allocation58_spill] sm:$0xff] %v6309_v27  ;;  %v6325_v16 = vsel %vm11497_vm9, %v11921_v43, %v11432_v60 }
  0xe8   :  { %11922 = vst [vmem:[#allocation60_spill] sm:$0xff] %v6325_v16 }
  0xe9   :  { %4599 = vrot.lane.b32.xlu1 %v5722_v36, %s5606_s25 }
  0xea   :  { %4594 = vrot.lane.b32.xlu0 %v5696_v29, %s5606_s25  ;;  %4604 = vrot.lane.b32.xlu2 %v5688_v25, %s5606_s25 }
  0xeb   :  { %v6333_v6 = vpop.permute.xlu1 %4389 }
  0xec   :  { %11923 = vst [vmem:[#allocation61_spill] sm:$0xff] %v6333_v6  ;;  %v6337_v56 = vpop.permute.xlu0 %4384  ;;  %v6339_v10 = vpop.permute.xlu2 %4439 }
  0xed   :  { %11924 = vst [vmem:[#allocation62_spill] sm:$0xff] %v6337_v56  ;;  %v11439_v43 = vunpack.i.h.bf16 %v6339_v10  ;;  %v11440_v54 = vunpack.i.l.bf16 %v6339_v10  ;;  %v11929_v23 = vunpack.i.l.bf16 %v6337_v56 }
  0xef   :  { %v6350_v60 = vsel %vm11494_vm11, %v11440_v54, %v11439_v43  ;;  %v11927_v43 = vunpack.i.h.bf16 %v6227_v5  ;;  %v6389_v16 = vsel %vm11533_vm10, %v11930_v53, %v11929_v23  ;;  %v11935_v53 = vunpack.i.l.bf16 %v6333_v6 }
  0xf0   :  { %11925 = vst [vmem:[#allocation63_spill] sm:$0xff] %v6350_v60  ;;  %v11936_v23 = vunpack.i.h.bf16 %v6337_v56 }
  0xf1   :  { %4614 = vrot.lane.b32.xlu1 %v5696_v29, %s5607_s26  ;;  %11931 = vst [vmem:[#allocation66_spill] sm:$0xff] %v6389_v16 }
  0xf2   :  { %4609 = vrot.lane.b32.xlu0 %v5718_v35, %s5606_s25  ;;  %4619 = vrot.lane.b32.xlu2 %v5722_v36, %s5607_s26  ;;  %v6411_v62 = vsel %vm11533_vm10, %v11936_v23, %v11935_v53 }
  0xf3   :  { %v6359_v11 = vpop.permute.xlu1 %4404  ;;  %11937 = vst [vmem:[#allocation68_spill] sm:$0xff] %v6411_v62 }
  0xf4   :  { %11926 = vst [vmem:[#allocation64_spill] sm:$0xff] %v6359_v11  ;;  %v6366_v55 = vpop.permute.xlu0 %4399  ;;  %v6373_v63 = vpop.permute.xlu2 %4454  ;;  %v11932_v3 = vunpack.i.l.bf16 %v6359_v11 }
  0xf5   :  { %v11447_v7 = vunpack.i.l.bf16 %v6366_v55  ;;  %v11933_v12 = vunpack.i.h.bf16 %v6366_v55 }
  0xf7   :  { %v6381_v54 = vsel %vm11493_vm12, %v11927_v43, %v11447_v7  ;;  %v6397_v4 = vsel %vm11493_vm12, %v11933_v12, %v11932_v3  ;;  %v11938_v12 = vunpack.i.l.bf16 %v6254_v13  ;;  %v11939_v3 = vunpack.i.h.bf16 %v6359_v11 }
  0xf8   :  { %11928 = vst [vmem:[#allocation65_spill] sm:$0xff] %v6381_v54  ;;  %v11459_v7 = vunpack.i.l.bf16 %v6373_v63 }
  0xf9   :  { %11934 = vst [vmem:[#allocation67_spill] sm:$0xff] %v6397_v4  ;;  %4629 = vrot.lane.b32.xlu1 %v5718_v35, %s5607_s26  ;;  %v6419_v43 = vsel %vm11493_vm12, %v11939_v3, %v11938_v12  ;;  %v11460_v3 = vunpack.i.h.bf16 %v6373_v63 }
  0xfa   :  { %11940 = vst [vmem:[#allocation69_spill] sm:$0xff] %v6419_v43  ;;  %4624 = vrot.lane.b32.xlu0 %v5688_v25, %s5607_s26  ;;  %4634 = vrot.lane.b32.xlu2 %v5696_v29, %s5608_s27 }
  0xfb   :  { %v6425_v16 = vpop.permute.xlu1 %4419  ;;  %v555_v43 = vsel %vm11496_vm14, %v11459_v7, %v11460_v3 }
  0xfc   :  { %v6429_v53 = vpop.permute.xlu0 %4414  ;;  %v11453_v23 = vunpack.i.h.bf16 %v6425_v16  ;;  %v11454_v4 = vunpack.i.l.bf16 %v6425_v16  ;;  %v6433_v12 = vpop.permute.xlu2 %4469 }
  0xfd   :  { %v11943_v27 = vunpack.i.h.bf16 %v6429_v53  ;;  %v11944_v54 = vunpack.i.l.bf16 %v6429_v53  ;;  %v11950_v33 = vunpack.i.l.bf16 %v6433_v12 }
  0xfe   :  { %v6444_v29 = vsel %vm11495_vm13, %v11454_v4, %v11453_v23 }
  0xff   :  { %11941 = vst [vmem:[#allocation70_spill] sm:$0xff] %v6444_v29  ;;  %v11948_v29 = vunpack.i.h.bf16 %v6333_v6  ;;  %v11476_v6 = vunpack.i.l.bf16 %v6138_v8 }
 0x101   :  { %4644 = vrot.lane.b32.xlu1 %v5688_v25, %s5608_s27 }
 0x102   :  { %4639 = vrot.lane.b32.xlu0 %v5722_v36, %s5608_s27  ;;  %4649 = vrot.lane.b32.xlu2 %v5718_v35, %s5608_s27  ;;  %v11467_v35 = vunpack.i.h.bf16 %v6254_v13 }
 0x103   :  { %v6451_v62 = vpop.permute.xlu1 %4434 }
 0x104   :  { %v4437_v25 = vunpack.i.h.bf16 %v6451_v62  ;;  %v11465_v36 = vunpack.i.l.bf16 %v6451_v62  ;;  %v6465_v56 = vpop.permute.xlu0 %4429  ;;  %v6467_v11 = vpop.permute.xlu2 %4484 }
 0x105   :  { %11942 = vst [vmem:[#allocation71_spill] sm:$0xff] %v6467_v11  ;;  %v489_v11 = vsel %vm11495_vm13, %v11944_v54, %v11943_v27  ;;  %v11473_v27 = vunpack.i.l.bf16 %v6251_v52 }
 0x106   :  { %v522_v7 = vsel %vm11494_vm11, %v11465_v36, %v4437_v25  ;;  %v11947_v36 = vunpack.i.l.bf16 %v6292_v19 }
 0x107   :  { %v1119_v23 = vpack.c.bf16 %v555_v43, %v522_v7  ;;  %v1111_v7 = vpack.c.bf16 %v489_v11, %v5681_v21  ;;  %v11945_v43 = vunpack.i.l.bf16 %v6227_v5  ;;  %v11949_v11 = vunpack.i.h.bf16 %v6433_v12 }
 0x108   :  { %v416_v21 = vsel %vm11533_vm10, %v11948_v29, %v11947_v36 }
 0x109   :  { %1208 = vmatpush.bf16.msra.mxu0 %v1119_v23  ;;  %v449_v15 = vsel %vm11493_vm12, %v11467_v35, %v11945_v43  ;;  %v6511_v43 = vsel %vm11496_vm14, %v11950_v33, %v11949_v11  ;;  %v11958_v33 = vunpack.i.h.bf16 %v6123_v9 }
 0x10a   :  { %11951 = vst [vmem:[#allocation73_spill] sm:$0xff] %v6511_v43  ;;  %v1103_v11 = vpack.c.bf16 %v449_v15, %v416_v21  ;;  %v11957_v21 = vunpack.i.l.bf16 %v6062_v26  ;;  %v11962_v15 = vunpack.i.h.bf16 %v6144_v24 }
 0x10b   :  { %v6485_v3 = vpop.permute.xlu1 %4449 }
 0x10c   :  { %v6497_v23 = vpop.permute.xlu0 %4444  ;;  %v6513_v35 = vpop.permute.xlu2 %4499  ;;  %v11953_v13 = vunpack.i.h.bf16 %v6485_v3  ;;  %v11954_v29 = vunpack.i.l.bf16 %v6485_v3 }
 0x10d   :  { %11946 = vst [vmem:[#allocation72_spill] sm:$0xff] %v6497_v23  ;;  %1209 = vmatpush.bf16.msra.mxu0 %v1111_v7  ;;  %v11956_v7 = vunpack.i.h.bf16 %v6298_v45  ;;  %v11966_v45 = vunpack.i.h.bf16 %v6373_v63 }
 0x10e   :  { %11952 = vst [vmem:[#allocation74_spill] sm:$0xff] %v6513_v35  ;;  %v6524_v36 = vsel %vm11494_vm11, %v11954_v29, %v11953_v13  ;;  %v11960_v13 = vunpack.i.h.bf16 %v6163_v42 }
 0x10f   :  { %11955 = vst [vmem:[#allocation75_spill] sm:$0xff] %v6524_v36  ;;  %v383_v54 = vsel %vm11497_vm9, %v11956_v7, %v11473_v27  ;;  %v350_v7 = vsel %vm11534_vm8, %v11958_v33, %v11957_v21  ;;  %v4446_v36 = vunpack.i.l.bf16 %v6497_v23 }
 0x110   :  { %v317_v29 = vsel %vm309_vm7, %v11960_v13, %v11476_v6  ;;  %v11961_v6 = vunpack.i.l.bf16 %v6119_v17 }
 0x111   :  { %1210 = vmatpush.bf16.msra.mxu0 %v1103_v11  ;;  %v1095_v11 = vpack.c.bf16 %v383_v54, %v350_v7 }
 0x112   :  { %v284_v42 = vsel %vm11504_vm6, %v11962_v15, %v11961_v6  ;;  %v11968_v15 = vunpack.i.h.bf16 %v6497_v23  ;;  %v11976_v23 = vunpack.i.l.bf16 %v6292_v19 }
 0x113   :  { %v6548_v35 = vpop.permute.xlu1 %4464  ;;  %v1087_v9 = vpack.c.bf16 %v317_v29, %v284_v42  ;;  %v11970_v29 = vunpack.i.l.bf16 %v5989_v61 }
 0x114   :  { %11959 = vst [vmem:[#allocation76_spill] sm:$0xff] %v6548_v35  ;;  %v11482_v33 = vunpack.i.h.bf16 %v6548_v35  ;;  %v4466_v21 = vunpack.i.l.bf16 %v6548_v35  ;;  %v4460_v4 = vpop.permute.xlu0 %4459  ;;  %v6560_v54 = vpop.permute.xlu2 %4514  ;;  %v11965_v35 = vunpack.i.l.bf16 %v6339_v10 }
 0x115   :  { %v4462_v27 = vunpack.i.h.bf16 %v4460_v4  ;;  %v4461_v43 = vunpack.i.l.bf16 %v4460_v4  ;;  %1211 = vmatpush.bf16.msra.mxu0 %v1095_v11  ;;  %v11963_v4 = vunpack.i.l.bf16 %v5927_v20  ;;  %v11964_v11 = vunpack.i.h.bf16 %v5954_v58 }
 0x116   :  { %v6567_v13 = vsel %vm11496_vm14, %v4466_v21, %v11482_v33  ;;  %v521_v33 = vsel %vm11494_vm11, %v4437_v25, %v11965_v35  ;;  %v11971_v25 = vunpack.i.h.bf16 %v6033_v50 }
 0x117   :  { %v251_v7 = vsel %vm243_vm5, %v11964_v11, %v11963_v4  ;;  %v554_v24 = vsel %vm11496_vm14, %v11966_v45, %v4461_v43  ;;  %v6591_v6 = vsel %vm11496_vm14, %v4461_v43, %v4462_v27  ;;  %v6597_v4 = vsel %vm11494_vm11, %v4446_v36, %v11968_v15 }
 0x118   :  { %11967 = vst [vmem:[#allocation77_spill] sm:$0xff] %v6591_v6  ;;  %v1120_v42 = vpack.c.bf16 %v554_v24, %v521_v33  ;;  %v218_v35 = vsel %vm11530_vm4, %v11971_v25, %v11970_v29  ;;  %v11972_v43 = vunpack.i.l.bf16 %v6425_v16  ;;  %v11973_v11 = vunpack.i.h.bf16 %v6429_v53 }
 0x119   :  { %11969 = vst [vmem:[#allocation78_spill] sm:$0xff] %v6597_v4  ;;  %1212 = vmatpush.bf16.msra.mxu0 %v1087_v9  ;;  %v11490_v33 = vunpack.i.l.bf16 %v5819_v44  ;;  %v4236_v29 = vunpack.i.l.bf16 %v5951_v0  ;;  %v1079_v9 = vpack.c.bf16 %v251_v7, %v218_v35  ;;  %v11975_v24 = vunpack.i.h.bf16 %v6292_v19 }
 0x11a   :  { %v488_v15 = vsel %vm11495_vm13, %v11973_v11, %v11972_v43  ;;  %1234 = vmatpush.bf16.msra.mxu2 %v1120_v42  ;;  %v11974_v43 = vunpack.i.h.bf16 %v5995_v59  ;;  %v11977_v7 = vunpack.i.h.bf16 %v6227_v5  ;;  %v11978_v35 = vunpack.i.l.bf16 %v6227_v5  ;;  %v6653_v5 = vld [vmem:[%s11333_s1] sm:$0xff] }
 0x11b   :  { %v6618_v25 = vpop.permute.xlu1 %4479  ;;  %v1112_v6 = vpack.c.bf16 %v488_v15, %v5684_v22  ;;  %v415_v42 = vsel %vm11533_vm10, %v11976_v23, %v11975_v24  ;;  %v11491_v45 = vunpack.i.l.bf16 %v5790_v37  ;;  %v11979_v19 = vunpack.i.h.bf16 %v5831_v47 }
 0x11c   :  { %v6621_v60 = vpop.permute.xlu0 %4474  ;;  %v185_v11 = vsel %vm11505_vm3, %v11974_v43, %v4236_v29  ;;  %v448_v22 = vsel %vm11493_vm12, %v11978_v35, %v11977_v7  ;;  %v6640_v15 = vpop.permute.xlu2 %4529  ;;  %v4176_v43 = vunpack.i.l.bf16 %v5829_v46  ;;  %v11985_v4 = vunpack.i.l.bf16 %v6062_v26 }
 0x11d   :  { %1213 = vmatpush.bf16.msra.mxu0 %v1079_v9  ;;  %v152_v23 = vsel %vm11515_vm2, %v11979_v19, %v11490_v33  ;;  %v1104_v7 = vpack.c.bf16 %v448_v22, %v415_v42  ;;  %v1174_v9 = vunpack.c.l.b16 %v6653_v5  ;;  %v552_v42 = vsel %vm11496_vm14, %v4462_v27, %v4466_v21 }
 0x11e   :  { %1235 = vmatpush.bf16.msra.mxu2 %v1112_v6  ;;  %v1071_v24 = vpack.c.bf16 %v185_v11, %v152_v23  ;;  %v11980_v6 = vunpack.i.h.bf16 %v5864_v57  ;;  %v11981_v11 = vunpack.i.h.bf16 %v6251_v52  ;;  %v11982_v23 = vunpack.i.l.bf16 %v6251_v52 }
 0x11f   :  { %v11983_v22 = vunpack.i.h.bf16 %v5837_v48 }
 0x120   :  { %v119_v35 = vsel %vm11506_vm0, %v11980_v6, %v11491_v45  ;;  %v382_v33 = vsel %vm11497_vm9, %v11982_v23, %v11981_v11  ;;  %v11986_v11 = vunpack.i.h.bf16 %v6339_v10  ;;  %v11990_v10 = vunpack.i.h.bf16 %v6425_v16 }
 0x121   :  { %1214 = vmatpush.bf16.msra.mxu0 %v1071_v24  ;;  %v86_v6 = vsel %vm11507_vm1, %v11983_v22, %v4176_v43  ;;  %v11984_v24 = vunpack.i.h.bf16 %v6062_v26  ;;  %v6690_v22 = vpack.c.b16 %v1174_v9, %v1174_v9  ;;  %v11992_v9 = vunpack.i.l.bf16 %v6119_v17 }
 0x122   :  { %1236 = vmatpush.bf16.msra.mxu2 %v1104_v7  ;;  %v1063_v19 = vpack.c.bf16 %v119_v35, %v86_v6  ;;  %v519_v27 = vsel %vm11494_vm11, %v11986_v11, %v4446_v36  ;;  %v11987_v35 = vunpack.i.h.bf16 %v6138_v8  ;;  %v11988_v6 = vunpack.i.l.bf16 %v6138_v8 }
 0x123   :  { %v6676_v45 = vpop.permute.xlu1 %4494  ;;  %v349_v52 = vsel %vm11534_vm8, %v11985_v4, %v11984_v24  ;;  %v1122_v23 = vpack.c.bf16 %v552_v42, %v519_v27  ;;  %v11989_v4 = vunpack.i.l.bf16 %v6301_v38  ;;  %v11994_v16 = vunpack.i.l.bf16 %v5989_v61 }
 0x124   :  { %v6688_v21 = vpop.permute.xlu0 %4489  ;;  %v1096_v7 = vpack.c.bf16 %v382_v33, %v349_v52  ;;  %v316_v26 = vsel %vm309_vm7, %v11988_v6, %v11987_v35  ;;  %v6704_v24 = vpop.permute.xlu2 %4544  ;;  %v11991_v33 = vunpack.i.h.bf16 %v6119_v17  ;;  %v11993_v52 = vunpack.i.h.bf16 %v5989_v61 }
 0x125   :  { %1215 = vmatpush.bf16.msra.mxu0 %v1063_v19  ;;  %v486_v36 = vsel %vm11495_vm13, %v11990_v10, %v11989_v4  ;;  %v11995_v27 = vunpack.i.h.bf16 %v5927_v20  ;;  %v11498_v61 = vunpack.i.h.bf16 %v6688_v21  ;;  %v12000_v4 = vunpack.i.l.bf16 %v6176_v41 }
 0x126   :  { %1237 = vmatpush.bf16.msra.mxu2 %v1096_v7  ;;  %v283_v8 = vsel %vm11504_vm6, %v11992_v9, %v11991_v33  ;;  %v1114_v42 = vpack.c.bf16 %v486_v36, %v5712_v34  ;;  %v217_v11 = vsel %vm11530_vm4, %v11994_v16, %v11993_v52  ;;  %v11996_v7 = vunpack.i.l.bf16 %v5927_v20 }
 0x127   :  { %v1088_v19 = vpack.c.bf16 %v316_v26, %v283_v8  ;;  %v11998_v34 = vunpack.i.l.bf16 %v6366_v55  ;;  %v11999_v20 = vunpack.i.h.bf16 %v6176_v41  ;;  %v4476_v36 = vunpack.i.l.bf16 %v6621_v60 }
 0x128   :  { %v250_v17 = vsel %vm243_vm5, %v11996_v7, %v11995_v27  ;;  %1216 = vmatmul.bf16.vlgmr.msra.gmra.mxu0 %v6690_v22  ;;  %v12002_v52 = vunpack.i.h.bf16 %v6242_v2  ;;  %v12003_v41 = vunpack.i.l.bf16 %v6242_v2  ;;  %v12005_v27 = vunpack.i.l.bf16 %v5819_v44 }
 0x129   :  { %1286 = vmatpush.bf16.msrb.mxu0 %v1122_v23  ;;  %v11997_v23 = vunpack.i.h.bf16 %v6366_v55  ;;  %v1080_v26 = vpack.c.bf16 %v250_v17, %v217_v11  ;;  %v413_v10 = vsel %vm11533_vm10, %v12000_v4, %v11999_v20  ;;  %v4496_v55 = vunpack.i.l.bf16 %v6676_v45 }
 0x12a   :  { %1238 = vmatpush.bf16.msra.mxu2 %v1088_v19  ;;  %v12001_v19 = vunpack.i.h.bf16 %v5951_v0  ;;  %v380_v16 = vsel %vm11497_vm9, %v12003_v41, %v12002_v52  ;;  %v6766_v0 = vsel %vm581_vm15, %v11498_v61, %v4476_v36  ;;  %v12006_v17 = vunpack.i.h.bf16 %v6223_v31 }
 0x12b   :  { %v446_v35 = vsel %vm11493_vm12, %v11998_v34, %v11997_v23  ;;  %v6733_v6 = vpop.permute.xlu1 %4509  ;;  %vm614_vm12 = vcmp.lt.s32.totalorder %v5798_v39, 108  ;;  %v12007_v23 = vunpack.i.l.bf16 %v6223_v31  ;;  %v12008_v4 = vunpack.i.h.bf16 %v5829_v46 }
 0x12c   :  { %v11499_v33 = vunpack.i.h.bf16 %v6733_v6  ;;  %v6744_v9 = vpop.permute.xlu0 %4504  ;;  %v1106_v8 = vpack.c.bf16 %v446_v35, %v413_v10  ;;  %v6756_v11 = vpop.permute.xlu2 %4559  ;;  %v12009_v10 = vunpack.i.h.bf16 %v5790_v37  ;;  %v12012_v52 = vunpack.i.l.bf16 %v6114_v51 }
 0x12d   :  { %1287 = vmatpush.bf16.msrb.mxu0 %v1114_v42  ;;  %v184_v42 = vsel %vm11505_vm3, %v4236_v29, %v12001_v19  ;;  %v12004_v29 = vunpack.i.h.bf16 %v5819_v44  ;;  %v347_v34 = vsel %vm11534_vm8, %v12007_v23, %v12006_v17  ;;  %v85_v44 = vsel %vm11507_vm1, %v4176_v43, %v12008_v4 }
 0x12e   :  { %1239 = vmatpush.bf16.msra.mxu2 %v1080_v26  ;;  %v6774_v2 = vsel %vm614_vm12, %v11499_v33, %v4496_v55  ;;  %v1098_v20 = vpack.c.bf16 %v380_v16, %v347_v34  ;;  %v12011_v19 = vunpack.i.h.bf16 %v6114_v51  ;;  %v12013_v41 = vunpack.i.h.bf16 %v6039_v30 }
 0x12f   :  { %v151_v7 = vsel %vm11515_vm2, %v12005_v27, %v12004_v29  ;;  %v12014_v46 = vunpack.i.l.bf16 %v6039_v30  ;;  %v12015_v51 = vunpack.i.h.bf16 %v6056_v18  ;;  %v12017_v30 = vunpack.i.h.bf16 %v5876_v1 }
 0x130   :  { %v1072_v26 = vpack.c.bf16 %v184_v42, %v151_v7  ;;  %v281_v42 = vsel %vm11504_vm6, %v12012_v52, %v12011_v19  ;;  %v12016_v7 = vunpack.i.l.bf16 %v6056_v18  ;;  %v12018_v34 = vunpack.i.l.bf16 %v5876_v1 }
 0x131   :  { %1288 = vmatpush.bf16.msrb.mxu0 %v1106_v8  ;;  %v12010_v8 = vunpack.i.l.bf16 %v5790_v37  ;;  %v314_v43 = vsel %vm309_vm7, %v12014_v46, %v12013_v41  ;;  %v12019_v4 = vunpack.i.h.bf16 %v5942_v28  ;;  %v12022_v1 = vunpack.i.l.bf16 %v5923_v14 }
 0x132   :  { %1240 = vmatpush.bf16.msra.mxu2 %v1072_v26  ;;  %v1090_v27 = vpack.c.bf16 %v314_v43, %v281_v42  ;;  %v248_v17 = vsel %vm243_vm5, %v12016_v7, %v12015_v51  ;;  %v215_v26 = vsel %vm11530_vm4, %v12018_v34, %v12017_v30  ;;  %v12024_v42 = vunpack.i.l.bf16 %v5841_v49 }
 0x133   :  { %v118_v31 = vsel %vm11506_vm0, %v12010_v8, %v12009_v10  ;;  %v6812_v37 = vpop.permute.xlu1 %4524  ;;  %v12021_v8 = vunpack.i.h.bf16 %v5923_v14  ;;  %v12025_v46 = vunpack.i.h.bf16 %v5800_v40  ;;  %v12026_v43 = vunpack.i.l.bf16 %v5800_v40 }
 0x134   :  { %v6814_v16 = vpop.permute.xlu0 %4519  ;;  %v1064_v29 = vpack.c.bf16 %v118_v31, %v85_v44  ;;  %v6822_v23 = vpop.permute.xlu2 %4574  ;;  %v12020_v44 = vunpack.i.l.bf16 %v5942_v28  ;;  %v12023_v28 = vunpack.i.h.bf16 %v5841_v49  ;;  %v12027_v51 = vunpack.i.l.bf16 %v6373_v63 }
 0x135   :  { %1289 = vmatpush.bf16.msrb.mxu0 %v1098_v20  ;;  %v1082_v20 = vpack.c.bf16 %v248_v17, %v215_v26  ;;  %v149_v31 = vsel %vm11515_vm2, %v12022_v1, %v12021_v8  ;;  %v116_v14 = vsel %vm11506_vm0, %v12026_v43, %v12025_v46  ;;  %v12028_v7 = vunpack.i.h.bf16 %v6433_v12  ;;  %v12035_v46 = vld [vmem:[#allocation53_spill] sm:$0xff] }
 0x136   :  { %1241 = vmatpush.bf16.msra.mxu2 %v1064_v29  ;;  %v182_v18 = vsel %vm11505_vm3, %v12020_v44, %v12019_v4  ;;  %v83_v41 = vsel %vm11507_vm1, %v12024_v42, %v12023_v28  ;;  %v12029_v17 = vunpack.i.l.bf16 %v6451_v62  ;;  %v12030_v30 = vunpack.i.h.bf16 %v6485_v3 }
 0x137   :  { %v1074_v52 = vpack.c.bf16 %v182_v18, %v149_v31  ;;  %v556_v49 = vsel %vm11496_vm14, %v12028_v7, %v12027_v51  ;;  %v1066_v34 = vpack.c.bf16 %v116_v14, %v83_v41  ;;  %v4516_v4 = vunpack.i.l.bf16 %v6560_v54 }
 0x138   :  { %v523_v40 = vsel %vm11494_vm11, %v12030_v30, %v12029_v17  ;;  %v11500_v62 = vunpack.i.h.bf16 %v6640_v15  ;;  %vm647_vm11 = vcmp.lt.s32.totalorder %v5798_v39, 107  ;;  %v12036_v43 = vunpack.i.h.bf16 %v12035_v46 }
 0x139   :  { %1290 = vmatpush.bf16.msrb.mxu0 %v1090_v27  ;;  %1242 = vmatmul.bf16.vlgmr.msra.gmra.mxu2 %v6690_v22  ;;  %v11508_v27 = vunpack.i.h.bf16 %v6465_v56  ;;  %v1126_v26 = vpack.c.bf16 %v556_v49, %v523_v40  ;;  %v12037_v14 = vunpack.i.l.bf16 %v12035_v46  ;;  %vm680_vm14 = vcmp.lt.s32.totalorder %v5798_v39, 106  ;;  %v12042_v46 = vld [vmem:[#allocation40_spill] sm:$0xff] }
 0x13a   :  { %v4576_v49 = vunpack.i.l.bf16 %v6822_v23 }
 0x13b   :  { %v6837_v10 = vpop.permute.xlu1 %4539 }
 0x13c   :  { %v6845_v19 = vpop.permute.xlu0 %4534  ;;  %v6859_v29 = vpop.permute.xlu2 %4589 }
 0x13d   :  { %1291 = vmatpush.bf16.msrb.mxu0 %v1082_v20  ;;  %v12031_v20 = vunpack.i.l.bf16 %v6429_v53  ;;  %v4536_v8 = vunpack.i.l.bf16 %v6845_v19  ;;  %v11502_v17 = vunpack.i.h.bf16 %v6859_v29 }
 0x13f   :  { %v490_v63 = vsel %vm11495_vm13, %v11508_v27, %v12031_v20  ;;  %vm12038_vm13 = vcmp.lt.s32.totalorder %v5798_v39, 1  ;;  %v11518_v27 = vunpack.i.h.bf16 %v6560_v54 }
 0x140   :  { %v1118_v1 = vpack.c.bf16 %v490_v63, %v5704_v32  ;;  %v442_v51 = vsel %vm12038_vm13, %v12037_v14, %v12036_v43  ;;  %v6912_v32 = vsel %vm647_vm11, %v11500_v62, %v4516_v4  ;;  %vm746_vm13 = vcmp.lt.s32.totalorder %v5798_v39, 89 }
 0x141   :  { %1292 = vmatpush.bf16.msrb.mxu0 %v1074_v52  ;;  %v12032_v52 = vld [vmem:[#allocation61_spill] sm:$0xff]  ;;  %v12044_v43 = vunpack.i.l.bf16 %v12042_v46 }
 0x142   :  { %v12033_v28 = vunpack.i.h.bf16 %v12032_v52  ;;  %v12034_v42 = vunpack.i.l.bf16 %v12032_v52 }
 0x143   :  { %v6882_v44 = vpop.permute.xlu1 %4554 }
 0x144   :  { %v6884_v18 = vpop.permute.xlu0 %4549  ;;  %v6890_v31 = vpop.permute.xlu2 %4604  ;;  %v409_v41 = vsel %vm11533_vm10, %v12034_v42, %v12033_v28 }
 0x145   :  { %1293 = vmatpush.bf16.msrb.mxu0 %v1066_v34  ;;  %v11501_v53 = vunpack.i.h.bf16 %v6884_v18  ;;  %v1110_v40 = vpack.c.bf16 %v442_v51, %v409_v41  ;;  %v4556_v34 = vunpack.i.l.bf16 %v6882_v44  ;;  %v12043_v41 = vunpack.i.h.bf16 %v12042_v46 }
 0x146   :  { %v6951_v51 = vsel %vm746_vm13, %v11502_v17, %v4576_v49  ;;  %v12054_v17 = vunpack.i.l.bf16 %v5954_v58 }
 0x147   :  { %v6920_v7 = vsel %vm680_vm14, %v11501_v53, %v4536_v8  ;;  %v343_v14 = vsel %vm11534_vm8, %v12044_v43, %v12043_v41 }
 0x148   :  { %1294 = vmatmul.bf16.vlgmr.msrb.gmra.mxu0 %v6690_v22 }
 0x149   :  { %1390 = vmatpush.bf16.msra.mxu0 %v1126_v26  ;;  %v12039_v26 = vld [vmem:[#allocation57_spill] sm:$0xff] }
 0x14a   :  { %v12040_v20 = vunpack.i.h.bf16 %v12039_v26  ;;  %v12041_v63 = vunpack.i.l.bf16 %v12039_v26 }
 0x14b   :  { %v6934_v52 = vpop.permute.xlu1 %4569 }
 0x14c   :  { %v11503_v28 = vunpack.i.h.bf16 %v6934_v52  ;;  %v6937_v42 = vpop.permute.xlu0 %4564  ;;  %v6953_v26 = vpop.permute.xlu2 %4619 }
 0x14d   :  { %1391 = vmatpush.bf16.msra.mxu0 %v1118_v1  ;;  %v376_v1 = vsel %vm11497_vm9, %v12041_v63, %v12040_v20  ;;  %vm713_vm9 = vcmp.lt.s32.totalorder %v5798_v39, 90  ;;  %v12045_v20 = vld [vmem:[#allocation45_spill] sm:$0xff] }
 0x14e   :  { %v12046_v63 = vunpack.i.h.bf16 %v12045_v20  ;;  %v12047_v46 = vunpack.i.l.bf16 %v12045_v20  ;;  %v6966_v43 = vsel %vm713_vm9, %v11503_v28, %v4556_v34 }
 0x150   :  { %v310_v41 = vsel %vm309_vm7, %v12047_v46, %v12046_v63  ;;  %v12051_v63 = vunpack.i.h.bf16 %v6033_v50  ;;  %v12052_v46 = vunpack.i.l.bf16 %v6033_v50  ;;  %v12055_v50 = vunpack.i.h.bf16 %v5995_v59 }
 0x151   :  { %1392 = vmatpush.bf16.msra.mxu0 %v1110_v40  ;;  %v1102_v40 = vpack.c.bf16 %v376_v1, %v343_v14  ;;  %v12048_v14 = vld [vmem:[#allocation42_spill] sm:$0xff] }
 0x152   :  { %v12049_v61 = vunpack.i.h.bf16 %v12048_v14  ;;  %v12050_v33 = vunpack.i.l.bf16 %v12048_v14  ;;  %v211_v53 = vsel %vm11530_vm4, %v12052_v46, %v12051_v63  ;;  %vm12103_vm4 = vcmp.lt.s32.totalorder %v5798_v39, 110 }
 0x153   :  { %v6988_v35 = vpop.permute.xlu1 %4584 }
 0x154   :  { %v277_v20 = vsel %vm11504_vm6, %v12050_v33, %v12049_v61  ;;  %v6990_v14 = vpop.permute.xlu0 %4579  ;;  %v6992_v33 = vpop.permute.xlu2 %4634  ;;  %vm845_vm6 = vcmp.lt.s32.totalorder %v5798_v39, 86 }
 0x155   :  { %1393 = vmatpush.bf16.msra.mxu0 %v1102_v40  ;;  %v1094_v62 = vpack.c.bf16 %v310_v41, %v277_v20  ;;  %v12053_v40 = vunpack.i.h.bf16 %v5954_v58  ;;  %v12056_v41 = vunpack.i.l.bf16 %v5995_v59  ;;  %v4637_v20 = vunpack.i.h.bf16 %v6992_v33 }
 0x157   :  { %v244_v28 = vsel %vm243_vm5, %v12054_v17, %v12053_v40  ;;  %v178_v58 = vsel %vm11505_vm3, %v12056_v41, %v12055_v50  ;;  %v11509_v17 = vunpack.i.l.bf16 %v6992_v33  ;;  %vm11634_vm3 = vcmask 1043456  }
 0x158   :  { %v1086_v61 = vpack.c.bf16 %v244_v28, %v211_v53  ;;  %v12058_v53 = vunpack.i.l.bf16 %v5831_v47  ;;  %v12059_v40 = vunpack.i.h.bf16 %v5837_v48  ;;  %v12061_v50 = vunpack.i.h.bf16 %v5864_v57 }
 0x159   :  { %1394 = vmatpush.bf16.msra.mxu0 %v1094_v62  ;;  %v12057_v62 = vunpack.i.h.bf16 %v5831_v47  ;;  %v852_v59 = vsel %vm845_vm6, %v11509_v17, %v4637_v20  ;;  %v12062_v41 = vunpack.i.l.bf16 %v5864_v57 }
 0x15a   :  { %v1159_v46 = vpack.c.bf16 %v852_v59, %v852_v59 }
 0x15b   :  { %v145_v28 = vsel %vm11515_vm2, %v12058_v53, %v12057_v62  ;;  %v112_v62 = vsel %vm11506_vm0, %v12062_v41, %v12061_v50  ;;  %v7027_v53 = vpop.permute.xlu1 %4599  ;;  %vm779_vm0 = vcmp.lt.s32.totalorder %v5798_v39, 88  ;;  %v11519_v50 = vunpack.i.h.bf16 %v6882_v44 }
 0x15c   :  { %v1078_v63 = vpack.c.bf16 %v178_v58, %v145_v28  ;;  %v1185_v58 = vsel %vm11634_vm3, %v1159_v46, 0  ;;  %v7030_v28 = vpop.permute.xlu0 %4594  ;;  %vm11633_vm2 = vcmask 588800  }
 0x15d   :  { %1395 = vmatpush.bf16.msra.mxu0 %v1086_v61  ;;  %v12060_v61 = vunpack.i.l.bf16 %v5837_v48  ;;  %1224 = vmatpush.bf16.msra.mxu1 %v1185_v58  ;;  %v11510_v48 = vunpack.i.h.bf16 %v7030_v28  ;;  %v720_v30 = vsel %vm713_vm9, %v4556_v34, %v11519_v50  ;;  %v12067_v50 = vld [vmem:[#allocation70_spill] sm:$0xff] }
 0x15f   :  { %v79_v47 = vsel %vm11507_vm1, %v12060_v61, %v12059_v40  ;;  %v4596_v40 = vunpack.i.l.bf16 %v7030_v28  ;;  %vm812_vm1 = vcmp.lt.s32.totalorder %v5798_v39, 87 }
 0x160   :  { %v1070_v59 = vpack.c.bf16 %v112_v62, %v79_v47 }
 0x161   :  { %1396 = vmatpush.bf16.msra.mxu0 %v1078_v63  ;;  %v11520_v63 = vunpack.i.h.bf16 %v6822_v23  ;;  %v786_v41 = vsel %vm779_vm0, %v4596_v40, %v11510_v48  ;;  %v11516_v48 = vunpack.i.h.bf16 %v6676_v45 }
 0x163   :  { %v7035_v57 = vpop.permute.xlu1 %4614  ;;  %v753_v1 = vsel %vm746_vm13, %v4576_v49, %v11520_v63 }
 0x164   :  { %v11511_v46 = vunpack.i.h.bf16 %v7035_v57  ;;  %v4616_v61 = vunpack.i.l.bf16 %v7035_v57  ;;  %v7042_v47 = vpop.permute.xlu0 %4609 }
 0x165   :  { %1397 = vmatpush.bf16.msra.mxu0 %v1070_v59  ;;  %v11512_v59 = vunpack.i.h.bf16 %v6845_v19  ;;  %v11513_v17 = vunpack.i.h.bf16 %v7042_v47 }
 0x166   :  { %v819_v62 = vsel %vm812_vm1, %v4616_v61, %v11511_v46 }
 0x167   :  { %v1151_v58 = vpack.c.bf16 %v819_v62, %v786_v41  ;;  %v1143_v62 = vpack.c.bf16 %v753_v1, %v720_v30  ;;  %v687_v49 = vsel %vm680_vm14, %v4536_v8, %v11512_v59  ;;  %v654_v30 = vsel %vm647_vm11, %v4516_v4, %v11518_v27  ;;  %v12066_v27 = vld [vmem:[#allocation14_spill] sm:$0xff] }
 0x168   :  { %1398 = vmatmul.bf16.vlgmr.msra.gmra.mxu0 %v6690_v22  ;;  %v7089_v1 = vsel %vm779_vm0, %v11513_v17, %v4596_v40  ;;  %v621_v4 = vsel %vm614_vm12, %v4496_v55, %v11516_v48  ;;  %v1175_v40 = vunpack.c.h.b16 %v6653_v5  ;;  %v11523_v48 = vunpack.i.l.bf16 %v6953_v26 }
 0x169   :  { %1225 = vmatpush.bf16.msra.mxu1 %v1151_v58  ;;  %v11517_v58 = vunpack.i.h.bf16 %v6621_v60 }
 0x16a   :  { %v7117_v59 = vpack.c.b16 %v1175_v40, %v1175_v40  ;;  %v1113_v40 = vpack.c.bf16 %v12067_v50, %v12066_v27  ;;  %v11525_v27 = vunpack.i.l.bf16 %v7027_v53 }
 0x16b   :  { %v7066_v41 = vpop.permute.xlu1 %4629 }
 0x16c   :  { %v11514_v46 = vunpack.i.h.bf16 %v7066_v41  ;;  %v7070_v34 = vpop.permute.xlu0 %4624 }
 0x16d   :  { %1226 = vmatpush.bf16.msra.mxu1 %v1143_v62  ;;  %v1135_v62 = vpack.c.bf16 %v687_v49, %v654_v30 }
 0x16e   :  { %v7095_v8 = vsel %vm812_vm1, %v11514_v46, %v4616_v61  ;;  %v588_v61 = vsel %vm581_vm15, %v4476_v36, %v11517_v58  ;;  %v11524_v36 = vunpack.i.l.bf16 %v7070_v34  ;;  %v12063_v58 = vld [vmem:[#allocation77_spill] sm:$0xff] }
 0x16f   :  { %v1127_v30 = vpack.c.bf16 %v621_v4, %v588_v61  ;;  %v12064_v4 = vld [vmem:[#allocation63_spill] sm:$0xff] }
 0x170   :  { %v12065_v61 = vpack.c.bf16 %v12063_v58, %v12064_v4 }
 0x171   :  { %1227 = vmatpush.bf16.msra.mxu1 %v1135_v62 }
 0x173   :  { %v7112_v49 = vpop.permute.xlu1 %4644 }
 0x174   :  { %v11522_v17 = vunpack.i.l.bf16 %v7112_v49  ;;  %v7115_v46 = vpop.permute.xlu0 %4639 }
 0x175   :  { %v11521_v5 = vunpack.i.l.bf16 %v7115_v46  ;;  %1228 = vmatpush.bf16.msra.mxu1 %v1127_v30  ;;  %v12068_v62 = vunpack.i.h.bf16 %v7115_v46 }
 0x177   :  { %v851_v30 = vsel %vm845_vm6, %v4637_v20, %v11521_v5  ;;  %v849_v58 = vsel %vm845_vm6, %v12068_v62, %v11522_v17  ;;  %v11527_v20 = vunpack.i.l.bf16 %v6990_v14  ;;  %v5609_v5 = vmov 0  }
 0x178   :  { %v1160_v50 = vpack.c.bf16 %v851_v30, %v851_v30  ;;  %v1162_v4 = vpack.c.bf16 %v849_v58, %v849_v58  ;;  %4120 = vmatmul.msk.bf16.vlgmr.msra.gmra.mxu1 %vm11633_vm2, %v7117_v59  ;;  %4653 = vset.pattern.permute.xlu0 %v5609_v5  ;;  %v12069_v30 = vunpack.i.h.bf16 %v7035_v57  ;;  %v12070_v17 = vunpack.i.h.bf16 %v6953_v26 }
 0x179   :  { %1260 = vmatpush.bf16.msrb.mxu1 %v12065_v61  ;;  %v11526_v61 = vunpack.i.l.bf16 %v6988_v35  ;;  %5134 = vset.pattern.permute.xlu2 %v5609_v5  ;;  %v12071_v57 = vunpack.i.h.bf16 %v7030_v28 }
 0x17a   :  { %v1188_v63 = vsel %vm11634_vm3, %v1160_v50, 0  ;;  %v1194_v62 = vsel %vm11634_vm3, %v1162_v4, 0  ;;  %v818_v58 = vsel %vm812_vm1, %v12069_v30, %v11523_v48  ;;  %v816_v55 = vsel %vm812_vm1, %v12070_v17, %v11524_v36  ;;  %v12075_v50 = vld [vmem:[#allocation58_spill] sm:$0xff] }
 0x17b   :  { %1250 = vmatpush.bf16.msra.mxu3 %v1188_v63  ;;  %1302 = vmatpush.bf16.msrb.mxu2 %v1194_v62  ;;  %v785_v4 = vsel %vm779_vm0, %v12071_v57, %v11525_v27  ;;  %v12072_v30 = vunpack.i.l.bf16 %v6890_v31  ;;  %v12073_v48 = vunpack.i.h.bf16 %v7027_v53  ;;  %v1167_v63 = vld [vmem:[%s11334_s2] sm:$0xff]  ;;  %v11528_v62 = vunpack.i.l.bf16 %v6704_v24  ;;  %v12074_v27 = vld [vmem:[#allocation65_spill] sm:$0xff] }
 0x17c   :  { %v1152_v36 = vpack.c.bf16 %v818_v58, %v785_v4  ;;  %1170 = vperm.xlu0 %4653, %v1167_v63   ;;  %v11529_v57 = vunpack.i.l.bf16 %v6837_v10  ;;  %v12081_v63 = vunpack.i.l.bf16 %v6937_v42  ;;  %v11531_v4 = vunpack.i.l.bf16 %v6744_v9 }
 0x17d   :  { %1261 = vmatpush.bf16.msrb.mxu1 %v1113_v40  ;;  %v783_v17 = vsel %vm779_vm0, %v12073_v48, %v12072_v30  ;;  %v12076_v40 = vpack.c.bf16 %v12074_v27, %v12075_v50  ;;  %v12077_v48 = vunpack.i.h.bf16 %v6822_v23  ;;  %v12079_v23 = vunpack.i.l.bf16 %v6756_v11 }
 0x17e   :  { %v1154_v5 = vpack.c.bf16 %v816_v55, %v783_v17  ;;  %v12078_v55 = vunpack.i.h.bf16 %v6990_v14  ;;  %v12080_v50 = vunpack.i.h.bf16 %v6882_v44  ;;  %v12085_v44 = vld [vmem:[#allocation52_spill] sm:$0xff] }
 0x17f   :  { %v752_v30 = vsel %vm746_vm13, %v12077_v48, %v11527_v20  ;;  %1251 = vmatpush.bf16.msra.mxu3 %v1152_v36  ;;  %v12082_v48 = vunpack.i.h.bf16 %v6756_v11  ;;  %v12083_v36 = vld [vmem:[#allocation74_spill] sm:$0xff] }
 0x180   :  { %v750_v58 = vsel %vm746_vm13, %v12078_v55, %v11526_v61  ;;  %1303 = vmatpush.bf16.msrb.mxu2 %v1154_v5  ;;  %v719_v17 = vsel %vm713_vm9, %v12080_v50, %v12079_v23  ;;  %v4502_v5 = vunpack.i.h.bf16 %v12083_v36  ;;  %v11532_v27 = vunpack.i.l.bf16 %v12083_v36 }
 0x181   :  { %1262 = vmatpush.bf16.msrb.mxu1 %v12076_v40  ;;  %v717_v55 = vsel %vm713_vm9, %v12082_v48, %v12081_v63  ;;  %v1144_v61 = vpack.c.bf16 %v752_v30, %v719_v17  ;;  %v12084_v40 = vld [vmem:[#allocation54_spill] sm:$0xff]  ;;  %v12087_v23 = vunpack.i.h.bf16 %v6845_v19  ;;  %v12088_v30 = vunpack.i.h.bf16 %v6837_v10  ;;  %v12089_v17 = vld [vmem:[#allocation71_spill] sm:$0xff]  ;;  %v12096_v63 = vld [vmem:[#allocation44_spill] sm:$0xff] }
 0x182   :  { %v1146_v20 = vpack.c.bf16 %v750_v58, %v717_v55  ;;  %v12086_v28 = vpack.c.bf16 %v12084_v40, %v12085_v44  ;;  %v12090_v19 = vunpack.i.l.bf16 %v6814_v16  ;;  %v12091_v40 = vunpack.i.h.bf16 %v6560_v54 }
 0x183   :  { %v686_v50 = vsel %vm680_vm14, %v12087_v23, %v11529_v57  ;;  %v684_v58 = vsel %vm680_vm14, %v12088_v30, %v11528_v62  ;;  %1252 = vmatpush.bf16.msra.mxu3 %v1144_v61  ;;  %v12092_v44 = vunpack.i.l.bf16 %v6812_v37  ;;  %v12093_v23 = vunpack.i.h.bf16 %v6814_v16 }
 0x184   :  { %1304 = vmatpush.bf16.msrb.mxu2 %v1146_v20  ;;  %v653_v55 = vsel %vm647_vm11, %v12091_v40, %v12090_v19  ;;  %v12094_v62 = vunpack.i.h.bf16 %v7115_v46  ;;  %v12095_v61 = vunpack.i.l.bf16 %v7115_v46  ;;  %v4647_v57 = vunpack.i.h.bf16 %v7112_v49  ;;  %v12097_v19 = vld [vmem:[#allocation41_spill] sm:$0xff] }
 0x185   :  { %1263 = vmatpush.bf16.msrb.mxu1 %v12086_v28  ;;  %v651_v30 = vsel %vm647_vm11, %v12093_v23, %v12092_v44  ;;  %v1136_v54 = vpack.c.bf16 %v686_v50, %v653_v55  ;;  %v12098_v40 = vpack.c.bf16 %v12096_v63, %v12097_v19  ;;  %v12099_v28 = vunpack.i.h.bf16 %v6676_v45  ;;  %v12101_v63 = vld [vmem:[#allocation76_spill] sm:$0xff] }
 0x186   :  { %v850_v20 = vsel %vm845_vm6, %v12095_v61, %v12094_v62  ;;  %v1138_v48 = vpack.c.bf16 %v684_v58, %v651_v30  ;;  %v618_v46 = vsel %vm614_vm12, %v4502_v5, %v11531_v4  ;;  %v4427_v62 = vunpack.i.h.bf16 %v6301_v38  ;;  %v12114_v4 = vld [vmem:[#allocation30_spill] sm:$0xff] }
 0x187   :  { %v620_v44 = vsel %vm614_vm12, %v12099_v28, %v11532_v27  ;;  %v4431_v50 = vunpack.i.l.bf16 %v6465_v56  ;;  %v12100_v58 = vunpack.i.l.bf16 %v6433_v12  ;;  %v12102_v55 = vunpack.i.h.bf16 %v12101_v63  ;;  %1253 = vmatpush.bf16.msra.mxu3 %v1136_v54 }
 0x188   :  { %1305 = vmatpush.bf16.msrb.mxu2 %v1138_v48  ;;  %v1161_v28 = vpack.c.bf16 %v850_v20, %v850_v20  ;;  %v12104_v23 = vunpack.i.l.bf16 %v6618_v25  ;;  %v12105_v30 = vunpack.i.h.bf16 %v6621_v60  ;;  %v12106_v19 = vunpack.i.l.bf16 %v12089_v17 }
 0x189   :  { %1264 = vmatpush.bf16.msrb.mxu1 %v12098_v40  ;;  %v550_v45 = vsel %vm12103_vm4, %v12102_v55, %v12100_v58  ;;  %v12107_v40 = vunpack.i.h.bf16 %v6618_v25  ;;  %v12108_v63 = vunpack.i.l.bf16 %v6485_v3  ;;  %v12109_v58 = vld [vmem:[#allocation72_spill] sm:$0xff]  ;;  %vm12111_vm4 = vcmp.lt.s32.totalorder %v5798_v39, 126 }
 0x18a   :  { %v587_v61 = vsel %vm581_vm15, %v12105_v30, %v12104_v23  ;;  %v12110_v54 = vunpack.i.h.bf16 %v12109_v58  ;;  %v12112_v60 = vunpack.i.l.bf16 %v7112_v49  ;;  %v12113_v30 = vld [vmem:[#allocation35_spill] sm:$0xff]  ;;  %v1191_v3 = vsel %vm11634_vm3, %v1161_v28, 0  ;;  %v12121_v28 = vld [vmem:[#allocation26_spill] sm:$0xff] }
 0x18b   :  { %v585_v12 = vsel %vm581_vm15, %v12107_v40, %v12106_v19  ;;  %v1128_v20 = vpack.c.bf16 %v620_v44, %v587_v61  ;;  %v12115_v27 = vpack.c.bf16 %v12113_v30, %v12114_v4  ;;  %v12116_v40 = vunpack.i.h.bf16 %v7027_v53  ;;  %v12230_v49 = vld [vmem:[#allocation39_spill] sm:$0xff] }
 0x18c   :  { %v517_v48 = vsel %vm12111_vm4, %v12110_v54, %v12108_v63  ;;  %v1130_v55 = vpack.c.bf16 %v618_v46, %v585_v12  ;;  %v848_v23 = vsel %vm845_vm6, %v12112_v60, %v4647_v57  ;;  %v12117_v44 = vunpack.i.l.bf16 %v7027_v53  ;;  %v12124_v54 = vld [vmem:[#allocation8_spill] sm:$0xff] }
 0x18d   :  { %1265 = vmatpush.bf16.msrb.mxu1 %v12115_v27  ;;  %v1124_v19 = vpack.c.bf16 %v550_v45, %v517_v48  ;;  %1254 = vmatpush.bf16.msra.mxu3 %v1128_v20  ;;  %v12118_v61 = vunpack.i.h.bf16 %v6953_v26  ;;  %v12119_v12 = vunpack.i.l.bf16 %v6953_v26  ;;  %vm12120_vm4 = vcmp.lt.s32.totalorder %v5798_v39, 127  ;;  %v12122_v26 = vld [vmem:[#allocation25_spill] sm:$0xff] }
 0x18e   :  { %1306 = vmatpush.bf16.msrb.mxu2 %v1130_v55  ;;  %v784_v46 = vsel %vm779_vm0, %v12117_v44, %v12116_v40  ;;  %v484_v27 = vsel %vm12120_vm4, %v4427_v62, %v4431_v50  ;;  %v1163_v53 = vpack.c.bf16 %v848_v23, %v848_v23  ;;  %v4627_v45 = vunpack.i.h.bf16 %v7070_v34  ;;  %v12127_v23 = vld [vmem:[#allocation64_spill] sm:$0xff] }
 0x18f   :  { %v817_v4 = vsel %vm812_vm1, %v12119_v12, %v12118_v61  ;;  %v12123_v63 = vpack.c.bf16 %v12121_v28, %v12122_v26  ;;  %v1116_v48 = vpack.c.bf16 %v484_v27, %v12124_v54  ;;  %v12125_v20 = vunpack.i.h.bf16 %v6990_v14  ;;  %v12133_v12 = vld [vmem:[#allocation62_spill] sm:$0xff] }
 0x190   :  { %4121 = vmatmul.msk.bf16.vlgmr.msra.gmra.mxu3 %vm11633_vm2, %v7117_v59  ;;  %v1153_v58 = vpack.c.bf16 %v817_v4, %v784_v46  ;;  %v12126_v55 = vunpack.i.l.bf16 %v6990_v14  ;;  %v12128_v30 = vunpack.i.h.bf16 %v12127_v23  ;;  %vm12130_vm4 = vcmp.lt.s32.totalorder %v5798_v39, 1 }
 0x191   :  { %1276 = vmatpush.bf16.msrb.mxu3 %v1191_v3  ;;  %1266 = vmatpush.bf16.msrb.mxu1 %v12123_v63  ;;  %v4607_v40 = vunpack.i.h.bf16 %v6890_v31  ;;  %v1197_v44 = vsel %vm11634_vm3, %v1163_v53, 0  ;;  %v12131_v14 = vunpack.i.h.bf16 %v6756_v11  ;;  %v12132_v46 = vunpack.i.l.bf16 %v6756_v11  ;;  %v12136_v63 = vld [vmem:[#allocation15_spill] sm:$0xff] }
 0x192   :  { %1338 = vmatpush.bf16.msra.mxu2 %v1124_v19  ;;  %v751_v60 = vsel %vm746_vm13, %v12126_v55, %v12125_v20  ;;  %v12129_v19 = vunpack.i.l.bf16 %v12127_v23  ;;  %v12134_v4 = vunpack.i.h.bf16 %v12133_v12  ;;  %v12135_v27 = vunpack.i.l.bf16 %v12133_v12 }
 0x193   :  { %4123 = vmatmul.msk.bf16.vlgmr.msrb.gmra.mxu2 %vm11633_vm2, %v7117_v59  ;;  %v718_v61 = vsel %vm713_vm9, %v12132_v46, %v12131_v14  ;;  %v4587_v26 = vunpack.i.h.bf16 %v6988_v35  ;;  %v12139_v11 = vunpack.i.l.bf16 %v7070_v34  ;;  %v12140_v55 = vunpack.i.h.bf16 %v6837_v10  ;;  %v12145_v46 = vld [vmem:[#allocation43_spill] sm:$0xff]  ;;  %v12237_v34 = vld [vmem:[#allocation32_spill] sm:$0xff] }
 0x194   :  { %v444_v3 = vsel %vm12130_vm4, %v12129_v19, %v12128_v30  ;;  %v411_v28 = vsel %vm11533_vm10, %v12135_v27, %v12134_v4  ;;  %v1145_v53 = vpack.c.bf16 %v751_v60, %v718_v61  ;;  %v12141_v23 = vunpack.i.l.bf16 %v6837_v10  ;;  %v12142_v19 = vld [vmem:[#allocation51_spill] sm:$0xff] }
 0x195   :  { %1277 = vmatpush.bf16.msrb.mxu3 %v1153_v58  ;;  %v12137_v58 = vld [vmem:[#allocation18_spill] sm:$0xff]  ;;  %v815_v20 = vsel %vm812_vm1, %v12139_v11, %v4627_v45  ;;  %v12143_v14 = vunpack.i.h.bf16 %v12142_v19  ;;  %v12144_v60 = vunpack.i.l.bf16 %v12142_v19  ;;  %v12146_v61 = vunpack.i.h.bf16 %v12145_v46 }
 0x196   :  { %1339 = vmatpush.bf16.msra.mxu2 %v1116_v48  ;;  %v12138_v54 = vpack.c.bf16 %v12136_v63, %v12137_v58  ;;  %v1108_v48 = vpack.c.bf16 %v444_v3, %v411_v28  ;;  %v685_v30 = vsel %vm680_vm14, %v12141_v23, %v12140_v55  ;;  %v12147_v12 = vunpack.i.l.bf16 %v12145_v46  ;;  %v12152_v11 = vld [vmem:[#allocation46_spill] sm:$0xff] }
 0x197   :  { %v345_v3 = vsel %vm11534_vm8, %v12144_v60, %v12143_v14  ;;  %vm12148_vm4 = vcmp.lt.s32.totalorder %v5798_v39, 18  ;;  %v4567_v4 = vunpack.i.h.bf16 %v6937_v42  ;;  %v12149_v10 = vunpack.i.l.bf16 %v6890_v31 }
 0x198   :  { %1267 = vmatpush.bf16.msrb.mxu1 %v12138_v54  ;;  %v12150_v28 = vunpack.i.h.bf16 %v6814_v16  ;;  %v12151_v63 = vunpack.i.l.bf16 %v6814_v16  ;;  %v4547_v23 = vunpack.i.h.bf16 %v6704_v24  ;;  %v12155_v16 = vunpack.i.l.bf16 %v6988_v35 }
 0x199   :  { %1278 = vmatpush.bf16.msrb.mxu3 %v1145_v53  ;;  %v782_v27 = vsel %vm779_vm0, %v12149_v10, %v4607_v40  ;;  %v12153_v53 = vunpack.i.h.bf16 %v12152_v11  ;;  %v12156_v60 = vunpack.i.h.bf16 %v6618_v25  ;;  %v12157_v46 = vunpack.i.l.bf16 %v6618_v25  ;;  %v12160_v10 = vld [vmem:[#allocation29_spill] sm:$0xff] }
 0x19a   :  { %1340 = vmatpush.bf16.msra.mxu2 %v1108_v48  ;;  %v652_v58 = vsel %vm647_vm11, %v12151_v63, %v12150_v28  ;;  %v1155_v54 = vpack.c.bf16 %v815_v20, %v782_v27  ;;  %v12154_v48 = vunpack.i.l.bf16 %v12152_v11  ;;  %v749_v20 = vsel %vm746_vm13, %v12155_v16, %v4587_v26 }
 0x19b   :  { %1268 = vmatmul.bf16.vlgmr.msrb.gmra.mxu1 %v6690_v22  ;;  %v1137_v19 = vpack.c.bf16 %v685_v30, %v652_v58  ;;  %v12158_v30 = vunpack.i.l.bf16 %v12083_v36  ;;  %v12161_v27 = vunpack.i.h.bf16 %v12160_v10  ;;  %v12162_v28 = vunpack.i.l.bf16 %v12160_v10 }
 0x19c   :  { %1328 = vmatpush.bf16.msra.mxu1 %v1197_v44  ;;  %v378_v44 = vsel %vm12148_vm4, %v12147_v12, %v12146_v61  ;;  %v312_v55 = vsel %vm309_vm7, %v12154_v48, %v12153_v53  ;;  %v586_v61 = vsel %vm581_vm15, %v12157_v46, %v12156_v60  ;;  %v4527_v12 = vunpack.i.h.bf16 %v6812_v37 }
 0x19d   :  { %v1100_v14 = vpack.c.bf16 %v378_v44, %v345_v3  ;;  %v619_v3 = vsel %vm614_vm12, %v12158_v30, %v4502_v5  ;;  %1279 = vmatpush.bf16.msrb.mxu3 %v1137_v19  ;;  %v12159_v44 = vunpack.i.l.bf16 %v6937_v42  ;;  %vm12163_vm4 = vcmp.lt.s32.totalorder %v5798_v39, 21 }
 0x19e   :  { %v279_v36 = vsel %vm12163_vm4, %v12162_v28, %v12161_v27  ;;  %v4507_v58 = vunpack.i.h.bf16 %v6744_v9  ;;  %v1129_v11 = vpack.c.bf16 %v619_v3, %v586_v61  ;;  %v12164_v53 = vunpack.i.l.bf16 %v6812_v37  ;;  %v12173_v27 = vld [vmem:[#allocation33_spill] sm:$0xff] }
 0x19f   :  { %1341 = vmatpush.bf16.msra.mxu2 %v1100_v14  ;;  %v716_v25 = vsel %vm713_vm9, %v12159_v44, %v4567_v4  ;;  %v1092_v5 = vpack.c.bf16 %v312_v55, %v279_v36  ;;  %v12165_v19 = vunpack.i.l.bf16 %v6704_v24  ;;  %v12166_v55 = vld [vmem:[#allocation34_spill] sm:$0xff]  ;;  %v4487_v46 = vunpack.i.h.bf16 %v12089_v17 }
 0x1a0   :  { %1329 = vmatpush.bf16.msra.mxu1 %v1155_v54  ;;  %v1147_v63 = vpack.c.bf16 %v749_v20, %v716_v25  ;;  %v7439_v54 = vpop.permute.xlu2 %4649  ;;  %v650_v48 = vsel %vm647_vm11, %v12164_v53, %v4527_v12  ;;  %v12167_v16 = vunpack.i.h.bf16 %v12166_v55  ;;  %v12168_v20 = vunpack.i.l.bf16 %v12166_v55  ;;  %v12171_v44 = vld [vmem:[#allocation78_spill] sm:$0xff]  ;;  %v12179_v53 = vld [vmem:[#allocation24_spill] sm:$0xff]  ;;  %v12183_v55 = vld [vmem:[#allocation17_spill] sm:$0xff] }
 0x1a1   :  { %v683_v14 = vsel %vm680_vm14, %v12165_v19, %v4547_v23  ;;  %1280 = vmatpush.bf16.msrb.mxu3 %v1129_v11  ;;  %v12169_v61 = vunpack.i.l.bf16 %v6301_v38  ;;  %vm12170_vm4 = vcmp.lt.s32.totalorder %v5798_v39, 127  ;;  %v4652_v3 = vunpack.i.h.bf16 %v7439_v54 }
 0x1a2   :  { %v246_v60 = vsel %vm243_vm5, %v12168_v20, %v12167_v16  ;;  %v12172_v25 = vpack.c.bf16 %v6567_v13, %v12171_v44  ;;  %v1139_v10 = vpack.c.bf16 %v683_v14, %v650_v48  ;;  %v12174_v28 = vunpack.i.h.bf16 %v12173_v27  ;;  %v12178_v13 = vld [vmem:[#allocation7_spill] sm:$0xff] }
 0x1a3   :  { %1342 = vmatpush.bf16.msra.mxu2 %v1092_v5  ;;  %v485_v30 = vsel %vm12170_vm4, %v12169_v61, %v4427_v62  ;;  %v12175_v36 = vunpack.i.l.bf16 %v12173_v27  ;;  %vm12176_vm10 = vcmp.lt.s32.totalorder %v5798_v39, 38  ;;  %v12177_v38 = vunpack.i.l.bf16 %v6744_v9 }
 0x1a4   :  { %1330 = vmatpush.bf16.msra.mxu1 %v1147_v63  ;;  %4122 = vmatmul.msk.bf16.vlgmr.msrb.gmra.mxu3 %vm11633_vm2, %v7117_v59  ;;  %v1115_v11 = vpack.c.bf16 %v485_v30, %v12178_v13  ;;  %v12180_v48 = vunpack.i.h.bf16 %v12179_v53  ;;  %v12181_v19 = vunpack.i.l.bf16 %v12179_v53  ;;  %v12184_v16 = vunpack.i.h.bf16 %v12183_v55 }
 0x1a5   :  { %1312 = vmatpush.bf16.msra.mxu3 %v12172_v25  ;;  %v213_v63 = vsel %vm12176_vm10, %v12175_v36, %v12174_v28  ;;  %v617_v62 = vsel %vm614_vm12, %v12177_v38, %v4507_v58  ;;  %vm12182_vm10 = vcmp.lt.s32.totalorder %v5798_v39, 40  ;;  %v12185_v20 = vunpack.i.l.bf16 %v12183_v55  ;;  %v12189_v28 = vld [vmem:[#allocation16_spill] sm:$0xff]  ;;  %v12193_v38 = vld [vmem:[#allocation19_spill] sm:$0xff] }
 0x1a6   :  { %v1084_v5 = vpack.c.bf16 %v246_v60, %v213_v63  ;;  %v147_v14 = vsel %vm12182_vm10, %v12181_v19, %v12180_v48  ;;  %vm12186_vm4 = vcmp.lt.s32.totalorder %v5798_v39, 39  ;;  %v12187_v61 = vunpack.i.l.bf16 %v12089_v17  ;;  %v12199_v48 = vld [vmem:[#allocation73_spill] sm:$0xff]  ;;  %v12200_v19 = vld [vmem:[#allocation75_spill] sm:$0xff] }
 0x1a7   :  { %v180_v60 = vsel %vm12186_vm4, %v12185_v20, %v12184_v16  ;;  %v12188_v25 = vunpack.i.l.bf16 %v6992_v33  ;;  %v12190_v36 = vunpack.i.h.bf16 %v12189_v28  ;;  %v12191_v63 = vunpack.i.l.bf16 %v12189_v28  ;;  %v12202_v16 = vld [vmem:[#allocation67_spill] sm:$0xff]  ;;  %v12203_v20 = vld [vmem:[#allocation66_spill] sm:$0xff]  ;;  %v12210_v28 = vld [vmem:[#allocation68_spill] sm:$0xff] }
 0x1a8   :  { %1331 = vmatpush.bf16.msra.mxu1 %v1139_v10  ;;  %1343 = vmatpush.bf16.msra.mxu2 %v1084_v5  ;;  %v584_v30 = vsel %vm581_vm15, %v12187_v61, %v4487_v46  ;;  %v1076_v27 = vpack.c.bf16 %v180_v60, %v147_v14  ;;  %vm12192_vm10 = vcmp.lt.s32.totalorder %v5798_v39, 42  ;;  %v12194_v13 = vunpack.i.h.bf16 %v12193_v38 }
 0x1a9   :  { %1313 = vmatpush.bf16.msra.mxu3 %v1115_v11  ;;  %v1131_v44 = vpack.c.bf16 %v617_v62, %v584_v30  ;;  %v853_v10 = vsel %vm845_vm6, %v4652_v3, %v12188_v25  ;;  %v81_v5 = vsel %vm12192_vm10, %v12191_v63, %v12190_v36  ;;  %v12195_v62 = vunpack.i.l.bf16 %v12193_v38  ;;  %v12205_v30 = vld [vmem:[#allocation13_spill] sm:$0xff]  ;;  %v12207_v25 = vld [vmem:[#allocation56_spill] sm:$0xff]  ;;  %v12212_v63 = vld [vmem:[#allocation47_spill] sm:$0xff] }
 0x1aa   :  { %vm12196_vm4 = vcmp.lt.s32.totalorder %v5798_v39, 41  ;;  %v12197_v11 = vunpack.i.h.bf16 %v6465_v56  ;;  %vm12198_vm8 = vcmp.lt.s32.totalorder %v5798_v39, 127  ;;  %v12201_v14 = vpack.c.bf16 %v12199_v48, %v12200_v19  ;;  %v12219_v48 = vld [vmem:[#allocation36_spill] sm:$0xff]  ;;  %v12220_v19 = vld [vmem:[#allocation37_spill] sm:$0xff] }
 0x1ab   :  { %v114_v33 = vsel %vm12196_vm4, %v12195_v62, %v12194_v13  ;;  %v1166_v55 = vpack.c.bf16 %v853_v10, %v853_v10  ;;  %v12204_v60 = vpack.c.bf16 %v12202_v16, %v12203_v20  ;;  %v12209_v10 = vld [vmem:[#allocation69_spill] sm:$0xff]  ;;  %v12215_v13 = vpack.c.bf16 %v7095_v8, %v7089_v1  ;;  %v12223_v8 = vld [vmem:[#allocation50_spill] sm:$0xff] }
 0x1ac   :  { %1332 = vmatpush.bf16.msra.mxu1 %v1131_v44  ;;  %v483_v53 = vsel %vm12198_vm8, %v4431_v50, %v12197_v11  ;;  %1344 = vmatpush.bf16.msra.mxu2 %v1076_v27  ;;  %v1068_v61 = vpack.c.bf16 %v114_v33, %v81_v5  ;;  %v12206_v50 = vld [vmem:[#allocation55_spill] sm:$0xff]  ;;  %v12211_v36 = vpack.c.bf16 %v12209_v10, %v12210_v28  ;;  %v12213_v5 = vld [vmem:[#allocation48_spill] sm:$0xff]  ;;  %v4651_v62 = vunpack.i.l.bf16 %v7439_v54  ;;  %v12224_v16 = vld [vmem:[#allocation49_spill] sm:$0xff] }
 0x1ad   :  { %1314 = vmatpush.bf16.msra.mxu3 %v12204_v60  ;;  %v1117_v44 = vpack.c.bf16 %v483_v53, %v12205_v30  ;;  %v1206_v56 = vsel %vm11634_vm3, %v1166_v55, 0  ;;  %v12208_v27 = vpack.c.bf16 %v12206_v50, %v12207_v25  ;;  %v12214_v38 = vpack.c.bf16 %v12212_v63, %v12213_v5  ;;  %v12216_v33 = vld [vmem:[#allocation60_spill] sm:$0xff]  ;;  %v12217_v11 = vld [vmem:[#allocation59_spill] sm:$0xff]  ;;  %v12231_v50 = vld [vmem:[#allocation38_spill] sm:$0xff] }
 0x1ae   :  { %v12218_v53 = vpack.c.bf16 %v12216_v33, %v12217_v11  ;;  %v12222_v55 = vpack.c.bf16 %v6951_v51, %v6966_v43  ;;  %v847_v1 = vsel %vm845_vm6, %v4647_v57, %v4651_v62  ;;  %v12225_v20 = vpack.c.bf16 %v12223_v8, %v12224_v16  ;;  %v12227_v30 = vld [vmem:[#allocation28_spill] sm:$0xff]  ;;  %v12234_v10 = vld [vmem:[#allocation22_spill] sm:$0xff] }
 0x1af   :  { %4124 = vmatmul.msk.bf16.vlgmr.msra.gmra.mxu1 %vm11633_vm2, %v7117_v59  ;;  %v4631_v60 = vunpack.i.l.bf16 %v7066_v41  ;;  %v1164_v51 = vpack.c.bf16 %v847_v1, %v847_v1  ;;  %v4611_v43 = vunpack.i.l.bf16 %v7042_v47  ;;  %v12232_v57 = vpack.c.bf16 %v12230_v49, %v12231_v50 }
 0x1b0   :  { %1364 = vmatpush.bf16.msrb.mxu1 %v12201_v14  ;;  %1345 = vmatpush.bf16.msra.mxu2 %v1068_v61  ;;  %v12221_v14 = vpack.c.bf16 %v12219_v48, %v12220_v19  ;;  %v12226_v61 = vld [vmem:[#allocation27_spill] sm:$0xff]  ;;  %v4591_v25 = vunpack.i.l.bf16 %v6859_v29  ;;  %v4571_v63 = vunpack.i.l.bf16 %v6934_v52  ;;  %v12241_v19 = vld [vmem:[#allocation21_spill] sm:$0xff]  ;;  %vm12268_vm8 = vcmp.lt.s32.totalorder %v5798_v39, 40 }
 0x1b1   :  { %1315 = vmatpush.bf16.msra.mxu3 %v12208_v27  ;;  %v12233_v27 = vld [vmem:[#allocation20_spill] sm:$0xff]  ;;  %v781_v5 = vsel %vm779_vm0, %v4607_v40, %v4611_v43  ;;  %v4531_v40 = vunpack.i.l.bf16 %v6640_v15  ;;  %v12240_v48 = vld [vmem:[#allocation23_spill] sm:$0xff]  ;;  %vm12270_vm10 = vcmp.lt.s32.totalorder %v5798_v39, 39  ;;  %vm12274_vm4 = vcmp.lt.s32.totalorder %v5798_v39, 42 }
 0x1b2   :  { %v12235_v28 = vpack.c.bf16 %v12233_v27, %v12234_v10  ;;  %v748_v31 = vsel %vm746_vm13, %v4587_v26, %v4591_v25  ;;  %v715_v33 = vsel %vm713_vm9, %v4567_v4, %v4571_v63  ;;  %v4491_v26 = vunpack.i.l.bf16 %v6688_v21 }
 0x1b3   :  { %1346 = vmatmul.bf16.vlgmr.msra.gmra.mxu2 %v6690_v22  ;;  %v1148_v11 = vpack.c.bf16 %v748_v31, %v715_v33  ;;  %v649_v42 = vsel %vm647_vm11, %v4527_v12, %v4531_v40  ;;  %v846_v4 = vsel %vm845_vm6, %v4651_v62, %v4652_v3 }
 0x1b4   :  { %1365 = vmatpush.bf16.msrb.mxu1 %v1117_v44  ;;  %1406 = vmatpush.bf16.msrb.mxu2 %v1206_v56  ;;  %v12228_v44 = vpack.c.bf16 %v12226_v61, %v12227_v30  ;;  %v12229_v56 = vpack.c.bf16 %v6920_v7, %v6912_v32  ;;  %v1200_v32 = vsel %vm11634_vm3, %v1164_v51, 0  ;;  %v814_v7 = vsel %vm812_vm1, %v4627_v45, %v4631_v60  ;;  %v1217_v45 = vpop.f32.mrf.mxu0 }
 0x1b5   :  { %1316 = vmatpush.bf16.msra.mxu3 %v12214_v38  ;;  %v12238_v38 = vld [vmem:[#allocation31_spill] sm:$0xff]  ;;  %v583_v37 = vsel %vm581_vm15, %v4487_v46, %v4491_v26  ;;  %v12245_v46 = vunpack.i.h.bf16 %v6934_v52 }
 0x1b7   :  { %v714_v62 = vsel %vm713_vm9, %v4571_v63, %v12245_v46 }
 0x1b8   :  { %1366 = vmatpush.bf16.msrb.mxu1 %v12211_v36  ;;  %1407 = vmatpush.bf16.msrb.mxu2 %v12215_v13  ;;  %v12236_v36 = vpack.c.bf16 %v6774_v2, %v6766_v0  ;;  %v1156_v0 = vpack.c.bf16 %v814_v7, %v781_v5  ;;  %v4551_v2 = vunpack.i.l.bf16 %v6884_v18  ;;  %v12239_v13 = vpack.c.bf16 %v12237_v34, %v12238_v38  ;;  %v12252_v34 = vld [vmem:[#allocation6_spill] sm:$0xff] }
 0x1b9   :  { %1317 = vmatpush.bf16.msra.mxu3 %v12221_v14  ;;  %v12242_v14 = vpack.c.bf16 %v12240_v48, %v12241_v19 }
 0x1ba   :  { %v682_v35 = vsel %vm680_vm14, %v4547_v23, %v4551_v2  ;;  %v1165_v23 = vpack.c.bf16 %v846_v4, %v846_v4 }
 0x1bc   :  { %1367 = vmatpush.bf16.msrb.mxu1 %v12218_v53  ;;  %1408 = vmatpush.bf16.msrb.mxu2 %v12222_v55  ;;  %v4511_v53 = vunpack.i.l.bf16 %v6733_v6  ;;  %v1140_v55 = vpack.c.bf16 %v682_v35, %v649_v42  ;;  %v1219_v1 = vpop.f32.mrf.mxu0  ;;  %v1203_v54 = vsel %vm11634_vm3, %v1165_v23, 0  ;;  %v12253_v42 = vld [vmem:[#allocation12_spill] sm:$0xff] }
 0x1bd   :  { %1318 = vmatpush.bf16.msra.mxu3 %v12228_v44  ;;  %v1243_v44 = vpop.f32.mrf.mxu2 }
 0x1be   :  { %v616_v24 = vsel %vm614_vm12, %v4507_v58, %v4511_v53  ;;  %v12244_v58 = vunpack.i.h.bf16 %v7042_v47  ;;  %v12247_v47 = vunpack.i.h.bf16 %v6884_v18  ;;  %v12250_v18 = vunpack.i.h.bf16 %v6688_v21 }
 0x1bf   :  { %v1132_v12 = vpack.c.bf16 %v616_v24, %v583_v37 }
 0x1c0   :  { %1368 = vmatpush.bf16.msrb.mxu1 %v12225_v20  ;;  %1409 = vmatpush.bf16.msrb.mxu2 %v12229_v56  ;;  %v780_v3 = vsel %vm779_vm0, %v4611_v43, %v12244_v58  ;;  %v681_v20 = vsel %vm680_vm14, %v4551_v2, %v12247_v47  ;;  %v582_v51 = vsel %vm581_vm15, %v4491_v26, %v12250_v18 }
 0x1c1   :  { %1319 = vmatpush.bf16.msra.mxu3 %v12235_v28 }
 0x1c4   :  { %1369 = vmatpush.bf16.msrb.mxu1 %v12232_v57  ;;  %1410 = vmatpush.bf16.msrb.mxu2 %v12236_v36 }
 0x1c5   :  { %1354 = vmatpush.bf16.msrb.mxu3 %v1200_v32  ;;  %v1295_v30 = vpop.f32.mrf.mxu0  ;;  %v1245_v49 = vpop.f32.mrf.mxu2 }
 0x1c6   :  { %1320 = vmatmul.bf16.vlgmr.msra.gmra.mxu3 %v6690_v22 }
 0x1c7   :  { %4127 = vmatmul.msk.bf16.vlgmr.msrb.gmra.mxu2 %vm11633_vm2, %v7117_v59 }
 0x1c8   :  { %1370 = vmatpush.bf16.msrb.mxu1 %v12239_v13 }
 0x1c9   :  { %1355 = vmatpush.bf16.msrb.mxu3 %v1156_v0  ;;  %v12251_v0 = vld [vmem:[#allocation5_spill] sm:$0xff] }
 0x1cc   :  { %1371 = vmatpush.bf16.msrb.mxu1 %v12242_v14 }
 0x1cd   :  { %1356 = vmatpush.bf16.msrb.mxu3 %v1148_v11 }
 0x1cf   :  { %1372 = vmatmul.bf16.vlgmr.msrb.gmra.mxu1 %v6690_v22  ;;  %v12243_v22 = vunpack.i.h.bf16 %v7066_v41  ;;  %v12246_v41 = vunpack.i.h.bf16 %v6859_v29  ;;  %v12249_v29 = vunpack.i.h.bf16 %v6733_v6 }
 0x1d1   :  { %1357 = vmatpush.bf16.msrb.mxu3 %v1140_v55  ;;  %v813_v9 = vsel %vm812_vm1, %v4631_v60, %v12243_v22  ;;  %v747_v8 = vsel %vm746_vm13, %v4591_v25, %v12246_v41  ;;  %v12248_v60 = vunpack.i.h.bf16 %v6640_v15  ;;  %v615_v56 = vsel %vm614_vm12, %v4511_v53, %v12249_v29  ;;  %v1297_v15 = vpop.f32.mrf.mxu0  ;;  %v12255_v55 = vld [vmem:[#allocation11_spill] sm:$0xff] }
 0x1d2   :  { %v1157_v17 = vpack.c.bf16 %v813_v9, %v780_v3  ;;  %v1149_v16 = vpack.c.bf16 %v747_v8, %v714_v62  ;;  %v1133_v43 = vpack.c.bf16 %v615_v56, %v582_v51 }
 0x1d3   :  { %v648_v52 = vsel %vm647_vm11, %v4531_v40, %v12248_v60 }
 0x1d4   :  { %v1141_v61 = vpack.c.bf16 %v681_v20, %v648_v52  ;;  %v12257_v52 = vld [vmem:[#allocation3_spill] sm:$0xff] }
 0x1d5   :  { %1358 = vmatpush.bf16.msrb.mxu3 %v1132_v12 }
 0x1d8   :  { %4125 = vmatmul.msk.bf16.vlgmr.msrb.gmra.mxu3 %vm11633_vm2, %v7117_v59 }
 0x1d9   :  { %1380 = vmatpush.bf16.msra.mxu3 %v1203_v54 }
 0x1dd   :  { %1381 = vmatpush.bf16.msra.mxu3 %v1157_v17 }
 0x1e1   :  { %1382 = vmatpush.bf16.msra.mxu3 %v1149_v16 }
 0x1e5   :  { %1383 = vmatpush.bf16.msra.mxu3 %v1141_v61  ;;  %v7674_v57 = vpop.f32.mrf.mxu0 }
 0x1e9   :  { %1384 = vmatpush.bf16.msra.mxu3 %v1133_v43 }
 0x1ec   :  { %4126 = vmatmul.msk.bf16.vlgmr.msra.gmra.mxu3 %vm11633_vm2, %v7117_v59 }
 0x1ed   :  { %v1401_v25 = vpop.f32.mrf.mxu0 }
 0x1ee   :  { %v7676_v27 = vpop.permute.xlu0 %1170  ;;  %v12260_v25 = vld [vmem:[#allocation10_spill] sm:$0xff] }
 0x1ef   :  { %v1218_v10 = vadd.f32 %v1217_v45, %v7676_v27  ;;  %v1244_v28 = vadd.f32 %v1243_v44, %v7676_v27  ;;  %v1296_v33 = vadd.f32 %v1295_v30, %v7676_v27  ;;  %v12258_v30 = vld [vmem:[#allocation4_spill] sm:$0xff]  ;;  %v1400_v18 = vadd.f32 %v7674_v57, %v7676_v27  ;;  %v12262_v57 = vld [vmem:[#allocation9_spill] sm:$0xff] }
 0x1f5   :  { %v1230_v50 = vpop.f32.mrf.mxu1 }
 0x1f6   :  { %v1231_v21 = vadd.f32 %v1230_v50, %v1218_v10 }
 0x1f8   :  { %v1416_v36 = vmax.f32 %v1231_v21, 0.0 }
 0x1fa   :  { %v7681_v2 = vmul.f32 %v1416_v36, %v12251_v0 }
 0x1fd   :  { %v1232_v6 = vpop.f32.mrf.mxu1 }
 0x213   :  { %v1256_v32 = vpop.f32.mrf.mxu3 }
 0x214   :  { %v1257_v7 = vadd.f32 %v1256_v32, %v1244_v28 }
 0x216   :  { %v1308_v5 = vpop.f32.mrf.mxu2  ;;  %v1417_v59 = vmax.f32 %v1257_v7, 0.0 }
 0x217   :  { %v1309_v11 = vadd.f32 %v1308_v5, %v1296_v33 }
 0x218   :  { %v1269_v63 = vpop.f32.mrf.mxu1  ;;  %v7684_v38 = vmul.f32 %v1417_v59, %v12252_v34 }
 0x219   :  { %v1270_v53 = vadd.f32 %v1269_v63, %v7676_v27  ;;  %v1419_v19 = vmax.f32 %v1309_v11, 0.0 }
 0x21a   :  { %v7688_v13 = vpack.i.bf16 %v7684_v38, %v7681_v2 }
 0x21b   :  { %v1258_v31 = vpop.f32.mrf.mxu3  ;;  %v7705_v4 = vmul.f32 %v1419_v19, %v12253_v42 }
 0x21c   :  { %4670 = vrot.lane.b32.xlu2 %v7688_v13, %s5588_s8  ;;  %4660 = vrot.lane.b32.xlu0 %v7688_v13, %s5586_s6 }
 0x21d   :  { %4655 = vrot.lane.b32.xlu1 %v7688_v13, %s5585_s0  ;;  %12254 = vst [vmem:[#allocation61_spill] sm:$0xff] %v7705_v4 }
 0x21e   :  { %v1310_v45 = vpop.f32.mrf.mxu2 }
 0x220   :  { %v1271_v40 = vpop.f32.mrf.mxu1 }
 0x224   :  { %4685 = vrot.lane.b32.xlu2 %v7688_v13, %s5591_s11  ;;  %4675 = vrot.lane.b32.xlu0 %v7688_v13, %s5589_s9 }
 0x225   :  { %4665 = vrot.lane.b32.xlu1 %v7688_v13, %s5587_s7 }
 0x227   :  { %v1282_v48 = vpop.f32.mrf.mxu3 }
 0x228   :  { %v1283_v14 = vadd.f32 %v1282_v48, %v1270_v53 }
 0x22a   :  { %v1418_v26 = vmax.f32 %v1283_v14, 0.0 }
 0x22c   :  { %v1334_v35 = vpop.f32.mrf.mxu1  ;;  %v7708_v24 = vmul.f32 %v1418_v26, %v12255_v55  ;;  %4690 = vrot.lane.b32.xlu0 %v7688_v13, %s5592_s12 }
 0x22d   :  { %4680 = vrot.lane.b32.xlu1 %v7688_v13, %s5590_s10 }
 0x22e   :  { %12256 = vst [vmem:[#allocation53_spill] sm:$0xff] %v7708_v24  ;;  %v7712_v23 = vpack.i.bf16 %v7705_v4, %v7708_v24 }
 0x22f   :  { %v1284_v1 = vpop.f32.mrf.mxu3 }
 0x230   :  { %4700 = vrot.lane.b32.xlu2 %v7712_v23, %s5585_s0 }
 0x234   :  { %v1336_v37 = vpop.f32.mrf.mxu1  ;;  %4715 = vrot.lane.b32.xlu0 %v7712_v23, %s5588_s8 }
 0x235   :  { %4695 = vrot.lane.b32.xlu1 %v7688_v13, %s5593_s13 }
 0x236   :  { %v1347_v12 = vpop.f32.mrf.mxu2 }
 0x237   :  { %v1348_v8 = vadd.f32 %v1347_v12, %v7676_v27 }
 0x238   :  { %4710 = vrot.lane.b32.xlu2 %v7712_v23, %s5587_s7 }
 0x23c   :  { %4730 = vrot.lane.b32.xlu0 %v7712_v23, %s5591_s11 }
 0x23d   :  { %4705 = vrot.lane.b32.xlu1 %v7712_v23, %s5586_s6 }
 0x23e   :  { %v1349_v54 = vpop.f32.mrf.mxu2 }
 0x240   :  { %4725 = vrot.lane.b32.xlu2 %v7712_v23, %s5590_s10 }
 0x245   :  { %4720 = vrot.lane.b32.xlu1 %v7712_v23, %s5589_s9 }
 0x248   :  { %4740 = vrot.lane.b32.xlu2 %v7712_v23, %s5593_s13 }
 0x249   :  { %v1321_v22 = vpop.f32.mrf.mxu3 }
 0x24a   :  { %v1412_v9 = vpop.f32.mrf.mxu2  ;;  %v1322_v46 = vadd.f32 %v1321_v22, %v7676_v27 }
 0x24b   :  { %v1413_v51 = vadd.f32 %v1412_v9, %v1400_v18 }
 0x24c   :  { %v1373_v58 = vpop.f32.mrf.mxu1  ;;  %v1335_v41 = vadd.f32 %v1334_v35, %v1322_v46 }
 0x24d   :  { %4735 = vrot.lane.b32.xlu1 %v7712_v23, %s5592_s12  ;;  %v1374_v43 = vadd.f32 %v1373_v58, %v7676_v27  ;;  %v1423_v49 = vmax.f32 %v1413_v51, 0.0 }
 0x24e   :  { %v1420_v47 = vmax.f32 %v1335_v41, 0.0 }
 0x24f   :  { %v7766_v10 = vmul.f32 %v1423_v49, %v12260_v25 }
 0x250   :  { %v7741_v61 = vmul.f32 %v1420_v47, %v12257_v52 }
 0x251   :  { %v1323_v3 = vpop.f32.mrf.mxu3  ;;  %12261 = vst [vmem:[#allocation40_spill] sm:$0xff] %v7766_v10 }
 0x252   :  { %v1414_v17 = vpop.f32.mrf.mxu2 }
 0x254   :  { %v1375_v62 = vpop.f32.mrf.mxu1 }
 0x25b   :  { %v1360_v16 = vpop.f32.mrf.mxu3 }
 0x25c   :  { %v1361_v20 = vadd.f32 %v1360_v16, %v1348_v8 }
 0x25e   :  { %v1421_v60 = vmax.f32 %v1361_v20, 0.0 }
 0x260   :  { %v7744_v44 = vmul.f32 %v1421_v60, %v12258_v30 }
 0x262   :  { %12259 = vst [vmem:[#allocation57_spill] sm:$0xff] %v7744_v44  ;;  %v7748_v29 = vpack.i.bf16 %v7744_v44, %v7741_v61 }
 0x263   :  { %v1362_v56 = vpop.f32.mrf.mxu3 }
 0x264   :  { %4750 = vrot.lane.b32.xlu2 %v7748_v29, %s5586_s6  ;;  %4755 = vrot.lane.b32.xlu0 %v7748_v29, %s5587_s7 }
 0x265   :  { %4745 = vrot.lane.b32.xlu1 %v7748_v29, %s5585_s0 }
 0x26c   :  { %4765 = vrot.lane.b32.xlu2 %v7748_v29, %s5589_s9  ;;  %4770 = vrot.lane.b32.xlu0 %v7748_v29, %s5590_s10 }
 0x26d   :  { %4760 = vrot.lane.b32.xlu1 %v7748_v29, %s5588_s8 }
 0x26f   :  { %v1386_v15 = vpop.f32.mrf.mxu3 }
 0x270   :  { %v1387_v50 = vadd.f32 %v1386_v15, %v1374_v43 }
 0x272   :  { %v1422_v6 = vmax.f32 %v1387_v50, 0.0 }
 0x274   :  { %v7769_v21 = vmul.f32 %v1422_v6, %v12262_v57  ;;  %4780 = vrot.lane.b32.xlu2 %v7748_v29, %s5592_s12 }
 0x275   :  { %4775 = vrot.lane.b32.xlu1 %v7748_v29, %s5591_s11 }
 0x276   :  { %12263 = vst [vmem:[#allocation45_spill] sm:$0xff] %v7769_v21  ;;  %v7773_v27 = vpack.i.bf16 %v7766_v10, %v7769_v21  ;;  %v7787_v36 = vpop.permute.xlu2 %4670 }
 0x277   :  { %v1388_v28 = vpop.f32.mrf.mxu3  ;;  %v11546_v19 = vunpack.i.h.bf16 %v7787_v36 }
 0x278   :  { %4790 = vrot.lane.b32.xlu0 %v7773_v27, %s5586_s6 }
 0x27c   :  { %4785 = vrot.lane.b32.xlu2 %v7773_v27, %s5585_s0 }
 0x27d   :  { %4795 = vrot.lane.b32.xlu1 %v7773_v27, %s5587_s7 }
 0x27e   :  { %v7801_v32 = vpop.permute.xlu2 %4685 }
 0x27f   :  { %v11549_v28 = vunpack.i.h.bf16 %v7801_v32 }
 0x280   :  { %4805 = vrot.lane.b32.xlu0 %v7773_v27, %s5589_s9 }
 0x284   :  { %4800 = vrot.lane.b32.xlu2 %v7773_v27, %s5588_s8 }
 0x285   :  { %4810 = vrot.lane.b32.xlu1 %v7773_v27, %s5590_s10 }
 0x288   :  { %4820 = vrot.lane.b32.xlu0 %v7773_v27, %s5592_s12 }
 0x28a   :  { %v7811_v63 = vpop.permute.xlu2 %4700 }
 0x28b   :  { %12264 = vst [vmem:[#allocation42_spill] sm:$0xff] %v7811_v63  ;;  %v11535_v58 = vunpack.i.l.bf16 %v7811_v63 }
 0x28c   :  { %4815 = vrot.lane.b32.xlu2 %v7773_v27, %s5591_s11 }
 0x28d   :  { %4830 = vrot.lane.b32.xlu1 %v7773_v27, %s5593_s13 }
 0x28e   :  { %v7809_v7 = vpop.permute.xlu0 %4660 }
 0x28f   :  { %v7813_v5 = vpop.permute.xlu1 %4655  ;;  %v11543_v3 = vunpack.i.h.bf16 %v7809_v7 }
 0x290   :  { %4825 = vrot.lane.b32.xlu0 %v7748_v29, %s5593_s13  ;;  %v11544_v22 = vunpack.i.h.bf16 %v7813_v5 }
 0x292   :  { %v7825_v45 = vpop.permute.xlu2 %4710  ;;  %v7891_v46 = vsel %vm12274_vm4, %v11544_v22, %v11535_v58  ;;  %vm12286_vm4 = vcmp.lt.s32.totalorder %v5798_v39, 21 }
 0x293   :  { %12265 = vst [vmem:[#allocation77_spill] sm:$0xff] %v7825_v45  ;;  %v11537_v14 = vunpack.i.l.bf16 %v7825_v45 }
 0x294   :  { %4835 = vrot.lane.b32.xlu2 %v7688_v13, %s5594_s14  ;;  %12275 = vst [vmem:[#allocation54_spill] sm:$0xff] %v7891_v46 }
 0x295   :  { %4845 = vrot.lane.b32.xlu1 %v7748_v29, %s5594_s14 }
 0x296   :  { %v7821_v59 = vpop.permute.xlu0 %4675 }
 0x297   :  { %v7823_v31 = vpop.permute.xlu1 %4665  ;;  %v11545_v20 = vunpack.i.h.bf16 %v7821_v59 }
 0x298   :  { %4840 = vrot.lane.b32.xlu0 %v7712_v23, %s5594_s14  ;;  %v11547_v53 = vunpack.i.h.bf16 %v7823_v31 }
 0x29a   :  { %v7837_v11 = vpop.permute.xlu2 %4725  ;;  %v7859_v1 = vsel %vm12268_vm8, %v11547_v53, %v11537_v14  ;;  %vm12276_vm8 = vcmp.lt.s32.totalorder %v5798_v39, 41 }
 0x29b   :  { %12266 = vst [vmem:[#allocation63_spill] sm:$0xff] %v7837_v11  ;;  %v11539_v60 = vunpack.i.l.bf16 %v7837_v11 }
 0x29c   :  { %4850 = vrot.lane.b32.xlu2 %v7773_v27, %s5594_s14  ;;  %12269 = vst [vmem:[#allocation70_spill] sm:$0xff] %v7859_v1 }
 0x29d   :  { %4860 = vrot.lane.b32.xlu1 %v7712_v23, %s5595_s15 }
 0x29e   :  { %v7833_v40 = vpop.permute.xlu0 %4690 }
 0x29f   :  { %v7835_v33 = vpop.permute.xlu1 %4680  ;;  %v11550_v41 = vunpack.i.h.bf16 %v7833_v40 }
 0x2a0   :  { %4855 = vrot.lane.b32.xlu0 %v7688_v13, %s5595_s15  ;;  %v11548_v16 = vunpack.i.h.bf16 %v7835_v33 }
 0x2a2   :  { %v7877_v54 = vpop.permute.xlu2 %4740  ;;  %v7931_v51 = vsel %vm243_vm5, %v11548_v16, %v11539_v60 }
 0x2a3   :  { %12272 = vst [vmem:[#allocation58_spill] sm:$0xff] %v7877_v54 }
 0x2a4   :  { %4865 = vrot.lane.b32.xlu2 %v7748_v29, %s5595_s15  ;;  %12282 = vst [vmem:[#allocation76_spill] sm:$0xff] %v7931_v51 }
 0x2a5   :  { %4875 = vrot.lane.b32.xlu1 %v7688_v13, %s5596_s16 }
 0x2a6   :  { %v7846_v48 = vpop.permute.xlu0 %4715 }
 0x2a7   :  { %12267 = vst [vmem:[#allocation14_spill] sm:$0xff] %v7846_v48  ;;  %v11538_v35 = vunpack.i.l.bf16 %v7846_v48  ;;  %v7851_v26 = vpop.permute.xlu1 %4695 }
 0x2a8   :  { %4870 = vrot.lane.b32.xlu0 %v7773_v27, %s5595_s15 }
 0x2a9   :  { %v7867_v37 = vsel %vm12270_vm10, %v11546_v19, %v11538_v35  ;;  %vm12280_vm10 = vcmp.lt.s32.totalorder %v5798_v39, 38 }
 0x2aa   :  { %12271 = vst [vmem:[#allocation65_spill] sm:$0xff] %v7867_v37 }
 0x2ac   :  { %4880 = vrot.lane.b32.xlu2 %v7712_v23, %s5596_s16 }
 0x2ad   :  { %4890 = vrot.lane.b32.xlu1 %v7773_v27, %s5596_s16 }
 0x2ae   :  { %v7933_v43 = vpop.permute.xlu0 %4730 }
 0x2af   :  { %v7880_v9 = vpop.permute.xlu1 %4705  ;;  %12283 = vst [vmem:[#allocation72_spill] sm:$0xff] %v7933_v43  ;;  %v11541_v50 = vunpack.i.l.bf16 %v7933_v43 }
 0x2b0   :  { %4885 = vrot.lane.b32.xlu0 %v7748_v29, %s5596_s16  ;;  %12273 = vst [vmem:[#allocation74_spill] sm:$0xff] %v7880_v9  ;;  %v11536_v17 = vunpack.i.l.bf16 %v7880_v9 }
 0x2b2   :  { %v7899_v62 = vsel %vm12276_vm8, %v11543_v3, %v11536_v17  ;;  %v7957_v17 = vsel %vm12286_vm4, %v11549_v28, %v11541_v50  ;;  %vm12299_vm8 = vcmp.lt.s32.totalorder %v5798_v39, 42  ;;  %vm12305_vm4 = vcmp.lt.s32.totalorder %v5798_v39, 40 }
 0x2b3   :  { %12277 = vst [vmem:[#allocation52_spill] sm:$0xff] %v7899_v62 }
 0x2b4   :  { %4895 = vrot.lane.b32.xlu2 %v7688_v13, %s5597_s17  ;;  %12287 = vst [vmem:[#allocation26_spill] sm:$0xff] %v7957_v17 }
 0x2b5   :  { %4905 = vrot.lane.b32.xlu1 %v7748_v29, %s5597_s17 }
 0x2b7   :  { %v7912_v47 = vpop.permute.xlu1 %4720 }
 0x2b8   :  { %4900 = vrot.lane.b32.xlu0 %v7712_v23, %s5597_s17  ;;  %12279 = vst [vmem:[#allocation44_spill] sm:$0xff] %v7912_v47  ;;  %v11540_v56 = vunpack.i.l.bf16 %v7912_v47 }
 0x2ba   :  { %v7923_v18 = vsel %vm12280_vm10, %v11545_v20, %v11540_v56  ;;  %vm12301_vm10 = vcmp.lt.s32.totalorder %v5798_v39, 41 }
 0x2bb   :  { %12281 = vst [vmem:[#allocation41_spill] sm:$0xff] %v7923_v18 }
 0x2bc   :  { %4910 = vrot.lane.b32.xlu2 %v7773_v27, %s5597_s17 }
 0x2bd   :  { %4920 = vrot.lane.b32.xlu1 %v7712_v23, %s5598_s18 }
 0x2be   :  { %v7909_v8 = vpop.permute.xlu2 %4750 }
 0x2bf   :  { %12278 = vst [vmem:[#allocation71_spill] sm:$0xff] %v7909_v8  ;;  %v7946_v6 = vpop.permute.xlu1 %4735 }
 0x2c0   :  { %4915 = vrot.lane.b32.xlu0 %v7688_v13, %s5598_s18  ;;  %12285 = vst [vmem:[#allocation30_spill] sm:$0xff] %v7946_v6  ;;  %v11542_v58 = vunpack.i.l.bf16 %v7946_v6 }
 0x2c2   :  { %v7965_v12 = vsel %vm309_vm7, %v11550_v41, %v11542_v58 }
 0x2c3   :  { %12288 = vst [vmem:[#allocation25_spill] sm:$0xff] %v7965_v12 }
 0x2c4   :  { %4925 = vrot.lane.b32.xlu2 %v7748_v29, %s5598_s18 }
 0x2c5   :  { %4935 = vrot.lane.b32.xlu1 %v7688_v13, %s5599_s19 }
 0x2c6   :  { %v7943_v49 = vpop.permute.xlu2 %4765 }
 0x2c7   :  { %12284 = vst [vmem:[#allocation35_spill] sm:$0xff] %v7943_v49 }
 0x2c8   :  { %4930 = vrot.lane.b32.xlu0 %v7773_v27, %s5598_s18 }
 0x2cc   :  { %4940 = vrot.lane.b32.xlu2 %v7712_v23, %s5599_s19 }
 0x2cd   :  { %4950 = vrot.lane.b32.xlu1 %v7773_v27, %s5599_s19 }
 0x2ce   :  { %v7975_v35 = vpop.permute.xlu2 %4780 }
 0x2cf   :  { %12289 = vst [vmem:[#allocation8_spill] sm:$0xff] %v7975_v35 }
 0x2d0   :  { %4945 = vrot.lane.b32.xlu0 %v7748_v29, %s5599_s19 }
 0x2d4   :  { %4955 = vrot.lane.b32.xlu2 %v7688_v13, %s5600_s20 }
 0x2d5   :  { %4965 = vrot.lane.b32.xlu1 %v7748_v29, %s5600_s20 }
 0x2d6   :  { %v7983_v15 = vpop.permute.xlu2 %4785  ;;  %v7985_v60 = vpop.permute.xlu0 %4755 }
 0x2d7   :  { %12290 = vst [vmem:[#allocation64_spill] sm:$0xff] %v7983_v15  ;;  %v7987_v56 = vpop.permute.xlu1 %4745  ;;  %v11552_v19 = vunpack.i.h.bf16 %v7983_v15  ;;  %v11551_v53 = vunpack.i.l.bf16 %v7983_v15 }
 0x2d8   :  { %4960 = vrot.lane.b32.xlu0 %v7712_v23, %s5600_s20  ;;  %12291 = vst [vmem:[#allocation62_spill] sm:$0xff] %v7985_v60 }
 0x2d9   :  { %12292 = vst [vmem:[#allocation15_spill] sm:$0xff] %v7987_v56  ;;  %v8025_v41 = vsel %vm12299_vm8, %v11551_v53, %v11552_v19  ;;  %vm12307_vm8 = vcmp.lt.s32.totalorder %v5798_v39, 39 }
 0x2da   :  { %12300 = vst [vmem:[#allocation78_spill] sm:$0xff] %v8025_v41 }
 0x2dc   :  { %4970 = vrot.lane.b32.xlu2 %v7773_v27, %s5600_s20 }
 0x2dd   :  { %4980 = vrot.lane.b32.xlu1 %v7712_v23, %s5601_s21 }
 0x2de   :  { %v7995_v14 = vpop.permute.xlu2 %4800  ;;  %v7997_v50 = vpop.permute.xlu0 %4770 }
 0x2df   :  { %12293 = vst [vmem:[#allocation18_spill] sm:$0xff] %v7995_v14  ;;  %v7999_v58 = vpop.permute.xlu1 %4760  ;;  %v11558_v53 = vunpack.i.h.bf16 %v7995_v14  ;;  %v11557_v19 = vunpack.i.l.bf16 %v7995_v14 }
 0x2e0   :  { %4975 = vrot.lane.b32.xlu0 %v7688_v13, %s5601_s21  ;;  %12294 = vst [vmem:[#allocation51_spill] sm:$0xff] %v7997_v50 }
 0x2e1   :  { %12295 = vst [vmem:[#allocation43_spill] sm:$0xff] %v7999_v58  ;;  %v8065_v55 = vsel %vm12307_vm8, %v11557_v19, %v11558_v53  ;;  %vm12326_vm8 = vcmp.lt.s32.totalorder %v5798_v39, 19 }
 0x2e2   :  { %12308 = vst [vmem:[#allocation16_spill] sm:$0xff] %v8065_v55 }
 0x2e4   :  { %4985 = vrot.lane.b32.xlu2 %v7748_v29, %s5601_s21 }
 0x2e5   :  { %4995 = vrot.lane.b32.xlu1 %v7688_v13, %s5602_s22 }
 0x2e6   :  { %v8007_v3 = vpop.permute.xlu2 %4815 }
 0x2e7   :  { %12296 = vst [vmem:[#allocation46_spill] sm:$0xff] %v8007_v3  ;;  %v8009_v22 = vpop.permute.xlu1 %4775  ;;  %v12313_v10 = vunpack.i.l.bf16 %v8007_v3 }
 0x2e8   :  { %4990 = vrot.lane.b32.xlu0 %v7773_v27, %s5601_s21  ;;  %12297 = vst [vmem:[#allocation29_spill] sm:$0xff] %v8009_v22 }
 0x2ea   :  { %v8011_v20 = vpop.permute.xlu0 %4790 }
 0x2eb   :  { %12298 = vst [vmem:[#allocation34_spill] sm:$0xff] %v8011_v20  ;;  %v11554_v16 = vunpack.i.h.bf16 %v8011_v20  ;;  %v11553_v28 = vunpack.i.l.bf16 %v8011_v20 }
 0x2ec   :  { %5000 = vrot.lane.b32.xlu2 %v7712_v23, %s5602_s22 }
 0x2ed   :  { %v8033_v25 = vsel %vm12301_vm10, %v11553_v28, %v11554_v16  ;;  %5010 = vrot.lane.b32.xlu1 %v7773_v27, %s5602_s22  ;;  %vm12314_vm10 = vcmp.lt.s32.totalorder %v5798_v39, 21 }
 0x2ee   :  { %12302 = vst [vmem:[#allocation33_spill] sm:$0xff] %v8033_v25  ;;  %v8041_v30 = vpop.permute.xlu2 %4835 }
 0x2ef   :  { %v8045_v52 = vpop.permute.xlu1 %4795  ;;  %v11585_v1 = vunpack.i.h.bf16 %v8041_v30 }
 0x2f0   :  { %5005 = vrot.lane.b32.xlu0 %v7748_v29, %s5602_s22  ;;  %12303 = vst [vmem:[#allocation7_spill] sm:$0xff] %v8045_v52  ;;  %v11556_v28 = vunpack.i.h.bf16 %v8045_v52  ;;  %v11555_v16 = vunpack.i.l.bf16 %v8045_v52 }
 0x2f2   :  { %v8047_v42 = vpop.permute.xlu0 %4805  ;;  %v8057_v57 = vsel %vm12305_vm4, %v11555_v16, %v11556_v28  ;;  %v12312_v28 = vunpack.i.h.bf16 %v8007_v3  ;;  %vm12319_vm4 = vcmp.lt.s32.totalorder %v5798_v39, 38 }
 0x2f3   :  { %12304 = vst [vmem:[#allocation24_spill] sm:$0xff] %v8047_v42  ;;  %v12317_v53 = vunpack.i.h.bf16 %v8047_v42  ;;  %v12318_v21 = vunpack.i.l.bf16 %v8047_v42 }
 0x2f4   :  { %12306 = vst [vmem:[#allocation17_spill] sm:$0xff] %v8057_v57  ;;  %5015 = vrot.lane.b32.xlu2 %v7688_v13, %s5603_s23  ;;  %v8095_v19 = vsel %vm12314_vm10, %v12313_v10, %v12312_v28  ;;  %vm12328_vm10 = vcmp.lt.s32.totalorder %v5798_v39, 18 }
 0x2f5   :  { %5025 = vrot.lane.b32.xlu1 %v7748_v29, %s5603_s23  ;;  %12315 = vst [vmem:[#allocation67_spill] sm:$0xff] %v8095_v19  ;;  %v8115_v10 = vsel %vm12319_vm4, %v12318_v21, %v12317_v53  ;;  %vm12332_vm4 = vmmov %vm12326_vm8 }
 0x2f6   :  { %v8077_v0 = vpop.permute.xlu2 %4850  ;;  %12320 = vst [vmem:[#allocation13_spill] sm:$0xff] %v8115_v10 }
 0x2f7   :  { %12309 = vst [vmem:[#allocation19_spill] sm:$0xff] %v8077_v0  ;;  %v8081_v41 = vpop.permute.xlu1 %4810  ;;  %v11576_v21 = vunpack.i.h.bf16 %v8077_v0  ;;  %v11575_v53 = vunpack.i.l.bf16 %v8077_v0 }
 0x2f8   :  { %5020 = vrot.lane.b32.xlu0 %v7712_v23, %s5603_s23  ;;  %12310 = vst [vmem:[#allocation73_spill] sm:$0xff] %v8081_v41  ;;  %v12321_v28 = vunpack.i.h.bf16 %v8081_v41  ;;  %v12322_v46 = vunpack.i.l.bf16 %v8081_v41 }
 0x2f9   :  { %v8155_v10 = vsel %vm12328_vm10, %v11575_v53, %v11576_v21  ;;  %v11581_v21 = vunpack.i.l.bf16 %v7877_v54 }
 0x2fa   :  { %v8083_v25 = vpop.permute.xlu0 %4820  ;;  %12329 = vst [vmem:[#allocation47_spill] sm:$0xff] %v8155_v10 }
 0x2fb   :  { %12311 = vst [vmem:[#allocation75_spill] sm:$0xff] %v8083_v25  ;;  %v11567_v55 = vunpack.i.h.bf16 %v8083_v25  ;;  %v11566_v16 = vunpack.i.l.bf16 %v8083_v25 }
 0x2fc   :  { %5030 = vrot.lane.b32.xlu2 %v7773_v27, %s5603_s23 }
 0x2fd   :  { %v8103_v34 = vsel %vm309_vm7, %v11566_v16, %v11567_v55  ;;  %v8123_v16 = vsel %vm243_vm5, %v12322_v46, %v12321_v28  ;;  %5040 = vrot.lane.b32.xlu1 %v7712_v23, %s5604_s3 }
 0x2fe   :  { %12316 = vst [vmem:[#allocation66_spill] sm:$0xff] %v8103_v34  ;;  %v8131_v55 = vpop.permute.xlu2 %4865 }
 0x2ff   :  { %12323 = vst [vmem:[#allocation55_spill] sm:$0xff] %v8123_v16  ;;  %v8135_v19 = vpop.permute.xlu1 %4830 }
 0x300   :  { %5035 = vrot.lane.b32.xlu0 %v7688_v13, %s5604_s3  ;;  %12324 = vst [vmem:[#allocation56_spill] sm:$0xff] %v8135_v19  ;;  %v11573_v46 = vunpack.i.h.bf16 %v8135_v19  ;;  %v11572_v28 = vunpack.i.l.bf16 %v8135_v19 }
 0x302   :  { %v8137_v34 = vpop.permute.xlu0 %4825  ;;  %v8147_v57 = vsel %vm12326_vm8, %v11572_v28, %v11573_v46  ;;  %v11582_v28 = vunpack.i.h.bf16 %v7851_v26  ;;  %vm12334_vm8 = vmmov %vm12328_vm10  ;;  %vm12339_vm10 = vcmp.lt.s32.totalorder %v5798_v39, 2 }
 0x303   :  { %12325 = vst [vmem:[#allocation69_spill] sm:$0xff] %v8137_v34 }
 0x304   :  { %12327 = vst [vmem:[#allocation68_spill] sm:$0xff] %v8147_v57  ;;  %5045 = vrot.lane.b32.xlu2 %v7748_v29, %s5604_s3  ;;  %v8181_v57 = vsel %vm12332_vm4, %v11582_v28, %v11581_v21  ;;  %vm12341_vm4 = vcmp.lt.s32.totalorder %v5798_v39, 1 }
 0x305   :  { %5055 = vrot.lane.b32.xlu1 %v7688_v13, %s5605_s24  ;;  %12333 = vst [vmem:[#allocation59_spill] sm:$0xff] %v8181_v57 }
 0x306   :  { %v8166_v46 = vpop.permute.xlu2 %4880 }
 0x307   :  { %v8168_v62 = vpop.permute.xlu1 %4845  ;;  %v11597_v12 = vunpack.i.l.bf16 %v8166_v46 }
 0x308   :  { %5050 = vrot.lane.b32.xlu0 %v7773_v27, %s5604_s3  ;;  %12330 = vst [vmem:[#allocation48_spill] sm:$0xff] %v8168_v62 }
 0x30a   :  { %v8170_v53 = vpop.permute.xlu0 %4840 }
 0x30b   :  { %12331 = vst [vmem:[#allocation60_spill] sm:$0xff] %v8170_v53  ;;  %v11584_v16 = vunpack.i.l.bf16 %v8170_v53 }
 0x30c   :  { %5060 = vrot.lane.b32.xlu2 %v7712_v23, %s5605_s24 }
 0x30d   :  { %v8189_v10 = vsel %vm12334_vm8, %v11585_v1, %v11584_v16  ;;  %5070 = vrot.lane.b32.xlu1 %v7773_v27, %s5605_s24  ;;  %vm12344_vm8 = vmmov %vm12339_vm10 }
 0x30e   :  { %12335 = vst [vmem:[#allocation36_spill] sm:$0xff] %v8189_v10  ;;  %v8199_v21 = vpop.permute.xlu2 %4895 }
 0x30f   :  { %12336 = vst [vmem:[#allocation37_spill] sm:$0xff] %v8199_v21  ;;  %v8201_v28 = vpop.permute.xlu1 %4860  ;;  %v4898_v4 = vunpack.i.h.bf16 %v8199_v21 }
 0x310   :  { %5065 = vrot.lane.b32.xlu0 %v7748_v29, %s5605_s24  ;;  %v11594_v37 = vunpack.i.l.bf16 %v8201_v28 }
 0x312   :  { %v8203_v18 = vpop.permute.xlu0 %4855 }
 0x313   :  { %v11595_v16 = vunpack.i.h.bf16 %v8203_v18  ;;  %v4857_v58 = vunpack.i.l.bf16 %v8203_v18 }
 0x314   :  { %5075 = vrot.lane.b32.xlu2 %v7688_v13, %s5606_s25 }
 0x315   :  { %5085 = vrot.lane.b32.xlu1 %v7748_v29, %s5606_s25  ;;  %v8227_v57 = vsel %vm12339_vm10, %v11595_v16, %v11594_v37  ;;  %vm12346_vm10 = vmmov %vm12341_vm4 }
 0x316   :  { %v8213_v1 = vpop.permute.xlu2 %4910  ;;  %12340 = vst [vmem:[#allocation27_spill] sm:$0xff] %v8227_v57 }
 0x317   :  { %12337 = vst [vmem:[#allocation50_spill] sm:$0xff] %v8213_v1  ;;  %v8215_v51 = vpop.permute.xlu1 %4875 }
 0x318   :  { %5080 = vrot.lane.b32.xlu0 %v7712_v23, %s5606_s25  ;;  %v11598_v44 = vunpack.i.h.bf16 %v8215_v51  ;;  %v4877_v47 = vunpack.i.l.bf16 %v8215_v51 }
 0x31a   :  { %v8217_v17 = vpop.permute.xlu0 %4870  ;;  %v8235_v10 = vsel %vm12341_vm4, %v11598_v44, %v11597_v12  ;;  %vm12349_vm4 = vcmp.lt.s32.totalorder %v5798_v39, 110 }
 0x31b   :  { %12338 = vst [vmem:[#allocation49_spill] sm:$0xff] %v8217_v17  ;;  %v11606_v12 = vunpack.i.h.bf16 %v8217_v17  ;;  %v11605_v44 = vunpack.i.l.bf16 %v8217_v17 }
 0x31c   :  { %12342 = vst [vmem:[#allocation28_spill] sm:$0xff] %v8235_v10  ;;  %5090 = vrot.lane.b32.xlu2 %v7773_v27, %s5606_s25 }
 0x31d   :  { %5100 = vrot.lane.b32.xlu1 %v7712_v23, %s5607_s26  ;;  %v8263_v10 = vsel %vm12344_vm8, %v11605_v44, %v11606_v12  ;;  %vm12351_vm8 = vcmp.lt.s32.totalorder %v5798_v39, 126 }
 0x31e   :  { %v8245_v37 = vpop.permute.xlu2 %4925  ;;  %12345 = vst [vmem:[#allocation38_spill] sm:$0xff] %v8263_v10 }
 0x31f   :  { %v8247_v16 = vpop.permute.xlu1 %4890  ;;  %v4928_v49 = vunpack.i.h.bf16 %v8245_v37 }
 0x320   :  { %5095 = vrot.lane.b32.xlu0 %v7688_v13, %s5607_s26  ;;  %12343 = vst [vmem:[#allocation39_spill] sm:$0xff] %v8247_v16  ;;  %v4893_v9 = vunpack.i.h.bf16 %v8247_v16  ;;  %v11610_v57 = vunpack.i.l.bf16 %v8247_v16 }
 0x322   :  { %v8249_v8 = vpop.permute.xlu0 %4885  ;;  %v8269_v63 = vsel %vm12346_vm10, %v11610_v57, %v4893_v9  ;;  %vm12352_vm10 = vmmov %vm12351_vm8 }
 0x323   :  { %12347 = vst [vmem:[#allocation20_spill] sm:$0xff] %v8269_v63  ;;  %v4927_v63 = vunpack.i.l.bf16 %v8245_v37 }
 0x324   :  { %5105 = vrot.lane.b32.xlu2 %v7748_v29, %s5607_s26 }
 0x325   :  { %5115 = vrot.lane.b32.xlu1 %v7688_v13, %s5608_s27 }
 0x326   :  { %v8277_v56 = vpop.permute.xlu2 %4940 }
 0x327   :  { %v11616_v44 = vunpack.i.h.bf16 %v8277_v56  ;;  %v4942_v12 = vunpack.i.l.bf16 %v8277_v56  ;;  %v8281_v16 = vpop.permute.xlu1 %4905 }
 0x328   :  { %5110 = vrot.lane.b32.xlu0 %v7773_v27, %s5607_s26 }
 0x329   :  { %v8289_v13 = vsel %vm12349_vm4, %v4942_v12, %v11616_v44  ;;  %vm12354_vm4 = vmmov %vm12351_vm8 }
 0x32a   :  { %v8283_v45 = vpop.permute.xlu0 %4900  ;;  %12350 = vst [vmem:[#allocation32_spill] sm:$0xff] %v8289_v13  ;;  %vm12359_vm3 = vmmov %vm12354_vm4 }
 0x32b   :  { %12348 = vst [vmem:[#allocation22_spill] sm:$0xff] %v8283_v45 }
 0x32c   :  { %5120 = vrot.lane.b32.xlu2 %v7712_v23, %s5608_s27 }
 0x32d   :  { %5130 = vrot.lane.b32.xlu1 %v7773_v27, %s5608_s27 }
 0x32e   :  { %v8297_v1 = vpop.permute.xlu2 %4955 }
 0x32f   :  { %v4921_v57 = vpop.permute.xlu1 %4920 }
 0x330   :  { %5125 = vrot.lane.b32.xlu0 %v7748_v29, %s5608_s27  ;;  %v4923_v60 = vunpack.i.h.bf16 %v4921_v57  ;;  %v4922_v48 = vunpack.i.l.bf16 %v4921_v57 }
 0x332   :  { %v4916_v10 = vpop.permute.xlu0 %4915  ;;  %v8302_v44 = vsel %vm12351_vm8, %v4923_v60, %v4927_v63  ;;  %v8306_v23 = vsel %vm12352_vm10, %v4922_v48, %v4923_v60  ;;  %v11640_v60 = vunpack.i.l.bf16 %v8297_v1  ;;  %vm12356_vm8 = vmmov %vm12354_vm4  ;;  %vm12357_vm10 = vcmp.lt.s32.totalorder %v5798_v39, 110 }
 0x333   :  { %12353 = vst [vmem:[#allocation31_spill] sm:$0xff] %v8306_v23  ;;  %v4918_v29 = vunpack.i.h.bf16 %v4916_v10  ;;  %v4917_v24 = vunpack.i.l.bf16 %v4916_v10  ;;  %vm12358_vm2 = vmmov %vm12357_vm10 }
 0x335   :  { %v1877_v10 = vsel %vm12354_vm4, %v4918_v29, %v4922_v48  ;;  %v1878_v11 = vsel %vm12356_vm8, %v4917_v24, %v4918_v29  ;;  %vm12360_vm4 = vmmov %vm12359_vm3  ;;  %vm12363_vm8 = vcmp.lt.s32.totalorder %v5798_v39, 127 }
 0x336   :  { %v8313_v57 = vpop.permute.xlu2 %4970 }
 0x337   :  { %v11639_v50 = vunpack.i.h.bf16 %v8313_v57  ;;  %v4936_v6 = vpop.permute.xlu1 %4935 }
 0x338   :  { %v4938_v23 = vunpack.i.h.bf16 %v4936_v6  ;;  %v4937_v13 = vunpack.i.l.bf16 %v4936_v6 }
 0x339   :  { %v8328_v37 = vsel %vm581_vm15, %v11639_v50, %v11640_v60  ;;  %v12362_v50 = vunpack.i.l.bf16 %v8199_v21  ;;  %v12366_v60 = vunpack.i.h.bf16 %v8215_v51 }
 0x33a   :  { %v4931_v27 = vpop.permute.xlu0 %4930  ;;  %12355 = vst [vmem:[#allocation23_spill] sm:$0xff] %v8328_v37  ;;  %v1909_v6 = vsel %vm12357_vm10, %v4938_v23, %v4942_v12  ;;  %v12364_v12 = vunpack.i.l.bf16 %v8283_v45  ;;  %vm12365_vm10 = vmmov %vm12363_vm8 }
 0x33b   :  { %v4933_v35 = vunpack.i.h.bf16 %v4931_v27  ;;  %v4932_v43 = vunpack.i.l.bf16 %v4931_v27  ;;  %v1910_v27 = vsel %vm12358_vm2, %v4937_v13, %v4938_v23  ;;  %v2467_v54 = vpack.c.bf16 %v1909_v6, %v1877_v10 }
 0x33c   :  { %v2466_v22 = vpack.c.bf16 %v1910_v27, %v1878_v11  ;;  %v1846_v29 = vsel %vm12363_vm8, %v12362_v50, %v4898_v4  ;;  %v1845_v23 = vsel %vm12365_vm10, %v4898_v4, %v12364_v12  ;;  %vm12367_vm2 = vcmp.lt.s32.totalorder %v5798_v39, 1 }
 0x33d   :  { %v8338_v48 = vsel %vm12359_vm3, %v4928_v49, %v4932_v43  ;;  %v8342_v34 = vsel %vm12360_vm4, %v4933_v35, %v4917_v24  ;;  %v1806_v11 = vsel %vm12367_vm2, %v4877_v47, %v12366_v60  ;;  %2580 = vmatpush.bf16.msra.mxu2 %v2467_v54  ;;  %v4692_v24 = vunpack.i.l.bf16 %v7833_v40  ;;  %vm12368_vm3 = vmmov %vm12367_vm2 }
 0x33e   :  { %12361 = vst [vmem:[#allocation21_spill] sm:$0xff] %v8342_v34  ;;  %2554 = vmatpush.bf16.msrb.mxu3 %v2466_v22  ;;  %v4837_v6 = vunpack.i.l.bf16 %v8041_v30  ;;  %v8359_v27 = vpop.permute.xlu2 %4985  ;;  %v1807_v50 = vsel %vm12368_vm3, %v4893_v9, %v4877_v47  ;;  %v12369_v4 = vunpack.i.h.bf16 %v8203_v18  ;;  %vm12370_vm4 = vcmp.lt.s32.totalorder %v5798_v39, 2 }
 0x33f   :  { %v4951_v12 = vpop.permute.xlu1 %4950  ;;  %v2458_v10 = vpack.c.bf16 %v1846_v29, %v7681_v2  ;;  %v2459_v54 = vpack.c.bf16 %v1845_v23, %v7684_v38  ;;  %v12371_v22 = vunpack.i.h.bf16 %v8217_v17  ;;  %vm12372_vm8 = vmmov %vm12370_vm4  ;;  %v4697_v18 = vunpack.i.l.bf16 %v7851_v26 }
 0x340   :  { %v1774_v51 = vsel %vm12370_vm4, %v4857_v58, %v12369_v4  ;;  %v4953_v53 = vunpack.i.h.bf16 %v4951_v12  ;;  %v4952_v62 = vunpack.i.l.bf16 %v4951_v12  ;;  %vm12373_vm10 = vcmp.lt.s32.totalorder %v5798_v39, 126 }
 0x341   :  { %v1775_v21 = vsel %vm12372_vm8, %v12371_v22, %v4857_v58  ;;  %v2451_v45 = vpack.c.bf16 %v1806_v11, %v1774_v51  ;;  %v8376_v4 = vsel %vm12373_vm10, %v4927_v63, %v4928_v49  ;;  %vm12374_vm2 = vmmov %vm12373_vm10  ;;  %2581 = vmatpush.bf16.msra.mxu2 %v2459_v54  ;;  %vm12376_vm3 = vcmp.lt.s32.totalorder %v5798_v39, 110 }
 0x342   :  { %v4946_v60 = vpop.permute.xlu0 %4945  ;;  %v8380_v2 = vsel %vm12374_vm2, %v4932_v43, %v4933_v35  ;;  %2555 = vmatpush.bf16.msrb.mxu3 %v2458_v10  ;;  %v2450_v38 = vpack.c.bf16 %v1807_v50, %v1775_v21  ;;  %v8384_v58 = vsel %vm12376_vm3, %v4952_v62, %v4953_v53  ;;  %vm12378_vm4 = vmmov %vm12376_vm3  ;;  %v12382_v49 = vunpack.i.h.bf16 %v8277_v56 }
 0x343   :  { %v4948_v9 = vunpack.i.h.bf16 %v4946_v60  ;;  %v4947_v47 = vunpack.i.l.bf16 %v4946_v60  ;;  %12375 = vst [vmem:[#allocation79_spill] sm:$0xff] %v8380_v2  ;;  %v8388_v29 = vsel %vm12378_vm4, %v4953_v53, %v4937_v13  ;;  %vm12380_vm8 = vmmov %vm12376_vm3  ;;  %v12384_v11 = vunpack.i.h.bf16 %v8135_v19 }
 0x344   :  { %12377 = vst [vmem:[#allocation80_spill] sm:$0xff] %v8384_v58  ;;  %vm12381_vm10 = vmmov %vm12376_vm3  ;;  %v12386_v56 = vunpack.i.h.bf16 %v8041_v30  ;;  %vm12387_vm4 = vcmp.lt.s32.totalorder %v5798_v39, 18  ;;  %v4687_v51 = vunpack.i.l.bf16 %v7801_v32  ;;  %v4667_v12 = vunpack.i.l.bf16 %v7823_v31 }
 0x345   :  { %12379 = vst [vmem:[#allocation81_spill] sm:$0xff] %v8388_v29  ;;  %v8392_v23 = vsel %vm12380_vm8, %v4948_v9, %v4952_v62  ;;  %v8396_v63 = vsel %vm12381_vm10, %v4947_v47, %v4948_v9  ;;  %vm12383_vm2 = vmmov %vm12376_vm3  ;;  %vm12385_vm3 = vcmp.lt.s32.totalorder %v5798_v39, 19  ;;  %v4682_v60 = vunpack.i.l.bf16 %v7835_v33  ;;  %2582 = vmatpush.bf16.msra.mxu2 %v2451_v45  ;;  %v8715_v29 = vld [vmem:[%s11333_s1 + $0x8] sm:$0xff] }
 0x346   :  { %v8406_v21 = vsel %vm12383_vm2, %v12382_v49, %v4947_v47  ;;  %v1711_v10 = vsel %vm12385_vm3, %v12384_v11, %v4697_v18  ;;  %v1742_v50 = vsel %vm12387_vm4, %v4837_v6, %v12386_v56  ;;  %2556 = vmatpush.bf16.msrb.mxu3 %v2450_v38  ;;  %v12388_v54 = vunpack.i.h.bf16 %v7833_v40  ;;  %v8431_v47 = vpop.permute.xlu2 %5000  ;;  %vm12390_vm8 = vmmov %vm12387_vm4 }
 0x347   :  { %v4987_v30 = vunpack.i.l.bf16 %v8359_v27  ;;  %v12389_v49 = vunpack.i.h.bf16 %v8077_v0  ;;  %v12391_v56 = vunpack.i.h.bf16 %v7851_v26  ;;  %vm12392_vm10 = vmmov %vm12385_vm3  ;;  %v4958_v40 = vunpack.i.h.bf16 %v8297_v1  ;;  %v4966_v38 = vpop.permute.xlu1 %4965 }
 0x348   :  { %v1678_v22 = vsel %vm309_vm7, %v4692_v24, %v12388_v54  ;;  %v12393_v13 = vunpack.i.h.bf16 %v8083_v25  ;;  %v4968_v62 = vunpack.i.h.bf16 %v4966_v38  ;;  %v4967_v9 = vunpack.i.l.bf16 %v4966_v38 }
 0x349   :  { %v1743_v11 = vsel %vm12390_vm8, %v12389_v49, %v4837_v6  ;;  %v1710_v45 = vsel %vm12392_vm10, %v4697_v18, %v12391_v56  ;;  %v4677_v26 = vunpack.i.l.bf16 %v7821_v59  ;;  %v11648_v49 = vunpack.i.l.bf16 %v8313_v57 }
 0x34a   :  { %v4961_v54 = vpop.permute.xlu0 %4960  ;;  %v2442_v43 = vpack.c.bf16 %v1743_v11, %v1711_v10  ;;  %v2443_v35 = vpack.c.bf16 %v1742_v50, %v1710_v45  ;;  %v1679_v53 = vsel %vm309_vm7, %v12393_v13, %v4692_v24  ;;  %v12394_v18 = vunpack.i.h.bf16 %v8007_v3 }
 0x34b   :  { %v4963_v19 = vunpack.i.h.bf16 %v4961_v54  ;;  %v4962_v6 = vunpack.i.l.bf16 %v4961_v54  ;;  %vm12395_vm2 = vcmp.lt.s32.totalorder %v5798_v39, 21  ;;  %v12396_v50 = vunpack.i.h.bf16 %v7801_v32 }
 0x34c   :  { %2557 = vmatpush.bf16.msrb.mxu3 %v2442_v43  ;;  %2583 = vmatpush.bf16.msra.mxu2 %v2443_v35  ;;  %v1647_v10 = vsel %vm12395_vm2, %v12394_v18, %v4687_v51  ;;  %vm12397_vm3 = vmmov %vm12395_vm2  ;;  %v8466_v35 = vsel %vm581_vm15, %v4967_v9, %v4968_v62  ;;  %v12399_v43 = vunpack.i.h.bf16 %v8359_v27  ;;  %v8480_v38 = vsel %vm581_vm15, %v4968_v62, %v11648_v49 }
 0x34d   :  { %v1646_v24 = vsel %vm12397_vm3, %v4687_v51, %v12396_v50  ;;  %v8458_v13 = vsel %vm581_vm15, %v4958_v40, %v4962_v6  ;;  %v8462_v11 = vsel %vm581_vm15, %v4963_v19, %v4967_v9  ;;  %12398 = vst [vmem:[#allocation82_spill] sm:$0xff] %v8466_v35  ;;  %v2434_v56 = vpack.c.bf16 %v1679_v53, %v1647_v10 }
 0x34e   :  { %v8472_v32 = vsel %vm614_vm12, %v4987_v30, %v12399_v43  ;;  %v2435_v51 = vpack.c.bf16 %v1678_v22, %v1646_v24  ;;  %12401 = vst [vmem:[#allocation84_spill] sm:$0xff] %v8480_v38  ;;  %v12402_v9 = vunpack.i.h.bf16 %v8081_v41  ;;  %v12403_v18 = vunpack.i.h.bf16 %v7835_v33 }
 0x34f   :  { %12400 = vst [vmem:[#allocation83_spill] sm:$0xff] %v8472_v32  ;;  %v12404_v22 = vunpack.i.h.bf16 %v7823_v31  ;;  %vm12405_vm4 = vcmp.lt.s32.totalorder %v5798_v39, 40  ;;  %v4662_v50 = vunpack.i.l.bf16 %v7809_v7  ;;  %v12406_v62 = vunpack.i.h.bf16 %v7787_v36 }
 0x350   :  { %v1615_v54 = vsel %vm243_vm5, %v12402_v9, %v4682_v60  ;;  %v1614_v53 = vsel %vm243_vm5, %v4682_v60, %v12403_v18  ;;  %2558 = vmatpush.bf16.msrb.mxu3 %v2434_v56  ;;  %2584 = vmatpush.bf16.msra.mxu2 %v2435_v51  ;;  %v12407_v24 = vunpack.i.l.bf16 %v7787_v36  ;;  %vm12408_vm8 = vcmp.lt.s32.totalorder %v5798_v39, 39  ;;  %v8502_v9 = vpop.permute.xlu2 %5015  ;;  %vm12414_vm3 = vmmov %vm12405_vm4 }
 0x351   :  { %v1518_v10 = vsel %vm12405_vm4, %v4667_v12, %v12404_v22  ;;  %v4657_v33 = vunpack.i.l.bf16 %v7813_v5  ;;  %v12409_v31 = vunpack.i.h.bf16 %v8047_v42  ;;  %vm12410_vm10 = vcmp.lt.s32.totalorder %v5798_v39, 38  ;;  %vm12417_vm4 = vmmov %vm12408_vm8 }
 0x352   :  { %v1550_v43 = vsel %vm12408_vm8, %v12407_v24, %v12406_v62  ;;  %v12411_v18 = vunpack.i.h.bf16 %v7821_v59  ;;  %vm12412_vm2 = vmmov %vm12410_vm10  ;;  %v12413_v51 = vunpack.i.h.bf16 %v8045_v52  ;;  %v4981_v62 = vpop.permute.xlu1 %4980  ;;  %v4976_v24 = vpop.permute.xlu0 %4975  ;;  %v12415_v41 = vunpack.i.l.bf16 %v7787_v36 }
 0x353   :  { %v1583_v60 = vsel %vm12410_vm10, %v12409_v31, %v4677_v26  ;;  %v12416_v42 = vunpack.i.h.bf16 %v7995_v14  ;;  %v2419_v59 = vpack.c.bf16 %v1550_v43, %v1518_v10  ;;  %v4983_v3 = vunpack.i.h.bf16 %v4981_v62 }
 0x354   :  { %v1582_v56 = vsel %vm12412_vm2, %v4677_v26, %v12411_v18  ;;  %v1519_v22 = vsel %vm12414_vm3, %v12413_v51, %v4667_v12  ;;  %v2426_v45 = vpack.c.bf16 %v1615_v54, %v1583_v60  ;;  %v4982_v25 = vunpack.i.l.bf16 %v4981_v62 }
 0x355   :  { %v2427_v49 = vpack.c.bf16 %v1614_v53, %v1582_v56  ;;  %v1551_v31 = vsel %vm12417_vm4, %v12416_v42, %v12415_v41  ;;  %v4978_v26 = vunpack.i.h.bf16 %v4976_v24  ;;  %v4977_v18 = vunpack.i.l.bf16 %v4976_v24 }
 0x356   :  { %2559 = vmatpush.bf16.msrb.mxu3 %v2426_v45  ;;  %v2418_v52 = vpack.c.bf16 %v1551_v31, %v1519_v22  ;;  %v8524_v12 = vsel %vm581_vm15, %v4962_v6, %v4963_v19  ;;  %v12418_v54 = vunpack.i.l.bf16 %v8297_v1  ;;  %v8534_v42 = vsel %vm614_vm12, %v4982_v25, %v4983_v3 }
 0x357   :  { %2585 = vmatpush.bf16.msra.mxu2 %v2427_v49  ;;  %v8538_v41 = vsel %vm614_vm12, %v4977_v18, %v4978_v26  ;;  %v8542_v49 = vsel %vm614_vm12, %v4978_v26, %v4982_v25  ;;  %v8546_v19 = vsel %vm614_vm12, %v4983_v3, %v4987_v30  ;;  %v12419_v53 = vunpack.i.h.bf16 %v8011_v20 }
 0x358   :  { %v8530_v36 = vsel %vm581_vm15, %v12418_v54, %v4958_v40  ;;  %vm12420_vm8 = vcmp.lt.s32.totalorder %v5798_v39, 41  ;;  %v12421_v3 = vunpack.i.h.bf16 %v7813_v5  ;;  %vm12422_vm10 = vcmp.lt.s32.totalorder %v5798_v39, 42  ;;  %v5031_v51 = vpop.permute.xlu2 %5030 }
 0x359   :  { %v1487_v25 = vsel %vm12420_vm8, %v12419_v53, %v4662_v50  ;;  %v12423_v10 = vunpack.i.h.bf16 %v7809_v7  ;;  %vm12424_vm2 = vmmov %vm12420_vm8  ;;  %v5018_v60 = vunpack.i.h.bf16 %v8502_v9  ;;  %v5017_v56 = vunpack.i.l.bf16 %v8502_v9 }
 0x35a   :  { %v1454_v30 = vsel %vm12422_vm10, %v4657_v33, %v12421_v3  ;;  %2560 = vmatpush.bf16.msrb.mxu3 %v2418_v52  ;;  %v12425_v22 = vunpack.i.h.bf16 %v7983_v15  ;;  %vm12426_vm3 = vmmov %vm12422_vm10  ;;  %v11654_v62 = vunpack.i.l.bf16 %v8431_v47  ;;  %v5033_v24 = vunpack.i.h.bf16 %v5031_v51  ;;  %v4996_v31 = vpop.permute.xlu1 %4995  ;;  %v4991_v7 = vpop.permute.xlu0 %4990 }
 0x35b   :  { %v1486_v43 = vsel %vm12424_vm2, %v4662_v50, %v12423_v10  ;;  %2586 = vmatpush.bf16.msra.mxu2 %v2419_v59  ;;  %v4998_v50 = vunpack.i.h.bf16 %v4996_v31  ;;  %v4997_v53 = vunpack.i.l.bf16 %v4996_v31  ;;  %v4993_v3 = vunpack.i.h.bf16 %v4991_v7 }
 0x35c   :  { %v1455_v5 = vsel %vm12426_vm3, %v12425_v22, %v4657_v33  ;;  %v2411_v54 = vpack.c.bf16 %v1486_v43, %v1454_v30  ;;  %v4992_v10 = vunpack.i.l.bf16 %v4991_v7  ;;  %v8577_v52 = vsel %vm680_vm14, %v5017_v56, %v5018_v60 }
 0x35d   :  { %v2410_v26 = vpack.c.bf16 %v1487_v25, %v1455_v5  ;;  %v12427_v9 = vunpack.i.h.bf16 %v8313_v57  ;;  %v12428_v33 = vunpack.i.l.bf16 %v8313_v57  ;;  %v8589_v25 = vsel %vm680_vm14, %v5033_v24, %v5017_v56 }
 0x35e   :  { %12430 = vst [vmem:[#allocation86_spill] sm:$0xff] %v8589_v25  ;;  %v8593_v30 = vsel %vm647_vm11, %v4997_v53, %v4998_v50  ;;  %v8599_v43 = vsel %vm647_vm11, %v4998_v50, %v11654_v62  ;;  %v8603_v57 = vsel %vm614_vm12, %v4992_v10, %v4993_v3  ;;  %v12432_v22 = vunpack.i.h.bf16 %v8359_v27 }
 0x35f   :  { %2561 = vmatpush.bf16.msrb.mxu3 %v2410_v26  ;;  %2587 = vmatpush.bf16.msra.mxu2 %v2411_v54  ;;  %v8585_v59 = vsel %vm581_vm15, %v12428_v33, %v12427_v9  ;;  %12431 = vst [vmem:[#allocation87_spill] sm:$0xff] %v8603_v57  ;;  %v8619_v26 = vsel %vm614_vm12, %v4993_v3, %v4977_v18  ;;  %v5032_v54 = vunpack.i.l.bf16 %v5031_v51  ;;  %vm12459_vm4 = vcmask 1043456  }
 0x360   :  { %12429 = vst [vmem:[#allocation85_spill] sm:$0xff] %v8585_v59  ;;  %v8609_v56 = vsel %vm614_vm12, %v12432_v22, %v4992_v10  ;;  %v8623_v50 = vpop.permute.xlu2 %5045  ;;  %v11655_v10 = vunpack.i.h.bf16 %v8431_v47  ;;  %vm12467_vm8 = vmmov %vm12459_vm4  ;;  %vm12473_vm2 = vcmp.lt.s32.totalorder %v5798_v39, 127  ;;  %vm12477_vm3 = vcmask 588800  }
 0x361   :  { %12433 = vst [vmem:[#allocation88_spill] sm:$0xff] %v8609_v56  ;;  %v8638_v51 = vsel %vm680_vm14, %v5032_v54, %v5033_v24  ;;  %v12444_v58 = vunpack.i.l.bf16 %v8623_v50  ;;  %vm12468_vm10 = vmmov %vm12459_vm4 }
 0x362   :  { %12434 = vst [vmem:[#allocation89_spill] sm:$0xff] %v8619_v26  ;;  %v5011_v9 = vpop.permute.xlu1 %5010  ;;  %v5006_v33 = vpop.permute.xlu0 %5005 }
 0x363   :  { %v5013_v22 = vunpack.i.h.bf16 %v5011_v9  ;;  %v5012_v45 = vunpack.i.l.bf16 %v5011_v9  ;;  %v5008_v31 = vunpack.i.h.bf16 %v5006_v33  ;;  %v5007_v6 = vunpack.i.l.bf16 %v5006_v33  ;;  %12436 = vst [vmem:[#allocation91_spill] sm:$0xff] %v8638_v51 }
 0x365   :  { %v8630_v18 = vsel %vm647_vm11, %v11655_v10, %v5007_v6  ;;  %v8634_v3 = vsel %vm647_vm11, %v5012_v45, %v5013_v22  ;;  %v8642_v27 = vsel %vm647_vm11, %v5008_v31, %v5012_v45  ;;  %v8648_v33 = vsel %vm647_vm11, %v5013_v22, %v4997_v53 }
 0x366   :  { %12435 = vst [vmem:[#allocation90_spill] sm:$0xff] %v8634_v3  ;;  %v8672_v7 = vsel %vm647_vm11, %v5007_v6, %v5008_v31 }
 0x367   :  { %12437 = vst [vmem:[#allocation92_spill] sm:$0xff] %v8642_v27 }
 0x368   :  { %12438 = vst [vmem:[#allocation93_spill] sm:$0xff] %v8648_v33  ;;  %v8652_v40 = vpop.permute.xlu2 %5060 }
 0x369   :  { %12439 = vst [vmem:[#allocation94_spill] sm:$0xff] %v8672_v7 }
 0x36a   :  { %v5026_v5 = vpop.permute.xlu1 %5025  ;;  %v8654_v1 = vpop.permute.xlu0 %5020 }
 0x36b   :  { %v5028_v24 = vunpack.i.h.bf16 %v5026_v5  ;;  %v5027_v62 = vunpack.i.l.bf16 %v5026_v5  ;;  %v11657_v45 = vunpack.i.h.bf16 %v8654_v1  ;;  %v11656_v10 = vunpack.i.l.bf16 %v8654_v1 }
 0x36c   :  { %v12461_v51 = vunpack.i.h.bf16 %v8654_v1 }
 0x36d   :  { %v8662_v53 = vsel %vm680_vm14, %v5018_v60, %v11656_v10  ;;  %v8668_v22 = vsel %vm680_vm14, %v11657_v45, %v5027_v62  ;;  %v8676_v5 = vsel %vm680_vm14, %v5027_v62, %v5028_v24  ;;  %v8686_v45 = vsel %vm680_vm14, %v5028_v24, %v5032_v54 }
 0x36e   :  { %12440 = vst [vmem:[#allocation95_spill] sm:$0xff] %v8676_v5  ;;  %v5048_v10 = vunpack.i.h.bf16 %v8623_v50  ;;  %v2522_v24 = vunpack.c.l.b16 %v8715_v29 }
 0x36f   :  { %12441 = vst [vmem:[#allocation96_spill] sm:$0xff] %v8686_v45 }
 0x370   :  { %v8690_v31 = vpop.permute.xlu2 %5075 }
 0x372   :  { %v8692_v62 = vpop.permute.xlu1 %5040  ;;  %v8694_v15 = vpop.permute.xlu0 %5035 }
 0x373   :  { %v12452_v32 = vunpack.i.l.bf16 %v8694_v15  ;;  %v5042_v59 = vunpack.i.l.bf16 %v8692_v62 }
 0x378   :  { %v8696_v9 = vpop.permute.xlu2 %5090 }
 0x379   :  { %12442 = vst [vmem:[#allocation97_spill] sm:$0xff] %v8696_v9 }
 0x37a   :  { %v8698_v20 = vpop.permute.xlu1 %5055  ;;  %v5051_v60 = vpop.permute.xlu0 %5050 }
 0x37b   :  { %v5052_v14 = vunpack.i.l.bf16 %v5051_v60  ;;  %v5053_v6 = vunpack.i.h.bf16 %v5051_v60 }
 0x37d   :  { %v8703_v54 = vsel %vm713_vm9, %v5048_v10, %v5052_v14  ;;  %v8728_v34 = vsel %vm713_vm9, %v5052_v14, %v5053_v6 }
 0x37e   :  { %12443 = vst [vmem:[#allocation98_spill] sm:$0xff] %v8703_v54 }
 0x37f   :  { %12446 = vst [vmem:[#allocation100_spill] sm:$0xff] %v8728_v34 }
 0x380   :  { %v8706_v37 = vpop.permute.xlu2 %5105 }
 0x381   :  { %v12457_v7 = vunpack.i.l.bf16 %v8706_v37 }
 0x382   :  { %v5071_v26 = vpop.permute.xlu1 %5070  ;;  %v8708_v0 = vpop.permute.xlu0 %5065 }
 0x383   :  { %v5073_v17 = vunpack.i.h.bf16 %v5071_v26  ;;  %v5072_v33 = vunpack.i.l.bf16 %v5071_v26  ;;  %v5068_v25 = vunpack.i.h.bf16 %v8708_v0  ;;  %v8724_v26 = vsel %vm713_vm9, %v12444_v58, %v5048_v10 }
 0x384   :  { %12445 = vst [vmem:[#allocation99_spill] sm:$0xff] %v8724_v26  ;;  %v12448_v2 = vunpack.i.l.bf16 %v8708_v0  ;;  %v8744_v58 = vpack.c.b16 %v2522_v24, %v2522_v24  ;;  %v5108_v10 = vunpack.i.h.bf16 %v8706_v37  ;;  %v11688_v24 = vunpack.i.l.bf16 %v8696_v9 }
 0x385   :  { %v8732_v38 = vsel %vm746_vm13, %v5072_v33, %v5073_v17  ;;  %v8742_v56 = vsel %vm746_vm13, %v5068_v25, %v5072_v33 }
 0x386   :  { %12447 = vst [vmem:[#allocation101_spill] sm:$0xff] %v8732_v38  ;;  %v8738_v60 = vsel %vm746_vm13, %v12448_v2, %v5068_v25  ;;  %v8756_v2 = vsel %vm713_vm9, %v5053_v6, %v12452_v32  ;;  %v12454_v25 = vunpack.i.l.bf16 %v8698_v20  ;;  %2562 = vmatmul.bf16.vlgmr.msrb.gmra.mxu3 %v8744_v58  ;;  %2588 = vmatmul.bf16.vlgmr.msra.gmra.mxu2 %v8744_v58 }
 0x387   :  { %12449 = vst [vmem:[#allocation102_spill] sm:$0xff] %v8738_v60  ;;  %v8795_v5 = vsel %vm812_vm1, %v12457_v7, %v5108_v10 }
 0x388   :  { %12450 = vst [vmem:[#allocation103_spill] sm:$0xff] %v8742_v56  ;;  %v8762_v33 = vsel %vm746_vm13, %v5073_v17, %v12454_v25  ;;  %v8768_v35 = vpop.permute.xlu2 %5120 }
 0x389   :  { %12451 = vst [vmem:[#allocation104_spill] sm:$0xff] %v8744_v58  ;;  %v11682_v6 = vunpack.i.h.bf16 %v8768_v35  ;;  %v5122_v14 = vunpack.i.l.bf16 %v8768_v35  ;;  %v12465_v58 = vunpack.i.l.bf16 %v8431_v47 }
 0x38a   :  { %12453 = vst [vmem:[#allocation105_spill] sm:$0xff] %v8756_v2  ;;  %v8774_v27 = vpop.permute.xlu1 %5085  ;;  %v8776_v17 = vpop.permute.xlu0 %5080 }
 0x38b   :  { %12455 = vst [vmem:[#allocation106_spill] sm:$0xff] %v8762_v33  ;;  %v5088_v25 = vunpack.i.h.bf16 %v8774_v27  ;;  %v11683_v45 = vunpack.i.l.bf16 %v8774_v27  ;;  %v2196_v2 = vsel %vm845_vm6, %v5122_v14, %v11682_v6  ;;  %v5082_v56 = vunpack.i.l.bf16 %v8776_v17 }
 0x38c   :  { %v2508_v32 = vpack.c.bf16 %v2196_v2, %v2196_v2  ;;  %12458 = vst [vmem:[#allocation108_spill] sm:$0xff] %v8795_v5  ;;  %v12460_v5 = vunpack.i.h.bf16 %v8692_v62 }
 0x38d   :  { %v8789_v33 = vsel %vm779_vm0, %v11683_v45, %v5088_v25  ;;  %v8801_v54 = vsel %vm779_vm0, %v5088_v25, %v11688_v24  ;;  %v11694_v45 = vunpack.i.h.bf16 %v8776_v17  ;;  %v11698_v24 = vunpack.i.h.bf16 %v8652_v40 }
 0x38e   :  { %12456 = vst [vmem:[#allocation107_spill] sm:$0xff] %v8789_v33  ;;  %v2537_v2 = vsel %vm12459_vm4, %v2508_v32, 0  ;;  %v2068_v57 = vsel %vm713_vm9, %v5042_v59, %v12460_v5 }
 0x38f   :  { %2622 = vmatpush.bf16.msra.mxu3 %v2537_v2  ;;  %v5062_v2 = vunpack.i.l.bf16 %v8652_v40  ;;  %v2132_v6 = vsel %vm779_vm0, %v5082_v56, %v11694_v45  ;;  %v12462_v45 = vunpack.i.l.bf16 %v8654_v1 }
 0x391   :  { %v2100_v3 = vsel %vm746_vm13, %v5062_v2, %v11698_v24  ;;  %v2036_v34 = vsel %vm680_vm14, %v12462_v45, %v12461_v51  ;;  %v12464_v24 = vunpack.i.h.bf16 %v8431_v47  ;;  %v5058_v45 = vunpack.i.h.bf16 %v8698_v20 }
 0x392   :  { %v8808_v26 = vpop.permute.xlu1 %5100  ;;  %v8810_v7 = vpop.permute.xlu0 %5095 }
 0x393   :  { %v11696_v25 = vunpack.i.h.bf16 %v8808_v26  ;;  %v5102_v32 = vunpack.i.l.bf16 %v8808_v26  ;;  %v2004_v1 = vsel %vm647_vm11, %v12465_v58, %v12464_v24  ;;  %v5098_v51 = vunpack.i.h.bf16 %v8810_v7 }
 0x394   :  { %v2484_v9 = vpack.c.bf16 %v2036_v34, %v2004_v1  ;;  %v11705_v24 = vunpack.i.l.bf16 %v8690_v31 }
 0x395   :  { %v2164_v60 = vsel %vm812_vm1, %v5102_v32, %v11696_v25 }
 0x396   :  { %v2500_v33 = vpack.c.bf16 %v2164_v60, %v2132_v6  ;;  %v2492_v6 = vpack.c.bf16 %v2100_v3, %v2068_v57  ;;  %v5078_v57 = vunpack.i.h.bf16 %v8690_v31 }
 0x398   :  { %2623 = vmatpush.bf16.msra.mxu3 %v2500_v33 }
 0x39a   :  { %v8840_v25 = vpop.permute.xlu1 %5115  ;;  %v8842_v60 = vpop.permute.xlu0 %5110 }
 0x39b   :  { %12463 = vst [vmem:[#allocation109_spill] sm:$0xff] %v8840_v25  ;;  %v5118_v5 = vunpack.i.h.bf16 %v8840_v25  ;;  %v11703_v33 = vunpack.i.l.bf16 %v8840_v25  ;;  %v12466_v47 = vunpack.i.l.bf16 %v8842_v60  ;;  %v12469_v25 = vunpack.i.l.bf16 %v8810_v7 }
 0x39c   :  { %2624 = vmatpush.bf16.msra.mxu3 %v2492_v6 }
 0x39d   :  { %v2198_v3 = vsel %vm845_vm6, %v11703_v33, %v5118_v5  ;;  %v2197_v38 = vsel %vm845_vm6, %v5118_v5, %v5122_v14  ;;  %v8866_v58 = vsel %vm812_vm1, %v5108_v10, %v12466_v47  ;;  %v2523_v33 = vunpack.c.h.b16 %v8715_v29 }
 0x39e   :  { %v2506_v6 = vpack.c.bf16 %v2198_v3, %v2198_v3  ;;  %v2507_v34 = vpack.c.bf16 %v2197_v38, %v2197_v38  ;;  %v2166_v10 = vsel %vm812_vm1, %v12469_v25, %v5098_v51  ;;  %v2165_v38 = vsel %vm812_vm1, %v5098_v51, %v5102_v32 }
 0x39f   :  { %v4908_v3 = vunpack.i.h.bf16 %v8281_v16  ;;  %v5038_v29 = vunpack.i.h.bf16 %v8694_v15  ;;  %v2133_v25 = vsel %vm779_vm0, %v5078_v57, %v5082_v56  ;;  %v8893_v1 = vpack.c.b16 %v2523_v33, %v2523_v33 }
 0x3a0   :  { %2625 = vmatpush.bf16.msra.mxu3 %v2484_v9  ;;  %v2531_v14 = vsel %vm12467_vm8, %v2506_v6, 0  ;;  %v2534_v5 = vsel %vm12468_vm10, %v2507_v34, 0  ;;  %v2134_v6 = vsel %vm779_vm0, %v11705_v24, %v5078_v57  ;;  %v2499_v34 = vpack.c.bf16 %v2165_v38, %v2133_v25 }
 0x3a1   :  { %2570 = vmatpush.bf16.msra.mxu1 %v2531_v14  ;;  %2596 = vmatpush.bf16.msrb.mxu0 %v2534_v5  ;;  %v2498_v51 = vpack.c.bf16 %v2166_v10, %v2134_v6  ;;  %v12470_v14 = vpack.c.bf16 %v8534_v42, %v8524_v12  ;;  %v12471_v5 = vunpack.i.l.bf16 %v8698_v20  ;;  %v2101_v24 = vsel %vm746_vm13, %v5058_v45, %v5062_v2 }
 0x3a2   :  { %v8884_v9 = vpop.permute.xlu0 %5125  ;;  %v4887_v56 = vunpack.i.l.bf16 %v8249_v8  ;;  %v12472_v33 = vunpack.i.l.bf16 %v8281_v16  ;;  %v12474_v20 = vunpack.i.h.bf16 %v8768_v35  ;;  %v12475_v2 = vpack.c.bf16 %v8396_v63, %v8376_v4 }
 0x3a3   :  { %v11708_v32 = vunpack.i.l.bf16 %v8884_v9  ;;  %v2102_v47 = vsel %vm746_vm13, %v12471_v5, %v5058_v45  ;;  %v12476_v45 = vunpack.i.l.bf16 %v8694_v15  ;;  %v2069_v10 = vsel %vm713_vm9, %v5038_v29, %v5042_v59  ;;  %v12479_v5 = vld [vmem:[#allocation60_spill] sm:$0xff] }
 0x3a4   :  { %2626 = vmatpush.bf16.msra.mxu3 %v12470_v14  ;;  %v1842_v12 = vsel %vm12473_vm2, %v12472_v33, %v4908_v3  ;;  %v4883_v6 = vunpack.i.h.bf16 %v8166_v46  ;;  %v4863_v35 = vunpack.i.h.bf16 %v8201_v28  ;;  %v4867_v4 = vunpack.i.l.bf16 %v8131_v55  ;;  %v12483_v33 = vld [vmem:[#allocation69_spill] sm:$0xff] }
 0x3a5   :  { %2571 = vmatpush.bf16.msra.mxu1 %v2498_v51  ;;  %2597 = vmatpush.bf16.msrb.mxu0 %v2499_v34  ;;  %v2195_v42 = vsel %vm845_vm6, %v12474_v20, %v11708_v32  ;;  %v2070_v57 = vsel %vm713_vm9, %v12476_v45, %v5038_v29  ;;  %v2491_v51 = vpack.c.bf16 %v2101_v24, %v2069_v10  ;;  %v12478_v34 = vld [vmem:[#allocation48_spill] sm:$0xff]  ;;  %v4843_v59 = vunpack.i.h.bf16 %v12479_v5 }
 0x3a6   :  { %v2509_v38 = vpack.c.bf16 %v2195_v42, %v2195_v42  ;;  %v2490_v25 = vpack.c.bf16 %v2102_v47, %v2070_v57  ;;  %v2462_v15 = vpack.c.bf16 %v1842_v12, %v7741_v61  ;;  %v4847_v14 = vunpack.i.l.bf16 %v12478_v34  ;;  %v12487_v57 = vld [vmem:[#allocation58_spill] sm:$0xff] }
 0x3a7   :  { %4132 = vmatmul.msk.bf16.vlgmr.msra.gmra.mxu3 %vm12477_vm3, %v8893_v1  ;;  %vm12480_vm8 = vcmp.lt.s32.totalorder %v5798_v39, 1  ;;  %v12481_v47 = vunpack.i.l.bf16 %v8706_v37  ;;  %v12482_v29 = vunpack.i.h.bf16 %v8808_v26  ;;  %v11711_v12 = vunpack.i.l.bf16 %v12483_v33 }
 0x3a8   :  { %2658 = vmatpush.bf16.msrb.mxu3 %v12475_v2  ;;  %v2540_v63 = vsel %vm12459_vm4, %v2509_v38, 0  ;;  %v1803_v24 = vsel %vm12480_vm8, %v4883_v6, %v4887_v56  ;;  %vm12484_vm10 = vcmp.lt.s32.totalorder %v5798_v39, 2  ;;  %v12485_v42 = vunpack.i.l.bf16 %v8774_v27  ;;  %v12488_v38 = vld [vmem:[#allocation29_spill] sm:$0xff] }
 0x3a9   :  { %2572 = vmatpush.bf16.msra.mxu1 %v2490_v25  ;;  %2598 = vmatpush.bf16.msrb.mxu0 %v2491_v51  ;;  %v2163_v61 = vsel %vm812_vm1, %v12482_v29, %v12481_v47  ;;  %v1771_v20 = vsel %vm12484_vm10, %v4863_v35, %v4867_v4  ;;  %v12486_v37 = vunpack.i.h.bf16 %v8776_v17  ;;  %v4743_v10 = vunpack.i.h.bf16 %v12487_v57  ;;  %v12489_v51 = vld [vmem:[#allocation22_spill] sm:$0xff] }
 0x3aa   :  { %2648 = vmatpush.bf16.msrb.mxu2 %v2540_v63  ;;  %v2454_v2 = vpack.c.bf16 %v1803_v24, %v1771_v20  ;;  %v11709_v25 = vunpack.i.l.bf16 %v12488_v38  ;;  %v12490_v63 = vpack.c.bf16 %v8577_v52, %v8593_v30  ;;  %v12491_v27 = vpack.c.bf16 %v8662_v53, %v8599_v43  ;;  %v12495_v30 = vld [vmem:[#allocation72_spill] sm:$0xff]  ;;  %v12498_v20 = vld [vmem:[#allocation30_spill] sm:$0xff] }
 0x3ab   :  { %v2131_v26 = vsel %vm779_vm0, %v12486_v37, %v12485_v42  ;;  %vm12492_vm2 = vcmp.lt.s32.totalorder %v5798_v39, 18  ;;  %v12493_v24 = vunpack.i.l.bf16 %v8708_v0  ;;  %v12494_v47 = vunpack.i.h.bf16 %v8652_v40  ;;  %v12496_v43 = vld [vmem:[#allocation8_spill] sm:$0xff] }
 0x3ac   :  { %2659 = vmatpush.bf16.msrb.mxu3 %v2462_v15  ;;  %v2501_v45 = vpack.c.bf16 %v2163_v61, %v2131_v26  ;;  %v4903_v15 = vunpack.i.h.bf16 %v12489_v51  ;;  %v1739_v17 = vsel %vm12492_vm2, %v4843_v59, %v4847_v14  ;;  %v4733_v29 = vunpack.i.h.bf16 %v12495_v30 }
 0x3ad   :  { %2573 = vmatpush.bf16.msra.mxu1 %v12490_v63  ;;  %2599 = vmatpush.bf16.msrb.mxu0 %v12491_v27  ;;  %v2099_v52 = vsel %vm746_vm13, %v12494_v47, %v12493_v24  ;;  %v11707_v53 = vunpack.i.l.bf16 %v12496_v43  ;;  %vm12497_vm3 = vcmp.lt.s32.totalorder %v5798_v39, 19  ;;  %v4738_v42 = vunpack.i.h.bf16 %v12498_v20 }
 0x3ae   :  { %2649 = vmatpush.bf16.msrb.mxu2 %v2501_v45  ;;  %v1707_v61 = vsel %vm12497_vm3, %v4743_v10, %v11711_v12  ;;  %v12499_v0 = vunpack.i.l.bf16 %v8623_v50  ;;  %v12500_v40 = vunpack.i.h.bf16 %v8692_v62  ;;  %v12502_v63 = vpack.c.bf16 %v8538_v41, %v8530_v36  ;;  %v12507_v36 = vld [vmem:[#allocation32_spill] sm:$0xff]  ;;  %v12508_v41 = vld [vmem:[#allocation31_spill] sm:$0xff] }
 0x3af   :  { %v2446_v37 = vpack.c.bf16 %v1739_v17, %v1707_v61  ;;  %v12503_v27 = vpack.c.bf16 %v8542_v49, %v8458_v13  ;;  %vm12504_vm4 = vcmp.lt.s32.totalorder %v5798_v39, 21  ;;  %v12505_v62 = vunpack.i.l.bf16 %v12489_v51  ;;  %v12534_v12 = vld [vmem:[#allocation71_spill] sm:$0xff] }
 0x3b0   :  { %2660 = vmatpush.bf16.msrb.mxu3 %v2454_v2  ;;  %v2067_v26 = vsel %vm713_vm9, %v12500_v40, %v12499_v0  ;;  %v12501_v2 = vld [vmem:[#allocation51_spill] sm:$0xff]  ;;  %v1643_v50 = vsel %vm12504_vm4, %v4733_v29, %v11709_v25  ;;  %vm12506_vm8 = vcmp.lt.s32.totalorder %v5798_v39, 127  ;;  %v12509_v47 = vpack.c.bf16 %v12507_v36, %v12508_v41  ;;  %v12520_v36 = vld [vmem:[#allocation61_spill] sm:$0xff] }
 0x3b1   :  { %v11706_v45 = vunpack.i.l.bf16 %v12501_v2  ;;  %2574 = vmatpush.bf16.msra.mxu1 %v12502_v63  ;;  %2600 = vmatpush.bf16.msrb.mxu0 %v12503_v27  ;;  %v2493_v24 = vpack.c.bf16 %v2099_v52, %v2067_v26  ;;  %v1844_v17 = vsel %vm12506_vm8, %v12505_v62, %v4903_v15  ;;  %v12510_v13 = vunpack.i.l.bf16 %v8281_v16  ;;  %vm12511_vm10 = vmmov %vm12506_vm8  ;;  %v12512_v52 = vld [vmem:[#allocation63_spill] sm:$0xff]  ;;  %v9031_v26 = vpop.permute.xlu1 %5130  ;;  %v12517_v63 = vld [vmem:[#allocation53_spill] sm:$0xff] }
 0x3b2   :  { %v11712_v61 = vunpack.i.h.bf16 %v12512_v52  ;;  %v12513_v0 = vld [vmem:[#allocation35_spill] sm:$0xff]  ;;  %v12514_v51 = vpack.c.bf16 %v8406_v21, %v8302_v44  ;;  %vm12515_vm2 = vcmask 588800   ;;  %v2460_v44 = vpack.c.bf16 %v1844_v17, %v12517_v63  ;;  %v12518_v21 = vld [vmem:[#allocation44_spill] sm:$0xff] }
 0x3b3   :  { %v1843_v49 = vsel %vm12511_vm10, %v4903_v15, %v12510_v13  ;;  %v11710_v40 = vunpack.i.l.bf16 %v12513_v0  ;;  %2650 = vmatpush.bf16.msrb.mxu2 %v2493_v24  ;;  %vm12516_vm3 = vmmov %vm12515_vm2  ;;  %v4723_v27 = vunpack.i.h.bf16 %v12518_v21  ;;  %v12519_v24 = vld [vmem:[#allocation43_spill] sm:$0xff]  ;;  %v4129_v13 = vld [vmem:[%s11334_s2 + $0x8] sm:$0xff]  ;;  %v12522_v17 = vunpack.i.l.bf16 %v8201_v28 }
 0x3b4   :  { %2661 = vmatpush.bf16.msrb.mxu3 %v2446_v37  ;;  %v1675_v37 = vsel %vm309_vm7, %v4738_v42, %v11707_v53  ;;  %4130 = vmatmul.msk.bf16.vlgmr.msra.gmra.mxu1 %vm12515_vm2, %v8893_v1  ;;  %v11713_v62 = vunpack.i.l.bf16 %v12519_v24  ;;  %v2461_v41 = vpack.c.bf16 %v1843_v49, %v12520_v36  ;;  %vm12523_vm4 = vcmp.lt.s32.totalorder %v5798_v39, 2 }
 0x3b5   :  { %2606 = vmatpush.bf16.msrb.mxu1 %v12509_v47  ;;  %2632 = vmatpush.bf16.msra.mxu0 %v12514_v51  ;;  %v2438_v15 = vpack.c.bf16 %v1675_v37, %v1643_v50  ;;  %v1611_v47 = vsel %vm243_vm5, %v11712_v61, %v11706_v45  ;;  %v12521_v50 = vld [vmem:[#allocation14_spill] sm:$0xff]  ;;  %v1772_v49 = vsel %vm12523_vm4, %v12522_v17, %v4863_v35  ;;  %v5133_v36 = vunpack.i.h.bf16 %v9031_v26  ;;  %v12535_v61 = vld [vmem:[#allocation28_spill] sm:$0xff] }
 0x3b6   :  { %4131 = vmatmul.msk.bf16.vlgmr.msrb.gmra.mxu0 %vm12516_vm3, %v8893_v1  ;;  %v4718_v51 = vunpack.i.h.bf16 %v12521_v50  ;;  %v12524_v37 = vld [vmem:[#allocation62_spill] sm:$0xff]  ;;  %v5132_v45 = vunpack.i.l.bf16 %v9031_v26  ;;  %v12525_v53 = vpack.c.bf16 %v8668_v22, %v8630_v18  ;;  %vm12526_vm8 = vcmp.lt.s32.totalorder %v5798_v39, 38  ;;  %2518 = vperm.xlu2 %5134, %v4129_v13   ;;  %v12530_v18 = vld [vmem:[#allocation15_spill] sm:$0xff] }
 0x3b7   :  { %v4757_v63 = vunpack.i.l.bf16 %v12524_v37  ;;  %v1579_v28 = vsel %vm12526_vm8, %v4723_v27, %v11710_v40  ;;  %v12528_v17 = vunpack.i.l.bf16 %v8166_v46  ;;  %vm12529_vm10 = vcmp.lt.s32.totalorder %v5798_v39, 1 }
 0x3b8   :  { %2662 = vmatpush.bf16.msrb.mxu3 %v2438_v15  ;;  %2651 = vmatpush.bf16.msrb.mxu2 %v12525_v53  ;;  %v12527_v15 = vld [vmem:[#allocation77_spill] sm:$0xff]  ;;  %v4747_v22 = vunpack.i.l.bf16 %v12530_v18  ;;  %v12531_v53 = vld [vmem:[#allocation50_spill] sm:$0xff]  ;;  %vm12532_vm2 = vcmp.lt.s32.totalorder %v5798_v39, 39  ;;  %v4752_v46 = vunpack.i.l.bf16 %v12534_v12  ;;  %vm12539_vm3 = vcmp.lt.s32.totalorder %v5798_v39, 18 }
 0x3b9   :  { %2607 = vmatpush.bf16.msrb.mxu1 %v2460_v44  ;;  %2633 = vmatpush.bf16.msra.mxu0 %v2461_v41  ;;  %v4713_v35 = vunpack.i.h.bf16 %v12527_v15  ;;  %v2430_v44 = vpack.c.bf16 %v1611_v47, %v1579_v28  ;;  %v1804_v41 = vsel %vm12529_vm10, %v12528_v17, %v4883_v6  ;;  %v4912_v32 = vunpack.i.l.bf16 %v12531_v53  ;;  %v12533_v28 = vld [vmem:[#allocation42_spill] sm:$0xff]  ;;  %v12536_v6 = vld [vmem:[#allocation27_spill] sm:$0xff] }
 0x3ba   :  { %v2453_v25 = vpack.c.bf16 %v1804_v41, %v1772_v49  ;;  %v1547_v47 = vsel %vm12532_vm2, %v4718_v51, %v11713_v62  ;;  %v4703_v40 = vunpack.i.h.bf16 %v12533_v28  ;;  %v12537_v13 = vpack.c.bf16 %v12535_v61, %v12536_v6 }
 0x3bb   :  { %v12538_v49 = vunpack.i.l.bf16 %v12479_v5  ;;  %v4888_v41 = vunpack.i.h.bf16 %v8249_v8  ;;  %v12540_v62 = vpack.c.bf16 %v8546_v19, %v8462_v11  ;;  %vm12541_vm4 = vcmp.lt.s32.totalorder %v5798_v39, 40 }
 0x3bc   :  { %2663 = vmatpush.bf16.msrb.mxu3 %v2430_v44  ;;  %v1515_v61 = vsel %vm12541_vm4, %v4713_v35, %v4757_v63  ;;  %vm12542_vm8 = vcmp.lt.s32.totalorder %v5798_v39, 127  ;;  %v2192_v11 = vsel %vm845_vm6, %v5132_v45, %v5133_v36  ;;  %v12543_v19 = vpack.c.bf16 %v8392_v23, %v8338_v48 }
 0x3bd   :  { %2608 = vmatpush.bf16.msrb.mxu1 %v12537_v13  ;;  %v1740_v17 = vsel %vm12539_vm3, %v12538_v49, %v4843_v59  ;;  %2634 = vmatpush.bf16.msra.mxu0 %v2453_v25  ;;  %v1841_v5 = vsel %vm12542_vm8, %v4908_v3, %v4912_v32  ;;  %v2422_v59 = vpack.c.bf16 %v1547_v47, %v1515_v61  ;;  %v12544_v25 = vunpack.i.l.bf16 %v12487_v57  ;;  %v12546_v3 = vld [vmem:[#allocation74_spill] sm:$0xff]  ;;  %v12548_v47 = vld [vmem:[#allocation36_spill] sm:$0xff]  ;;  %v12549_v57 = vld [vmem:[#allocation59_spill] sm:$0xff] }
 0x3be   :  { %2652 = vmatpush.bf16.msrb.mxu2 %v12540_v62  ;;  %vm12545_vm10 = vcmp.lt.s32.totalorder %v5798_v39, 19  ;;  %v4708_v62 = vunpack.i.h.bf16 %v12546_v3  ;;  %v4868_v44 = vunpack.i.h.bf16 %v8131_v55  ;;  %vm12547_vm2 = vcmp.lt.s32.totalorder %v5798_v39, 42  ;;  %v12676_v55 = vld [vmem:[#allocation56_spill] sm:$0xff] }
 0x3bf   :  { %v1708_v16 = vsel %vm12545_vm10, %v12544_v25, %v4743_v10  ;;  %v1451_v48 = vsel %vm12547_vm2, %v4703_v40, %v4747_v22  ;;  %v5113_v23 = vunpack.i.h.bf16 %v8842_v60  ;;  %v12550_v13 = vpack.c.bf16 %v12548_v47, %v12549_v57  ;;  %v12551_v10 = vld [vmem:[#allocation57_spill] sm:$0xff] }
 0x3c0   :  { %v2445_v6 = vpack.c.bf16 %v1740_v17, %v1708_v16  ;;  %2664 = vmatpush.bf16.msrb.mxu3 %v2422_v59  ;;  %v2463_v49 = vpack.c.bf16 %v1841_v5, %v12551_v10  ;;  %v12552_v17 = vunpack.i.l.bf16 %v12498_v20  ;;  %v4848_v25 = vunpack.i.h.bf16 %v12478_v34  ;;  %v12556_v20 = vld [vmem:[#allocation97_spill] sm:$0xff] }
 0x3c1   :  { %2609 = vmatpush.bf16.msrb.mxu1 %v12550_v13  ;;  %vm12553_vm3 = vcmp.lt.s32.totalorder %v5798_v39, 41  ;;  %vm12554_vm4 = vcmp.lt.s32.totalorder %v5798_v39, 1  ;;  %vm12555_vm8 = vcmask 588800   ;;  %v12557_v16 = vunpack.i.l.bf16 %v12495_v30  ;;  %v12560_v13 = vld [vmem:[#allocation25_spill] sm:$0xff] }
 0x3c2   :  { %2684 = vmatpush.bf16.msra.mxu2 %v12543_v19  ;;  %v1676_v61 = vsel %vm309_vm7, %v12552_v17, %v4738_v42  ;;  %v2512_v19 = vpack.c.bf16 %v2192_v11, %v2192_v11  ;;  %2635 = vmatpush.bf16.msra.mxu0 %v2445_v6  ;;  %v1483_v59 = vsel %vm12553_vm3, %v4708_v62, %v4752_v46  ;;  %v5093_v42 = vunpack.i.h.bf16 %v12556_v20 }
 0x3c3   :  { %v1802_v5 = vsel %vm12554_vm4, %v4887_v56, %v4888_v41  ;;  %4133 = vmatmul.msk.bf16.vlgmr.msrb.gmra.mxu2 %vm12555_vm8, %v8893_v1  ;;  %v2414_v11 = vpack.c.bf16 %v1483_v59, %v1451_v48  ;;  %vm12558_vm10 = vcmp.lt.s32.totalorder %v5798_v39, 21  ;;  %v4828_v47 = vunpack.i.h.bf16 %v12483_v33  ;;  %v12561_v48 = vld [vmem:[#allocation26_spill] sm:$0xff] }
 0x3c4   :  { %v1644_v6 = vsel %vm12558_vm10, %v12557_v16, %v4733_v29  ;;  %vm12559_vm2 = vcmp.lt.s32.totalorder %v5798_v39, 2  ;;  %v12562_v10 = vpack.c.bf16 %v12560_v13, %v12561_v48  ;;  %vm12563_vm3 = vcmask 1043456  }
 0x3c5   :  { %v2437_v57 = vpack.c.bf16 %v1676_v61, %v1644_v6  ;;  %v1770_v56 = vsel %vm12559_vm2, %v4867_v4, %v4868_v44  ;;  %2665 = vmatpush.bf16.msrb.mxu3 %v2414_v11  ;;  %v2549_v30 = vsel %vm12563_vm3, %v2512_v19, 0  ;;  %v12564_v29 = vunpack.i.l.bf16 %v12518_v21 }
 0x3c6   :  { %2685 = vmatpush.bf16.msra.mxu2 %v2463_v49  ;;  %2610 = vmatpush.bf16.msrb.mxu1 %v12562_v10  ;;  %v2455_v49 = vpack.c.bf16 %v1802_v5, %v1770_v56  ;;  %vm12565_vm4 = vcmp.lt.s32.totalorder %v5798_v39, 38  ;;  %v12566_v61 = vunpack.i.l.bf16 %v8842_v60  ;;  %v4778_v59 = vunpack.i.h.bf16 %v12488_v38  ;;  %v12574_v10 = vld [vmem:[#allocation76_spill] sm:$0xff] }
 0x3c7   :  { %v1580_v17 = vsel %vm12565_vm4, %v12564_v29, %v4723_v27  ;;  %2636 = vmatpush.bf16.msra.mxu0 %v2437_v57  ;;  %vm12567_vm8 = vcmp.lt.s32.totalorder %v5798_v39, 18  ;;  %v5128_v27 = vunpack.i.h.bf16 %v8884_v9  ;;  %v12568_v19 = vunpack.i.h.bf16 %v12512_v52 }
 0x3c8   :  { %v2160_v4 = vsel %vm812_vm1, %v12566_v61, %v5113_v23  ;;  %v1738_v21 = vsel %vm12567_vm8, %v4847_v14, %v4848_v25  ;;  %v12569_v5 = vunpack.i.l.bf16 %v12512_v52  ;;  %v12570_v16 = vunpack.i.l.bf16 %v12556_v20  ;;  %v12571_v14 = vld [vmem:[#allocation104_spill] sm:$0xff] }
 0x3c9   :  { %2726 = vmatpush.bf16.msra.mxu3 %v2549_v30  ;;  %v4783_v57 = vunpack.i.h.bf16 %v12496_v43  ;;  %v12572_v52 = vunpack.i.l.bf16 %v12483_v33  ;;  %vm12573_vm10 = vcmp.lt.s32.totalorder %v5798_v39, 19  ;;  %v12575_v30 = vld [vmem:[#allocation41_spill] sm:$0xff]  ;;  %v12577_v61 = vunpack.i.l.bf16 %v12521_v50  ;;  %v12684_v33 = vld [vmem:[#allocation46_spill] sm:$0xff] }
 0x3ca   :  { %2686 = vmatpush.bf16.msra.mxu2 %v2455_v49  ;;  %v1612_v11 = vsel %vm243_vm5, %v12569_v5, %v12568_v19  ;;  %v2128_v6 = vsel %vm779_vm0, %v12570_v16, %v5093_v42  ;;  %2666 = vmatmul.bf16.vlgmr.msrb.gmra.mxu3 %v12571_v14  ;;  %v12576_v49 = vpack.c.bf16 %v12574_v10, %v12575_v30  ;;  %vm12578_vm2 = vcmp.lt.s32.totalorder %v5798_v39, 39 }
 0x3cb   :  { %v2429_v56 = vpack.c.bf16 %v1612_v11, %v1580_v17  ;;  %v2504_v13 = vpack.c.bf16 %v2160_v4, %v2128_v6  ;;  %v1706_v48 = vsel %vm12573_vm10, %v12572_v52, %v4828_v47  ;;  %v1548_v17 = vsel %vm12578_vm2, %v12577_v61, %v4718_v51  ;;  %v12591_v61 = vld [vmem:[#allocation100_spill] sm:$0xff] }
 0x3cc   :  { %2611 = vmatpush.bf16.msrb.mxu1 %v12576_v49  ;;  %v2447_v29 = vpack.c.bf16 %v1738_v21, %v1706_v48  ;;  %v4773_v4 = vunpack.i.h.bf16 %v12501_v2  ;;  %v12579_v19 = vunpack.i.l.bf16 %v12488_v38  ;;  %vm12580_vm3 = vcmp.lt.s32.totalorder %v5798_v39, 21 }
 0x3cd   :  { %2637 = vmatpush.bf16.msra.mxu0 %v2429_v56  ;;  %2727 = vmatpush.bf16.msra.mxu3 %v2504_v13  ;;  %v12581_v21 = vunpack.i.l.bf16 %v12527_v15  ;;  %vm12582_vm4 = vcmp.lt.s32.totalorder %v5798_v39, 40  ;;  %v12583_v51 = vunpack.i.l.bf16 %v8884_v9  ;;  %v4768_v16 = vunpack.i.h.bf16 %v12513_v0  ;;  %v12586_v9 = vld [vmem:[#allocation70_spill] sm:$0xff] }
 0x3ce   :  { %v1642_v5 = vsel %vm12580_vm3, %v12579_v19, %v4778_v59  ;;  %2687 = vmatpush.bf16.msra.mxu2 %v2447_v29  ;;  %v12584_v56 = vunpack.i.l.bf16 %v12496_v43  ;;  %v2193_v15 = vsel %vm845_vm6, %v5128_v27, %v5132_v45  ;;  %v12588_v10 = vunpack.i.l.bf16 %v12546_v3  ;;  %v12590_v29 = vld [vmem:[#allocation101_spill] sm:$0xff] }
 0x3cf   :  { %v1516_v50 = vsel %vm12582_vm4, %v12581_v21, %v4713_v35  ;;  %v2194_v11 = vsel %vm845_vm6, %v12583_v51, %v5128_v27  ;;  %v12585_v35 = vld [vmem:[#allocation65_spill] sm:$0xff]  ;;  %vm12589_vm8 = vcmp.lt.s32.totalorder %v5798_v39, 41  ;;  %v4763_v49 = vunpack.i.h.bf16 %v12519_v24 }
 0x3d0   :  { %v2421_v6 = vpack.c.bf16 %v1548_v17, %v1516_v50  ;;  %v1674_v13 = vsel %vm309_vm7, %v12584_v56, %v4783_v57  ;;  %v12587_v52 = vpack.c.bf16 %v12585_v35, %v12586_v9  ;;  %v1484_v30 = vsel %vm12589_vm8, %v12588_v10, %v4708_v62  ;;  %v12599_v56 = vld [vmem:[#allocation54_spill] sm:$0xff]  ;;  %v12687_v43 = vld [vmem:[#allocation73_spill] sm:$0xff] }
 0x3d1   :  { %v2439_v48 = vpack.c.bf16 %v1674_v13, %v1642_v5  ;;  %v12592_v17 = vpack.c.bf16 %v12590_v29, %v12591_v61  ;;  %v2510_v19 = vpack.c.bf16 %v2194_v11, %v2194_v11  ;;  %v12593_v45 = vunpack.i.l.bf16 %v12501_v2 }
 0x3d2   :  { %2612 = vmatpush.bf16.msrb.mxu1 %v12587_v52  ;;  %2638 = vmatpush.bf16.msra.mxu0 %v2421_v6  ;;  %v12594_v3 = vunpack.i.l.bf16 %v12533_v28  ;;  %vm12595_vm10 = vcmp.lt.s32.totalorder %v5798_v39, 42  ;;  %v2511_v5 = vpack.c.bf16 %v2193_v15, %v2193_v15  ;;  %v4758_v21 = vunpack.i.h.bf16 %v12524_v37  ;;  %v12598_v6 = vld [vmem:[#allocation52_spill] sm:$0xff]  ;;  %v12602_v15 = vld [vmem:[#allocation90_spill] sm:$0xff] }
 0x3d3   :  { %2728 = vmatpush.bf16.msra.mxu3 %v12592_v17  ;;  %v1610_v27 = vsel %vm243_vm5, %v12593_v45, %v4773_v4  ;;  %2688 = vmatpush.bf16.msra.mxu2 %v2439_v48  ;;  %v12596_v51 = vunpack.i.l.bf16 %v12513_v0  ;;  %vm12597_vm2 = vcmp.lt.s32.totalorder %v5798_v39, 38  ;;  %v12600_v13 = vpack.c.bf16 %v12598_v6, %v12599_v56  ;;  %v12609_v17 = vld [vmem:[#allocation109_spill] sm:$0xff] }
 0x3d4   :  { %v1452_v62 = vsel %vm12595_vm10, %v12594_v3, %v4703_v40  ;;  %v4748_v28 = vunpack.i.h.bf16 %v12530_v18  ;;  %v12601_v40 = vld [vmem:[#allocation91_spill] sm:$0xff]  ;;  %vm12604_vm3 = vcmask 1043456   ;;  %v12605_v48 = vunpack.i.l.bf16 %v12519_v24 }
 0x3d5   :  { %v2413_v50 = vpack.c.bf16 %v1484_v30, %v1452_v62  ;;  %v1578_v11 = vsel %vm12597_vm2, %v12596_v51, %v4768_v16  ;;  %v12603_v9 = vpack.c.bf16 %v12601_v40, %v12602_v15  ;;  %v2543_v52 = vsel %vm12604_vm3, %v2510_v19, 0  ;;  %vm12607_vm8 = vmmov %vm12604_vm3  ;;  %v12611_v3 = vld [vmem:[#allocation87_spill] sm:$0xff]  ;;  %v12612_v62 = vld [vmem:[#allocation85_spill] sm:$0xff] }
 0x3d6   :  { %2613 = vmatpush.bf16.msrb.mxu1 %v12600_v13  ;;  %v2431_v35 = vpack.c.bf16 %v1610_v27, %v1578_v11  ;;  %vm12606_vm4 = vcmp.lt.s32.totalorder %v5798_v39, 39  ;;  %v2546_v30 = vsel %vm12607_vm8, %v2511_v5, 0  ;;  %v4753_v29 = vunpack.i.h.bf16 %v12534_v12  ;;  %v12616_v51 = vld [vmem:[#allocation107_spill] sm:$0xff] }
 0x3d7   :  { %2639 = vmatpush.bf16.msra.mxu0 %v2413_v50  ;;  %2729 = vmatpush.bf16.msra.mxu3 %v12603_v9  ;;  %v1546_v10 = vsel %vm12606_vm4, %v12605_v48, %v4763_v49  ;;  %vm12608_vm10 = vcmp.lt.s32.totalorder %v5798_v39, 40  ;;  %v12610_v19 = vunpack.i.l.bf16 %v12609_v17  ;;  %v12613_v5 = vpack.c.bf16 %v12611_v3, %v12612_v62  ;;  %v12615_v50 = vld [vmem:[#allocation108_spill] sm:$0xff]  ;;  %v12622_v13 = vld [vmem:[#allocation99_spill] sm:$0xff] }
 0x3d8   :  { %2689 = vmatpush.bf16.msra.mxu2 %v2431_v35  ;;  %v1514_v61 = vsel %vm12608_vm10, %v4757_v63, %v4758_v21  ;;  %vm12614_vm2 = vcmp.lt.s32.totalorder %v5798_v39, 42  ;;  %v12617_v26 = vpack.c.bf16 %v12615_v50, %v12616_v51  ;;  %v12618_v11 = vpack.c.bf16 %v8866_v58, %v8801_v54  ;;  %v12625_v15 = vld [vmem:[#allocation103_spill] sm:$0xff]  ;;  %v12633_v17 = vld [vmem:[#allocation92_spill] sm:$0xff]  ;;  %v12645_v51 = vld [vmem:[#allocation37_spill] sm:$0xff] }
 0x3d9   :  { %2614 = vmatmul.bf16.vlgmr.msrb.gmra.mxu1 %v12571_v14  ;;  %v2199_v45 = vsel %vm845_vm6, %v5133_v36, %v12610_v19  ;;  %v2423_v27 = vpack.c.bf16 %v1546_v10, %v1514_v61  ;;  %v1450_v63 = vsel %vm12614_vm2, %v4747_v22, %v4748_v28  ;;  %vm12619_vm3 = vcmp.lt.s32.totalorder %v5798_v39, 41  ;;  %v12621_v22 = vld [vmem:[#allocation102_spill] sm:$0xff]  ;;  %v12629_v10 = vld [vmem:[#allocation95_spill] sm:$0xff]  ;;  %v12632_v61 = vld [vmem:[#allocation96_spill] sm:$0xff] }
 0x3da   :  { %2674 = vmatpush.bf16.msra.mxu1 %v2543_v52  ;;  %2640 = vmatmul.bf16.vlgmr.msra.gmra.mxu0 %v12571_v14  ;;  %v2513_v36 = vpack.c.bf16 %v2199_v45, %v2199_v45  ;;  %v1482_v6 = vsel %vm12619_vm3, %v4752_v46, %v4753_v29  ;;  %vm12620_vm4 = vcmask 588800   ;;  %v12623_v35 = vpack.c.bf16 %v12621_v22, %v12622_v13  ;;  %v12626_v46 = vld [vmem:[#allocation98_spill] sm:$0xff]  ;;  %v12640_v3 = vld [vmem:[#allocation84_spill] sm:$0xff]  ;;  %v12652_v22 = vld [vmem:[#allocation105_spill] sm:$0xff] }
 0x3db   :  { %2700 = vmatpush.bf16.msrb.mxu0 %v2546_v30  ;;  %2730 = vmatpush.bf16.msra.mxu3 %v12613_v5  ;;  %v2415_v56 = vpack.c.bf16 %v1482_v6, %v1450_v63  ;;  %v12624_v54 = vunpack.i.l.bf16 %v8810_v7  ;;  %v12627_v9 = vpack.c.bf16 %v12625_v15, %v12626_v46  ;;  %v12628_v52 = vunpack.i.l.bf16 %v8690_v31  ;;  %v12630_v30 = vld [vmem:[#allocation94_spill] sm:$0xff]  ;;  %v12635_v31 = vld [vmem:[#allocation83_spill] sm:$0xff]  ;;  %v12642_v5 = vld [vmem:[#allocation80_spill] sm:$0xff] }
 0x3dc   :  { %2690 = vmatpush.bf16.msra.mxu2 %v2423_v27  ;;  %v2552_v40 = vsel %vm12607_vm8, %v2513_v36, 0  ;;  %v4913_v60 = vunpack.i.h.bf16 %v12531_v53  ;;  %v12634_v19 = vpack.c.bf16 %v12632_v61, %v12633_v17  ;;  %v12636_v45 = vld [vmem:[#allocation82_spill] sm:$0xff]  ;;  %vm12638_vm10 = vcmp.lt.s32.totalorder %v5798_v39, 127  ;;  %v12639_v27 = vld [vmem:[#allocation88_spill] sm:$0xff]  ;;  %v12643_v63 = vld [vmem:[#allocation79_spill] sm:$0xff] }
 0x3dd   :  { %v2167_v58 = vsel %vm812_vm1, %v5113_v23, %v12624_v54  ;;  %v2135_v48 = vsel %vm779_vm0, %v5093_v42, %v12628_v52  ;;  %v12631_v23 = vpack.c.bf16 %v12629_v10, %v12630_v30  ;;  %v12637_v20 = vpack.c.bf16 %v12635_v31, %v12636_v45  ;;  %vm12647_vm2 = vmmov %vm12638_vm10  ;;  %v12649_v6 = vld [vmem:[#allocation21_spill] sm:$0xff]  ;;  %v12651_v53 = vld [vmem:[#allocation106_spill] sm:$0xff] }
 0x3de   :  { %2675 = vmatpush.bf16.msra.mxu1 %v12617_v26  ;;  %4136 = vmatmul.msk.bf16.vlgmr.msra.gmra.mxu3 %vm12620_vm4, %v8893_v1  ;;  %v2505_v7 = vpack.c.bf16 %v2167_v58, %v2135_v48  ;;  %v1840_v42 = vsel %vm12638_vm10, %v4912_v32, %v4913_v60  ;;  %v12641_v62 = vpack.c.bf16 %v12639_v27, %v12640_v3  ;;  %v12646_v26 = vunpack.i.l.bf16 %v12645_v51  ;;  %vm12654_vm3 = vmmov %vm12620_vm4  ;;  %v12655_v13 = vld [vmem:[#allocation45_spill] sm:$0xff]  ;;  %v12658_v58 = vld [vmem:[#allocation39_spill] sm:$0xff] }
 0x3df   :  { %2701 = vmatpush.bf16.msrb.mxu0 %v12618_v11  ;;  %v12644_v50 = vpack.c.bf16 %v12642_v5, %v12643_v63  ;;  %v12648_v11 = vld [vmem:[#allocation81_spill] sm:$0xff]  ;;  %v12653_v32 = vpack.c.bf16 %v12651_v53, %v12652_v22  ;;  %vm12656_vm4 = vmmov %vm12654_vm3  ;;  %v12659_v15 = vunpack.i.l.bf16 %v12658_v58  ;;  %vm12660_vm8 = vcmp.lt.s32.totalorder %v5798_v39, 1  ;;  %v12671_v17 = vld [vmem:[#allocation38_spill] sm:$0xff] }
 0x3e0   :  { %2691 = vmatpush.bf16.msra.mxu2 %v2415_v56  ;;  %v1847_v36 = vsel %vm12647_vm2, %v4913_v60, %v12646_v26  ;;  %v12650_v56 = vpack.c.bf16 %v12648_v11, %v12649_v6  ;;  %v12662_v52 = vld [vmem:[#allocation93_spill] sm:$0xff]  ;;  %vm12666_vm10 = vcmp.lt.s32.totalorder %v5798_v39, 2  ;;  %vm12669_vm2 = vcmp.lt.s32.totalorder %v5798_v39, 18  ;;  %v12674_v45 = vld [vmem:[#allocation23_spill] sm:$0xff]  ;;  %v12682_v5 = vld [vmem:[#allocation68_spill] sm:$0xff] }
 0x3e1   :  { %v1801_v46 = vsel %vm12660_vm8, %v4888_v41, %v12659_v15  ;;  %v12670_v41 = vld [vmem:[#allocation20_spill] sm:$0xff]  ;;  %v12673_v31 = vld [vmem:[#allocation89_spill] sm:$0xff]  ;;  %v12679_v27 = vld [vmem:[#allocation75_spill] sm:$0xff]  ;;  %vm12686_vm8 = vcmp.lt.s32.totalorder %v5798_v39, 21  ;;  %v12688_v26 = vunpack.i.l.bf16 %v12687_v43 }
 0x3e2   :  { %2676 = vmatpush.bf16.msra.mxu1 %v12623_v35  ;;  %v2464_v35 = vpack.c.bf16 %v1840_v42, %v12655_v13  ;;  %v12677_v42 = vunpack.i.l.bf16 %v12676_v55  ;;  %v12680_v3 = vunpack.i.l.bf16 %v12679_v27  ;;  %v12692_v6 = vld [vmem:[#allocation24_spill] sm:$0xff]  ;;  %v12695_v53 = vld [vmem:[#allocation7_spill] sm:$0xff]  ;;  %v12708_v15 = vld [vmem:[#allocation17_spill] sm:$0xff] }
 0x3e3   :  { %2702 = vmatpush.bf16.msrb.mxu0 %v12627_v9  ;;  %2692 = vmatmul.bf16.vlgmr.msra.gmra.mxu2 %v12571_v14  ;;  %v12661_v9 = vld [vmem:[#allocation86_spill] sm:$0xff]  ;;  %v12696_v22 = vunpack.i.l.bf16 %v12695_v53  ;;  %v12716_v55 = vld [vmem:[#allocation5_spill] sm:$0xff] }
 0x3e4   :  { %2752 = vmatpush.bf16.msrb.mxu2 %v2552_v40  ;;  %v12657_v40 = vld [vmem:[#allocation40_spill] sm:$0xff]  ;;  %v12663_v48 = vpack.c.bf16 %v12661_v9, %v12662_v52 }
 0x3e5   :  { %v2465_v54 = vpack.c.bf16 %v1847_v36, %v12657_v40  ;;  %v12690_v36 = vld [vmem:[#allocation67_spill] sm:$0xff]  ;;  %v12710_v9 = vld [vmem:[#allocation64_spill] sm:$0xff] }
 0x3e6   :  { %2677 = vmatpush.bf16.msra.mxu1 %v12631_v23  ;;  %v12667_v23 = vld [vmem:[#allocation19_spill] sm:$0xff]  ;;  %v12711_v52 = vunpack.i.l.bf16 %v12710_v9 }
 0x3e7   :  { %2703 = vmatpush.bf16.msrb.mxu0 %v12634_v19  ;;  %v12668_v61 = vunpack.i.l.bf16 %v12667_v23  ;;  %v12672_v19 = vpack.c.bf16 %v12670_v41, %v12671_v17 }
 0x3e8   :  { %2753 = vmatpush.bf16.msrb.mxu2 %v2505_v7  ;;  %v12664_v7 = vld [vmem:[#allocation49_spill] sm:$0xff] }
 0x3e9   :  { %v12665_v60 = vunpack.i.l.bf16 %v12664_v7  ;;  %v1737_v8 = vsel %vm12669_vm2, %v4848_v25, %v12668_v61  ;;  %v1673_v25 = vsel %vm309_vm7, %v4783_v57, %v12680_v3  ;;  %v1609_v57 = vsel %vm243_vm5, %v4773_v4, %v12688_v26  ;;  %v12698_v4 = vld [vmem:[#allocation55_spill] sm:$0xff]  ;;  %v12714_v7 = vld [vmem:[#allocation78_spill] sm:$0xff] }
 0x3ea   :  { %2678 = vmatpush.bf16.msra.mxu1 %v12637_v20  ;;  %v12675_v20 = vpack.c.bf16 %v12673_v31, %v12674_v45  ;;  %vm12697_vm2 = vcmp.lt.s32.totalorder %v5798_v39, 40 }
 0x3eb   :  { %2704 = vmatpush.bf16.msrb.mxu0 %v12641_v62  ;;  %v1769_v10 = vsel %vm12666_vm10, %v4868_v44, %v12665_v60  ;;  %v12681_v62 = vld [vmem:[#allocation47_spill] sm:$0xff]  ;;  %vm12694_vm10 = vcmp.lt.s32.totalorder %v5798_v39, 38  ;;  %v1513_v2 = vsel %vm12697_vm2, %v4758_v21, %v12696_v22  ;;  %v12707_v21 = vld [vmem:[#allocation16_spill] sm:$0xff] }
 0x3ec   :  { %2754 = vmatpush.bf16.msrb.mxu2 %v12653_v32  ;;  %v2456_v30 = vpack.c.bf16 %v1801_v46, %v1769_v10  ;;  %v12683_v63 = vpack.c.bf16 %v12681_v62, %v12682_v5  ;;  %v12699_v32 = vld [vmem:[#allocation13_spill] sm:$0xff]  ;;  %v12709_v46 = vpack.c.bf16 %v12707_v21, %v12708_v15 }
 0x3ed   :  { %4134 = vmatmul.msk.bf16.vlgmr.msra.gmra.mxu1 %vm12654_vm3, %v8893_v1  ;;  %vm12678_vm3 = vcmp.lt.s32.totalorder %v5798_v39, 19  ;;  %v12700_v13 = vpack.c.bf16 %v12698_v4, %v12699_v32 }
 0x3ee   :  { %2710 = vmatpush.bf16.msrb.mxu1 %v12644_v50  ;;  %4135 = vmatmul.msk.bf16.vlgmr.msrb.gmra.mxu0 %vm12656_vm4, %v8893_v1  ;;  %v1705_v44 = vsel %vm12678_vm3, %v4828_v47, %v12677_v42  ;;  %v12685_v50 = vunpack.i.l.bf16 %v12684_v33  ;;  %vm12703_vm3 = vcmp.lt.s32.totalorder %v5798_v39, 39  ;;  %v12717_v42 = vld [vmem:[#allocation6_spill] sm:$0xff] }
 0x3ef   :  { %2736 = vmatpush.bf16.msra.mxu0 %v12650_v56  ;;  %v2448_v34 = vpack.c.bf16 %v1737_v8, %v1705_v44  ;;  %v12693_v56 = vunpack.i.l.bf16 %v12692_v6  ;;  %v12720_v6 = vld [vmem:[#allocation12_spill] sm:$0xff] }
 0x3f0   :  { %2755 = vmatpush.bf16.msrb.mxu2 %v12663_v48  ;;  %v1641_v47 = vsel %vm12686_vm8, %v4778_v59, %v12685_v50  ;;  %vm12712_vm8 = vcmp.lt.s32.totalorder %v5798_v39, 42  ;;  %v12713_v48 = vld [vmem:[#allocation33_spill] sm:$0xff] }
 0x3f1   :  { %v2440_v51 = vpack.c.bf16 %v1673_v25, %v1641_v47  ;;  %v1577_v38 = vsel %vm12694_vm10, %v4768_v16, %v12693_v56  ;;  %v1449_v24 = vsel %vm12712_vm8, %v4748_v28, %v12711_v52  ;;  %v12715_v12 = vpack.c.bf16 %v12713_v48, %v12714_v7  ;;  %v12722_v52 = vld [vmem:[#allocation3_spill] sm:$0xff]  ;;  %vm12730_vm2 = vmmov %vm12712_vm8 }
 0x3f2   :  { %2711 = vmatpush.bf16.msrb.mxu1 %v2464_v35  ;;  %v2432_v59 = vpack.c.bf16 %v1609_v57, %v1577_v38  ;;  %v12701_v35 = vld [vmem:[#allocation18_spill] sm:$0xff]  ;;  %vm12733_vm8 = vcmp.lt.s32.totalorder %v5798_v39, 40 }
 0x3f3   :  { %2737 = vmatpush.bf16.msra.mxu0 %v2465_v54  ;;  %v12702_v40 = vunpack.i.l.bf16 %v12701_v35  ;;  %v12704_v54 = vld [vmem:[#allocation34_spill] sm:$0xff] }
 0x3f4   :  { %2756 = vmatpush.bf16.msrb.mxu2 %v12675_v20  ;;  %v12705_v58 = vunpack.i.l.bf16 %v12704_v54 }
 0x3f5   :  { %v1545_v0 = vsel %vm12703_vm3, %v4763_v49, %v12702_v40  ;;  %vm12731_vm3 = vcmp.lt.s32.totalorder %v5798_v39, 38 }
 0x3f6   :  { %2712 = vmatpush.bf16.msrb.mxu1 %v2456_v30  ;;  %v2424_v16 = vpack.c.bf16 %v1545_v0, %v1513_v2 }
 0x3f7   :  { %2738 = vmatpush.bf16.msra.mxu0 %v12672_v19  ;;  %4137 = vmatmul.msk.bf16.vlgmr.msrb.gmra.mxu2 %vm12656_vm4, %v8893_v1  ;;  %v12689_v1 = vld [vmem:[#allocation66_spill] sm:$0xff]  ;;  %vm12706_vm4 = vcmp.lt.s32.totalorder %v5798_v39, 41 }
 0x3f8   :  { %v12691_v11 = vpack.c.bf16 %v12689_v1, %v12690_v36  ;;  %v1481_v37 = vsel %vm12706_vm4, %v4753_v29, %v12705_v58  ;;  %v12718_v36 = vld [vmem:[#allocation11_spill] sm:$0xff]  ;;  %vm12729_vm10 = vmmov %vm12706_vm4 }
 0x3f9   :  { %v2416_v49 = vpack.c.bf16 %v1481_v37, %v1449_v24 }
 0x3fa   :  { %2713 = vmatpush.bf16.msrb.mxu1 %v2448_v34 }
 0x3fb   :  { %2739 = vmatpush.bf16.msra.mxu0 %v12683_v63 }
 0x3fe   :  { %2714 = vmatpush.bf16.msrb.mxu1 %v2440_v51 }
 0x3ff   :  { %2740 = vmatpush.bf16.msra.mxu0 %v12691_v11 }
 0x402   :  { %2715 = vmatpush.bf16.msrb.mxu1 %v2432_v59 }
 0x403   :  { %2741 = vmatpush.bf16.msra.mxu0 %v12700_v13 }
 0x406   :  { %2716 = vmatpush.bf16.msrb.mxu1 %v2424_v16 }
 0x407   :  { %2742 = vmatpush.bf16.msra.mxu0 %v12709_v46 }
 0x409   :  { %v2563_v29 = vpop.f32.mrf.mxu3  ;;  %v2589_v60 = vpop.f32.mrf.mxu2 }
 0x40a   :  { %2717 = vmatpush.bf16.msrb.mxu1 %v2416_v49  ;;  %v12723_v49 = vld [vmem:[#allocation4_spill] sm:$0xff] }
 0x40b   :  { %2743 = vmatpush.bf16.msra.mxu0 %v12715_v12 }
 0x40d   :  { %2718 = vmatmul.bf16.vlgmr.msrb.gmra.mxu1 %v12571_v14 }
 0x40e   :  { %2744 = vmatmul.bf16.vlgmr.msra.gmra.mxu0 %v12571_v14 }
 0x410   :  { %v9492_v61 = vpop.permute.xlu2 %2518 }
 0x411   :  { %v2565_v10 = vpop.f32.mrf.mxu3  ;;  %v2591_v30 = vpop.f32.mrf.mxu2  ;;  %v2564_v18 = vadd.f32 %v2563_v29, %v9492_v61  ;;  %v2590_v28 = vadd.f32 %v2589_v60, %v9492_v61 }
 0x42a   :  { %v2628_v23 = vpop.f32.mrf.mxu3 }
 0x431   :  { %v2576_v8 = vpop.f32.mrf.mxu1 }
 0x432   :  { %v2577_v17 = vadd.f32 %v2576_v8, %v2564_v18  ;;  %v2630_v31 = vpop.f32.mrf.mxu3 }
 0x433   :  { %v2602_v41 = vpop.f32.mrf.mxu0  ;;  %v12725_v31 = vld [vmem:[#allocation9_spill] sm:$0xff] }
 0x434   :  { %v2603_v19 = vadd.f32 %v2602_v41, %v2590_v28  ;;  %v2762_v45 = vmax.f32 %v2577_v17, 0.0 }
 0x436   :  { %v2763_v20 = vmax.f32 %v2603_v19, 0.0  ;;  %v9497_v14 = vmul.f32 %v2762_v45, %v12716_v55 }
 0x438   :  { %v9500_v44 = vmul.f32 %v2763_v20, %v12717_v42  ;;  %v12726_v20 = vld [vmem:[#allocation10_spill] sm:$0xff] }
 0x439   :  { %v2578_v27 = vpop.f32.mrf.mxu1 }
 0x43a   :  { %v9504_v34 = vpack.i.bf16 %v9500_v44, %v9497_v14 }
 0x43b   :  { %v2604_v3 = vpop.f32.mrf.mxu0 }
 0x43c   :  { %5146 = vrot.lane.b32.xlu2 %v9504_v34, %s5587_s7  ;;  %5141 = vrot.lane.b32.xlu1 %v9504_v34, %s5586_s6 }
 0x43d   :  { %5136 = vrot.lane.b32.xlu0 %v9504_v34, %s5585_s0 }
 0x444   :  { %5161 = vrot.lane.b32.xlu2 %v9504_v34, %s5590_s10  ;;  %5156 = vrot.lane.b32.xlu1 %v9504_v34, %s5589_s9 }
 0x445   :  { %5151 = vrot.lane.b32.xlu0 %v9504_v34, %s5588_s8 }
 0x446   :  { %v2654_v25 = vpop.f32.mrf.mxu2 }
 0x44c   :  { %5176 = vrot.lane.b32.xlu2 %v9504_v34, %s5593_s13  ;;  %5171 = vrot.lane.b32.xlu1 %v9504_v34, %s5592_s12 }
 0x44d   :  { %v2667_v62 = vpop.f32.mrf.mxu3  ;;  %5166 = vrot.lane.b32.xlu0 %v9504_v34, %s5591_s11 }
 0x44e   :  { %v2656_v5 = vpop.f32.mrf.mxu2  ;;  %v2668_v58 = vadd.f32 %v2667_v62, %v9492_v61 }
 0x454   :  { %5191 = vrot.lane.b32.xlu2 %v9504_v34, %s5596_s16  ;;  %5186 = vrot.lane.b32.xlu1 %v9504_v34, %s5595_s15 }
 0x455   :  { %v2669_v51 = vpop.f32.mrf.mxu3  ;;  %5181 = vrot.lane.b32.xlu0 %v9504_v34, %s5594_s14 }
 0x456   :  { %v2615_v63 = vpop.f32.mrf.mxu1 }
 0x457   :  { %v2616_v33 = vadd.f32 %v2615_v63, %v9492_v61  ;;  %v2641_v50 = vpop.f32.mrf.mxu0 }
 0x458   :  { %v2642_v47 = vadd.f32 %v2641_v50, %v9492_v61 }
 0x459   :  { %v2629_v43 = vadd.f32 %v2628_v23, %v2616_v33 }
 0x45a   :  { %v2655_v26 = vadd.f32 %v2654_v25, %v2642_v47 }
 0x45b   :  { %v2764_v57 = vmax.f32 %v2629_v43, 0.0 }
 0x45c   :  { %v2765_v1 = vmax.f32 %v2655_v26, 0.0  ;;  %5201 = vrot.lane.b32.xlu1 %v9504_v34, %s5598_s18 }
 0x45d   :  { %v9533_v11 = vmul.f32 %v2764_v57, %v12718_v36  ;;  %5196 = vrot.lane.b32.xlu0 %v9504_v34, %s5597_s17 }
 0x45e   :  { %v9536_v56 = vmul.f32 %v2765_v1, %v12720_v6  ;;  %v2617_v38 = vpop.f32.mrf.mxu1 }
 0x45f   :  { %12719 = vst [vmem:[#allocation48_spill] sm:$0xff] %v9533_v11  ;;  %v2643_v59 = vpop.f32.mrf.mxu0 }
 0x460   :  { %12721 = vst [vmem:[#allocation60_spill] sm:$0xff] %v9536_v56  ;;  %v9540_v53 = vpack.i.bf16 %v9536_v56, %v9533_v11 }
 0x461   :  { %v2732_v2 = vpop.f32.mrf.mxu3 }
 0x462   :  { %5216 = vrot.lane.b32.xlu2 %v9540_v53, %s5586_s6 }
 0x464   :  { %5211 = vrot.lane.b32.xlu1 %v9540_v53, %s5585_s0 }
 0x465   :  { %5206 = vrot.lane.b32.xlu0 %v9504_v34, %s5599_s19 }
 0x466   :  { %v2693_v22 = vpop.f32.mrf.mxu2 }
 0x467   :  { %v2694_v16 = vadd.f32 %v2693_v22, %v9492_v61 }
 0x469   :  { %v2734_v35 = vpop.f32.mrf.mxu3 }
 0x46a   :  { %v2680_v4 = vpop.f32.mrf.mxu1  ;;  %5231 = vrot.lane.b32.xlu2 %v9540_v53, %s5589_s9 }
 0x46b   :  { %v2706_v32 = vpop.f32.mrf.mxu0  ;;  %v2681_v37 = vadd.f32 %v2680_v4, %v2668_v58 }
 0x46c   :  { %5226 = vrot.lane.b32.xlu1 %v9540_v53, %s5588_s8  ;;  %v2707_v21 = vadd.f32 %v2706_v32, %v2694_v16 }
 0x46d   :  { %5221 = vrot.lane.b32.xlu0 %v9540_v53, %s5587_s7  ;;  %v2766_v15 = vmax.f32 %v2681_v37, 0.0 }
 0x46e   :  { %v2695_v13 = vpop.f32.mrf.mxu2  ;;  %v2767_v46 = vmax.f32 %v2707_v21, 0.0 }
 0x46f   :  { %v9575_v24 = vmul.f32 %v2766_v15, %v12722_v52 }
 0x470   :  { %v9578_v48 = vmul.f32 %v2767_v46, %v12723_v49 }
 0x472   :  { %v2682_v40 = vpop.f32.mrf.mxu1  ;;  %5246 = vrot.lane.b32.xlu2 %v9540_v53, %s5592_s12  ;;  %v9582_v29 = vpack.i.bf16 %v9578_v48, %v9575_v24 }
 0x473   :  { %v2708_v0 = vpop.f32.mrf.mxu0 }
 0x474   :  { %5241 = vrot.lane.b32.xlu1 %v9540_v53, %s5591_s11 }
 0x475   :  { %5236 = vrot.lane.b32.xlu0 %v9540_v53, %s5590_s10 }
 0x47a   :  { %v2758_v54 = vpop.f32.mrf.mxu2  ;;  %5261 = vrot.lane.b32.xlu2 %v9540_v53, %s5595_s15 }
 0x47c   :  { %5256 = vrot.lane.b32.xlu1 %v9540_v53, %s5594_s14 }
 0x47d   :  { %5251 = vrot.lane.b32.xlu0 %v9540_v53, %s5593_s13 }
 0x482   :  { %v2760_v9 = vpop.f32.mrf.mxu2  ;;  %5276 = vrot.lane.b32.xlu2 %v9540_v53, %s5598_s18 }
 0x484   :  { %5271 = vrot.lane.b32.xlu1 %v9540_v53, %s5597_s17 }
 0x485   :  { %5266 = vrot.lane.b32.xlu0 %v9540_v53, %s5596_s16 }
 0x48a   :  { %v2719_v7 = vpop.f32.mrf.mxu1  ;;  %5286 = vrot.lane.b32.xlu2 %v9582_v29, %s5585_s0 }
 0x48b   :  { %v2745_v12 = vpop.f32.mrf.mxu0  ;;  %v2720_v23 = vadd.f32 %v2719_v7, %v9492_v61 }
 0x48c   :  { %5281 = vrot.lane.b32.xlu1 %v9540_v53, %s5599_s19  ;;  %v2746_v18 = vadd.f32 %v2745_v12, %v9492_v61 }
 0x48d   :  { %5291 = vrot.lane.b32.xlu0 %v9582_v29, %s5586_s6  ;;  %v2733_v8 = vadd.f32 %v2732_v2, %v2720_v23 }
 0x48e   :  { %v2759_v41 = vadd.f32 %v2758_v54, %v2746_v18 }
 0x48f   :  { %v2768_v17 = vmax.f32 %v2733_v8, 0.0 }
 0x490   :  { %v2769_v19 = vmax.f32 %v2759_v41, 0.0 }
 0x491   :  { %v9623_v45 = vmul.f32 %v2768_v17, %v12725_v31 }
 0x492   :  { %v2721_v60 = vpop.f32.mrf.mxu1  ;;  %5301 = vrot.lane.b32.xlu2 %v9582_v29, %s5588_s8  ;;  %v9626_v55 = vmul.f32 %v2769_v19, %v12726_v20 }
 0x493   :  { %v2747_v10 = vpop.f32.mrf.mxu0 }
 0x494   :  { %5296 = vrot.lane.b32.xlu1 %v9582_v29, %s5587_s7  ;;  %12727 = vst [vmem:[#allocation58_spill] sm:$0xff] %v9626_v55  ;;  %v9630_v42 = vpack.i.bf16 %v9626_v55, %v9623_v45 }
 0x495   :  { %5306 = vrot.lane.b32.xlu0 %v9582_v29, %s5589_s9 }
 0x496   :  { %v9602_v30 = vpop.permute.xlu2 %5146 }
 0x497   :  { %v11734_v57 = vunpack.i.h.bf16 %v9602_v30  ;;  %v11724_v1 = vunpack.i.l.bf16 %v9602_v30 }
 0x499   :  { %v9713_v16 = vsel %vm12733_vm8, %v11724_v1, %v11734_v57  ;;  %vm12743_vm8 = vcmp.lt.s32.totalorder %v5798_v39, 1 }
 0x49a   :  { %5316 = vrot.lane.b32.xlu2 %v9582_v29, %s5591_s11 }
 0x49c   :  { %5311 = vrot.lane.b32.xlu1 %v9582_v29, %s5590_s10 }
 0x49d   :  { %5321 = vrot.lane.b32.xlu0 %v9582_v29, %s5592_s12 }
 0x49e   :  { %v9612_v28 = vpop.permute.xlu2 %5161 }
 0x49f   :  { %v11730_v43 = vunpack.i.h.bf16 %v9612_v28  ;;  %v11717_v26 = vunpack.i.l.bf16 %v9612_v28 }
 0x4a1   :  { %v9697_v35 = vsel %vm243_vm5, %v11717_v26, %v11730_v43 }
 0x4a2   :  { %5331 = vrot.lane.b32.xlu2 %v9582_v29, %s5594_s14 }
 0x4a4   :  { %5326 = vrot.lane.b32.xlu1 %v9582_v29, %s5593_s13 }
 0x4a5   :  { %5336 = vrot.lane.b32.xlu0 %v9582_v29, %s5595_s15 }
 0x4a6   :  { %v9620_v61 = vpop.permute.xlu2 %5176 }
 0x4a7   :  { %12724 = vst [vmem:[#allocation69_spill] sm:$0xff] %v9620_v61  ;;  %v11728_v41 = vunpack.i.h.bf16 %v9620_v61  ;;  %v11723_v17 = vunpack.i.l.bf16 %v9620_v61 }
 0x4aa   :  { %5346 = vrot.lane.b32.xlu2 %v9582_v29, %s5597_s17 }
 0x4ac   :  { %5341 = vrot.lane.b32.xlu1 %v9582_v29, %s5596_s16 }
 0x4ad   :  { %5356 = vrot.lane.b32.xlu0 %v9630_v42, %s5585_s0 }
 0x4ae   :  { %v9638_v27 = vpop.permute.xlu2 %5191  ;;  %v9640_v3 = vpop.permute.xlu1 %5141 }
 0x4af   :  { %12728 = vst [vmem:[#allocation29_spill] sm:$0xff] %v9638_v27  ;;  %v5144_v25 = vunpack.i.h.bf16 %v9640_v3  ;;  %v11719_v62 = vunpack.i.l.bf16 %v9640_v3  ;;  %v9644_v5 = vpop.permute.xlu0 %5136  ;;  %v11726_v18 = vunpack.i.h.bf16 %v9638_v27  ;;  %v11722_v8 = vunpack.i.l.bf16 %v9638_v27 }
 0x4b0   :  { %v5139_v63 = vunpack.i.h.bf16 %v9644_v5  ;;  %v11720_v33 = vunpack.i.l.bf16 %v9644_v5 }
 0x4b1   :  { %v9652_v50 = vsel %vm12729_vm10, %v11719_v62, %v5144_v25  ;;  %vm12734_vm10 = vcmp.lt.s32.totalorder %v5798_v39, 39 }
 0x4b2   :  { %5351 = vrot.lane.b32.xlu2 %v9582_v29, %s5598_s18  ;;  %v9660_v47 = vsel %vm12730_vm2, %v11720_v33, %v5139_v63  ;;  %vm12737_vm2 = vmmov %vm12731_vm3 }
 0x4b4   :  { %5361 = vrot.lane.b32.xlu1 %v9630_v42, %s5586_s6 }
 0x4b5   :  { %5371 = vrot.lane.b32.xlu0 %v9630_v42, %s5588_s8 }
 0x4b6   :  { %v9676_v6 = vpop.permute.xlu1 %5156 }
 0x4b7   :  { %v5159_v59 = vunpack.i.h.bf16 %v9676_v6  ;;  %v11716_v22 = vunpack.i.l.bf16 %v9676_v6  ;;  %v9681_v2 = vpop.permute.xlu0 %5151 }
 0x4b8   :  { %v11735_v4 = vunpack.i.h.bf16 %v9681_v2  ;;  %v11718_v32 = vunpack.i.l.bf16 %v9681_v2 }
 0x4b9   :  { %v9689_v13 = vsel %vm12731_vm3, %v11716_v22, %v5159_v59  ;;  %vm12739_vm3 = vcmp.lt.s32.totalorder %v5798_v39, 21 }
 0x4ba   :  { %5366 = vrot.lane.b32.xlu2 %v9630_v42, %s5587_s7  ;;  %v9721_v54 = vsel %vm12734_vm10, %v11718_v32, %v11735_v4  ;;  %v9797_v32 = vsel %vm12743_vm8, %v11722_v8, %v11726_v18  ;;  %vm12745_vm10 = vcmp.lt.s32.totalorder %v5798_v39, 19  ;;  %vm12753_vm8 = vcmp.lt.s32.totalorder %v5798_v39, 42 }
 0x4bc   :  { %v9674_v36 = vpop.permute.xlu2 %5216  ;;  %5376 = vrot.lane.b32.xlu1 %v9630_v42, %s5589_s9 }
 0x4bd   :  { %v5218_v38 = vunpack.i.l.bf16 %v9674_v36  ;;  %5386 = vrot.lane.b32.xlu0 %v9630_v42, %s5591_s11  ;;  %v11737_v0 = vunpack.i.h.bf16 %v9674_v36 }
 0x4be   :  { %v9733_v21 = vpop.permute.xlu1 %5171 }
 0x4bf   :  { %v9703_v40 = vsel %vm12706_vm4, %v5144_v25, %v5218_v38  ;;  %12735 = vst [vmem:[#allocation72_spill] sm:$0xff] %v9733_v21  ;;  %v5174_v46 = vunpack.i.h.bf16 %v9733_v21  ;;  %v11714_v9 = vunpack.i.l.bf16 %v9733_v21  ;;  %v9738_v52 = vpop.permute.xlu0 %5166  ;;  %vm12742_vm4 = vcmp.lt.s32.totalorder %v5798_v39, 2 }
 0x4c0   :  { %12732 = vst [vmem:[#allocation22_spill] sm:$0xff] %v9703_v40  ;;  %v11732_v49 = vunpack.i.h.bf16 %v9738_v52  ;;  %v11715_v7 = vunpack.i.l.bf16 %v9738_v52 }
 0x4c1   :  { %12736 = vst [vmem:[#allocation8_spill] sm:$0xff] %v9738_v52  ;;  %v9746_v12 = vsel %vm309_vm7, %v11714_v9, %v5174_v46 }
 0x4c2   :  { %5381 = vrot.lane.b32.xlu2 %v9630_v42, %s5590_s10  ;;  %v9760_v10 = vsel %vm12739_vm3, %v11715_v7, %v11732_v49  ;;  %vm12749_vm3 = vmmov %vm12742_vm4 }
 0x4c4   :  { %v9731_v37 = vpop.permute.xlu2 %5231  ;;  %5391 = vrot.lane.b32.xlu1 %v9630_v42, %s5592_s12 }
 0x4c5   :  { %v11733_v15 = vunpack.i.l.bf16 %v9731_v37  ;;  %5401 = vrot.lane.b32.xlu0 %v9630_v42, %s5594_s14 }
 0x4c6   :  { %v9776_v31 = vpop.permute.xlu1 %5186 }
 0x4c7   :  { %v9752_v60 = vsel %vm12737_vm2, %v5159_v59, %v11733_v15  ;;  %12740 = vst [vmem:[#allocation51_spill] sm:$0xff] %v9776_v31  ;;  %v5189_v25 = vunpack.i.h.bf16 %v9776_v31  ;;  %v11721_v59 = vunpack.i.l.bf16 %v9776_v31  ;;  %v9781_v9 = vpop.permute.xlu0 %5181  ;;  %vm12746_vm2 = vcmp.lt.s32.totalorder %v5798_v39, 18 }
 0x4c8   :  { %12738 = vst [vmem:[#allocation30_spill] sm:$0xff] %v9752_v60  ;;  %v11729_v7 = vunpack.i.h.bf16 %v9781_v9  ;;  %v11725_v22 = vunpack.i.l.bf16 %v9781_v9  ;;  %v12790_v31 = vunpack.i.h.bf16 %v9612_v28 }
 0x4c9   :  { %12741 = vst [vmem:[#allocation32_spill] sm:$0xff] %v9781_v9  ;;  %v9789_v26 = vsel %vm12742_vm4, %v11721_v59, %v5189_v25  ;;  %v9813_v59 = vsel %vm12745_vm10, %v11723_v17, %v11728_v41  ;;  %vm12752_vm4 = vcmp.lt.s32.totalorder %v5798_v39, 126  ;;  %vm12755_vm10 = vmmov %vm12753_vm8 }
 0x4ca   :  { %5396 = vrot.lane.b32.xlu2 %v9630_v42, %s5593_s13  ;;  %v9821_v8 = vsel %vm12746_vm2, %v11725_v22, %v11729_v7  ;;  %vm12757_vm2 = vcmp.lt.s32.totalorder %v5798_v39, 41 }
 0x4cc   :  { %v9774_v19 = vpop.permute.xlu2 %5246  ;;  %5406 = vrot.lane.b32.xlu1 %v9630_v42, %s5595_s15 }
 0x4cd   :  { %v11731_v20 = vunpack.i.l.bf16 %v9774_v19  ;;  %5416 = vrot.lane.b32.xlu0 %v9630_v42, %s5597_s17  ;;  %v12786_v56 = vunpack.i.l.bf16 %v9774_v19 }
 0x4ce   :  { %v9833_v1 = vpop.permute.xlu1 %5201 }
 0x4cf   :  { %v9803_v62 = vsel %vm309_vm7, %v5174_v46, %v11731_v20  ;;  %12747 = vst [vmem:[#allocation63_spill] sm:$0xff] %v9833_v1  ;;  %v9836_v22 = vpop.permute.xlu0 %5196  ;;  %v11739_v23 = vunpack.i.h.bf16 %v9833_v1  ;;  %v11738_v46 = vunpack.i.l.bf16 %v9833_v1  ;;  %v9887_v20 = vsel %vm12757_vm2, %v5218_v38, %v11737_v0 }
 0x4d0   :  { %12744 = vst [vmem:[#allocation31_spill] sm:$0xff] %v9803_v62 }
 0x4d1   :  { %12748 = vst [vmem:[#allocation35_spill] sm:$0xff] %v9836_v22 }
 0x4d2   :  { %5411 = vrot.lane.b32.xlu2 %v9630_v42, %s5596_s16  ;;  %12758 = vst [vmem:[#allocation14_spill] sm:$0xff] %v9887_v20 }
 0x4d4   :  { %v9831_v17 = vpop.permute.xlu2 %5261  ;;  %5426 = vrot.lane.b32.xlu1 %v9540_v53, %s5608_s27 }
 0x4d5   :  { %v11727_v51 = vunpack.i.l.bf16 %v9831_v17  ;;  %5421 = vrot.lane.b32.xlu0 %v9504_v34, %s5608_s27 }
 0x4d6   :  { %v5212_v18 = vpop.permute.xlu1 %5211 }
 0x4d7   :  { %v9842_v58 = vsel %vm12749_vm3, %v5189_v25, %v11727_v51  ;;  %v5214_v41 = vunpack.i.h.bf16 %v5212_v18  ;;  %v5213_v7 = vunpack.i.l.bf16 %v5212_v18  ;;  %v9857_v43 = vpop.permute.xlu0 %5206  ;;  %vm12759_vm3 = vmmov %vm12752_vm4 }
 0x4d8   :  { %12750 = vst [vmem:[#allocation53_spill] sm:$0xff] %v9842_v58  ;;  %v11741_v15 = vunpack.i.h.bf16 %v9857_v43  ;;  %v11740_v57 = vunpack.i.l.bf16 %v9857_v43 }
 0x4d9   :  { %12751 = vst [vmem:[#allocation44_spill] sm:$0xff] %v9857_v43  ;;  %v9875_v18 = vsel %vm12753_vm8, %v5139_v63, %v5213_v7  ;;  %v9879_v49 = vsel %vm12755_vm10, %v5213_v7, %v5214_v41  ;;  %v3224_v63 = vsel %vm12759_vm3, %v11738_v46, %v11739_v23  ;;  %v12761_v46 = vunpack.i.h.bf16 %v9836_v22 }
 0x4da   :  { %5431 = vrot.lane.b32.xlu2 %v9582_v29, %s5599_s19  ;;  %12754 = vst [vmem:[#allocation43_spill] sm:$0xff] %v9875_v18  ;;  %v12762_v23 = vunpack.i.l.bf16 %v9836_v22  ;;  %vm12763_vm8 = vcmp.lt.s32.totalorder %v5798_v39, 127  ;;  %vm12765_vm10 = vcmp.lt.s32.totalorder %v5798_v39, 39  ;;  %vm12769_vm3 = vcmp.lt.s32.totalorder %v5798_v39, 42 }
 0x4db   :  { %12756 = vst [vmem:[#allocation61_spill] sm:$0xff] %v9879_v49  ;;  %vm12767_vm2 = vmmov %vm12765_vm10 }
 0x4dc   :  { %v9853_v33 = vpop.permute.xlu2 %5276  ;;  %5441 = vrot.lane.b32.xlu1 %v9540_v53, %s5606_s25 }
 0x4dd   :  { %v11736_v25 = vunpack.i.h.bf16 %v9853_v33  ;;  %v11742_v51 = vunpack.i.l.bf16 %v9853_v33  ;;  %5436 = vrot.lane.b32.xlu0 %v9504_v34, %s5606_s25 }
 0x4df   :  { %v9869_v4 = vsel %vm12752_vm4, %v11742_v51, %v11736_v25  ;;  %vm12760_vm4 = vcmp.lt.s32.totalorder %v5798_v39, 110  ;;  %v9920_v51 = vpop.permute.xlu0 %5221 }
 0x4e0   :  { %v3256_v7 = vsel %vm12760_vm4, %v11740_v57, %v11741_v15  ;;  %v3192_v57 = vsel %vm12763_vm8, %v12762_v23, %v12761_v46  ;;  %v11746_v20 = vunpack.i.h.bf16 %v9920_v51  ;;  %v5223_v18 = vunpack.i.l.bf16 %v9920_v51 }
 0x4e1   :  { %v3812_v0 = vpack.c.bf16 %v3256_v7, %v3224_v63  ;;  %v5227_v63 = vpop.permute.xlu1 %5226  ;;  %v3804_v49 = vpack.c.bf16 %v3192_v57, %v9497_v14  ;;  %v12764_v23 = vunpack.i.h.bf16 %v9681_v2  ;;  %v12771_v57 = vunpack.i.h.bf16 %v9602_v30 }
 0x4e2   :  { %5446 = vrot.lane.b32.xlu2 %v9504_v34, %s5607_s26  ;;  %v5229_v38 = vunpack.i.h.bf16 %v5227_v63  ;;  %v5228_v15 = vunpack.i.l.bf16 %v5227_v63  ;;  %vm12772_vm4 = vcmp.lt.s32.totalorder %v5798_v39, 40 }
 0x4e3   :  { %3900 = vmatpush.bf16.msrb.mxu3 %v3812_v0  ;;  %vm12774_vm8 = vmmov %vm12772_vm4 }
 0x4e4   :  { %v9917_v25 = vpop.permute.xlu2 %5286  ;;  %v9929_v0 = vsel %vm12765_vm10, %v12764_v23, %v5228_v15  ;;  %v9933_v46 = vsel %vm12767_vm2, %v5228_v15, %v5229_v38  ;;  %v9951_v63 = vsel %vm12774_vm8, %v5223_v18, %v11746_v20  ;;  %5456 = vrot.lane.b32.xlu1 %v9504_v34, %s5604_s3  ;;  %vm12778_vm10 = vcmp.lt.s32.totalorder %v5798_v39, 38 }
 0x4e5   :  { %v11747_v7 = vunpack.i.l.bf16 %v9917_v25  ;;  %12766 = vst [vmem:[#allocation62_spill] sm:$0xff] %v9929_v0  ;;  %5451 = vrot.lane.b32.xlu0 %v9540_v53, %s5607_s26  ;;  %v12780_v0 = vunpack.i.h.bf16 %v9738_v52  ;;  %vm12781_vm2 = vcmp.lt.s32.totalorder %v5798_v39, 21  ;;  %vm12795_vm8 = vcmp.lt.s32.totalorder %v5798_v39, 18 }
 0x4e6   :  { %12768 = vst [vmem:[#allocation77_spill] sm:$0xff] %v9933_v46  ;;  %v12776_v46 = vunpack.i.h.bf16 %v9731_v37 }
 0x4e7   :  { %3901 = vmatpush.bf16.msrb.mxu3 %v3804_v49  ;;  %v9939_v14 = vsel %vm12769_vm3, %v5214_v41, %v11747_v7  ;;  %v9945_v49 = vsel %vm12772_vm4, %v12771_v57, %v5223_v18  ;;  %12775 = vst [vmem:[#allocation42_spill] sm:$0xff] %v9951_v63  ;;  %v9968_v40 = vpop.permute.xlu0 %5236  ;;  %v12777_v57 = vunpack.i.l.bf16 %v9731_v37  ;;  %vm12783_vm3 = vmmov %vm12781_vm2  ;;  %v12785_v41 = vunpack.i.h.bf16 %v9774_v19 }
 0x4e8   :  { %12770 = vst [vmem:[#allocation15_spill] sm:$0xff] %v9939_v14  ;;  %v5238_v63 = vunpack.i.l.bf16 %v9968_v40  ;;  %vm12789_vm4 = vcmp.lt.s32.totalorder %v5798_v39, 39  ;;  %v12905_v14 = vunpack.i.l.bf16 %v9640_v3 }
 0x4e9   :  { %12773 = vst [vmem:[#allocation50_spill] sm:$0xff] %v9945_v49  ;;  %v5242_v20 = vpop.permute.xlu1 %5241  ;;  %v9978_v49 = vsel %vm12778_vm10, %v12777_v57, %v12776_v46  ;;  %v9996_v11 = vsel %vm309_vm7, %v12786_v56, %v12785_v41  ;;  %v12792_v56 = vunpack.i.h.bf16 %v9968_v40  ;;  %vm12797_vm10 = vmmov %vm12795_vm8 }
 0x4ea   :  { %5461 = vrot.lane.b32.xlu2 %v9540_v53, %s5604_s3  ;;  %v5244_v7 = vunpack.i.h.bf16 %v5242_v20  ;;  %v5243_v23 = vunpack.i.l.bf16 %v5242_v20  ;;  %12779 = vst [vmem:[#allocation71_spill] sm:$0xff] %v9978_v49  ;;  %v10012_v55 = vsel %vm243_vm5, %v12790_v31, %v5238_v63 }
 0x4eb   :  { %12787 = vst [vmem:[#allocation74_spill] sm:$0xff] %v9996_v11  ;;  %v10018_v41 = vsel %vm243_vm5, %v5238_v63, %v12792_v56 }
 0x4ec   :  { %v9965_v18 = vpop.permute.xlu2 %5301  ;;  %v9984_v15 = vsel %vm12781_vm2, %v12780_v0, %v5243_v23  ;;  %v9988_v20 = vsel %vm12783_vm3, %v5243_v23, %v5244_v7  ;;  %12791 = vst [vmem:[#allocation36_spill] sm:$0xff] %v10012_v55  ;;  %5471 = vrot.lane.b32.xlu1 %v9540_v53, %s5605_s24  ;;  %vm12800_vm3 = vcmp.lt.s32.totalorder %v5798_v39, 19 }
 0x4ed   :  { %12782 = vst [vmem:[#allocation28_spill] sm:$0xff] %v9984_v15  ;;  %v12788_v46 = vunpack.i.l.bf16 %v9965_v18  ;;  %5466 = vrot.lane.b32.xlu0 %v9504_v34, %s5605_s24  ;;  %v12810_v15 = vunpack.i.h.bf16 %v9831_v17 }
 0x4ee   :  { %12784 = vst [vmem:[#allocation27_spill] sm:$0xff] %v9988_v20 }
 0x4ef   :  { %v10002_v57 = vsel %vm12789_vm4, %v5229_v38, %v12788_v46  ;;  %12793 = vst [vmem:[#allocation59_spill] sm:$0xff] %v10018_v41  ;;  %v10033_v38 = vpop.permute.xlu0 %5251  ;;  %v12794_v41 = vunpack.i.h.bf16 %v9781_v9  ;;  %v12799_v46 = vunpack.i.h.bf16 %v9620_v61  ;;  %vm12803_vm4 = vmmov %vm12800_vm3 }
 0x4f0   :  { %v5253_v49 = vunpack.i.l.bf16 %v10033_v38  ;;  %v12802_v11 = vunpack.i.h.bf16 %v10033_v38 }
 0x4f1   :  { %v5257_v23 = vpop.permute.xlu1 %5256 }
 0x4f2   :  { %5476 = vrot.lane.b32.xlu2 %v9582_v29, %s5608_s27  ;;  %v5259_v56 = vunpack.i.h.bf16 %v5257_v23  ;;  %v5258_v0 = vunpack.i.l.bf16 %v5257_v23  ;;  %v10057_v20 = vsel %vm12800_vm3, %v12799_v46, %v5253_v49  ;;  %vm12812_vm3 = vcmp.lt.s32.totalorder %v5798_v39, 2 }
 0x4f3   :  { %12801 = vst [vmem:[#allocation25_spill] sm:$0xff] %v10057_v20  ;;  %v12807_v20 = vunpack.i.h.bf16 %v9638_v27  ;;  %v12818_v27 = vunpack.i.h.bf16 %v9833_v1 }
 0x4f4   :  { %v10030_v31 = vpop.permute.xlu2 %5316  ;;  %v10041_v60 = vsel %vm12795_vm8, %v12794_v41, %v5258_v0  ;;  %v10045_v55 = vsel %vm12797_vm10, %v5258_v0, %v5259_v56  ;;  %v10063_v41 = vsel %vm12803_vm4, %v5253_v49, %v12802_v11  ;;  %5486 = vrot.lane.b32.xlu1 %v9540_v53, %s5602_s22  ;;  %vm12805_vm8 = vcmp.lt.s32.totalorder %v5798_v39, 127 }
 0x4f5   :  { %v11765_v63 = vunpack.i.l.bf16 %v10030_v31  ;;  %12796 = vst [vmem:[#allocation57_spill] sm:$0xff] %v10041_v60  ;;  %5481 = vrot.lane.b32.xlu0 %v9504_v34, %s5602_s22  ;;  %v12811_v60 = vunpack.i.l.bf16 %v9831_v17 }
 0x4f6   :  { %12798 = vst [vmem:[#allocation97_spill] sm:$0xff] %v10045_v55 }
 0x4f7   :  { %v10051_v23 = vsel %vm12781_vm2, %v5244_v7, %v11765_v63  ;;  %12804 = vst [vmem:[#allocation26_spill] sm:$0xff] %v10063_v41  ;;  %v10079_v62 = vpop.permute.xlu0 %5266  ;;  %vm12808_vm2 = vcmp.lt.s32.totalorder %v5798_v39, 1  ;;  %v10105_v9 = vsel %vm12812_vm3, %v12811_v60, %v12810_v15  ;;  %vm12824_vm3 = vcmp.lt.s32.totalorder %v5798_v39, 127 }
 0x4f8   :  { %v5268_v41 = vunpack.i.l.bf16 %v10079_v62  ;;  %12813 = vst [vmem:[#allocation41_spill] sm:$0xff] %v10105_v9  ;;  %vm12815_vm4 = vmmov %vm12808_vm2 }
 0x4f9   :  { %v5272_v11 = vpop.permute.xlu1 %5271 }
 0x4fa   :  { %5491 = vrot.lane.b32.xlu2 %v9504_v34, %s5603_s23  ;;  %v5274_v0 = vunpack.i.h.bf16 %v5272_v11  ;;  %v5273_v63 = vunpack.i.l.bf16 %v5272_v11  ;;  %v10097_v11 = vsel %vm12808_vm2, %v12807_v20, %v5268_v41 }
 0x4fb   :  { %12809 = vst [vmem:[#allocation76_spill] sm:$0xff] %v10097_v11  ;;  %v12817_v11 = vunpack.i.l.bf16 %v9853_v33 }
 0x4fc   :  { %v10076_v46 = vpop.permute.xlu2 %5331  ;;  %v10085_v55 = vsel %vm12805_vm8, %v5273_v63, %v5274_v0  ;;  %5501 = vrot.lane.b32.xlu1 %v9630_v42, %s5598_s18  ;;  %vm12819_vm8 = vcmp.lt.s32.totalorder %v5798_v39, 126 }
 0x4fd   :  { %v11772_v49 = vunpack.i.l.bf16 %v10076_v46  ;;  %12806 = vst [vmem:[#allocation104_spill] sm:$0xff] %v10085_v55  ;;  %v12814_v55 = vunpack.i.h.bf16 %v10079_v62  ;;  %5496 = vrot.lane.b32.xlu0 %v9540_v53, %s5603_s23  ;;  %v3223_v21 = vsel %vm12819_vm8, %v12818_v27, %v12817_v11  ;;  %v12825_v11 = vunpack.i.h.bf16 %v9674_v36 }
 0x4fe   :  { %vm12829_vm8 = vcmp.lt.s32.totalorder %v5798_v39, 42  ;;  %v12834_v36 = vunpack.i.h.bf16 %v9836_v22 }
 0x4ff   :  { %v10091_v7 = vsel %vm12797_vm10, %v5259_v56, %v11772_v49  ;;  %v10111_v56 = vsel %vm12815_vm4, %v5268_v41, %v12814_v55  ;;  %v10131_v9 = vpop.permute.xlu0 %5291  ;;  %vm12820_vm10 = vcmp.lt.s32.totalorder %v5798_v39, 110  ;;  %v12821_v41 = vunpack.i.h.bf16 %v9857_v43 }
 0x500   :  { %12816 = vst [vmem:[#allocation65_spill] sm:$0xff] %v10111_v56  ;;  %v5293_v58 = vunpack.i.l.bf16 %v10131_v9  ;;  %vm12822_vm2 = vmmov %vm12820_vm10  ;;  %vm12826_vm4 = vcmp.lt.s32.totalorder %v5798_v39, 41  ;;  %v12827_v43 = vunpack.i.h.bf16 %v9917_v25 }
 0x501   :  { %v10125_v15 = vpop.permute.xlu1 %5281 }
 0x502   :  { %5506 = vrot.lane.b32.xlu2 %v9630_v42, %s5599_s19  ;;  %v11782_v49 = vunpack.i.h.bf16 %v10125_v15  ;;  %v5283_v20 = vunpack.i.l.bf16 %v10125_v15 }
 0x504   :  { %v10123_v60 = vpop.permute.xlu2 %5346  ;;  %v10145_v55 = vsel %vm12820_vm10, %v5283_v20, %v11782_v49  ;;  %v3255_v56 = vsel %vm12822_vm2, %v12821_v41, %v5283_v20  ;;  %v10163_v49 = vsel %vm12826_vm4, %v12825_v11, %v5293_v58  ;;  %v12828_v20 = vunpack.i.l.bf16 %v9917_v25  ;;  %vm12832_vm10 = vmmov %vm12826_vm4  ;;  %5516 = vrot.lane.b32.xlu1 %v9582_v29, %s5607_s26 }
 0x505   :  { %v12823_v52 = vunpack.i.l.bf16 %v10123_v60  ;;  %v3813_v1 = vpack.c.bf16 %v3255_v56, %v3223_v21  ;;  %vm12835_vm2 = vmmov %vm12824_vm3  ;;  %5511 = vrot.lane.b32.xlu0 %v9582_v29, %s5606_s25  ;;  %v12836_v56 = vunpack.i.h.bf16 %v9853_v33  ;;  %vm12839_vm4 = vcmp.lt.s32.totalorder %v5798_v39, 40 }
 0x506   :  { %v10171_v41 = vsel %vm12829_vm8, %v12828_v20, %v12827_v43  ;;  %vm12840_vm8 = vmmov %vm12839_vm4 }
 0x507   :  { %v10155_v61 = vsel %vm12824_vm3, %v5274_v0, %v12823_v52  ;;  %12830 = vst [vmem:[#allocation70_spill] sm:$0xff] %v10171_v41  ;;  %v12831_v52 = vunpack.i.h.bf16 %v10131_v9  ;;  %v3191_v0 = vsel %vm12835_vm2, %v12834_v36, %v5273_v63  ;;  %3926 = vmatpush.bf16.msra.mxu2 %v3813_v1  ;;  %v10197_v63 = vpop.permute.xlu0 %5306  ;;  %vm12837_vm3 = vcmp.lt.s32.totalorder %v5798_v39, 126 }
 0x508   :  { %v3805_v36 = vpack.c.bf16 %v3191_v0, %v9500_v44  ;;  %v5308_v43 = vunpack.i.l.bf16 %v10197_v63  ;;  %v12842_v0 = vunpack.i.h.bf16 %v9965_v18  ;;  %v12843_v41 = vunpack.i.l.bf16 %v9965_v18 }
 0x509   :  { %v10177_v21 = vsel %vm12832_vm10, %v5293_v58, %v12831_v52  ;;  %v5297_v20 = vpop.permute.xlu1 %5296  ;;  %v12838_v58 = vunpack.i.h.bf16 %v9920_v51  ;;  %vm12844_vm10 = vcmp.lt.s32.totalorder %v5798_v39, 39  ;;  %vm12847_vm2 = vcmp.lt.s32.totalorder %v5798_v39, 38 }
 0x50a   :  { %12833 = vst [vmem:[#allocation101_spill] sm:$0xff] %v10177_v21  ;;  %5521 = vrot.lane.b32.xlu2 %v9504_v34, %s5600_s20  ;;  %v5299_v27 = vunpack.i.h.bf16 %v5297_v20  ;;  %v5298_v22 = vunpack.i.l.bf16 %v5297_v20  ;;  %v10225_v33 = vsel %vm12844_vm10, %v12843_v41, %v12842_v0  ;;  %v12848_v41 = vpack.c.bf16 %v9797_v32, %v9789_v26  ;;  %vm12864_vm10 = vmmov %vm12840_vm8 }
 0x50b   :  { %3927 = vmatpush.bf16.msra.mxu2 %v3805_v36  ;;  %12845 = vst [vmem:[#allocation52_spill] sm:$0xff] %v10225_v33  ;;  %v12850_v26 = vunpack.i.l.bf16 %v10030_v31  ;;  %v12867_v33 = vpack.c.bf16 %v9697_v35, %v9689_v13  ;;  %v10354_v13 = vld [vmem:[%s11333_s1 + $0x10] sm:$0xff]  ;;  %v12876_v35 = vunpack.i.h.bf16 %v9831_v17 }
 0x50c   :  { %v10194_v11 = vpop.permute.xlu2 %5351  ;;  %v10213_v20 = vsel %vm12839_vm4, %v12838_v58, %v5298_v22  ;;  %v10217_v44 = vsel %vm12840_vm8, %v5298_v22, %v5299_v27  ;;  %5531 = vrot.lane.b32.xlu1 %v9504_v34, %s5601_s21  ;;  %v12855_v34 = vunpack.i.h.bf16 %v10197_v63  ;;  %vm12856_vm4 = vmmov %vm12847_vm2 }
 0x50d   :  { %v11786_v52 = vunpack.i.l.bf16 %v10194_v11  ;;  %12841 = vst [vmem:[#allocation100_spill] sm:$0xff] %v10217_v44  ;;  %5526 = vrot.lane.b32.xlu0 %v9540_v53, %s5600_s20 }
 0x50e   :  { %v10277_v44 = vsel %vm12856_vm4, %v5308_v43, %v12855_v34  ;;  %vm12874_vm4 = vcmp.lt.s32.totalorder %v5798_v39, 18 }
 0x50f   :  { %v10207_v1 = vsel %vm12837_vm3, %v12836_v56, %v11786_v52  ;;  %v12846_v56 = vunpack.i.h.bf16 %v9731_v37  ;;  %3928 = vmatpush.bf16.msra.mxu2 %v12848_v41  ;;  %v10252_v21 = vpop.permute.xlu0 %5321  ;;  %vm12851_vm3 = vcmp.lt.s32.totalorder %v5798_v39, 21  ;;  %v12853_v41 = vpack.c.bf16 %v9821_v8, %v9813_v59  ;;  %12857 = vst [vmem:[#allocation91_spill] sm:$0xff] %v10277_v44 }
 0x510   :  { %v5323_v37 = vunpack.i.l.bf16 %v10252_v21 }
 0x511   :  { %v10231_v51 = vsel %vm12847_vm2, %v12846_v56, %v5308_v43  ;;  %v5312_v56 = vpop.permute.xlu1 %5311  ;;  %v12861_v43 = vunpack.i.h.bf16 %v10252_v21  ;;  %vm12869_vm2 = vcmp.lt.s32.totalorder %v5798_v39, 19 }
 0x512   :  { %5536 = vrot.lane.b32.xlu2 %v9540_v53, %s5601_s21  ;;  %v5314_v52 = vunpack.i.h.bf16 %v5312_v56  ;;  %v5313_v36 = vunpack.i.l.bf16 %v5312_v56  ;;  %v12849_v53 = vunpack.i.h.bf16 %v10030_v31  ;;  %v12854_v56 = vunpack.i.h.bf16 %v9968_v40 }
 0x513   :  { %3929 = vmatpush.bf16.msra.mxu2 %v12853_v41  ;;  %v12860_v40 = vunpack.i.h.bf16 %v9774_v19  ;;  %v10299_v34 = vsel %vm309_vm7, %v5323_v37, %v12861_v43 }
 0x514   :  { %v10248_v0 = vpop.permute.xlu2 %5366  ;;  %v10262_v32 = vsel %vm12851_vm3, %v12850_v26, %v12849_v53  ;;  %v10271_v22 = vsel %vm243_vm5, %v12854_v56, %v5313_v36  ;;  %v10281_v53 = vsel %vm243_vm5, %v5313_v36, %v5314_v52  ;;  %12862 = vst [vmem:[#allocation87_spill] sm:$0xff] %v10299_v34  ;;  %5546 = vrot.lane.b32.xlu1 %v9582_v29, %s5605_s24  ;;  %vm12870_vm3 = vmmov %vm12869_vm2 }
 0x515   :  { %v5368_v58 = vunpack.i.l.bf16 %v10248_v0  ;;  %12852 = vst [vmem:[#allocation54_spill] sm:$0xff] %v10262_v32  ;;  %v10291_v59 = vsel %vm309_vm7, %v12860_v40, %v5323_v37  ;;  %v12863_v41 = vunpack.i.h.bf16 %v10248_v0  ;;  %5541 = vrot.lane.b32.xlu0 %v9582_v29, %s5604_s3  ;;  %v12866_v40 = vpack.c.bf16 %v9746_v12, %v9760_v10 }
 0x516   :  { %12858 = vst [vmem:[#allocation90_spill] sm:$0xff] %v10281_v53  ;;  %v12868_v12 = vunpack.i.h.bf16 %v10033_v38 }
 0x517   :  { %v10285_v8 = vsel %vm12840_vm8, %v5299_v27, %v5368_v58  ;;  %v10311_v56 = vsel %vm12864_vm10, %v5368_v58, %v12863_v41  ;;  %3930 = vmatpush.bf16.msra.mxu2 %v12866_v40  ;;  %v10327_v27 = vpop.permute.xlu0 %5336  ;;  %v12873_v58 = vunpack.i.l.bf16 %v10076_v46  ;;  %vm12877_vm8 = vcmp.lt.s32.totalorder %v5798_v39, 2 }
 0x518   :  { %12859 = vst [vmem:[#allocation109_spill] sm:$0xff] %v10285_v8  ;;  %v5338_v37 = vunpack.i.l.bf16 %v10327_v27  ;;  %vm12883_vm10 = vmmov %vm12877_vm8 }
 0x519   :  { %12865 = vst [vmem:[#allocation85_spill] sm:$0xff] %v10311_v56  ;;  %v5327_v36 = vpop.permute.xlu1 %5326  ;;  %v12930_v56 = vunpack.i.h.bf16 %v10125_v15 }
 0x51a   :  { %5551 = vrot.lane.b32.xlu2 %v9582_v29, %s5602_s22  ;;  %v5329_v19 = vunpack.i.h.bf16 %v5327_v36  ;;  %v5328_v26 = vunpack.i.l.bf16 %v5327_v36  ;;  %v12872_v36 = vunpack.i.h.bf16 %v10076_v46  ;;  %v10360_v38 = vsel %vm12877_vm8, %v12876_v35, %v5338_v37 }
 0x51b   :  { %3931 = vmatpush.bf16.msra.mxu2 %v12867_v33  ;;  %v3868_v35 = vunpack.c.l.b16 %v10354_v13 }
 0x51c   :  { %v10323_v43 = vpop.permute.xlu2 %5381  ;;  %v10337_v10 = vsel %vm12869_vm2, %v12868_v12, %v5328_v26  ;;  %v10341_v40 = vsel %vm12870_vm3, %v5328_v26, %v5329_v19  ;;  %v10349_v44 = vsel %vm12874_vm4, %v12873_v58, %v12872_v36  ;;  %3274 = vrot.lane.b32.xlu1 %v9575_v24, %s5600_s20  ;;  %vm12887_vm2 = vcmp.lt.s32.totalorder %v5798_v39, 1 }
 0x51d   :  { %v5383_v41 = vunpack.i.l.bf16 %v10323_v43  ;;  %12871 = vst [vmem:[#allocation108_spill] sm:$0xff] %v10341_v40  ;;  %v12879_v12 = vunpack.i.h.bf16 %v10323_v43  ;;  %5556 = vrot.lane.b32.xlu0 %v9582_v29, %s5603_s23  ;;  %v12882_v29 = vunpack.i.h.bf16 %v10327_v27  ;;  %vm12888_vm3 = vmmov %vm12887_vm2  ;;  %vm12890_vm4 = vcmp.lt.s32.totalorder %v5798_v39, 19 }
 0x51e   :  { %12875 = vst [vmem:[#allocation107_spill] sm:$0xff] %v10349_v44  ;;  %vm12893_vm8 = vmmov %vm12890_vm4  ;;  %v12900_v44 = vunpack.i.l.bf16 %v9602_v30 }
 0x51f   :  { %v10368_v58 = vsel %vm243_vm5, %v5314_v52, %v5383_v41  ;;  %v10374_v36 = vsel %vm243_vm5, %v5383_v41, %v12879_v12  ;;  %v12881_v52 = vpack.c.bf16 %v9721_v54, %v9713_v16  ;;  %v5357_v32 = vpop.permute.xlu0 %5356  ;;  %v10395_v16 = vsel %vm12883_vm10, %v5338_v37, %v12882_v29 }
 0x520   :  { %12878 = vst [vmem:[#allocation102_spill] sm:$0xff] %v10368_v58  ;;  %v5359_v34 = vunpack.i.h.bf16 %v5357_v32  ;;  %v5358_v40 = vunpack.i.l.bf16 %v5357_v32  ;;  %v12885_v54 = vpack.c.bf16 %v9652_v50, %v9660_v47  ;;  %v12886_v12 = vunpack.i.h.bf16 %v10079_v62 }
 0x521   :  { %12880 = vst [vmem:[#allocation99_spill] sm:$0xff] %v10374_v36  ;;  %3932 = vmatpush.bf16.msra.mxu2 %v12881_v52  ;;  %v5342_v41 = vpop.permute.xlu1 %5341  ;;  %v10400_v52 = vpack.c.b16 %v3868_v35, %v3868_v35  ;;  %vm12896_vm10 = vcmp.lt.s32.totalorder %v5798_v39, 42  ;;  %v12953_v36 = vunpack.i.h.bf16 %v10252_v21 }
 0x522   :  { %3306 = vrot.lane.b32.xlu2 %v9575_v24, %s5601_s21  ;;  %v5344_v17 = vunpack.i.h.bf16 %v5342_v41  ;;  %v5343_v53 = vunpack.i.l.bf16 %v5342_v41  ;;  %12884 = vst [vmem:[#allocation103_spill] sm:$0xff] %v10395_v16  ;;  %v12901_v16 = vunpack.i.h.bf16 %v10248_v0 }
 0x524   :  { %v10387_v26 = vpop.permute.xlu2 %5396  ;;  %v10406_v41 = vsel %vm12887_vm2, %v12886_v12, %v5343_v53  ;;  %v10410_v32 = vsel %vm12888_vm3, %v5343_v53, %v5344_v17  ;;  %v12895_v12 = vunpack.i.h.bf16 %v9917_v25  ;;  %vm12898_vm2 = vmmov %vm12896_vm10  ;;  %5566 = vrot.lane.b32.xlu1 %v9630_v42, %s5606_s25  ;;  %vm12902_vm3 = vcmp.lt.s32.totalorder %v5798_v39, 40 }
 0x525   :  { %v5398_v33 = vunpack.i.l.bf16 %v10387_v26  ;;  %3933 = vmatpush.bf16.msra.mxu2 %v12885_v54  ;;  %12889 = vst [vmem:[#allocation98_spill] sm:$0xff] %v10410_v32  ;;  %v12892_v62 = vunpack.i.h.bf16 %v10387_v26  ;;  %5561 = vrot.lane.b32.xlu0 %v9630_v42, %s5608_s27  ;;  %v12903_v32 = vunpack.i.l.bf16 %v9644_v5  ;;  %v12912_v5 = vunpack.i.l.bf16 %v9681_v2 }
 0x526   :  { %v10430_v53 = vsel %vm12896_vm10, %v12895_v12, %v5358_v40  ;;  %vm12907_vm10 = vcmp.lt.s32.totalorder %v5798_v39, 1 }
 0x527   :  { %v10414_v37 = vsel %vm12890_vm4, %v5329_v19, %v5398_v33  ;;  %v10424_v35 = vsel %vm12893_vm8, %v5398_v33, %v12892_v62  ;;  %12897 = vst [vmem:[#allocation96_spill] sm:$0xff] %v10430_v53  ;;  %v10434_v19 = vsel %vm12898_vm2, %v5358_v40, %v5359_v34  ;;  %v5372_v12 = vpop.permute.xlu0 %5371  ;;  %vm12904_vm4 = vmmov %vm12898_vm2  ;;  %vm12906_vm8 = vcmp.lt.s32.totalorder %v5798_v39, 41 }
 0x528   :  { %12891 = vst [vmem:[#allocation95_spill] sm:$0xff] %v10414_v37  ;;  %3934 = vmatmul.bf16.vlgmr.msra.gmra.mxu2 %v10400_v52  ;;  %v5374_v47 = vunpack.i.h.bf16 %v5372_v12  ;;  %v5373_v50 = vunpack.i.l.bf16 %v5372_v12  ;;  %v10459_v29 = vsel %vm12904_vm4, %v5359_v34, %v12903_v32  ;;  %vm12910_vm2 = vmmov %vm12907_vm10  ;;  %v12919_v12 = vunpack.i.h.bf16 %v10131_v9 }
 0x529   :  { %12894 = vst [vmem:[#allocation94_spill] sm:$0xff] %v10424_v35  ;;  %v5362_v33 = vpop.permute.xlu1 %5361  ;;  %v12927_v53 = vunpack.i.h.bf16 %v10323_v43 }
 0x52a   :  { %12899 = vst [vmem:[#allocation92_spill] sm:$0xff] %v10434_v19  ;;  %5571 = vrot.lane.b32.xlu2 %v9630_v42, %s5607_s26  ;;  %v5364_v40 = vunpack.i.h.bf16 %v5362_v33  ;;  %v5363_v62 = vunpack.i.l.bf16 %v5362_v33  ;;  %v10453_v42 = vsel %vm12902_vm3, %v12901_v16, %v12900_v44  ;;  %vm12913_vm3 = vcmp.lt.s32.totalorder %v5798_v39, 39 }
 0x52b   :  { %v10481_v34 = vsel %vm12913_vm3, %v5374_v47, %v12912_v5  ;;  %vm12915_vm4 = vmmov %vm12913_vm3 }
 0x52c   :  { %v10443_v25 = vpop.permute.xlu2 %5411  ;;  %v10465_v33 = vsel %vm12906_vm8, %v5364_v40, %v12905_v14  ;;  %v12914_v14 = vunpack.i.h.bf16 %v9965_v18  ;;  %vm12917_vm8 = vmmov %vm12913_vm3  ;;  %3438 = vrot.lane.b32.xlu1 %v9623_v45, %s5605_s24  ;;  %vm12925_vm3 = vcmp.lt.s32.totalorder %v5798_v39, 126 }
 0x52d   :  { %v5413_v54 = vunpack.i.l.bf16 %v10443_v25  ;;  %v12909_v0 = vunpack.i.h.bf16 %v10443_v25  ;;  %v10493_v16 = vsel %vm12917_vm8, %v5373_v50, %v5374_v47  ;;  %3406 = vrot.lane.b32.xlu0 %v9623_v45, %s5604_s3 }
 0x52e   :  { %12918 = vst [vmem:[#allocation84_spill] sm:$0xff] %v10493_v16  ;;  %v12948_v16 = vld [vmem:[#allocation8_spill] sm:$0xff] }
 0x52f   :  { %v10469_v30 = vsel %vm12907_vm10, %v5344_v17, %v5413_v54  ;;  %v10475_v44 = vsel %vm12910_vm2, %v5413_v54, %v12909_v0  ;;  %v10489_v17 = vsel %vm12915_vm4, %v12914_v14, %v5373_v50  ;;  %vm12920_vm10 = vcmp.lt.s32.totalorder %v5798_v39, 41 }
 0x530   :  { %12908 = vst [vmem:[#allocation83_spill] sm:$0xff] %v10469_v30  ;;  %v10505_v18 = vsel %vm12920_vm10, %v12919_v12, %v5363_v62  ;;  %v11804_v0 = vunpack.i.h.bf16 %v10194_v11  ;;  %vm12922_vm2 = vmmov %vm12920_vm10  ;;  %v5580_v12 = vpack.i.bf16 %v9623_v45, %v9578_v48  ;;  %vm12929_vm4 = vcmp.lt.s32.totalorder %v5798_v39, 110 }
 0x531   :  { %12911 = vst [vmem:[#allocation82_spill] sm:$0xff] %v10475_v44  ;;  %v10516_v47 = vsel %vm12922_vm2, %v5363_v62, %v5364_v40  ;;  %v5377_v14 = vpop.permute.xlu1 %5376  ;;  %v5387_v40 = vpop.permute.xlu0 %5386  ;;  %v12924_v62 = vunpack.i.l.bf16 %v10194_v11  ;;  %vm12931_vm8 = vmmov %vm12929_vm4  ;;  %vm12933_vm10 = vcmp.lt.s32.totalorder %v5798_v39, 38  ;;  %vm12938_vm2 = vcmp.lt.s32.totalorder %v5798_v39, 21 }
 0x532   :  { %12916 = vst [vmem:[#allocation88_spill] sm:$0xff] %v10489_v17  ;;  %3342 = vrot.lane.b32.xlu2 %v9623_v45, %s5602_s22  ;;  %v5379_v32 = vunpack.i.h.bf16 %v5377_v14  ;;  %v5378_v3 = vunpack.i.l.bf16 %v5377_v14  ;;  %v5389_v2 = vunpack.i.h.bf16 %v5387_v40  ;;  %v5388_v19 = vunpack.i.l.bf16 %v5387_v40  ;;  %v12951_v17 = vld [vmem:[#allocation72_spill] sm:$0xff] }
 0x533   :  { %12921 = vst [vmem:[#allocation80_spill] sm:$0xff] %v10505_v18  ;;  %v10534_v9 = vsel %vm12925_vm3, %v12924_v62, %v11804_v0  ;;  %vm12940_vm3 = vmmov %vm12938_vm2 }
 0x534   :  { %12923 = vst [vmem:[#allocation79_spill] sm:$0xff] %v10516_v47  ;;  %v10522_v5 = vpop.permute.xlu2 %5431  ;;  %v12926_v47 = vunpack.i.l.bf16 %v9612_v28  ;;  %v12932_v28 = vunpack.i.l.bf16 %v9676_v6  ;;  %v12937_v6 = vunpack.i.h.bf16 %v10030_v31  ;;  %5576 = vrot.lane.b32.xlu1 %v5580_v12, %s5600_s20  ;;  %v12949_v31 = vunpack.i.l.bf16 %v12948_v16 }
 0x535   :  { %v5433_v50 = vunpack.i.l.bf16 %v10522_v5  ;;  %v12928_v14 = vunpack.i.h.bf16 %v10522_v5  ;;  %3374 = vrot.lane.b32.xlu0 %v9623_v45, %s5603_s23 }
 0x536   :  { %v10542_v54 = vsel %vm243_vm5, %v12927_v53, %v12926_v47  ;;  %v10560_v43 = vsel %vm12933_vm10, %v5379_v32, %v12932_v28  ;;  %v12934_v53 = vunpack.i.h.bf16 %v10197_v63  ;;  %vm12935_vm5 = vmmov %vm12933_vm10  ;;  %v10582_v63 = vsel %vm12940_vm3, %v5388_v19, %v5389_v2 }
 0x537   :  { %v10548_v18 = vsel %vm12929_vm4, %v5433_v50, %v12928_v14  ;;  %v10554_v62 = vsel %vm12931_vm8, %v12930_v56, %v5433_v50  ;;  %v10578_v50 = vsel %vm12938_vm2, %v12937_v6, %v5388_v19  ;;  %12941 = vst [vmem:[#allocation21_spill] sm:$0xff] %v10582_v63  ;;  %vm12942_vm4 = vmmov %vm12935_vm5  ;;  %v12946_v56 = vunpack.i.h.bf16 %v10387_v26 }
 0x538   :  { %v10566_v47 = vsel %vm12935_vm5, %v12934_v53, %v5378_v3  ;;  %12939 = vst [vmem:[#allocation81_spill] sm:$0xff] %v10578_v50  ;;  %v10588_v28 = vsel %vm12942_vm4, %v5378_v3, %v5379_v32  ;;  %v12944_v3 = vld [vmem:[#allocation69_spill] sm:$0xff]  ;;  %vm12947_vm8 = vcmp.lt.s32.totalorder %v5798_v39, 19  ;;  %vm12950_vm10 = vmmov %vm12938_vm2  ;;  %vm12958_vm5 = vcmp.lt.s32.totalorder %v5798_v39, 18 }
 0x539   :  { %12936 = vst [vmem:[#allocation37_spill] sm:$0xff] %v10566_v47  ;;  %v5392_v19 = vpop.permute.xlu1 %5391  ;;  %v5402_v14 = vpop.permute.xlu0 %5401  ;;  %v12945_v32 = vunpack.i.l.bf16 %v12944_v3  ;;  %v2993_v8 = vsel %vm12950_vm10, %v5389_v2, %v12949_v31  ;;  %vm12960_vm2 = vmmov %vm12958_vm5  ;;  %vm12971_vm4 = vcmp.lt.s32.totalorder %v5798_v39, 1 }
 0x53a   :  { %12943 = vst [vmem:[#allocation106_spill] sm:$0xff] %v10588_v28  ;;  %5581 = vrot.lane.b32.xlu2 %v5580_v12, %s5601_s21  ;;  %v5394_v6 = vunpack.i.h.bf16 %v5392_v19  ;;  %v5393_v15 = vunpack.i.l.bf16 %v5392_v19  ;;  %v5404_v40 = vunpack.i.h.bf16 %v5402_v14  ;;  %v5403_v0 = vunpack.i.l.bf16 %v5402_v14  ;;  %vm12962_vm3 = vmmov %vm12960_vm2 }
 0x53b   :  { %v3057_v12 = vsel %vm12947_vm8, %v12946_v56, %v12945_v32  ;;  %v12952_v28 = vunpack.i.l.bf16 %v12951_v17  ;;  %v12956_v56 = vld [vmem:[#allocation32_spill] sm:$0xff]  ;;  %v12959_v17 = vunpack.i.h.bf16 %v10076_v46  ;;  %v12964_v46 = vld [vmem:[#allocation58_spill] sm:$0xff] }
 0x53c   :  { %v10596_v53 = vpop.permute.xlu2 %5446  ;;  %v10616_v14 = vsel %vm309_vm7, %v12953_v36, %v5393_v15  ;;  %v10620_v26 = vsel %vm309_vm7, %v5393_v15, %v5394_v6  ;;  %v12957_v16 = vunpack.i.l.bf16 %v12956_v56  ;;  %v10634_v21 = vsel %vm12962_vm3, %v5403_v0, %v5404_v40  ;;  %3440 = vrot.lane.b32.xlu1 %v12964_v46, %s5605_s24 }
 0x53d   :  { %v3025_v19 = vsel %vm309_vm7, %v5394_v6, %v12952_v28  ;;  %12954 = vst [vmem:[#allocation105_spill] sm:$0xff] %v10616_v14  ;;  %v10630_v28 = vsel %vm12960_vm2, %v12959_v17, %v5403_v0  ;;  %3408 = vrot.lane.b32.xlu0 %v12964_v46, %s5604_s3  ;;  %vm12967_vm7 = vcmp.lt.s32.totalorder %v5798_v39, 2  ;;  %v12968_v0 = vld [vmem:[#allocation29_spill] sm:$0xff]  ;;  %v12970_v15 = vunpack.i.h.bf16 %v10443_v25 }
 0x53e   :  { %12955 = vst [vmem:[#allocation45_spill] sm:$0xff] %v10620_v26  ;;  %v3089_v2 = vsel %vm12958_vm5, %v5404_v40, %v12957_v16  ;;  %v3780_v31 = vpack.c.bf16 %v3025_v19, %v2993_v8  ;;  %v12969_v6 = vunpack.i.l.bf16 %v12968_v0  ;;  %vm12973_vm8 = vmmov %vm12967_vm7  ;;  %v12977_v0 = vunpack.i.h.bf16 %v10123_v60 }
 0x53f   :  { %12961 = vst [vmem:[#allocation40_spill] sm:$0xff] %v10630_v28  ;;  %v3788_v36 = vpack.c.bf16 %v3089_v2, %v3057_v12  ;;  %v12965_v2 = vld [vmem:[#allocation51_spill] sm:$0xff]  ;;  %vm12975_vm10 = vmmov %vm12967_vm7  ;;  %vm12978_vm5 = vcmp.lt.s32.totalorder %v5798_v39, 127  ;;  %vm12979_vm2 = vcmask 1043456   ;;  %v5449_v35 = vunpack.i.h.bf16 %v10596_v53 }
 0x540   :  { %12963 = vst [vmem:[#allocation39_spill] sm:$0xff] %v10634_v21  ;;  %v12966_v17 = vunpack.i.l.bf16 %v12965_v2  ;;  %v3153_v47 = vsel %vm12971_vm4, %v12970_v15, %v12969_v6  ;;  %vm12980_vm3 = vmmov %vm12979_vm2  ;;  %v11821_v21 = vunpack.i.l.bf16 %v10596_v53 }
 0x541   :  { %v5407_v3 = vpop.permute.xlu1 %5406  ;;  %v10652_v19 = vpop.permute.xlu0 %5416  ;;  %vm12987_vm4 = vmmov %vm12979_vm2 }
 0x542   :  { %3344 = vrot.lane.b32.xlu2 %v12964_v46, %s5602_s22  ;;  %v5409_v32 = vunpack.i.h.bf16 %v5407_v3  ;;  %v5408_v12 = vunpack.i.l.bf16 %v5407_v3  ;;  %v11812_v16 = vunpack.i.l.bf16 %v10652_v19  ;;  %v12972_v3 = vunpack.i.h.bf16 %v10327_v27 }
 0x544   :  { %v10650_v40 = vpop.permute.xlu2 %5461  ;;  %v3121_v8 = vsel %vm12967_vm7, %v5409_v32, %v12966_v17  ;;  %v10670_v58 = vsel %vm12973_vm8, %v12972_v3, %v5408_v12  ;;  %v10674_v56 = vsel %vm12975_vm10, %v5408_v12, %v5409_v32  ;;  %v10682_v25 = vsel %vm12978_vm5, %v12977_v0, %v11812_v16  ;;  %3280 = vrot.lane.b32.xlu1 %v12964_v46, %s5600_s20  ;;  %vm12981_vm7 = vmmov %vm12979_vm2 }
 0x545   :  { %12974 = vst [vmem:[#allocation86_spill] sm:$0xff] %v10670_v58  ;;  %v3796_v2 = vpack.c.bf16 %v3153_v47, %v3121_v8  ;;  %3376 = vrot.lane.b32.xlu0 %v12964_v46, %s5603_s23  ;;  %vm12991_vm8 = vcmp.lt.s32.totalorder %v5798_v39, 110 }
 0x546   :  { %12976 = vst [vmem:[#allocation93_spill] sm:$0xff] %v10674_v56  ;;  %vm12993_vm10 = vmmov %vm12991_vm8 }
 0x547   :  { %3902 = vmatpush.bf16.msrb.mxu3 %v3796_v2  ;;  %vm12996_vm5 = vmmov %vm12991_vm8 }
 0x549   :  { %v5427_v6 = vpop.permute.xlu1 %5426  ;;  %v10698_v3 = vpop.permute.xlu0 %5421 }
 0x54a   :  { %3312 = vrot.lane.b32.xlu2 %v12964_v46, %s5601_s21  ;;  %v5429_v12 = vunpack.i.h.bf16 %v5427_v6  ;;  %v5428_v17 = vunpack.i.l.bf16 %v5427_v6  ;;  %v5424_v0 = vunpack.i.h.bf16 %v10698_v3  ;;  %v11820_v27 = vunpack.i.l.bf16 %v10698_v3  ;;  %v4139_v6 = vld [vmem:[%s11334_s2 + $0x10] sm:$0xff] }
 0x54b   :  { %3903 = vmatpush.bf16.msrb.mxu3 %v3788_v36 }
 0x54c   :  { %v10694_v15 = vpop.permute.xlu2 %5476  ;;  %v3544_v16 = vsel %vm845_vm6, %v11820_v27, %v5424_v0  ;;  %v3543_v36 = vsel %vm845_vm6, %v5424_v0, %v5428_v17 }
 0x54d   :  { %v11817_v8 = vunpack.i.h.bf16 %v10694_v15  ;;  %v5478_v32 = vunpack.i.l.bf16 %v10694_v15  ;;  %v3852_v26 = vpack.c.bf16 %v3544_v16, %v3544_v16  ;;  %v3853_v50 = vpack.c.bf16 %v3543_v36, %v3543_v36  ;;  %3864 = vperm.xlu0 %4653, %v4139_v6  }
 0x54f   :  { %v3541_v47 = vsel %vm845_vm6, %v5429_v12, %v5478_v32  ;;  %v10708_v2 = vsel %vm845_vm6, %v5478_v32, %v11817_v8  ;;  %3904 = vmatpush.bf16.msrb.mxu3 %v3780_v31  ;;  %v3877_v32 = vsel %vm12980_vm3, %v3852_v26, 0  ;;  %v3880_v8 = vsel %vm12981_vm7, %v3853_v50, 0 }
 0x550   :  { %v3855_v63 = vpack.c.bf16 %v3541_v47, %v3541_v47  ;;  %3916 = vmatpush.bf16.msra.mxu1 %v3877_v32  ;;  %3942 = vmatpush.bf16.msrb.mxu0 %v3880_v8  ;;  %v12982_v26 = vpack.c.bf16 %v10542_v54, %v10560_v43  ;;  %v3542_v31 = vsel %vm845_vm6, %v5428_v17, %v5429_v12 }
 0x551   :  { %v10724_v27 = vpop.permute.xlu1 %5441  ;;  %v10726_v47 = vpop.permute.xlu0 %5436  ;;  %v12984_v54 = vpack.c.bf16 %v10481_v34, %v10453_v42  ;;  %v3854_v43 = vpack.c.bf16 %v3542_v31, %v3542_v31  ;;  %v12986_v17 = vpack.c.bf16 %v10465_v33, %v10459_v29 }
 0x552   :  { %v3886_v14 = vsel %vm12979_vm2, %v3855_v63, 0  ;;  %v5439_v16 = vunpack.i.h.bf16 %v10726_v47  ;;  %v11822_v63 = vunpack.i.l.bf16 %v10726_v47  ;;  %v11824_v6 = vunpack.i.h.bf16 %v10724_v27 }
 0x553   :  { %3994 = vmatpush.bf16.msrb.mxu2 %v3886_v14  ;;  %3905 = vmatpush.bf16.msrb.mxu3 %v12982_v26  ;;  %v3512_v14 = vsel %vm812_vm1, %v11821_v21, %v5449_v35  ;;  %v5443_v36 = vunpack.i.l.bf16 %v10724_v27  ;;  %v3883_v42 = vsel %vm12987_vm4, %v3854_v43, 0  ;;  %vm12997_vm2 = vcmp.lt.s32.totalorder %v5798_v39, 126 }
 0x554   :  { %v3480_v50 = vsel %vm779_vm0, %v11822_v63, %v5439_v16  ;;  %v10743_v0 = vpop.permute.xlu2 %5491  ;;  %vm12999_vm3 = vmmov %vm12997_vm2  ;;  %vm13011_vm4 = vcmp.lt.s32.totalorder %v5798_v39, 127 }
 0x555   :  { %v3844_v8 = vpack.c.bf16 %v3512_v14, %v3480_v50  ;;  %12983 = vst [vmem:[#allocation49_spill] sm:$0xff] %v10743_v0  ;;  %v3479_v34 = vsel %vm779_vm0, %v5439_v16, %v5443_v36  ;;  %v3478_v14 = vsel %vm779_vm0, %v5443_v36, %v11824_v6  ;;  %v5463_v16 = vunpack.i.l.bf16 %v10650_v40  ;;  %vm13002_vm7 = vmmov %vm12997_vm2 }
 0x557   :  { %3906 = vmatpush.bf16.msrb.mxu3 %v12984_v54  ;;  %3917 = vmatpush.bf16.msra.mxu1 %v3844_v8  ;;  %v11827_v8 = vunpack.i.h.bf16 %v10650_v40 }
 0x559   :  { %v10750_v32 = vpop.permute.xlu1 %5456  ;;  %v10752_v26 = vpop.permute.xlu0 %5451 }
 0x55a   :  { %12985 = vst [vmem:[#allocation19_spill] sm:$0xff] %v10750_v32  ;;  %v11825_v21 = vunpack.i.h.bf16 %v10752_v26  ;;  %v5453_v12 = vunpack.i.l.bf16 %v10752_v26  ;;  %v11823_v54 = vunpack.i.l.bf16 %v10750_v32 }
 0x55b   :  { %3907 = vmatpush.bf16.msrb.mxu3 %v12986_v17 }
 0x55c   :  { %v3511_v50 = vsel %vm812_vm1, %v5449_v35, %v5453_v12  ;;  %v3510_v29 = vsel %vm812_vm1, %v5453_v12, %v11825_v21  ;;  %v5459_v35 = vunpack.i.h.bf16 %v10750_v32  ;;  %v5507_v36 = vpop.permute.xlu2 %5506 }
 0x55d   :  { %v3845_v33 = vpack.c.bf16 %v3511_v50, %v3479_v34  ;;  %v3846_v31 = vpack.c.bf16 %v3510_v29, %v3478_v14  ;;  %v3414_v29 = vsel %vm713_vm9, %v5463_v16, %v11827_v8  ;;  %v5494_v8 = vunpack.i.h.bf16 %v10743_v0 }
 0x55e   :  { %3908 = vmatmul.bf16.vlgmr.msrb.gmra.mxu3 %v10400_v52  ;;  %v3416_v14 = vsel %vm713_vm9, %v11823_v54, %v5459_v35  ;;  %v3415_v63 = vsel %vm713_vm9, %v5459_v35, %v5463_v16 }
 0x55f   :  { %3968 = vmatpush.bf16.msra.mxu3 %v3883_v42  ;;  %3943 = vmatpush.bf16.msrb.mxu0 %v3845_v33 }
 0x561   :  { %v10777_v43 = vpop.permute.xlu1 %5471  ;;  %v10781_v42 = vpop.permute.xlu0 %5466 }
 0x562   :  { %v11828_v17 = vunpack.i.h.bf16 %v10777_v43  ;;  %v5473_v12 = vunpack.i.l.bf16 %v10777_v43  ;;  %12988 = vst [vmem:[#allocation20_spill] sm:$0xff] %v10781_v42  ;;  %v5469_v34 = vunpack.i.h.bf16 %v10781_v42  ;;  %v11831_v50 = vunpack.i.l.bf16 %v10781_v42 }
 0x563   :  { %3969 = vmatpush.bf16.msra.mxu3 %v3846_v31 }
 0x564   :  { %v3446_v33 = vsel %vm746_vm13, %v5473_v12, %v11828_v17  ;;  %v3448_v31 = vsel %vm746_vm13, %v11831_v50, %v5469_v34  ;;  %v3447_v54 = vsel %vm746_vm13, %v5469_v34, %v5473_v12  ;;  %v11834_v17 = vunpack.i.l.bf16 %v10743_v0  ;;  %v10813_v35 = vpop.permute.xlu2 %5521 }
 0x565   :  { %v3838_v6 = vpack.c.bf16 %v3446_v33, %v3414_v29  ;;  %v3836_v21 = vpack.c.bf16 %v3448_v31, %v3416_v14  ;;  %v3837_v37 = vpack.c.bf16 %v3447_v54, %v3415_v63  ;;  %12990 = vst [vmem:[#allocation89_spill] sm:$0xff] %v10813_v35  ;;  %v5509_v63 = vunpack.i.h.bf16 %v5507_v36 }
 0x567   :  { %3970 = vmatpush.bf16.msra.mxu3 %v3838_v6  ;;  %3918 = vmatpush.bf16.msra.mxu1 %v3836_v21  ;;  %v5508_v6 = vunpack.i.l.bf16 %v5507_v36 }
 0x568   :  { %3944 = vmatpush.bf16.msrb.mxu0 %v3837_v37  ;;  %v3384_v37 = vsel %vm680_vm14, %v11834_v17, %v5494_v8 }
 0x569   :  { %v10807_v28 = vpop.permute.xlu1 %5486  ;;  %v10809_v56 = vpop.permute.xlu0 %5481  ;;  %v10826_v14 = vsel %vm12991_vm8, %v5508_v6, %v5509_v63  ;;  %vm13013_vm8 = vcmask 588800  }
 0x56a   :  { %12989 = vst [vmem:[#allocation38_spill] sm:$0xff] %v10809_v56  ;;  %v5484_v50 = vunpack.i.h.bf16 %v10809_v56  ;;  %v11832_v16 = vunpack.i.l.bf16 %v10809_v56  ;;  %v5488_v12 = vunpack.i.l.bf16 %v10807_v28  ;;  %v12992_v56 = vunpack.i.h.bf16 %v10522_v5 }
 0x56b   :  { %v12998_v5 = vunpack.i.h.bf16 %v10194_v11 }
 0x56c   :  { %v3352_v21 = vsel %vm647_vm11, %v11832_v16, %v5484_v50  ;;  %v10835_v36 = vsel %vm12993_vm10, %v12992_v56, %v5508_v6  ;;  %v13000_v6 = vld [vmem:[#allocation63_spill] sm:$0xff]  ;;  %vm13014_vm10 = vmmov %vm13013_vm8 }
 0x56d   :  { %v3828_v54 = vpack.c.bf16 %v3384_v37, %v3352_v21  ;;  %v12994_v21 = vld [vmem:[#allocation44_spill] sm:$0xff] }
 0x56e   :  { %v12995_v37 = vunpack.i.l.bf16 %v12994_v21  ;;  %v13001_v21 = vunpack.i.l.bf16 %v13000_v6 }
 0x56f   :  { %3919 = vmatpush.bf16.msra.mxu1 %v3828_v54 }
 0x570   :  { %v10841_v54 = vsel %vm12996_vm5, %v5509_v63, %v12995_v37  ;;  %v3351_v37 = vsel %vm647_vm11, %v5484_v50, %v5488_v12  ;;  %vm13018_vm5 = vmmov %vm13013_vm8 }
 0x571   :  { %v5502_v34 = vpop.permute.xlu1 %5501  ;;  %v10829_v16 = vpop.permute.xlu0 %5496 }
 0x572   :  { %v5504_v33 = vunpack.i.h.bf16 %v5502_v34  ;;  %v5503_v31 = vunpack.i.l.bf16 %v5502_v34  ;;  %v5498_v29 = vunpack.i.l.bf16 %v10829_v16 }
 0x574   :  { %v10847_v34 = vsel %vm12997_vm2, %v5503_v31, %v5504_v33  ;;  %v10853_v56 = vsel %vm12999_vm3, %v12998_v5, %v5503_v31  ;;  %v10859_v63 = vsel %vm13002_vm7, %v5504_v33, %v13001_v21  ;;  %v3383_v31 = vsel %vm680_vm14, %v5494_v8, %v5498_v29  ;;  %v10871_v5 = vpop.permute.xlu2 %5536  ;;  %vm13052_vm2 = vmmov %vm13018_vm5 }
 0x575   :  { %v3829_v6 = vpack.c.bf16 %v3383_v31, %v3351_v37  ;;  %v13003_v33 = vunpack.i.h.bf16 %v10807_v28  ;;  %v13004_v21 = vunpack.i.h.bf16 %v10829_v16  ;;  %vm13074_vm3 = vcmask 1043456  }
 0x576   :  { %vm13075_vm7 = vmmov %vm13074_vm3 }
 0x577   :  { %v3350_v50 = vsel %vm647_vm11, %v5488_v12, %v13003_v33  ;;  %v3382_v17 = vsel %vm680_vm14, %v5498_v29, %v13004_v21  ;;  %3945 = vmatpush.bf16.msrb.mxu0 %v3829_v6  ;;  %v13005_v12 = vunpack.i.h.bf16 %v10752_v26  ;;  %v5524_v6 = vunpack.i.h.bf16 %v10813_v35 }
 0x578   :  { %v3830_v0 = vpack.c.bf16 %v3382_v17, %v3350_v50  ;;  %v13006_v17 = vunpack.i.h.bf16 %v10724_v27  ;;  %v11843_v33 = vunpack.i.l.bf16 %v10813_v35  ;;  %v5539_v26 = vunpack.i.h.bf16 %v10871_v5 }
 0x579   :  { %v10881_v11 = vpop.permute.xlu1 %5516  ;;  %v10884_v44 = vpop.permute.xlu0 %5511  ;;  %v5538_v21 = vunpack.i.l.bf16 %v10871_v5 }
 0x57a   :  { %3971 = vmatpush.bf16.msra.mxu3 %v3830_v0  ;;  %v11837_v8 = vunpack.i.l.bf16 %v10881_v11  ;;  %v11839_v37 = vunpack.i.l.bf16 %v10884_v44 }
 0x57c   :  { %v3509_v31 = vsel %vm812_vm1, %v13005_v12, %v11837_v8  ;;  %v3477_v0 = vsel %vm779_vm0, %v13006_v17, %v11839_v37  ;;  %v10901_v50 = vpop.permute.xlu2 %5551 }
 0x57d   :  { %v3847_v29 = vpack.c.bf16 %v3509_v31, %v3477_v0  ;;  %v3869_v31 = vunpack.c.h.b16 %v10354_v13 }
 0x57f   :  { %3995 = vmatpush.bf16.msrb.mxu2 %v3847_v29  ;;  %v3288_v29 = vsel %vm581_vm15, %v11843_v33, %v5524_v6  ;;  %v10926_v42 = vpack.c.b16 %v3869_v31, %v3869_v31 }
 0x581   :  { %v10905_v12 = vpop.permute.xlu1 %5531  ;;  %v5527_v58 = vpop.permute.xlu0 %5526 }
 0x582   :  { %v5534_v8 = vunpack.i.h.bf16 %v10905_v12  ;;  %v5533_v27 = vunpack.i.l.bf16 %v10905_v12  ;;  %v5529_v17 = vunpack.i.h.bf16 %v5527_v58  ;;  %v5528_v0 = vunpack.i.l.bf16 %v5527_v58 }
 0x583   :  { %v3318_v58 = vsel %vm614_vm12, %v5538_v21, %v5539_v26 }
 0x584   :  { %v3320_v5 = vsel %vm614_vm12, %v5533_v27, %v5534_v8  ;;  %v3319_v37 = vsel %vm614_vm12, %v5534_v8, %v5538_v21  ;;  %v3287_v32 = vsel %vm581_vm15, %v5524_v6, %v5528_v0  ;;  %v3286_v13 = vsel %vm581_vm15, %v5528_v0, %v5529_v17  ;;  %v13017_v21 = vld [vmem:[#allocation60_spill] sm:$0xff] }
 0x585   :  { %v3820_v30 = vpack.c.bf16 %v3320_v5, %v3288_v29  ;;  %v3821_v35 = vpack.c.bf16 %v3319_v37, %v3287_v32  ;;  %v3822_v33 = vpack.c.bf16 %v3318_v58, %v3286_v13  ;;  %v13007_v8 = vpack.c.bf16 %v10145_v55, %v9869_v4 }
 0x586   :  { %v13008_v6 = vpack.c.bf16 %v10554_v62, %v10207_v1  ;;  %v13009_v0 = vunpack.i.h.bf16 %v10123_v60  ;;  %v13010_v32 = vunpack.i.l.bf16 %v10123_v60  ;;  %v13015_v60 = vld [vmem:[#allocation48_spill] sm:$0xff]  ;;  %v3807_v31 = vpack.c.bf16 %v10155_v61, %v13017_v21  ;;  %v13028_v21 = vld [vmem:[#allocation57_spill] sm:$0xff] }
 0x587   :  { %3920 = vmatpush.bf16.msra.mxu1 %v3820_v30  ;;  %3946 = vmatpush.bf16.msrb.mxu0 %v3821_v35  ;;  %v10942_v30 = vpop.permute.xlu2 %3306  ;;  %v13012_v35 = vpack.c.bf16 %v10548_v18, %v10534_v9  ;;  %v13016_v62 = vld [vmem:[#allocation104_spill] sm:$0xff]  ;;  %v13019_v9 = vunpack.i.h.bf16 %v10777_v43  ;;  %v13020_v13 = vunpack.i.h.bf16 %v10650_v40  ;;  %v13027_v40 = vpack.c.bf16 %v10406_v41, %v10360_v38 }
 0x588   :  { %3972 = vmatpush.bf16.msra.mxu3 %v3822_v33  ;;  %v3188_v37 = vsel %vm13011_vm4, %v13010_v32, %v13009_v0  ;;  %v3806_v33 = vpack.c.bf16 %v13016_v62, %v13015_v60  ;;  %v13024_v0 = vld [vmem:[#allocation65_spill] sm:$0xff]  ;;  %v13035_v41 = vunpack.i.h.bf16 %v10829_v16  ;;  %vm13076_vm4 = vmmov %vm13074_vm3 }
 0x589   :  { %v10934_v29 = vpop.permute.xlu1 %5546  ;;  %v10948_v55 = vpop.permute.xlu0 %5541  ;;  %v3808_v18 = vpack.c.bf16 %v3188_v37, %v9575_v24  ;;  %v5553_v24 = vunpack.i.l.bf16 %v10901_v50  ;;  %v13025_v32 = vld [vmem:[#allocation41_spill] sm:$0xff] }
 0x58a   :  { %v5548_v4 = vunpack.i.l.bf16 %v10934_v29  ;;  %4140 = vmatmul.msk.bf16.vlgmr.msra.gmra.mxu1 %vm13013_vm8, %v10926_v42  ;;  %v5543_v1 = vunpack.i.l.bf16 %v10948_v55  ;;  %4141 = vmatmul.msk.bf16.vlgmr.msrb.gmra.mxu0 %vm13014_vm10, %v10926_v42  ;;  %v13026_v37 = vpack.c.bf16 %v13024_v0, %v13025_v32  ;;  %v13037_v0 = vld [vmem:[#allocation31_spill] sm:$0xff]  ;;  %v13038_v32 = vld [vmem:[#allocation28_spill] sm:$0xff]  ;;  %vm13097_vm10 = vmmov %vm13052_vm2 }
 0x58b   :  { %3952 = vmatpush.bf16.msrb.mxu1 %v13007_v8  ;;  %3978 = vmatpush.bf16.msra.mxu0 %v13008_v6  ;;  %v13021_v8 = vld [vmem:[#allocation76_spill] sm:$0xff]  ;;  %v13022_v6 = vld [vmem:[#allocation53_spill] sm:$0xff]  ;;  %v13039_v16 = vpack.c.bf16 %v13037_v0, %v13038_v32  ;;  %v13058_v32 = vld [vmem:[#allocation42_spill] sm:$0xff] }
 0x58c   :  { %4004 = vmatpush.bf16.msrb.mxu3 %v13012_v35  ;;  %v3445_v5 = vsel %vm746_vm13, %v13019_v9, %v5548_v4  ;;  %v3413_v61 = vsel %vm713_vm9, %v13020_v13, %v5543_v1  ;;  %v13023_v43 = vpack.c.bf16 %v13021_v8, %v13022_v6  ;;  %v13031_v9 = vld [vmem:[#allocation97_spill] sm:$0xff]  ;;  %v13036_v8 = vpack.c.bf16 %v10091_v7, %v10337_v10 }
 0x58d   :  { %4142 = vmatmul.msk.bf16.vlgmr.msra.gmra.mxu3 %vm13018_vm5, %v10926_v42  ;;  %v3839_v58 = vpack.c.bf16 %v3445_v5, %v3413_v61  ;;  %v13032_v5 = vld [vmem:[#allocation26_spill] sm:$0xff]  ;;  %v13034_v61 = vunpack.i.h.bf16 %v10807_v28  ;;  %v3317_v28 = vsel %vm614_vm12, %v5539_v26, %v10942_v30  ;;  %vm13101_vm5 = vmmov %vm13074_vm3 }
 0x58e   :  { %v13033_v13 = vpack.c.bf16 %v13031_v9, %v13032_v5  ;;  %v13044_v9 = vld [vmem:[#allocation36_spill] sm:$0xff]  ;;  %v13045_v5 = vld [vmem:[#allocation30_spill] sm:$0xff] }
 0x58f   :  { %3953 = vmatpush.bf16.msrb.mxu1 %v3806_v33  ;;  %3979 = vmatpush.bf16.msra.mxu0 %v3807_v31  ;;  %v10989_v33 = vpop.permute.xlu2 %5571  ;;  %v13029_v31 = vld [vmem:[#allocation25_spill] sm:$0xff]  ;;  %v3349_v38 = vsel %vm647_vm11, %v13034_v61, %v5553_v24  ;;  %v13047_v61 = vld [vmem:[#allocation59_spill] sm:$0xff] }
 0x590   :  { %4005 = vmatpush.bf16.msrb.mxu3 %v3808_v18  ;;  %3996 = vmatpush.bf16.msrb.mxu2 %v3839_v58  ;;  %v13030_v18 = vpack.c.bf16 %v13028_v21, %v13029_v31  ;;  %v13043_v31 = vpack.c.bf16 %v10291_v59, %v10051_v23  ;;  %v13050_v23 = vpack.c.bf16 %v10271_v22, %v10231_v51  ;;  %v5519_v22 = vunpack.i.h.bf16 %v10881_v11 }
 0x591   :  { %v10981_v35 = vpop.permute.xlu1 %3274  ;;  %v10986_v60 = vpop.permute.xlu0 %5556  ;;  %v13051_v59 = vpack.c.bf16 %v10835_v36, %v10853_v56  ;;  %v5514_v36 = vunpack.i.h.bf16 %v10884_v44  ;;  %v13054_v56 = vld [vmem:[#allocation62_spill] sm:$0xff] }
 0x592   :  { %v5558_v62 = vunpack.i.l.bf16 %v10986_v60 }
 0x593   :  { %3954 = vmatpush.bf16.msrb.mxu1 %v13023_v43  ;;  %3980 = vmatpush.bf16.msra.mxu0 %v13026_v37  ;;  %v3285_v43 = vsel %vm581_vm15, %v5529_v17, %v10981_v35  ;;  %v13040_v37 = vld [vmem:[#allocation74_spill] sm:$0xff] }
 0x594   :  { %4006 = vmatpush.bf16.msrb.mxu3 %v13027_v40  ;;  %v3381_v58 = vsel %vm680_vm14, %v13035_v41, %v5558_v62  ;;  %v13041_v40 = vld [vmem:[#allocation27_spill] sm:$0xff]  ;;  %v3823_v10 = vpack.c.bf16 %v3317_v28, %v3285_v43  ;;  %v3809_v43 = vpack.c.bf16 %v10682_v25, %v9578_v48  ;;  %v13055_v28 = vld [vmem:[#allocation50_spill] sm:$0xff]  ;;  %v13060_v25 = vpack.c.bf16 %v10002_v57, %v10213_v20 }
 0x595   :  { %v3831_v6 = vpack.c.bf16 %v3381_v58, %v3349_v38  ;;  %v13042_v21 = vpack.c.bf16 %v13040_v37, %v13041_v40  ;;  %v13048_v38 = vld [vmem:[#allocation71_spill] sm:$0xff]  ;;  %v13056_v0 = vpack.c.bf16 %v13054_v56, %v13055_v28  ;;  %v13061_v57 = vld [vmem:[#allocation22_spill] sm:$0xff] }
 0x596   :  { %v13049_v41 = vpack.c.bf16 %v13047_v61, %v13048_v38  ;;  %v5544_v61 = vunpack.i.h.bf16 %v10948_v55  ;;  %v13062_v20 = vld [vmem:[#allocation43_spill] sm:$0xff]  ;;  %v13071_v28 = vld [vmem:[#allocation98_spill] sm:$0xff]  ;;  %v13078_v55 = vld [vmem:[#allocation108_spill] sm:$0xff] }
 0x597   :  { %3955 = vmatpush.bf16.msrb.mxu1 %v13030_v18  ;;  %3981 = vmatpush.bf16.msra.mxu0 %v13033_v13  ;;  %v13046_v13 = vpack.c.bf16 %v13044_v9, %v13045_v5  ;;  %v11039_v58 = vpop.permute.xlu2 %3342  ;;  %v5574_v9 = vunpack.i.h.bf16 %v10989_v33  ;;  %v5573_v5 = vunpack.i.l.bf16 %v10989_v33  ;;  %v13063_v38 = vpack.c.bf16 %v13061_v57, %v13062_v20 }
 0x598   :  { %4007 = vmatpush.bf16.msrb.mxu3 %v13036_v8  ;;  %3997 = vmatpush.bf16.msrb.mxu2 %v3831_v6  ;;  %v13053_v8 = vunpack.i.h.bf16 %v10694_v15  ;;  %v13057_v15 = vld [vmem:[#allocation77_spill] sm:$0xff]  ;;  %v3412_v57 = vsel %vm713_vm9, %v5543_v1, %v5544_v61  ;;  %v5559_v20 = vunpack.i.h.bf16 %v10986_v60 }
 0x599   :  { %v11024_v7 = vpop.permute.xlu1 %5566  ;;  %v11029_v17 = vpop.permute.xlu0 %5561 }
 0x59a   :  { %v5563_v18 = vunpack.i.l.bf16 %v11029_v17  ;;  %v5564_v26 = vunpack.i.h.bf16 %v11029_v17  ;;  %v5568_v48 = vunpack.i.l.bf16 %v11024_v7  ;;  %v13090_v17 = vunpack.i.l.bf16 %v10652_v19 }
 0x59b   :  { %3956 = vmatpush.bf16.msrb.mxu1 %v13039_v16  ;;  %3982 = vmatpush.bf16.msra.mxu0 %v13042_v21  ;;  %v13059_v16 = vpack.c.bf16 %v13057_v15, %v13058_v32  ;;  %v3856_v21 = vpack.c.bf16 %v10708_v2, %v10708_v2  ;;  %v13067_v2 = vunpack.i.l.bf16 %v10884_v44 }
 0x59c   :  { %4008 = vmatpush.bf16.msrb.mxu3 %v13043_v31  ;;  %3998 = vmatpush.bf16.msrb.mxu2 %v3823_v10  ;;  %v3539_v6 = vsel %vm845_vm6, %v13053_v8, %v5563_v18  ;;  %v3538_v51 = vsel %vm845_vm6, %v5563_v18, %v5564_v26  ;;  %v5569_v31 = vunpack.i.h.bf16 %v11024_v7 }
 0x59d   :  { %v3857_v10 = vpack.c.bf16 %v3539_v6, %v3539_v6  ;;  %v3858_v18 = vpack.c.bf16 %v3538_v51, %v3538_v51  ;;  %v3476_v8 = vsel %vm779_vm0, %v13067_v2, %v5514_v36  ;;  %v13068_v6 = vunpack.i.l.bf16 %v10881_v11  ;;  %v13069_v51 = vld [vmem:[#allocation15_spill] sm:$0xff] }
 0x59e   :  { %v13070_v56 = vpack.c.bf16 %v10163_v49, %v13069_v51  ;;  %v3889_v32 = vsel %vm13074_vm3, %v3856_v21, 0  ;;  %v3474_v49 = vsel %vm779_vm0, %v5568_v48, %v5569_v31  ;;  %v13081_v51 = vld [vmem:[#allocation54_spill] sm:$0xff] }
 0x59f   :  { %3957 = vmatpush.bf16.msrb.mxu1 %v13046_v13  ;;  %3983 = vmatpush.bf16.msra.mxu0 %v13049_v41  ;;  %v5549_v13 = vunpack.i.h.bf16 %v10934_v29  ;;  %v13064_v41 = vld [vmem:[#allocation14_spill] sm:$0xff]  ;;  %v3892_v44 = vsel %vm13075_vm7, %v3857_v10, 0  ;;  %v3895_v11 = vsel %vm13076_vm4, %v3858_v18, 0  ;;  %v3507_v10 = vsel %vm812_vm1, %v5519_v22, %v5573_v5 }
 0x5a0   :  { %4009 = vmatpush.bf16.msrb.mxu3 %v13050_v23  ;;  %4030 = vmatpush.bf16.msra.mxu2 %v13051_v59  ;;  %v13065_v23 = vld [vmem:[#allocation61_spill] sm:$0xff] }
 0x5a1   :  { %4143 = vmatmul.msk.bf16.vlgmr.msrb.gmra.mxu2 %vm13052_vm2, %v10926_v42  ;;  %v11067_v37 = vpop.permute.xlu1 %3438  ;;  %v11073_v40 = vpop.permute.xlu0 %3406  ;;  %v13066_v59 = vpack.c.bf16 %v13064_v41, %v13065_v23  ;;  %v13077_v41 = vld [vmem:[#allocation107_spill] sm:$0xff] }
 0x5a2   :  { %v13079_v23 = vpack.c.bf16 %v13077_v41, %v13078_v55  ;;  %v13087_v41 = vld [vmem:[#allocation52_spill] sm:$0xff] }
 0x5a3   :  { %3958 = vmatpush.bf16.msrb.mxu1 %v13056_v0  ;;  %3984 = vmatpush.bf16.msra.mxu0 %v13059_v16  ;;  %v13072_v0 = vld [vmem:[#allocation103_spill] sm:$0xff]  ;;  %v3475_v16 = vsel %vm779_vm0, %v5514_v36, %v5568_v48  ;;  %v3506_v36 = vsel %vm812_vm1, %v5573_v5, %v5574_v9  ;;  %v3443_v5 = vsel %vm746_vm13, %v5549_v13, %v11067_v37  ;;  %v13088_v55 = vld [vmem:[#allocation100_spill] sm:$0xff] }
 0x5a4   :  { %4010 = vmatpush.bf16.msrb.mxu3 %v13060_v25  ;;  %4031 = vmatpush.bf16.msra.mxu2 %v3809_v43  ;;  %v3508_v43 = vsel %vm812_vm1, %v13068_v6, %v5519_v22  ;;  %v13073_v15 = vpack.c.bf16 %v13071_v28, %v13072_v0  ;;  %v11111_v25 = vpop.permute.xlu2 %5581  ;;  %v3849_v48 = vpack.c.bf16 %v3507_v10, %v3475_v16 }
 0x5a5   :  { %v3848_v21 = vpack.c.bf16 %v3508_v43, %v3476_v8  ;;  %v3444_v22 = vsel %vm746_vm13, %v5548_v4, %v5549_v13  ;;  %v5554_v4 = vunpack.i.h.bf16 %v10901_v50  ;;  %v13080_v43 = vld [vmem:[#allocation87_spill] sm:$0xff]  ;;  %v3380_v28 = vsel %vm680_vm14, %v5558_v62, %v5559_v20  ;;  %v13083_v62 = vld [vmem:[#allocation90_spill] sm:$0xff] }
 0x5a6   :  { %v3840_v8 = vpack.c.bf16 %v3444_v22, %v3412_v57  ;;  %v13086_v57 = vunpack.i.l.bf16 %v10698_v3 }
 0x5a7   :  { %3959 = vmatpush.bf16.msrb.mxu1 %v13063_v38  ;;  %3985 = vmatpush.bf16.msra.mxu0 %v13066_v59  ;;  %v3411_v38 = vsel %vm713_vm9, %v5544_v61, %v11073_v40  ;;  %v3850_v59 = vpack.c.bf16 %v3506_v36, %v3474_v49  ;;  %v3347_v0 = vsel %vm647_vm11, %v5554_v4, %v11039_v58 }
 0x5a8   :  { %4011 = vmatpush.bf16.msrb.mxu3 %v13070_v56  ;;  %4032 = vmatpush.bf16.msra.mxu2 %v13073_v15  ;;  %v3841_v2 = vpack.c.bf16 %v3443_v5, %v3411_v38  ;;  %v13082_v56 = vpack.c.bf16 %v13080_v43, %v13081_v51  ;;  %v5584_v15 = vunpack.i.h.bf16 %v11111_v25 }
 0x5a9   :  { %v11122_v18 = vpop.permute.xlu1 %5576  ;;  %v3375_v1 = vpop.permute.xlu0 %3374 }
 0x5aa   :  { %3960 = vmatmul.bf16.vlgmr.msrb.gmra.mxu1 %v10400_v52  ;;  %3986 = vmatmul.bf16.vlgmr.msra.gmra.mxu0 %v10400_v52  ;;  %v5579_v13 = vunpack.i.h.bf16 %v11122_v18  ;;  %v5578_v6 = vunpack.i.l.bf16 %v11122_v18  ;;  %v3379_v61 = vsel %vm680_vm14, %v5559_v20, %v3375_v1 }
 0x5ab   :  { %4020 = vmatpush.bf16.msra.mxu1 %v3889_v32  ;;  %4046 = vmatpush.bf16.msrb.mxu0 %v3892_v44  ;;  %v11142_v29 = vpop.f32.mrf.mxu2  ;;  %v5583_v32 = vunpack.i.l.bf16 %v11111_v25  ;;  %v3348_v44 = vsel %vm647_vm11, %v5553_v24, %v5554_v4  ;;  %v3833_v16 = vpack.c.bf16 %v3379_v61, %v3347_v0  ;;  %v5419_v25 = vunpack.i.h.bf16 %v10652_v19  ;;  %v13098_v19 = vld [vmem:[#allocation101_spill] sm:$0xff] }
 0x5ac   :  { %4072 = vmatpush.bf16.msra.mxu3 %v3895_v11  ;;  %4033 = vmatpush.bf16.msra.mxu2 %v13079_v23  ;;  %v3832_v11 = vpack.c.bf16 %v3380_v28, %v3348_v44  ;;  %v3345_v49 = vpop.permute.xlu2 %3344  ;;  %v3284_v50 = vsel %vm581_vm15, %v10981_v35, %v5578_v6  ;;  %v3283_v24 = vsel %vm581_vm15, %v5578_v6, %v5579_v13  ;;  %v13099_v6 = vld [vmem:[#allocation70_spill] sm:$0xff] }
 0x5ad   :  { %4012 = vmatmul.bf16.vlgmr.msrb.gmra.mxu3 %v10400_v52  ;;  %v3316_v20 = vsel %vm614_vm12, %v10942_v30, %v5583_v32  ;;  %v3315_v5 = vsel %vm614_vm12, %v5583_v32, %v5584_v15  ;;  %v13089_v23 = vpack.c.bf16 %v13087_v41, %v13088_v55  ;;  %v13100_v61 = vpack.c.bf16 %v13098_v19, %v13099_v6  ;;  %v13126_v41 = vld [vmem:[#allocation89_spill] sm:$0xff] }
 0x5ae   :  { %v3824_v38 = vpack.c.bf16 %v3316_v20, %v3284_v50  ;;  %v13122_v20 = vld [vmem:[#allocation39_spill] sm:$0xff]  ;;  %v13127_v55 = vunpack.i.l.bf16 %v13126_v41  ;;  %v13135_v19 = vld [vmem:[#allocation37_spill] sm:$0xff] }
 0x5af   :  { %4021 = vmatpush.bf16.msra.mxu1 %v3848_v21  ;;  %4047 = vmatpush.bf16.msrb.mxu0 %v3849_v48  ;;  %v13084_v21 = vld [vmem:[#allocation91_spill] sm:$0xff] }
 0x5b0   :  { %4073 = vmatpush.bf16.msra.mxu3 %v3850_v59  ;;  %4034 = vmatpush.bf16.msra.mxu2 %v13082_v56  ;;  %v13085_v10 = vpack.c.bf16 %v13083_v62, %v13084_v21  ;;  %v13092_v59 = vld [vmem:[#allocation35_spill] sm:$0xff]  ;;  %v13110_v62 = vld [vmem:[#allocation86_spill] sm:$0xff] }
 0x5b1   :  { %v3441_v60 = vpop.permute.xlu1 %3440  ;;  %v3409_v18 = vpop.permute.xlu0 %3408  ;;  %v13093_v30 = vunpack.i.l.bf16 %v13092_v59  ;;  %v13131_v59 = vld [vmem:[#allocation45_spill] sm:$0xff] }
 0x5b2   :  { %v3442_v36 = vsel %vm746_vm13, %v11067_v37, %v3441_v60  ;;  %v3410_v48 = vsel %vm713_vm9, %v11073_v40, %v3409_v18  ;;  %v3545_v37 = vsel %vm845_vm6, %v5564_v26, %v13086_v57  ;;  %v3825_v40 = vpack.c.bf16 %v3315_v5, %v3283_v24  ;;  %v13115_v24 = vld [vmem:[#allocation49_spill] sm:$0xff]  ;;  %v13123_v5 = vld [vmem:[#allocation94_spill] sm:$0xff] }
 0x5b3   :  { %4022 = vmatpush.bf16.msra.mxu1 %v3840_v8  ;;  %4048 = vmatpush.bf16.msrb.mxu0 %v3841_v2  ;;  %v3937_v22 = vpop.f32.mrf.mxu2  ;;  %v3842_v35 = vpack.c.bf16 %v3442_v36, %v3410_v48  ;;  %v3859_v3 = vpack.c.bf16 %v3545_v37, %v3545_v37  ;;  %vm13091_vm6 = vcmp.lt.s32.totalorder %v5798_v39, 127  ;;  %v13095_v2 = vpack.c.bf16 %v10826_v14, %v10847_v34  ;;  %v13113_v36 = vld [vmem:[#allocation93_spill] sm:$0xff]  ;;  %v13117_v48 = vld [vmem:[#allocation38_spill] sm:$0xff]  ;;  %v13119_v37 = vld [vmem:[#allocation40_spill] sm:$0xff] }
 0x5b4   :  { %4035 = vmatpush.bf16.msra.mxu2 %v13085_v10  ;;  %v3186_v26 = vsel %vm13091_vm6, %v13090_v17, %v5419_v25  ;;  %vm13094_vm8 = vmmov %vm13091_vm6  ;;  %v13096_v8 = vpack.c.bf16 %v10841_v54, %v10859_v63  ;;  %v13102_v34 = vunpack.i.l.bf16 %v10726_v47  ;;  %v3346_v63 = vsel %vm647_vm11, %v11039_v58, %v3345_v49  ;;  %v3313_v32 = vpop.permute.xlu2 %3312  ;;  %v13105_v58 = vld [vmem:[#allocation20_spill] sm:$0xff]  ;;  %v13112_v10 = vld [vmem:[#allocation82_spill] sm:$0xff] }
 0x5b5   :  { %4074 = vmatpush.bf16.msra.mxu3 %v3842_v35  ;;  %v3193_v4 = vsel %vm13094_vm8, %v5419_v25, %v13093_v30  ;;  %v3898_v56 = vsel %vm13101_vm5, %v3859_v3, 0  ;;  %v3810_v28 = vpack.c.bf16 %v3186_v26, %v9623_v45  ;;  %v13103_v45 = vunpack.i.l.bf16 %v10596_v53  ;;  %v13107_v53 = vld [vmem:[#allocation19_spill] sm:$0xff]  ;;  %v13128_v3 = vld [vmem:[#allocation105_spill] sm:$0xff]  ;;  %v13141_v39 = vld [vmem:[#allocation88_spill] sm:$0xff] }
 0x5b6   :  { %v3811_v14 = vpack.c.bf16 %v3193_v4, %v12964_v46  ;;  %v3481_v54 = vsel %vm779_vm0, %v5569_v31, %v13102_v34  ;;  %vm13104_vm0 = vmmov %vm13052_vm2  ;;  %v13106_v31 = vunpack.i.l.bf16 %v13105_v58  ;;  %v13114_v50 = vpack.c.bf16 %v13112_v10, %v13113_v36  ;;  %v13120_v22 = vld [vmem:[#allocation95_spill] sm:$0xff]  ;;  %v13129_v17 = vld [vmem:[#allocation81_spill] sm:$0xff] }
 0x5b7   :  { %4023 = vmatpush.bf16.msra.mxu1 %v3832_v11  ;;  %4049 = vmatpush.bf16.msrb.mxu0 %v3833_v16  ;;  %v3513_v46 = vsel %vm812_vm1, %v5574_v9, %v13103_v45  ;;  %v13108_v16 = vunpack.i.l.bf16 %v13107_v53  ;;  %v3314_v9 = vsel %vm614_vm12, %v5584_v15, %v3313_v32  ;;  %v13109_v11 = vld [vmem:[#allocation83_spill] sm:$0xff]  ;;  %v13116_v25 = vunpack.i.l.bf16 %v13115_v24  ;;  %vm13125_vm1 = vmmov %vm13104_vm0  ;;  %v13132_v30 = vld [vmem:[#allocation21_spill] sm:$0xff] }
 0x5b8   :  { %4036 = vmatpush.bf16.msra.mxu2 %v13089_v23  ;;  %v3851_v7 = vpack.c.bf16 %v3513_v46, %v3481_v54  ;;  %v13111_v21 = vpack.c.bf16 %v13109_v11, %v13110_v62  ;;  %v13118_v15 = vunpack.i.l.bf16 %v13117_v48  ;;  %v13121_v35 = vpack.c.bf16 %v13119_v37, %v13120_v22  ;;  %v13147_v34 = vld [vmem:[#allocation80_spill] sm:$0xff] }
 0x5b9   :  { %v3281_v43 = vpop.permute.xlu1 %3280  ;;  %v3377_v51 = vpop.permute.xlu0 %3376  ;;  %v3417_v33 = vsel %vm713_vm9, %v3409_v18, %v13108_v16  ;;  %v13130_v26 = vpack.c.bf16 %v13128_v3, %v13129_v17  ;;  %v13133_v4 = vpack.c.bf16 %v13131_v59, %v13132_v30  ;;  %vm13140_vm9 = vmmov %vm13104_vm0  ;;  %v13148_v54 = vld [vmem:[#allocation96_spill] sm:$0xff] }
 0x5ba   :  { %v3378_v0 = vsel %vm680_vm14, %v3375_v1, %v3377_v51  ;;  %v3282_v47 = vsel %vm581_vm15, %v5579_v13, %v3281_v43  ;;  %v3449_v1 = vsel %vm746_vm13, %v3441_v60, %v13106_v31  ;;  %v3385_v18 = vsel %vm680_vm14, %v3377_v51, %v13116_v25 }
 0x5bb   :  { %4024 = vmatpush.bf16.msra.mxu1 %v3824_v38  ;;  %4050 = vmatpush.bf16.msrb.mxu0 %v3825_v40  ;;  %v3834_v44 = vpack.c.bf16 %v3378_v0, %v3346_v63  ;;  %v3826_v13 = vpack.c.bf16 %v3314_v9, %v3282_v47  ;;  %v3843_v60 = vpack.c.bf16 %v3449_v1, %v3417_v33  ;;  %v13150_v0 = vld [vmem:[#allocation79_spill] sm:$0xff] }
 0x5bc   :  { %4037 = vmatpush.bf16.msra.mxu2 %v13100_v61  ;;  %v3353_v57 = vsel %vm647_vm11, %v3345_v49, %v13118_v15  ;;  %v13124_v38 = vpack.c.bf16 %v13122_v20, %v13123_v5  ;;  %v3289_v23 = vsel %vm581_vm15, %v3281_v43, %v13127_v55  ;;  %v3321_v49 = vsel %vm614_vm12, %v3313_v32, %v5533_v27  ;;  %v13137_v61 = vld [vmem:[#allocation99_spill] sm:$0xff]  ;;  %v13138_v43 = vld [vmem:[#allocation106_spill] sm:$0xff]  ;;  %v13142_v27 = vld [vmem:[#allocation109_spill] sm:$0xff] }
 0x5bd   :  { %4075 = vmatpush.bf16.msra.mxu3 %v3834_v44  ;;  %v3835_v40 = vpack.c.bf16 %v3385_v18, %v3353_v57  ;;  %v13139_v12 = vpack.c.bf16 %v13137_v61, %v13138_v43  ;;  %v13143_v51 = vpack.c.bf16 %v13141_v39, %v13142_v27  ;;  %v13149_v63 = vpack.c.bf16 %v13147_v34, %v13148_v54  ;;  %v13151_v32 = vld [vmem:[#allocation92_spill] sm:$0xff] }
 0x5be   :  { %4144 = vmatmul.msk.bf16.vlgmr.msra.gmra.mxu1 %vm13097_vm10, %v10926_v42  ;;  %4145 = vmatmul.msk.bf16.vlgmr.msrb.gmra.mxu0 %vm13104_vm0, %v10926_v42  ;;  %v13152_v44 = vpack.c.bf16 %v13150_v0, %v13151_v32 }
 0x5bf   :  { %4056 = vmatpush.bf16.msrb.mxu1 %v13095_v2  ;;  %4082 = vmatpush.bf16.msra.mxu0 %v13096_v8  ;;  %v3827_v2 = vpack.c.bf16 %v3321_v49, %v3289_v23  ;;  %v13134_v8 = vld [vmem:[#allocation102_spill] sm:$0xff] }
 0x5c0   :  { %4098 = vmatpush.bf16.msrb.mxu2 %v3898_v56  ;;  %v13136_v6 = vpack.c.bf16 %v13134_v8, %v13135_v19  ;;  %v13144_v56 = vld [vmem:[#allocation84_spill] sm:$0xff] }
 0x5c1   :  { %4038 = vmatmul.bf16.vlgmr.msra.gmra.mxu2 %v10400_v52  ;;  %4076 = vmatpush.bf16.msra.mxu3 %v3826_v13  ;;  %v3865_v46 = vpop.permute.xlu0 %3864 }
 0x5c3   :  { %4057 = vmatpush.bf16.msrb.mxu1 %v3810_v28  ;;  %4083 = vmatpush.bf16.msra.mxu0 %v3811_v14  ;;  %v13145_v28 = vld [vmem:[#allocation85_spill] sm:$0xff] }
 0x5c4   :  { %4099 = vmatpush.bf16.msrb.mxu2 %v3851_v7  ;;  %4146 = vmatmul.msk.bf16.vlgmr.msra.gmra.mxu3 %vm13125_vm1, %v10926_v42  ;;  %v13146_v14 = vpack.c.bf16 %v13144_v56, %v13145_v28  ;;  %v3936_v7 = vadd.f32 %v11142_v29, %v3865_v46 }
 0x5c7   :  { %4058 = vmatpush.bf16.msrb.mxu1 %v13111_v21  ;;  %4084 = vmatpush.bf16.msra.mxu0 %v13114_v50 }
 0x5c8   :  { %4100 = vmatpush.bf16.msrb.mxu2 %v3843_v60 }
 0x5cb   :  { %4059 = vmatpush.bf16.msrb.mxu1 %v13121_v35  ;;  %4085 = vmatpush.bf16.msra.mxu0 %v13124_v38 }
 0x5cc   :  { %4101 = vmatpush.bf16.msrb.mxu2 %v3835_v40 }
 0x5cf   :  { %4060 = vmatpush.bf16.msrb.mxu1 %v13130_v26  ;;  %4086 = vmatpush.bf16.msra.mxu0 %v13133_v4 }
 0x5d0   :  { %4102 = vmatpush.bf16.msrb.mxu2 %v3827_v2 }
 0x5d3   :  { %4061 = vmatpush.bf16.msrb.mxu1 %v13136_v6  ;;  %4087 = vmatpush.bf16.msra.mxu0 %v13139_v12 }
 0x5d4   :  { %4147 = vmatmul.msk.bf16.vlgmr.msrb.gmra.mxu2 %vm13140_vm9, %v10926_v42 }
 0x5d7   :  { %4062 = vmatpush.bf16.msrb.mxu1 %v13143_v51  ;;  %4088 = vmatpush.bf16.msra.mxu0 %v13146_v14 }
 0x5db   :  { %4063 = vmatpush.bf16.msrb.mxu1 %v13149_v63  ;;  %4089 = vmatpush.bf16.msra.mxu0 %v13152_v44 }
 0x5de   :  { %4064 = vmatmul.bf16.vlgmr.msrb.gmra.mxu1 %v10400_v52  ;;  %4090 = vmatmul.bf16.vlgmr.msra.gmra.mxu0 %v10400_v52 }
 0x5e1   :  { %v3909_v42 = vpop.f32.mrf.mxu3 }
 0x5e2   :  { %v3910_v47 = vadd.f32 %v3909_v42, %v3865_v46 }
 0x5e9   :  { %v3911_v45 = vpop.f32.mrf.mxu3 }
 0x607   :  { %v3922_v58 = vpop.f32.mrf.mxu1  ;;  %v3948_v1 = vpop.f32.mrf.mxu0 }
 0x608   :  { %v3923_v31 = vadd.f32 %v3922_v58, %v3910_v47  ;;  %v3949_v53 = vadd.f32 %v3948_v1, %v3936_v7 }
 0x60a   :  { %4108 = vst [vmem:[%s11335_s4] sm:$0xff] %v3923_v31 }
 0x60b   :  { %4109 = vst [vmem:[%s11335_s4 + $0x8] sm:$0xff] %v3949_v53 }
 0x60f   :  { %v3924_v52 = vpop.f32.mrf.mxu1  ;;  %v3950_v33 = vpop.f32.mrf.mxu0 }
 0x610   :  { %v3974_v16 = vpop.f32.mrf.mxu3 }
 0x618   :  { %v3976_v9 = vpop.f32.mrf.mxu3 }
 0x624   :  { %v4000_v13 = vpop.f32.mrf.mxu2 }
 0x627   :  { %v3961_v11 = vpop.f32.mrf.mxu1  ;;  %v3987_v29 = vpop.f32.mrf.mxu0 }
 0x628   :  { %v3962_v62 = vadd.f32 %v3961_v11, %v3865_v46  ;;  %v3988_v21 = vadd.f32 %v3987_v29, %v3865_v46 }
 0x62a   :  { %v3975_v10 = vadd.f32 %v3974_v16, %v3962_v62  ;;  %v4001_v36 = vadd.f32 %v4000_v13, %v3988_v21 }
 0x62c   :  { %4110 = vst [vmem:[%s11335_s4 + $0x10] sm:$0xff] %v3975_v10  ;;  %v4002_v50 = vpop.f32.mrf.mxu2 }
 0x62d   :  { %4111 = vst [vmem:[%s11335_s4 + $0x18] sm:$0xff] %v4001_v36 }
 0x62f   :  { %v3963_v24 = vpop.f32.mrf.mxu1  ;;  %v3989_v25 = vpop.f32.mrf.mxu0 }
 0x630   :  { %v4013_v60 = vpop.f32.mrf.mxu3 }
 0x631   :  { %v4014_v48 = vadd.f32 %v4013_v60, %v3865_v46 }
 0x638   :  { %v4015_v18 = vpop.f32.mrf.mxu3 }
 0x63b   :  { %v4026_v15 = vpop.f32.mrf.mxu1  ;;  %v4052_v37 = vpop.f32.mrf.mxu0 }
 0x63c   :  { %v4027_v57 = vadd.f32 %v4026_v15, %v4014_v48 }
 0x63e   :  { %4112 = vst [vmem:[%s11335_s4 + $0x20] sm:$0xff] %v4027_v57 }
 0x643   :  { %v4028_v22 = vpop.f32.mrf.mxu1  ;;  %v4054_v5 = vpop.f32.mrf.mxu0 }
 0x644   :  { %v4039_v35 = vpop.f32.mrf.mxu2 }
 0x645   :  { %v4040_v20 = vadd.f32 %v4039_v35, %v3865_v46 }
 0x647   :  { %v4053_v38 = vadd.f32 %v4052_v37, %v4040_v20  ;;  %v4078_v41 = vpop.f32.mrf.mxu3 }
 0x649   :  { %4113 = vst [vmem:[%s11335_s4 + $0x28] sm:$0xff] %v4053_v38 }
 0x64c   :  { %v4041_v40 = vpop.f32.mrf.mxu2 }
 0x64f   :  { %v4080_v55 = vpop.f32.mrf.mxu3 }
 0x657   :  { %v4104_v23 = vpop.f32.mrf.mxu2 }
 0x65b   :  { %v4065_v49 = vpop.f32.mrf.mxu1  ;;  %v4091_v3 = vpop.f32.mrf.mxu0 }
 0x65c   :  { %v4066_v17 = vadd.f32 %v4065_v49, %v3865_v46  ;;  %v4092_v26 = vadd.f32 %v4091_v3, %v3865_v46 }
 0x65e   :  { %v4079_v59 = vadd.f32 %v4078_v41, %v4066_v17  ;;  %v4105_v30 = vadd.f32 %v4104_v23, %v4092_v26 }
 0x65f   :  { %v4106_v4 = vpop.f32.mrf.mxu2 }
 0x660   :  { %4114 = vst [vmem:[%s11335_s4 + $0x30] sm:$0xff] %v4079_v59 }
 0x661   :  { %4115 = vst [vmem:[%s11335_s4 + $0x38] sm:$0xff] %v4105_v30 }
 0x663   :  { %v4067_v2 = vpop.f32.mrf.mxu1  ;;  %v4093_v8 = vpop.f32.mrf.mxu0 }

</bundles_post_ra>
